<compile_context>
chip_gen: v7x
topology: tpu7x:2x2x1
jax: 0.10.0
libtpu: 0.0.40
codegen_flags: <defaults>
</compile_context>

<pallas_src>
from functools import partial

import jax
import jax.numpy as jnp
from jax import lax
from jax.experimental import pallas as pl
from jax.experimental.pallas import tpu as pltpu


# --------------------------------------------------------------------------
# fused kernel
# --------------------------------------------------------------------------
def _make_basic_block_kernel(B, H, W, Cin, P, stride, use_opt_a):
    """Build the fused BasicBlock kernel for static (B, H, W, Cin, P, stride)."""
    Ho, Wo = H // stride, W // stride
    K1 = 9 * Cin

    def kernel(x_ref, w1_ref, b1_ref, w2_ref, b2_ref, o_ref, mid_ref):
        # x_ref:   (B, H+2, W+2, Cin) f32   spatially padded input batch block
        # w1_ref:  (9*Cin, P) bf16          conv1 weights with BN1 scale folded in
        # b1_ref:  (1, P)     f32           BN1 shift
        # w2_ref:  (9*P, P)   bf16          conv2 weights with BN2 scale folded in
        # b2_ref:  (1, P)     f32           BN2 shift
        # o_ref:   (B, Ho*Wo, P) f32        block output
        # mid_ref: (B, Ho+2, Wo+2, P) f32   VMEM scratch: padded conv1 activation
        patches, shortcuts = [], []
        for bi in range(B):                                   # static unroll over images
            x = x_ref[bi]                                     # (H+2, W+2, Cin)

            # ---- im2col patch for conv1: 3x3 taps stacked along K ----
            taps = []
            for kh in range(3):
                for kw in range(3):
                    taps.append(x[kh:kh + H, kw:kw + W, :].reshape(H * W, Cin))
            p = jnp.concatenate(taps, axis=-1)                # (H*W, 9*Cin)
            if stride == 2:
                # keep only even output rows/cols BEFORE the matmul (4x fewer flops)
                p = p.reshape(Ho, 2, Wo, 2, K1)[:, 0, :, 0, :].reshape(Ho * Wo, K1)
            patches.append(p)

            # ---- option-A shortcut, derived from the x tile already in VMEM ----
            sc = x[1:H + 1, 1:W + 1, :].reshape(H * W, Cin)   # un-padded input, f32
            if use_opt_a:
                sc = sc.reshape(H // 2, 2, W // 2, 2, Cin)[:, 0, :, 0, :]
                sc = sc.reshape((H // 2) * (W // 2), Cin)
            shortcuts.append(sc)

        patch1 = jnp.concatenate(patches, axis=0)             # (B*Ho*Wo, 9*Cin)
        sc = jnp.concatenate(shortcuts, axis=0)
        if use_opt_a:
            p4 = P // 4
            if p4 > 0:
                z = jnp.zeros((sc.shape[0], p4), sc.dtype)
                sc = jnp.concatenate([z, sc, z], axis=-1)     # channel zero-pad -> (M, P)

        # ---- conv1 (+ folded BN1 scale): one MXU matmul, f32 accumulate ----
        acc1 = jnp.dot(patch1.astype(jnp.bfloat16), w1_ref[...],
                       preferred_element_type=jnp.float32)    # (M, P)
        h1 = jnp.maximum(acc1 + b1_ref[...], 0.0)             # BN1 shift + ReLU

        # ---- zero-padded intermediate lives in VMEM (no HBM round trip) ----
        mid_ref[...] = jnp.zeros_like(mid_ref)
        mid_ref[:, 1:Ho + 1, 1:Wo + 1, :] = h1.reshape(B, Ho, Wo, P)

        # ---- conv2 (+ folded BN2 scale): one MXU matmul, K = 9*P ----
        taps2 = []
        for bi in range(B):
            m = mid_ref[bi]                                   # (Ho+2, Wo+2, P)
            tb = []
            for kh in range(3):
                for kw in range(3):
                    tb.append(m[kh:kh + Ho, kw:kw + Wo, :].reshape(Ho * Wo, P))
            taps2.append(jnp.concatenate(tb, axis=-1))        # (Ho*Wo, 9*P)
        patch2 = jnp.concatenate(taps2, axis=0)               # (M, 9*P)
        acc2 = jnp.dot(patch2.astype(jnp.bfloat16), w2_ref[...],
                       preferred_element_type=jnp.float32) + b2_ref[...]

        out = jnp.maximum(acc2 + sc, 0.0)                     # residual add + ReLU
        o_ref[...] = out.reshape(B, Ho * Wo, P).astype(o_ref.dtype)

    return kernel


# --------------------------------------------------------------------------
# wrapper
# --------------------------------------------------------------------------
def _fold_bn(gamma, beta, mean, var, eps=1e-5):
    scale = gamma / jnp.sqrt(var + eps)
    bias = beta - mean * scale
    return scale, bias


def _pick_batch_block(N, H, W, Cin, P, stride):
    """Images per grid step: bigger M for the MXU / fewer grid steps, bounded
    by a conservative VMEM budget for the in-kernel im2col patch values."""
    Ho, Wo = H // stride, W // stride
    patch_bytes = (H * W * 9 * Cin + Ho * Wo * 9 * P) * 4     # f32 patch values
    budget = 2 * 1024 * 1024
    return int(max(1, min(8, N, budget // max(patch_bytes, 1))))


@partial(jax.jit, static_argnames=("stride", "option"))
def basic_block_forward(x_nchw, params, stride=1, option="A"):
    """BasicBlock forward.  Input/output NCHW like the PyTorch module.

    BatchNorm is applied in inference mode (running stats folded into the
    conv weights / a per-channel shift).
    """
    x = jnp.transpose(x_nchw, (0, 2, 3, 1)).astype(jnp.float32)   # -> NHWC
    N, H, W, Cin = x.shape
    P = params["w1"].shape[-1]
    assert stride in (1, 2) and H % stride == 0 and W % stride == 0
    Ho, Wo = H // stride, W // stride

    use_opt_a = (stride != 1) or (Cin != P)
    if use_opt_a and option != "A":
        # TODO(synk): option 'B' (1x1 conv + BN shortcut) not implemented.
        raise NotImplementedError("option B shortcut not implemented")

    # fold BN scales into the conv weights at trace time (exact in f32).
    s1, b1 = _fold_bn(*params["bn1"])
    s2, b2 = _fold_bn(*params["bn2"])
    w1f = (params["w1"] * s1).reshape(9 * Cin, P).astype(jnp.bfloat16)
    w2f = (params["w2"] * s2).reshape(9 * P, P).astype(jnp.bfloat16)
    b1 = b1.reshape(1, P).astype(jnp.float32)
    b2 = b2.reshape(1, P).astype(jnp.float32)

    # batch blocking + 3x3 halo pad (padded batch elems are sliced off below)
    B = _pick_batch_block(N, H, W, Cin, P, stride)
    Npad = pl.cdiv(N, B) * B
    xp = jnp.pad(x, ((0, Npad - N), (1, 1), (1, 1), (0, 0)))

    kernel = _make_basic_block_kernel(B, H, W, Cin, P, stride, use_opt_a)
    out = pl.pallas_call(
        kernel,
        out_shape=jax.ShapeDtypeStruct((Npad, Ho * Wo, P), jnp.float32),
        grid=(Npad // B,),
        in_specs=[
            pl.BlockSpec((B, H + 2, W + 2, Cin), lambda g: (g, 0, 0, 0)),
            pl.BlockSpec((9 * Cin, P), lambda g: (0, 0)),
            pl.BlockSpec((1, P), lambda g: (0, 0)),
            pl.BlockSpec((9 * P, P), lambda g: (0, 0)),
            pl.BlockSpec((1, P), lambda g: (0, 0)),
        ],
        out_specs=pl.BlockSpec((B, Ho * Wo, P), lambda g: (g, 0, 0)),
        scratch_shapes=[pltpu.VMEM((B, Ho + 2, Wo + 2, P), jnp.float32)],
        compiler_params=pltpu.CompilerParams(
            dimension_semantics=("parallel",),        # 2 TCs on v7x; no-op v5e/v6e
            vmem_limit_bytes=32 * 1024 * 1024),       # raise v5e's 16 MiB default
    )(xp, w1f, b1, w2f, b2)

    out = out.reshape(Npad, Ho, Wo, P)[:N]
    return jnp.transpose(out, (0, 3, 1, 2))                       # -> NCHW


# --------------------------------------------------------------------------
# pure-JAX reference (mirrors the kernel's bf16 matmul-input quantization)
# --------------------------------------------------------------------------
def _ref_basic_block(x_nchw, params, stride=1):
    x = jnp.transpose(x_nchw, (0, 2, 3, 1)).astype(jnp.float32)
    Cin = x.shape[-1]
    P = params["w1"].shape[-1]

    s1, b1 = _fold_bn(*params["bn1"])
    s2, b2 = _fold_bn(*params["bn2"])
    w1f = (params["w1"] * s1).astype(jnp.bfloat16).astype(jnp.float32)
    w2f = (params["w2"] * s2).astype(jnp.bfloat16).astype(jnp.float32)

    def conv(h, w, s):
        return lax.conv_general_dilated(
            h, w, (s, s), padding=((1, 1), (1, 1)),
            dimension_numbers=("NHWC", "HWIO", "NHWC"))

    q = lambda a: a.astype(jnp.bfloat16).astype(jnp.float32)      # MXU-input quant
    h1 = jax.nn.relu(conv(q(x), w1f, stride) + b1.reshape(1, 1, 1, -1))
    h2 = conv(q(h1), w2f, 1) + b2.reshape(1, 1, 1, -1)

    if stride != 1 or Cin != P:
        sc = x[:, ::2, ::2, :]
        p4 = P // 4
        sc = jnp.pad(sc, ((0, 0), (0, 0), (0, 0), (p4, p4)))
    else:
        sc = x
    out = jax.nn.relu(h2 + sc)
    return jnp.transpose(out, (0, 3, 1, 2))


# --------------------------------------------------------------------------
# deterministic test params / self-check
# --------------------------------------------------------------------------
def make_params(key, in_planes, planes):
    k1, k2, k3, k4 = jax.random.split(key, 4)

    def bn_params(k, c):
        ka, kb, kc, kd = jax.random.split(k, 4)
        gamma = 1.0 + 0.1 * jax.random.normal(ka, (c,), jnp.float32)
        beta = 0.1 * jax.random.normal(kb, (c,), jnp.float32)
        mean = 0.1 * jax.random.normal(kc, (c,), jnp.float32)
        var = jnp.abs(jax.random.normal(kd, (c,), jnp.float32)) + 0.5
        return (gamma, beta, mean, var)

    return {
        "w1": 0.1 * jax.random.normal(k1, (3, 3, in_planes, planes), jnp.float32),
        "bn1": bn_params(k3, planes),
        "w2": 0.1 * jax.random.normal(k2, (3, 3, planes, planes), jnp.float32),
        "bn2": bn_params(k4, planes),
    }


if __name__ == "__main__":
    key = jax.random.PRNGKey(0)
    kx, kx2, kp1, kp2 = jax.random.split(key, 4)

    # NCHW input like the PyTorch module: batch=2, channels=8, 16x16 spatial.
    x = jax.random.normal(kx, (2, 8, 16, 16), jnp.float32)

    # Case 1: identity shortcut (stride=1, in_planes == planes == 8)
    p1 = make_params(kp1, 8, 8)
    y1 = jax.block_until_ready(basic_block_forward(x, p1, stride=1))
    r1 = _ref_basic_block(x, p1, stride=1)
    assert y1.shape == (2, 8, 16, 16)
    assert jnp.allclose(y1, r1, atol=5e-3, rtol=5e-3), float(jnp.max(jnp.abs(y1 - r1)))

    # Case 2: option-A shortcut (stride=2, 8 -> 16 planes)
    p2 = make_params(kp2, 8, 16)
    y2 = jax.block_until_ready(basic_block_forward(x, p2, stride=2, option="A"))
    r2 = _ref_basic_block(x, p2, stride=2)
    assert y2.shape == (2, 16, 8, 8)
    assert jnp.allclose(y2, r2, atol=5e-3, rtol=5e-3), float(jnp.max(jnp.abs(y2 - r2)))

    # Case 3: larger batch (exercises batch-blocked grid + batch padding)
    xb = jax.random.normal(kx2, (10, 8, 16, 16), jnp.float32)
    y3 = jax.block_until_ready(basic_block_forward(xb, p1, stride=1))
    r3 = _ref_basic_block(xb, p1, stride=1)
    assert y3.shape == (10, 8, 16, 16)
    assert jnp.allclose(y3, r3, atol=5e-3, rtol=5e-3), float(jnp.max(jnp.abs(y3 - r3)))

    print("KERNEL_OK")
</pallas_src>

<mosaic_0001>
module attributes {stable_mosaic.version = 11 : i64} {
  func.func @kernel(%arg0: i32, %arg1: memref<2x18x18x8xf32, #tpu.memory_space<vmem>>, %arg2: memref<72x8xbf16, #tpu.memory_space<vmem>>, %arg3: memref<1x8xf32, #tpu.memory_space<vmem>>, %arg4: memref<72x8xbf16, #tpu.memory_space<vmem>>, %arg5: memref<1x8xf32, #tpu.memory_space<vmem>>, %arg6: memref<2x256x8xf32, #tpu.memory_space<vmem>>, %arg7: memref<2x18x18x8xf32, #tpu.memory_space<vmem>>) attributes {dimension_semantics = [#tpu.dimension_semantics<parallel>], iteration_bounds = array<i64: 1>, scalar_prefetch = 0 : i64, scratch_operands = 1 : i64, tpu.core_type = #tpu.core_type<tc>, window_params = [{transform_indices = @transform_0, window_bounds = array<i64: 2, 18, 18, 8>}, {pipeline_mode = #tpu.pipeline_mode<synchronous>, transform_indices = @transform_1, window_bounds = array<i64: 72, 8>}, {pipeline_mode = #tpu.pipeline_mode<synchronous>, transform_indices = @transform_2, window_bounds = array<i64: 1, 8>}, {pipeline_mode = #tpu.pipeline_mode<synchronous>, transform_indices = @transform_3, window_bounds = array<i64: 72, 8>}, {pipeline_mode = #tpu.pipeline_mode<synchronous>, transform_indices = @transform_4, window_bounds = array<i64: 1, 8>}, {transform_indices = @transform_5, window_bounds = array<i64: 2, 256, 8>}]} {
    %c0 = arith.constant 0 : index
    %c0_0 = arith.constant 0 : index
    %c0_1 = arith.constant 0 : index
    %c0_2 = arith.constant 0 : index
    %0 = vector.load %arg1[%c0, %c0_0, %c0_1, %c0_2] : memref<2x18x18x8xf32, #tpu.memory_space<vmem>>, vector<1x18x18x8xf32>
    %1 = vector.shape_cast %0 : vector<1x18x18x8xf32> to vector<18x18x8xf32>
    %2 = vector.extract_strided_slice %1 {offsets = [0, 0, 0], sizes = [16, 16, 8], strides = [1, 1, 1]} : vector<18x18x8xf32> to vector<16x16x8xf32>
    %3 = vector.shape_cast %2 : vector<16x16x8xf32> to vector<256x8xf32>
    %4 = vector.extract_strided_slice %1 {offsets = [0, 1, 0], sizes = [16, 16, 8], strides = [1, 1, 1]} : vector<18x18x8xf32> to vector<16x16x8xf32>
    %5 = vector.shape_cast %4 : vector<16x16x8xf32> to vector<256x8xf32>
    %6 = vector.extract_strided_slice %1 {offsets = [0, 2, 0], sizes = [16, 16, 8], strides = [1, 1, 1]} : vector<18x18x8xf32> to vector<16x16x8xf32>
    %7 = vector.shape_cast %6 : vector<16x16x8xf32> to vector<256x8xf32>
    %8 = vector.extract_strided_slice %1 {offsets = [1, 0, 0], sizes = [16, 16, 8], strides = [1, 1, 1]} : vector<18x18x8xf32> to vector<16x16x8xf32>
    %9 = vector.shape_cast %8 : vector<16x16x8xf32> to vector<256x8xf32>
    %10 = vector.extract_strided_slice %1 {offsets = [1, 1, 0], sizes = [16, 16, 8], strides = [1, 1, 1]} : vector<18x18x8xf32> to vector<16x16x8xf32>
    %11 = vector.shape_cast %10 : vector<16x16x8xf32> to vector<256x8xf32>
    %12 = vector.extract_strided_slice %1 {offsets = [1, 2, 0], sizes = [16, 16, 8], strides = [1, 1, 1]} : vector<18x18x8xf32> to vector<16x16x8xf32>
    %13 = vector.shape_cast %12 : vector<16x16x8xf32> to vector<256x8xf32>
    %14 = vector.extract_strided_slice %1 {offsets = [2, 0, 0], sizes = [16, 16, 8], strides = [1, 1, 1]} : vector<18x18x8xf32> to vector<16x16x8xf32>
    %15 = vector.shape_cast %14 : vector<16x16x8xf32> to vector<256x8xf32>
    %16 = vector.extract_strided_slice %1 {offsets = [2, 1, 0], sizes = [16, 16, 8], strides = [1, 1, 1]} : vector<18x18x8xf32> to vector<16x16x8xf32>
    %17 = vector.shape_cast %16 : vector<16x16x8xf32> to vector<256x8xf32>
    %18 = vector.extract_strided_slice %1 {offsets = [2, 2, 0], sizes = [16, 16, 8], strides = [1, 1, 1]} : vector<18x18x8xf32> to vector<16x16x8xf32>
    %19 = vector.shape_cast %18 : vector<16x16x8xf32> to vector<256x8xf32>
    %20 = tpu.concatenate %3, %5, %7, %9, %11, %13, %15, %17, %19 in 1 : vector<256x8xf32>, vector<256x8xf32>, vector<256x8xf32>, vector<256x8xf32>, vector<256x8xf32>, vector<256x8xf32>, vector<256x8xf32>, vector<256x8xf32>, vector<256x8xf32> -> vector<256x72xf32>
    %21 = vector.extract_strided_slice %1 {offsets = [1, 1, 0], sizes = [16, 16, 8], strides = [1, 1, 1]} : vector<18x18x8xf32> to vector<16x16x8xf32>
    %22 = vector.shape_cast %21 : vector<16x16x8xf32> to vector<256x8xf32>
    %c1 = arith.constant 1 : index
    %c0_3 = arith.constant 0 : index
    %c0_4 = arith.constant 0 : index
    %c0_5 = arith.constant 0 : index
    %23 = vector.load %arg1[%c1, %c0_3, %c0_4, %c0_5] : memref<2x18x18x8xf32, #tpu.memory_space<vmem>>, vector<1x18x18x8xf32>
    %24 = vector.shape_cast %23 : vector<1x18x18x8xf32> to vector<18x18x8xf32>
    %25 = vector.extract_strided_slice %24 {offsets = [0, 0, 0], sizes = [16, 16, 8], strides = [1, 1, 1]} : vector<18x18x8xf32> to vector<16x16x8xf32>
    %26 = vector.shape_cast %25 : vector<16x16x8xf32> to vector<256x8xf32>
    %27 = vector.extract_strided_slice %24 {offsets = [0, 1, 0], sizes = [16, 16, 8], strides = [1, 1, 1]} : vector<18x18x8xf32> to vector<16x16x8xf32>
    %28 = vector.shape_cast %27 : vector<16x16x8xf32> to vector<256x8xf32>
    %29 = vector.extract_strided_slice %24 {offsets = [0, 2, 0], sizes = [16, 16, 8], strides = [1, 1, 1]} : vector<18x18x8xf32> to vector<16x16x8xf32>
    %30 = vector.shape_cast %29 : vector<16x16x8xf32> to vector<256x8xf32>
    %31 = vector.extract_strided_slice %24 {offsets = [1, 0, 0], sizes = [16, 16, 8], strides = [1, 1, 1]} : vector<18x18x8xf32> to vector<16x16x8xf32>
    %32 = vector.shape_cast %31 : vector<16x16x8xf32> to vector<256x8xf32>
    %33 = vector.extract_strided_slice %24 {offsets = [1, 1, 0], sizes = [16, 16, 8], strides = [1, 1, 1]} : vector<18x18x8xf32> to vector<16x16x8xf32>
    %34 = vector.shape_cast %33 : vector<16x16x8xf32> to vector<256x8xf32>
    %35 = vector.extract_strided_slice %24 {offsets = [1, 2, 0], sizes = [16, 16, 8], strides = [1, 1, 1]} : vector<18x18x8xf32> to vector<16x16x8xf32>
    %36 = vector.shape_cast %35 : vector<16x16x8xf32> to vector<256x8xf32>
    %37 = vector.extract_strided_slice %24 {offsets = [2, 0, 0], sizes = [16, 16, 8], strides = [1, 1, 1]} : vector<18x18x8xf32> to vector<16x16x8xf32>
    %38 = vector.shape_cast %37 : vector<16x16x8xf32> to vector<256x8xf32>
    %39 = vector.extract_strided_slice %24 {offsets = [2, 1, 0], sizes = [16, 16, 8], strides = [1, 1, 1]} : vector<18x18x8xf32> to vector<16x16x8xf32>
    %40 = vector.shape_cast %39 : vector<16x16x8xf32> to vector<256x8xf32>
    %41 = vector.extract_strided_slice %24 {offsets = [2, 2, 0], sizes = [16, 16, 8], strides = [1, 1, 1]} : vector<18x18x8xf32> to vector<16x16x8xf32>
    %42 = vector.shape_cast %41 : vector<16x16x8xf32> to vector<256x8xf32>
    %43 = tpu.concatenate %26, %28, %30, %32, %34, %36, %38, %40, %42 in 1 : vector<256x8xf32>, vector<256x8xf32>, vector<256x8xf32>, vector<256x8xf32>, vector<256x8xf32>, vector<256x8xf32>, vector<256x8xf32>, vector<256x8xf32>, vector<256x8xf32> -> vector<256x72xf32>
    %44 = vector.extract_strided_slice %24 {offsets = [1, 1, 0], sizes = [16, 16, 8], strides = [1, 1, 1]} : vector<18x18x8xf32> to vector<16x16x8xf32>
    %45 = vector.shape_cast %44 : vector<16x16x8xf32> to vector<256x8xf32>
    %46 = tpu.concatenate %20, %43 in 0 : vector<256x72xf32>, vector<256x72xf32> -> vector<512x72xf32>
    %47 = tpu.concatenate %22, %45 in 0 : vector<256x8xf32>, vector<256x8xf32> -> vector<512x8xf32>
    %48 = arith.truncf %46 : vector<512x72xf32> to vector<512x72xbf16>
    %c0_6 = arith.constant 0 : index
    %c0_7 = arith.constant 0 : index
    %49 = vector.load %arg2[%c0_6, %c0_7] : memref<72x8xbf16, #tpu.memory_space<vmem>>, vector<72x8xbf16>
    %cst = arith.constant dense<0.000000e+00> : vector<512x8xf32>
    %50 = tpu.matmul %48, %49, %cst {dimension_numbers = #tpu.dot_dimension_numbers<[1], [0], [0], [1], [0, 0, 1, 1], [], []>} : vector<512x72xbf16>, vector<72x8xbf16>, vector<512x8xf32> -> vector<512x8xf32>
    %c0_8 = arith.constant 0 : index
    %c0_9 = arith.constant 0 : index
    %51 = vector.load %arg3[%c0_8, %c0_9] : memref<1x8xf32, #tpu.memory_space<vmem>>, vector<1x8xf32>
    %52 = vector.broadcast %51 : vector<1x8xf32> to vector<512x8xf32>
    %53 = arith.addf %50, %52 : vector<512x8xf32>
    %cst_10 = arith.constant 0.000000e+00 : f32
    %54 = vector.broadcast %cst_10 : f32 to vector<512x8xf32>
    %55 = arith.maximumf %53, %54 : vector<512x8xf32>
    %cst_11 = arith.constant 0.000000e+00 : f32
    %56 = vector.broadcast %cst_11 : f32 to vector<2x18x18x8xf32>
    %c0_12 = arith.constant 0 : index
    %c0_13 = arith.constant 0 : index
    %c0_14 = arith.constant 0 : index
    %c0_15 = arith.constant 0 : index
    %57 = vector.load %arg7[%c0_12, %c0_13, %c0_14, %c0_15] : memref<2x18x18x8xf32, #tpu.memory_space<vmem>>, vector<2x18x18x8xf32>
    tpu.vector_store %arg7[%c0_12, %c0_13, %c0_14, %c0_15], %56 {strides = array<i32>} : memref<2x18x18x8xf32, #tpu.memory_space<vmem>>, vector<2x18x18x8xf32>,
    %58 = vector.shape_cast %55 : vector<512x8xf32> to vector<2x16x16x8xf32>
    %c0_16 = arith.constant 0 : index
    %c1_17 = arith.constant 1 : index
    %c1_18 = arith.constant 1 : index
    %c0_19 = arith.constant 0 : index
    %59 = vector.load %arg7[%c0_16, %c1_17, %c1_18, %c0_19] : memref<2x18x18x8xf32, #tpu.memory_space<vmem>>, vector<2x16x16x8xf32>
    tpu.vector_store %arg7[%c0_16, %c1_17, %c1_18, %c0_19], %58 {strides = array<i32>} : memref<2x18x18x8xf32, #tpu.memory_space<vmem>>, vector<2x16x16x8xf32>,
    %c0_20 = arith.constant 0 : index
    %c0_21 = arith.constant 0 : index
    %c0_22 = arith.constant 0 : index
    %c0_23 = arith.constant 0 : index
    %60 = vector.load %arg7[%c0_20, %c0_21, %c0_22, %c0_23] : memref<2x18x18x8xf32, #tpu.memory_space<vmem>>, vector<1x18x18x8xf32>
    %61 = vector.shape_cast %60 : vector<1x18x18x8xf32> to vector<18x18x8xf32>
    %62 = vector.extract_strided_slice %61 {offsets = [0, 0, 0], sizes = [16, 16, 8], strides = [1, 1, 1]} : vector<18x18x8xf32> to vector<16x16x8xf32>
    %63 = vector.shape_cast %62 : vector<16x16x8xf32> to vector<256x8xf32>
    %64 = vector.extract_strided_slice %61 {offsets = [0, 1, 0], sizes = [16, 16, 8], strides = [1, 1, 1]} : vector<18x18x8xf32> to vector<16x16x8xf32>
    %65 = vector.shape_cast %64 : vector<16x16x8xf32> to vector<256x8xf32>
    %66 = vector.extract_strided_slice %61 {offsets = [0, 2, 0], sizes = [16, 16, 8], strides = [1, 1, 1]} : vector<18x18x8xf32> to vector<16x16x8xf32>
    %67 = vector.shape_cast %66 : vector<16x16x8xf32> to vector<256x8xf32>
    %68 = vector.extract_strided_slice %61 {offsets = [1, 0, 0], sizes = [16, 16, 8], strides = [1, 1, 1]} : vector<18x18x8xf32> to vector<16x16x8xf32>
    %69 = vector.shape_cast %68 : vector<16x16x8xf32> to vector<256x8xf32>
    %70 = vector.extract_strided_slice %61 {offsets = [1, 1, 0], sizes = [16, 16, 8], strides = [1, 1, 1]} : vector<18x18x8xf32> to vector<16x16x8xf32>
    %71 = vector.shape_cast %70 : vector<16x16x8xf32> to vector<256x8xf32>
    %72 = vector.extract_strided_slice %61 {offsets = [1, 2, 0], sizes = [16, 16, 8], strides = [1, 1, 1]} : vector<18x18x8xf32> to vector<16x16x8xf32>
    %73 = vector.shape_cast %72 : vector<16x16x8xf32> to vector<256x8xf32>
    %74 = vector.extract_strided_slice %61 {offsets = [2, 0, 0], sizes = [16, 16, 8], strides = [1, 1, 1]} : vector<18x18x8xf32> to vector<16x16x8xf32>
    %75 = vector.shape_cast %74 : vector<16x16x8xf32> to vector<256x8xf32>
    %76 = vector.extract_strided_slice %61 {offsets = [2, 1, 0], sizes = [16, 16, 8], strides = [1, 1, 1]} : vector<18x18x8xf32> to vector<16x16x8xf32>
    %77 = vector.shape_cast %76 : vector<16x16x8xf32> to vector<256x8xf32>
    %78 = vector.extract_strided_slice %61 {offsets = [2, 2, 0], sizes = [16, 16, 8], strides = [1, 1, 1]} : vector<18x18x8xf32> to vector<16x16x8xf32>
    %79 = vector.shape_cast %78 : vector<16x16x8xf32> to vector<256x8xf32>
    %80 = tpu.concatenate %63, %65, %67, %69, %71, %73, %75, %77, %79 in 1 : vector<256x8xf32>, vector<256x8xf32>, vector<256x8xf32>, vector<256x8xf32>, vector<256x8xf32>, vector<256x8xf32>, vector<256x8xf32>, vector<256x8xf32>, vector<256x8xf32> -> vector<256x72xf32>
    %c1_24 = arith.constant 1 : index
    %c0_25 = arith.constant 0 : index
    %c0_26 = arith.constant 0 : index
    %c0_27 = arith.constant 0 : index
    %81 = vector.load %arg7[%c1_24, %c0_25, %c0_26, %c0_27] : memref<2x18x18x8xf32, #tpu.memory_space<vmem>>, vector<1x18x18x8xf32>
    %82 = vector.shape_cast %81 : vector<1x18x18x8xf32> to vector<18x18x8xf32>
    %83 = vector.extract_strided_slice %82 {offsets = [0, 0, 0], sizes = [16, 16, 8], strides = [1, 1, 1]} : vector<18x18x8xf32> to vector<16x16x8xf32>
    %84 = vector.shape_cast %83 : vector<16x16x8xf32> to vector<256x8xf32>
    %85 = vector.extract_strided_slice %82 {offsets = [0, 1, 0], sizes = [16, 16, 8], strides = [1, 1, 1]} : vector<18x18x8xf32> to vector<16x16x8xf32>
    %86 = vector.shape_cast %85 : vector<16x16x8xf32> to vector<256x8xf32>
    %87 = vector.extract_strided_slice %82 {offsets = [0, 2, 0], sizes = [16, 16, 8], strides = [1, 1, 1]} : vector<18x18x8xf32> to vector<16x16x8xf32>
    %88 = vector.shape_cast %87 : vector<16x16x8xf32> to vector<256x8xf32>
    %89 = vector.extract_strided_slice %82 {offsets = [1, 0, 0], sizes = [16, 16, 8], strides = [1, 1, 1]} : vector<18x18x8xf32> to vector<16x16x8xf32>
    %90 = vector.shape_cast %89 : vector<16x16x8xf32> to vector<256x8xf32>
    %91 = vector.extract_strided_slice %82 {offsets = [1, 1, 0], sizes = [16, 16, 8], strides = [1, 1, 1]} : vector<18x18x8xf32> to vector<16x16x8xf32>
    %92 = vector.shape_cast %91 : vector<16x16x8xf32> to vector<256x8xf32>
    %93 = vector.extract_strided_slice %82 {offsets = [1, 2, 0], sizes = [16, 16, 8], strides = [1, 1, 1]} : vector<18x18x8xf32> to vector<16x16x8xf32>
    %94 = vector.shape_cast %93 : vector<16x16x8xf32> to vector<256x8xf32>
    %95 = vector.extract_strided_slice %82 {offsets = [2, 0, 0], sizes = [16, 16, 8], strides = [1, 1, 1]} : vector<18x18x8xf32> to vector<16x16x8xf32>
    %96 = vector.shape_cast %95 : vector<16x16x8xf32> to vector<256x8xf32>
    %97 = vector.extract_strided_slice %82 {offsets = [2, 1, 0], sizes = [16, 16, 8], strides = [1, 1, 1]} : vector<18x18x8xf32> to vector<16x16x8xf32>
    %98 = vector.shape_cast %97 : vector<16x16x8xf32> to vector<256x8xf32>
    %99 = vector.extract_strided_slice %82 {offsets = [2, 2, 0], sizes = [16, 16, 8], strides = [1, 1, 1]} : vector<18x18x8xf32> to vector<16x16x8xf32>
    %100 = vector.shape_cast %99 : vector<16x16x8xf32> to vector<256x8xf32>
    %101 = tpu.concatenate %84, %86, %88, %90, %92, %94, %96, %98, %100 in 1 : vector<256x8xf32>, vector<256x8xf32>, vector<256x8xf32>, vector<256x8xf32>, vector<256x8xf32>, vector<256x8xf32>, vector<256x8xf32>, vector<256x8xf32>, vector<256x8xf32> -> vector<256x72xf32>
    %102 = tpu.concatenate %80, %101 in 0 : vector<256x72xf32>, vector<256x72xf32> -> vector<512x72xf32>
    %103 = arith.truncf %102 : vector<512x72xf32> to vector<512x72xbf16>
    %c0_28 = arith.constant 0 : index
    %c0_29 = arith.constant 0 : index
    %104 = vector.load %arg4[%c0_28, %c0_29] : memref<72x8xbf16, #tpu.memory_space<vmem>>, vector<72x8xbf16>
    %cst_30 = arith.constant dense<0.000000e+00> : vector<512x8xf32>
    %105 = tpu.matmul %103, %104, %cst_30 {dimension_numbers = #tpu.dot_dimension_numbers<[1], [0], [0], [1], [0, 0, 1, 1], [], []>} : vector<512x72xbf16>, vector<72x8xbf16>, vector<512x8xf32> -> vector<512x8xf32>
    %c0_31 = arith.constant 0 : index
    %c0_32 = arith.constant 0 : index
    %106 = vector.load %arg5[%c0_31, %c0_32] : memref<1x8xf32, #tpu.memory_space<vmem>>, vector<1x8xf32>
    %107 = vector.broadcast %106 : vector<1x8xf32> to vector<512x8xf32>
    %108 = arith.addf %105, %107 : vector<512x8xf32>
    %109 = arith.addf %108, %47 : vector<512x8xf32>
    %cst_33 = arith.constant 0.000000e+00 : f32
    %110 = vector.broadcast %cst_33 : f32 to vector<512x8xf32>
    %111 = arith.maximumf %109, %110 : vector<512x8xf32>
    %112 = vector.shape_cast %111 : vector<512x8xf32> to vector<2x256x8xf32>
    %c0_34 = arith.constant 0 : index
    %c0_35 = arith.constant 0 : index
    %c0_36 = arith.constant 0 : index
    %113 = vector.load %arg6[%c0_34, %c0_35, %c0_36] : memref<2x256x8xf32, #tpu.memory_space<vmem>>, vector<2x256x8xf32>
    tpu.vector_store %arg6[%c0_34, %c0_35, %c0_36], %112 {strides = array<i32>} : memref<2x256x8xf32, #tpu.memory_space<vmem>>, vector<2x256x8xf32>,
    return
  }
  func.func @transform_0(%arg0: i32) -> (i32, i32, i32, i32) {
    %c0_i32 = arith.constant 0 : i32
    %c0_i32_0 = arith.constant 0 : i32
    %c0_i32_1 = arith.constant 0 : i32
    %c0_i32_2 = arith.constant 0 : i32
    return %arg0, %c0_i32, %c0_i32_0, %c0_i32_1 : i32, i32, i32, i32
  }
  func.func @transform_1(%arg0: i32) -> (i32, i32) {
    %c0_i32 = arith.constant 0 : i32
    %c0_i32_0 = arith.constant 0 : i32
    %c0_i32_1 = arith.constant 0 : i32
    return %c0_i32, %c0_i32_0 : i32, i32
  }
  func.func @transform_2(%arg0: i32) -> (i32, i32) {
    %c0_i32 = arith.constant 0 : i32
    %c0_i32_0 = arith.constant 0 : i32
    %c0_i32_1 = arith.constant 0 : i32
    return %c0_i32, %c0_i32_0 : i32, i32
  }
  func.func @transform_3(%arg0: i32) -> (i32, i32) {
    %c0_i32 = arith.constant 0 : i32
    %c0_i32_0 = arith.constant 0 : i32
    %c0_i32_1 = arith.constant 0 : i32
    return %c0_i32, %c0_i32_0 : i32, i32
  }
  func.func @transform_4(%arg0: i32) -> (i32, i32) {
    %c0_i32 = arith.constant 0 : i32
    %c0_i32_0 = arith.constant 0 : i32
    %c0_i32_1 = arith.constant 0 : i32
    return %c0_i32, %c0_i32_0 : i32, i32
  }
  func.func @transform_5(%arg0: i32) -> (i32, i32, i32) {
    %c0_i32 = arith.constant 0 : i32
    %c0_i32_0 = arith.constant 0 : i32
    %c0_i32_1 = arith.constant 0 : i32
    return %arg0, %c0_i32, %c0_i32_0 : i32, i32, i32
  }
}

</mosaic_0001>

<bundles_post_ra>
// kernel: basic_block_forward.1
= control target key start
LH: loop header
LB: loop body
LE: loop exit
PB: predicated region body
PF: predicated region fallthrough
CT: control target
= control target key end

     0   :  { %vm123_vm0 = vcmask 1046528   ;;  %s9778_s25 = smov 8   ;;  %vm204_vm1 = vcmask 1045504   ;;  %s9779_s17 = smov 16   ;;  %vm1111_vm2 = vcmask 64512   ;;  %vm1144_vm3 = vcmask 130048   ;;  %s18748_s0 = inlined_call_operand.vmem [shape: f32[2,18,18,8], index: 0, kind: input, shape index: {}]   ;;  %s18749_s1 = inlined_call_operand.vmem [shape: bf16[72,8], index: 1, kind: input, shape index: {}]   ;;  %s18750_s2 = inlined_call_operand.vmem [shape: f32[1,8], index: 2, kind: input, shape index: {}]   ;;  %s18751_s3 = inlined_call_operand.vmem [shape: bf16[72,8], index: 3, kind: input, shape index: {}]   ;;  %s18752_s4 = inlined_call_operand.vmem [shape: f32[1,8], index: 4, kind: input, shape index: {}]   ;;  %s18753_s5 = inlined_call_operand.vmem [shape: f32[2,256,8], index: 5, kind: output, shape index: {}]  }
   0x1   :  { %v9820_v0 = vld [vmem:[%s18748_s0 + $0x30] sm:$0xff]  ;;  %v9825_v1 = vld [vmem:[%s18748_s0 + $0x38] sm:$0xff]  ;;  %v9830_v2 = vld [vmem:[%s18748_s0 + $0x40] sm:$0x3]  ;;  %s9780_s24 = smov 24   ;;  %s9781_s26 = smov 32  }
   0x2   :  { %v134_v3 = vrot.slane %v9820_v0, 1  ;;  %v135_v4 = vrot.slane %v9825_v1, 1  ;;  %v137_v5 = vrot.slane %v9830_v2, 1  ;;  %v9838_v6 = vld [vmem:[%s18748_s0] sm:$0xff]  ;;  %v9843_v7 = vld [vmem:[%s18748_s0 + $0x8] sm:$0xff]  ;;  %v9860_v12 = vld [vmem:[%s18748_s0 + $0x50] sm:$0xff] }
   0x3   :  { %v9848_v8 = vld [vmem:[%s18748_s0 + $0x48] sm:$0xff]  ;;  %v9853_v9 = vld [vmem:[%s18748_s0 + $0x10] sm:$0x3]  ;;  %v124_v10 = vrot.slane %v9838_v6, 1  ;;  %v125_v11 = vrot.slane %v9843_v7, 1  ;;  %v9878_v18 = vld [vmem:[%s18748_s0 + $0x18] sm:$0xff] }
   0x4   :  { %v139_v13 = vrot.slane %v9848_v8, 1  ;;  %v9864_v14 = vsel %vm123_vm0, %v134_v3, %v135_v4  ;;  %v9867_v15 = vsel %vm123_vm0, %v135_v4, %v137_v5  ;;  %v127_v16 = vrot.slane %v9853_v9, 1  ;;  %v9873_v17 = vld [vmem:[%s18748_s0 + $0x58] sm:$0x3]  ;;  %v9883_v19 = vld [vmem:[%s18748_s0 + $0x20] sm:$0xff]  ;;  %v9933_v37 = vld [vmem:[%s18748_s0 + $0x68] sm:$0xff] }
   0x5   :  { %19403 = vst [vmem:[#allocation3_spill] sm:$0xff] %v9864_v14  ;;  %19404 = vst [vmem:[#allocation4_spill] sm:$0xff] %v9867_v15  ;;  %v9887_v20 = vpack.i.bf16 %v9867_v15, %v9864_v14  ;;  %v126_v21 = vsel %vm123_vm0, %v124_v10, %v125_v11  ;;  %v140_v22 = vrot.slane %v9860_v12, 1  ;;  %v142_v23 = vrot.slane %v9873_v17, 1  ;;  %v9895_v24 = vld [vmem:[%s18748_s0 + $0x28] sm:$0x3] }
   0x6   :  { %v9900_v25 = vld [vmem:[%s18748_s0 + $0x78] sm:$0xff]  ;;  %v9905_v26 = vld [vmem:[%s18748_s0 + $0x80] sm:$0xff]  ;;  %v128_v27 = vsel %vm123_vm0, %v125_v11, %v127_v16  ;;  %v129_v28 = vrot.slane %v9878_v18, 1  ;;  %v130_v29 = vrot.slane %v9883_v19, 1  ;;  %v132_v30 = vrot.slane %v9895_v24, 1  ;;  %v9943_v39 = vld [vmem:[%s18748_s0 + $0xa8] sm:$0xff] }
   0x7   :  { %19405 = vst [vmem:[#allocation5_spill] sm:$0xff] %v9887_v20  ;;  %v9914_v31 = vld [vmem:[%s18748_s0 + $0x88] sm:$0x3]  ;;  %v9919_v32 = vld [vmem:[%s18748_s0 + $0x60] sm:$0xff]  ;;  %7081 = vrot.lane.b32.xlu1 %v9887_v20, %s9778_s25  ;;  %v7070_v33 = vpack.i.bf16 %v128_v27, %v126_v21  ;;  %v9924_v34 = vsel %vm123_vm0, %v139_v13, %v140_v22  ;;  %v9927_v35 = vsel %vm123_vm0, %v140_v22, %v142_v23  ;;  %v149_v36 = vrot.slane %v9900_v25, 1  ;;  %v9959_v44 = vld [vmem:[%s18748_s0 + $0xb0] sm:$0xff] }
   0x8   :  { %19406 = vst [vmem:[#allocation6_spill] sm:$0xff] %v9924_v34  ;;  %19407 = vst [vmem:[#allocation7_spill] sm:$0xff] %v9927_v35  ;;  %v9938_v38 = vld [vmem:[%s18748_s0 + $0x70] sm:$0x3]  ;;  %v9947_v40 = vpack.i.bf16 %v9927_v35, %v9924_v34  ;;  %v9950_v41 = vsel %vm123_vm0, %v129_v28, %v130_v29  ;;  %v9953_v42 = vsel %vm123_vm0, %v130_v29, %v132_v30  ;;  %v150_v43 = vrot.slane %v9905_v26, 1  ;;  %v9982_v51 = vld [vmem:[%s18748_s0 + $0x98] sm:$0xff] }
   0x9   :  { %19409 = vst [vmem:[#allocation9_spill] sm:$0xff] %v9950_v41  ;;  %19410 = vst [vmem:[#allocation10_spill] sm:$0xff] %v9953_v42  ;;  %v9964_v45 = vld [vmem:[%s18748_s0 + $0xb8] sm:$0x3]  ;;  %v9969_v46 = vld [vmem:[%s18748_s0 + $0x90] sm:$0xff]  ;;  %7071 = vrot.lane.b32.xlu0 %v7070_v33, %s9778_s25  ;;  %v9974_v47 = vpack.i.bf16 %v9953_v42, %v9950_v41  ;;  %v152_v48 = vrot.slane %v9914_v31, 1 }
   0xa   :  { %19408 = vst [vmem:[#allocation8_spill] sm:$0xff] %v9947_v40  ;;  %v144_v49 = vrot.slane %v9919_v32, 1  ;;  %v145_v50 = vrot.slane %v9933_v37, 1  ;;  %v9985_v52 = vsel %vm123_vm0, %v149_v36, %v150_v43  ;;  %v147_v53 = vrot.slane %v9938_v38, 1  ;;  %v9993_v56 = vld [vmem:[%s18748_s0 + $0xa0] sm:$0x3] }
   0xb   :  { %19411 = vst [vmem:[#allocation11_spill] sm:$0xff] %v9974_v47  ;;  %19412 = vst [vmem:[#allocation12_spill] sm:$0xff] %v9985_v52  ;;  %v159_v54 = vrot.slane %v9943_v39, 1  ;;  %v160_v55 = vrot.slane %v9959_v44, 1  ;;  %v9998_v57 = vld [vmem:[%s18748_s0 + $0xd8] sm:$0xff]  ;;  %7086 = vrot.lane.b32.xlu1 %v9947_v40, %s9778_s25  ;;  %v10003_v58 = vsel %vm123_vm0, %v150_v43, %v152_v48  ;;  %v162_v60 = vrot.slane %v9964_v45, 1 }
   0xc   :  { %19413 = vst [vmem:[#allocation13_spill] sm:$0xff] %v10003_v58  ;;  %v10006_v59 = vsel %vm123_vm0, %v144_v49, %v145_v50  ;;  %v154_v61 = vrot.slane %v9969_v46, 1  ;;  %v10013_v62 = vld [vmem:[%s18748_s0 + $0xe0] sm:$0xff]  ;;  %v10018_v63 = vld [vmem:[%s18748_s0 + $0xe8] sm:$0x3]  ;;  %v10022_v3 = vpack.i.bf16 %v10003_v58, %v9985_v52  ;;  %v10025_v4 = vsel %vm123_vm0, %v145_v50, %v147_v53  ;;  %v10074_v43 = vld [vmem:[%s18748_s0 + $0x110] sm:$0xff] }
   0xd   :  { %19414 = vst [vmem:[#allocation14_spill] sm:$0xff] %v10006_v59  ;;  %19416 = vst [vmem:[#allocation16_spill] sm:$0xff] %v10025_v4  ;;  %v10028_v5 = vsel %vm123_vm0, %v159_v54, %v160_v55  ;;  %v155_v10 = vrot.slane %v9982_v51, 1  ;;  %v10034_v11 = vld [vmem:[%s18748_s0 + $0xc0] sm:$0xff]  ;;  %v10039_v13 = vld [vmem:[%s18748_s0 + $0xc8] sm:$0xff]  ;;  %7076 = vrot.lane.b32.xlu0 %v9974_v47, %s9778_s25  ;;  %v10050_v21 = vpack.i.bf16 %v10025_v4, %v10006_v59  ;;  %v157_v23 = vrot.slane %v9993_v56, 1 }
   0xe   :  { %19415 = vst [vmem:[#allocation15_spill] sm:$0xff] %v10022_v3  ;;  %19417 = vst [vmem:[#allocation17_spill] sm:$0xff] %v10028_v5  ;;  %v10044_v16 = vld [vmem:[%s18748_s0 + $0xd0] sm:$0x3]  ;;  %v10053_v22 = vsel %vm123_vm0, %v160_v55, %v162_v60  ;;  %v169_v27 = vrot.slane %v9998_v57, 1  ;;  %v10060_v28 = vld [vmem:[%s18748_s0 + $0x108] sm:$0xff] }
   0xf   :  { %19418 = vst [vmem:[#allocation18_spill] sm:$0xff] %v10050_v21  ;;  %19419 = vst [vmem:[#allocation19_spill] sm:$0xff] %v10053_v22  ;;  %v10064_v29 = vpack.i.bf16 %v10053_v22, %v10028_v5  ;;  %v10067_v30 = vsel %vm123_vm0, %v154_v61, %v155_v10  ;;  %v170_v33 = vrot.slane %v10013_v62, 1  ;;  %v172_v36 = vrot.slane %v10018_v63, 1  ;;  %v10079_v48 = vld [vmem:[%s18748_s0 + $0x118] sm:$0x3]  ;;  %7096 = vrot.lane.b32.xlu1 %v10022_v3, %s9778_s25 }
  0x10   :  { %19421 = vst [vmem:[#allocation21_spill] sm:$0xff] %v10067_v30  ;;  %v10084_v49 = vsel %vm123_vm0, %v155_v10, %v157_v23  ;;  %v164_v50 = vrot.slane %v10034_v11, 1  ;;  %v165_v53 = vrot.slane %v10039_v13, 1  ;;  %v167_v54 = vrot.slane %v10044_v16, 1  ;;  %v10092_v55 = vld [vmem:[%s18748_s0 + $0xf0] sm:$0xff]  ;;  %v10097_v60 = vld [vmem:[%s18748_s0 + $0xf8] sm:$0xff] }
  0x11   :  { %19420 = vst [vmem:[#allocation20_spill] sm:$0xff] %v10064_v29  ;;  %19422 = vst [vmem:[#allocation22_spill] sm:$0xff] %v10084_v49  ;;  %v10100_v61 = vsel %vm123_vm0, %v169_v27, %v170_v33  ;;  %v10103_v10 = vsel %vm123_vm0, %v170_v33, %v172_v36  ;;  %v179_v23 = vrot.slane %v10060_v28, 1  ;;  %v10109_v22 = vld [vmem:[%s18748_s0 + $0x100] sm:$0x3]  ;;  %7091 = vrot.lane.b32.xlu0 %v10050_v21, %s9778_s25  ;;  %v180_v33 = vrot.slane %v10074_v43, 1 }
  0x12   :  { %19423 = vst [vmem:[#allocation23_spill] sm:$0xff] %v10100_v61  ;;  %19424 = vst [vmem:[#allocation24_spill] sm:$0xff] %v10103_v10  ;;  %v10115_v5 = vpack.i.bf16 %v10084_v49, %v10067_v30  ;;  %v10118_v27 = vsel %vm123_vm0, %v164_v50, %v165_v53  ;;  %v10124_v36 = vld [vmem:[%s18748_s0 + $0x138] sm:$0xff]  ;;  %v10129_v58 = vld [vmem:[%s18748_s0 + $0x140] sm:$0xff]  ;;  %v10137_v50 = vsel %vm123_vm0, %v165_v53, %v167_v54  ;;  %v182_v52 = vrot.slane %v10079_v48, 1  ;;  %s9782_s27 = smov 40  }
  0x13   :  { %19426 = vst [vmem:[#allocation26_spill] sm:$0xff] %v10118_v27  ;;  %v10134_v49 = vld [vmem:[%s18748_s0 + $0x148] sm:$0x3]  ;;  %19427 = vst [vmem:[#allocation27_spill] sm:$0xff] %v10137_v50  ;;  %v174_v30 = vrot.slane %v10092_v55, 1  ;;  %v175_v35 = vrot.slane %v10097_v60, 1  ;;  %7106 = vrot.lane.b32.xlu1 %v10064_v29, %s9778_s25  ;;  %v10156_v53 = vpack.i.bf16 %v10103_v10, %v10100_v61  ;;  %v10159_v54 = vsel %vm123_vm0, %v179_v23, %v180_v33 }
  0x14   :  { %19425 = vst [vmem:[#allocation25_spill] sm:$0xff] %v10115_v5  ;;  %v10145_v4 = vld [vmem:[%s18748_s0 + $0x120] sm:$0xff]  ;;  %v10150_v34 = vld [vmem:[%s18748_s0 + $0x128] sm:$0xff]  ;;  %19429 = vst [vmem:[#allocation29_spill] sm:$0xff] %v10159_v54  ;;  %v177_v59 = vrot.slane %v10109_v22, 1  ;;  %v10168_v15 = vsel %vm123_vm0, %v180_v33, %v182_v52  ;;  %v189_v41 = vrot.slane %v10124_v36, 1  ;;  %v10187_v52 = vpack.i.bf16 %v10137_v50, %v10118_v27 }
  0x15   :  { %19428 = vst [vmem:[#allocation28_spill] sm:$0xff] %v10156_v53  ;;  %v10165_v42 = vld [vmem:[%s18748_s0 + $0x130] sm:$0x3]  ;;  %19430 = vst [vmem:[#allocation30_spill] sm:$0xff] %v10168_v15  ;;  %v190_v14 = vrot.slane %v10129_v58, 1  ;;  %v192_v10 = vrot.slane %v10134_v49, 1  ;;  %7101 = vrot.lane.b32.xlu0 %v10115_v5, %s9778_s25  ;;  %v10197_v40 = vsel %vm123_vm0, %v174_v30, %v175_v35  ;;  %v10207_v50 = vpack.i.bf16 %v10168_v15, %v10159_v54 }
  0x16   :  { %v10176_v23 = vld [vmem:[%s18748_s0 + $0x168] sm:$0xff]  ;;  %v10181_v61 = vld [vmem:[%s18748_s0 + $0x170] sm:$0xff]  ;;  %19433 = vst [vmem:[#allocation33_spill] sm:$0xff] %v10187_v52  ;;  %v184_v33 = vrot.slane %v10145_v4, 1  ;;  %v185_v29 = vrot.slane %v10150_v34, 1  ;;  %19434 = vst [vmem:[#allocation34_spill] sm:$0xff] %v10197_v40  ;;  %v10200_v21 = vsel %vm123_vm0, %v175_v35, %v177_v59 }
  0x17   :  { %19431 = vst [vmem:[#allocation31_spill] sm:$0xff] %v10176_v23  ;;  %19432 = vst [vmem:[#allocation32_spill] sm:$0xff] %v10181_v61  ;;  %v10194_v3 = vld [vmem:[%s18748_s0 + $0x178] sm:$0x3]  ;;  %v187_v5 = vrot.slane %v10165_v42, 1  ;;  %7116 = vrot.lane.b32.xlu1 %v10156_v53, %s9778_s25  ;;  %v199_v27 = vrot.slane %v10176_v23, 1  ;;  %v10227_v15 = vsel %vm123_vm0, %v189_v41, %v190_v14  ;;  %v10230_v54 = vsel %vm123_vm0, %v190_v14, %v192_v10 }
  0x18   :  { %19435 = vst [vmem:[#allocation35_spill] sm:$0xff] %v10200_v21  ;;  %19436 = vst [vmem:[#allocation36_spill] sm:$0xff] %v10207_v50  ;;  %v200_v47 = vrot.slane %v10181_v61, 1  ;;  %v10214_v30 = vld [vmem:[%s18748_s0 + $0x150] sm:$0xff]  ;;  %v10219_v35 = vld [vmem:[%s18748_s0 + $0x158] sm:$0xff]  ;;  %v202_v53 = vrot.slane %v10194_v3, 1  ;;  %v10237_v20 = vpack.i.bf16 %v10200_v21, %v10197_v40  ;;  %v10240_v61 = vsel %vm123_vm0, %v184_v33, %v185_v29 }
  0x19   :  { %v10224_v59 = vld [vmem:[%s18748_s0 + $0x160] sm:$0x3]  ;;  %19437 = vst [vmem:[#allocation37_spill] sm:$0xff] %v10227_v15  ;;  %19438 = vst [vmem:[#allocation38_spill] sm:$0xff] %v10230_v54  ;;  %7111 = vrot.lane.b32.xlu0 %v10187_v52, %s9778_s25  ;;  %v10243_v23 = vsel %vm123_vm0, %v185_v29, %v187_v5  ;;  %v194_v41 = vrot.slane %v10214_v30, 1  ;;  %v195_v14 = vrot.slane %v10219_v35, 1  ;;  %v10252_v52 = vpack.i.bf16 %v10230_v54, %v10227_v15 }
  0x1a   :  { %19439 = vst [vmem:[#allocation39_spill] sm:$0xff] %v10240_v61  ;;  %19440 = vst [vmem:[#allocation40_spill] sm:$0xff] %v10243_v23  ;;  %v197_v10 = vrot.slane %v10224_v59, 1  ;;  %v10255_v21 = vsel %vm123_vm0, %v199_v27, %v200_v47  ;;  %v10258_v33 = vsel %vm123_vm0, %v200_v47, %v202_v53  ;;  %v210_v5 = vrot.slane %v9878_v18, 2  ;;  %s9783_s28 = smov 48   ;;  %s9784_s10 = smov 56  }
  0x1b   :  { %7126 = vrot.lane.b32.xlu1 %v10207_v50, %s9778_s25  ;;  %19441 = vst [vmem:[#allocation41_spill] sm:$0xff] %v10255_v21  ;;  %19442 = vst [vmem:[#allocation42_spill] sm:$0xff] %v10258_v33  ;;  %v211_v29 = vrot.slane %v9883_v19, 2  ;;  %v213_v40 = vrot.slane %v9895_v24, 2  ;;  %v10267_v50 = vpack.i.bf16 %v10243_v23, %v10240_v61  ;;  %v205_v27 = vrot.slane %v9838_v6, 2  ;;  %s9785_s8 = smov 64  }
  0x1c   :  { %v206_v54 = vrot.slane %v9843_v7, 2  ;;  %v208_v47 = vrot.slane %v9853_v9, 2  ;;  %v10273_v53 = vsel %vm123_vm0, %v194_v41, %v195_v14  ;;  %v10276_v15 = vsel %vm123_vm0, %v195_v14, %v197_v10 }
  0x1d   :  { %7121 = vrot.lane.b32.xlu0 %v10237_v20, %s9778_s25  ;;  %19443 = vst [vmem:[#allocation43_spill] sm:$0xff] %v10273_v53  ;;  %19444 = vst [vmem:[#allocation44_spill] sm:$0xff] %v10276_v15  ;;  %v10282_v24 = vpack.i.bf16 %v10258_v33, %v10255_v21  ;;  %v220_v23 = vrot.slane %v9848_v8, 2  ;;  %v221_v6 = vrot.slane %v9860_v12, 2  ;;  %v212_v7 = vsel %vm204_vm1, %v210_v5, %v211_v29 }
  0x1e   :  { %v214_v9 = vsel %vm204_vm1, %v211_v29, %v213_v40  ;;  %v223_v41 = vrot.slane %v9873_v17, 2  ;;  %v10293_v14 = vpack.i.bf16 %v10276_v15, %v10273_v53  ;;  %v207_v10 = vsel %vm204_vm1, %v205_v27, %v206_v54 }
  0x1f   :  { %7136 = vrot.lane.b32.xlu1 %v10252_v52, %s9778_s25  ;;  %v209_v33 = vsel %vm204_vm1, %v206_v54, %v208_v47  ;;  %v215_v21 = vrot.slane %v9820_v0, 2  ;;  %v216_v61 = vrot.slane %v9825_v1, 2  ;;  %v218_v5 = vrot.slane %v9830_v2, 2 }
  0x20   :  { %v10302_v17 = vpack.i.bf16 %v214_v9, %v212_v7  ;;  %v222_v40 = vsel %vm204_vm1, %v220_v23, %v221_v6  ;;  %v224_v29 = vsel %vm204_vm1, %v221_v6, %v223_v41  ;;  %v230_v15 = vrot.slane %v9900_v25, 2 }
  0x21   :  { %7131 = vrot.lane.b32.xlu0 %v10267_v50, %s9778_s25  ;;  %v231_v27 = vrot.slane %v9905_v26, 2  ;;  %v233_v54 = vrot.slane %v9914_v31, 2  ;;  %v7150_v47 = vpack.i.bf16 %v209_v33, %v207_v10  ;;  %v225_v2 = vrot.slane %v9919_v32, 2 }
  0x22   :  { %v226_v53 = vrot.slane %v9933_v37, 2  ;;  %v217_v7 = vsel %vm204_vm1, %v215_v21, %v216_v61  ;;  %v219_v23 = vsel %vm204_vm1, %v216_v61, %v218_v5  ;;  %v228_v6 = vrot.slane %v9938_v38, 2 }
  0x23   :  { %7146 = vrot.lane.b32.xlu1 %v10282_v24, %s9778_s25  ;;  %v10318_v9 = vpack.i.bf16 %v224_v29, %v222_v40  ;;  %v240_v31 = vrot.slane %v9943_v39, 2  ;;  %v232_v33 = vsel %vm204_vm1, %v230_v15, %v231_v27  ;;  %v234_v41 = vsel %vm204_vm1, %v231_v27, %v233_v54 }
  0x24   :  { %v241_v10 = vrot.slane %v9959_v44, 2  ;;  %v243_v21 = vrot.slane %v9964_v45, 2  ;;  %v10326_v61 = vpack.i.bf16 %v219_v23, %v217_v7  ;;  %v227_v38 = vsel %vm204_vm1, %v225_v2, %v226_v53 }
  0x25   :  { %7141 = vrot.lane.b32.xlu0 %v10293_v14, %s9778_s25  ;;  %v229_v5 = vsel %vm204_vm1, %v226_v53, %v228_v6  ;;  %v235_v40 = vrot.slane %v9969_v46, 2  ;;  %v236_v29 = vrot.slane %v9982_v51, 2  ;;  %v238_v15 = vrot.slane %v9993_v56, 2 }
  0x26   :  { %v10335_v27 = vpack.i.bf16 %v234_v41, %v232_v33  ;;  %v250_v45 = vrot.slane %v9998_v57, 2  ;;  %v251_v54 = vrot.slane %v10013_v62, 2  ;;  %v244_v2 = vsel %vm204_vm1, %v241_v10, %v243_v21 }
  0x27   :  { %7156 = vrot.lane.b32.xlu1 %v10302_v17, %s9779_s17  ;;  %v253_v53 = vrot.slane %v10018_v63, 2  ;;  %v10344_v7 = vpack.i.bf16 %v229_v5, %v227_v38  ;;  %v245_v56 = vrot.slane %v10034_v11, 2  ;;  %v246_v23 = vrot.slane %v10039_v13, 2 }
  0x28   :  { %19445 = vst [vmem:[#allocation45_spill] sm:$0xff] %v10335_v27  ;;  %v237_v6 = vsel %vm204_vm1, %v235_v40, %v236_v29  ;;  %v239_v33 = vsel %vm204_vm1, %v236_v29, %v238_v15  ;;  %v248_v41 = vrot.slane %v10044_v16, 2  ;;  %v252_v63 = vsel %vm204_vm1, %v250_v45, %v251_v54 }
  0x29   :  { %7151 = vrot.lane.b32.xlu0 %v7150_v47, %s9779_s17  ;;  %v242_v47 = vsel %vm204_vm1, %v240_v31, %v241_v10  ;;  %v254_v10 = vsel %vm204_vm1, %v251_v54, %v253_v53  ;;  %v260_v21 = vrot.slane %v10060_v28, 2  ;;  %v261_v38 = vrot.slane %v10074_v43, 2 }
  0x2a   :  { %v10353_v31 = vpack.i.bf16 %v244_v2, %v242_v47  ;;  %v263_v5 = vrot.slane %v10079_v48, 2  ;;  %v10362_v40 = vpack.i.bf16 %v239_v33, %v237_v6  ;;  %v247_v16 = vsel %vm204_vm1, %v245_v56, %v246_v23 }
  0x2b   :  { %7166 = vrot.lane.b32.xlu1 %v10318_v9, %s9779_s17  ;;  %v249_v29 = vsel %vm204_vm1, %v246_v23, %v248_v41  ;;  %v255_v15 = vrot.slane %v10092_v55, 2  ;;  %v256_v45 = vrot.slane %v10097_v60, 2  ;;  %v258_v54 = vrot.slane %v10109_v22, 2 }
  0x2c   :  { %19446 = vst [vmem:[#allocation46_spill] sm:$0xff] %v10353_v31  ;;  %v10371_v47 = vpack.i.bf16 %v254_v10, %v252_v63  ;;  %v270_v48 = vrot.slane %v10124_v36, 2  ;;  %v271_v2 = vrot.slane %v10129_v58, 2  ;;  %v262_v53 = vsel %vm204_vm1, %v260_v21, %v261_v38 }
  0x2d   :  { %7161 = vrot.lane.b32.xlu0 %v10326_v61, %s9779_s17  ;;  %v264_v56 = vsel %vm204_vm1, %v261_v38, %v263_v5  ;;  %v273_v23 = vrot.slane %v10134_v49, 2  ;;  %v10380_v6 = vpack.i.bf16 %v249_v29, %v247_v16  ;;  %v265_v22 = vrot.slane %v10145_v4, 2  ;;  %v19450_v5 = vld [vmem:[#allocation31_spill] sm:$0xff]  ;;  %v19451_v29 = vld [vmem:[#allocation32_spill] sm:$0xff] }
  0x2e   :  { %19447 = vst [vmem:[#allocation47_spill] sm:$0xff] %v10371_v47  ;;  %v266_v33 = vrot.slane %v10150_v34, 2  ;;  %v257_v41 = vsel %vm204_vm1, %v255_v15, %v256_v45  ;;  %v259_v63 = vsel %vm204_vm1, %v256_v45, %v258_v54  ;;  %v268_v10 = vrot.slane %v10165_v42, 2 }
  0x2f   :  { %7176 = vrot.lane.b32.xlu1 %v10335_v27, %s9779_s17  ;;  %19448 = vst [vmem:[#allocation48_spill] sm:$0xff] %v10380_v6  ;;  %v10389_v21 = vpack.i.bf16 %v264_v56, %v262_v53  ;;  %v272_v49 = vsel %vm204_vm1, %v270_v48, %v271_v2  ;;  %v274_v38 = vsel %vm204_vm1, %v271_v2, %v273_v23  ;;  %v280_v16 = vrot.slane %v19450_v5, 2 }
  0x30   :  { %v283_v27 = vrot.slane %v10194_v3, 2  ;;  %v10398_v15 = vpack.i.bf16 %v259_v63, %v257_v41  ;;  %v267_v42 = vsel %vm204_vm1, %v265_v22, %v266_v33  ;;  %v269_v45 = vsel %vm204_vm1, %v266_v33, %v268_v10  ;;  %v10425_v41 = vld [vmem:[%s18748_s0 + $0x188] sm:$0xff] }
  0x31   :  { %7171 = vrot.lane.b32.xlu0 %v10344_v7, %s9779_s17  ;;  %19449 = vst [vmem:[#allocation49_spill] sm:$0xff] %v10389_v21  ;;  %v275_v54 = vrot.slane %v10214_v30, 2  ;;  %v276_v48 = vrot.slane %v10219_v35, 2  ;;  %v278_v2 = vrot.slane %v10224_v59, 2  ;;  %v10407_v53 = vpack.i.bf16 %v274_v38, %v272_v49  ;;  %v10420_v59 = vld [vmem:[%s18748_s0 + $0x180] sm:$0xff] }
  0x32   :  { %19452 = vst [vmem:[#allocation31_spill] sm:$0xff] %v10398_v15  ;;  %v10413_v23 = vpack.i.bf16 %v269_v45, %v267_v42  ;;  %v325_v63 = vrot.slane %v10420_v59, 2  ;;  %v326_v10 = vrot.slane %v10425_v41, 2  ;;  %vm2892_vm4 = vcmask 1043456  }
  0x33   :  { %7186 = vrot.lane.b32.xlu1 %v10353_v31, %s9779_s17  ;;  %v281_v31 = vrot.slane %v19451_v29, 2  ;;  %19453 = vst [vmem:[#allocation32_spill] sm:$0xff] %v10407_v53  ;;  %v277_v22 = vsel %vm204_vm1, %v275_v54, %v276_v48  ;;  %v279_v33 = vsel %vm204_vm1, %v276_v48, %v278_v2  ;;  %v10451_v54 = vpack.i.bf16 %v9825_v1, %v9820_v0 }
  0x34   :  { %19454 = vst [vmem:[#allocation50_spill] sm:$0xff] %v10413_v23  ;;  %v10441_v38 = vpack.i.bf16 %v279_v33, %v277_v22  ;;  %v7230_v48 = vpack.i.bf16 %v9883_v19, %v9878_v18  ;;  %v10459_v2 = vpack.i.bf16 %v10425_v41, %v10420_v59  ;;  %v10470_v0 = vpack.i.bf16 %v9860_v12, %v9848_v8 }
  0x35   :  { %7181 = vrot.lane.b32.xlu0 %v10362_v40, %s9779_s17  ;;  %v282_v3 = vsel %vm204_vm1, %v280_v16, %v281_v31  ;;  %v284_v56 = vsel %vm204_vm1, %v281_v31, %v283_v27  ;;  %v10430_v27 = vld [vmem:[%s18748_s0 + $0x190] sm:$0x3]  ;;  %v327_v16 = vsel %vm204_vm1, %v325_v63, %v326_v10  ;;  %v10476_v1 = vpack.i.bf16 %v9982_v51, %v9969_v46  ;;  %v19459_v46 = vld [vmem:[#allocation11_spill] sm:$0xff]  ;;  %v19460_v51 = vld [vmem:[#allocation18_spill] sm:$0xff] }
  0x36   :  { %v10434_v31 = vpack.i.bf16 %v284_v56, %v282_v3  ;;  %v328_v49 = vrot.slane %v10430_v27, 2  ;;  %19456 = vst [vmem:[#allocation52_spill] sm:$0xff] %v10441_v38  ;;  %v10465_v3 = vpack.i.bf16 %v9933_v37, %v9919_v32  ;;  %v10482_v18 = vpack.i.bf16 %v9905_v26, %v9900_v25 }
  0x37   :  { %7196 = vrot.lane.b32.xlu1 %v10371_v47, %s9779_s17  ;;  %v10488_v8 = vpack.i.bf16 %v10039_v13, %v10034_v11  ;;  %v10494_v12 = vpack.i.bf16 %v9959_v44, %v9943_v39  ;;  %v10500_v19 = vpack.i.bf16 %v10097_v60, %v10092_v55  ;;  %v10506_v25 = vpack.i.bf16 %v10013_v62, %v9998_v57  ;;  %v19458_v44 = vld [vmem:[#allocation5_spill] sm:$0xff]  ;;  %v19461_v57 = vld [vmem:[#allocation8_spill] sm:$0xff]  ;;  %v19463_v62 = vld [vmem:[#allocation15_spill] sm:$0xff] }
  0x38   :  { %19455 = vst [vmem:[#allocation51_spill] sm:$0xff] %v10434_v31  ;;  %v329_v42 = vsel %vm204_vm1, %v326_v10, %v328_v49  ;;  %v10512_v26 = vpack.i.bf16 %v10150_v34, %v10145_v4  ;;  %v10518_v32 = vpack.i.bf16 %v10074_v43, %v10060_v28  ;;  %v10524_v37 = vpack.i.bf16 %v10219_v35, %v10214_v30  ;;  %v19464_v4 = vld [vmem:[#allocation33_spill] sm:$0xff]  ;;  %v19465_v11 = vld [vmem:[#allocation20_spill] sm:$0xff] }
  0x39   :  { %7191 = vrot.lane.b32.xlu0 %v10380_v6, %s9779_s17  ;;  %v10445_v45 = vpack.i.bf16 %v329_v42, %v327_v16  ;;  %v10530_v34 = vpack.i.bf16 %v10129_v58, %v10124_v36  ;;  %v10538_v39 = vpack.i.bf16 %v19451_v29, %v19450_v5  ;;  %v19462_v58 = vld [vmem:[#allocation25_spill] sm:$0xff]  ;;  %v288_v13 = vrot.slane %v10420_v59, 1  ;;  %v19466_v55 = vld [vmem:[#allocation28_spill] sm:$0xff] }
  0x3a   :  { %v289_v28 = vrot.slane %v10425_v41, 1  ;;  %v291_v43 = vrot.slane %v10430_v27, 1  ;;  %v19469_v5 = vld [vmem:[#allocation36_spill] sm:$0xff]  ;;  %v19470_v42 = vld [vmem:[#allocation45_spill] sm:$0xff]  ;;  %vm1177_vm5 = vcmask 195584   ;;  %vm1210_vm6 = vcmask 261120  }
  0x3b   :  { %7206 = vrot.lane.b32.xlu1 %v10389_v21, %s9779_s17  ;;  %19457 = vst [vmem:[#allocation53_spill] sm:$0xff] %v10445_v45  ;;  %vm1243_vm7 = vcmask 326656   ;;  %vm1276_vm8 = vcmask 392192   ;;  %vm1309_vm9 = vcmask 457728   ;;  %vm1342_vm10 = vcmask 523264  }
  0x3c   :  { %v10574_v30 = vsel %vm123_vm0, %v288_v13, %v289_v28  ;;  %v10577_v35 = vsel %vm123_vm0, %v289_v28, %v291_v43  ;;  %vm2795_vm11 = vcmask 588800   ;;  %vm3251_vm12 = vcmask 58368  }
  0x3d   :  { %7201 = vrot.lane.b32.xlu0 %v10398_v15, %s9779_s17  ;;  %19467 = vst [vmem:[#allocation5_spill] sm:$0xff] %v10574_v30  ;;  %19468 = vst [vmem:[#allocation11_spill] sm:$0xff] %v10577_v35  ;;  %v10589_v22 = vpack.i.bf16 %v10577_v35, %v10574_v30 }
  0x3f   :  { %7216 = vrot.lane.b32.xlu1 %v10407_v53, %s9779_s17 }
  0x41   :  { %7211 = vrot.lane.b32.xlu0 %v10413_v23, %s9779_s17 }
  0x43   :  { %7226 = vrot.lane.b32.xlu1 %v10434_v31, %s9779_s17 }
  0x45   :  { %7221 = vrot.lane.b32.xlu0 %v10441_v38, %s9779_s17 }
  0x47   :  { %7236 = vrot.lane.b32.xlu1 %v10451_v54, %s9780_s24 }
  0x49   :  { %7231 = vrot.lane.b32.xlu0 %v7230_v48, %s9780_s24 }
  0x4b   :  { %7246 = vrot.lane.b32.xlu1 %v10465_v3, %s9780_s24 }
  0x4d   :  { %7241 = vrot.lane.b32.xlu0 %v10470_v0, %s9780_s24 }
  0x4f   :  { %7256 = vrot.lane.b32.xlu1 %v10476_v1, %s9780_s24 }
  0x51   :  { %7251 = vrot.lane.b32.xlu0 %v10482_v18, %s9780_s24 }
  0x53   :  { %7266 = vrot.lane.b32.xlu1 %v10488_v8, %s9780_s24 }
  0x55   :  { %7261 = vrot.lane.b32.xlu0 %v10494_v12, %s9780_s24 }
  0x57   :  { %7276 = vrot.lane.b32.xlu1 %v10500_v19, %s9780_s24 }
  0x59   :  { %7271 = vrot.lane.b32.xlu0 %v10506_v25, %s9780_s24 }
  0x5b   :  { %7286 = vrot.lane.b32.xlu1 %v10512_v26, %s9780_s24 }
  0x5d   :  { %7281 = vrot.lane.b32.xlu0 %v10518_v32, %s9780_s24 }
  0x5f   :  { %7296 = vrot.lane.b32.xlu1 %v10524_v37, %s9780_s24 }
  0x61   :  { %7291 = vrot.lane.b32.xlu0 %v10530_v34, %s9780_s24 }
  0x63   :  { %7306 = vrot.lane.b32.xlu1 %v10459_v2, %s9780_s24 }
  0x65   :  { %7301 = vrot.lane.b32.xlu0 %v10538_v39, %s9780_s24 }
  0x67   :  { %7316 = vrot.lane.b32.xlu1 %v19458_v44, %s9781_s26 }
  0x69   :  { %7311 = vrot.lane.b32.xlu0 %v19459_v46, %s9781_s26  ;;  %v19471_v46 = vld [vmem:[#allocation46_spill] sm:$0xff] }
  0x6b   :  { %7326 = vrot.lane.b32.xlu1 %v19460_v51, %s9781_s26 }
  0x6d   :  { %7321 = vrot.lane.b32.xlu0 %v19461_v57, %s9781_s26 }
  0x6f   :  { %7336 = vrot.lane.b32.xlu1 %v19462_v58, %s9781_s26 }
  0x71   :  { %7331 = vrot.lane.b32.xlu0 %v19463_v62, %s9781_s26 }
  0x73   :  { %7346 = vrot.lane.b32.xlu1 %v19464_v4, %s9781_s26 }
  0x75   :  { %7341 = vrot.lane.b32.xlu0 %v19465_v11, %s9781_s26 }
  0x77   :  { %7356 = vrot.lane.b32.xlu1 %v10237_v20, %s9781_s26 }
  0x79   :  { %7351 = vrot.lane.b32.xlu0 %v19466_v55, %s9781_s26  ;;  %v10567_v60 = vpop.permute.xlu1 %7081 }
  0x7b   :  { %v10569_v36 = vpop.permute.xlu0 %7071  ;;  %7366 = vrot.lane.b32.xlu1 %v10267_v50, %s9781_s26 }
  0x7d   :  { %7361 = vrot.lane.b32.xlu0 %v19469_v5, %s9781_s26  ;;  %v10581_v29 = vpop.permute.xlu1 %7086 }
  0x7f   :  { %v10583_v56 = vpop.permute.xlu0 %7076  ;;  %7376 = vrot.lane.b32.xlu1 %v10293_v14, %s9781_s26 }
  0x81   :  { %7371 = vrot.lane.b32.xlu0 %v10252_v52, %s9781_s26  ;;  %v10593_v33 = vpop.permute.xlu1 %7096 }
  0x83   :  { %v10595_v59 = vpop.permute.xlu0 %7091  ;;  %7386 = vrot.lane.b32.xlu1 %v10589_v22, %s9781_s26 }
  0x85   :  { %7381 = vrot.lane.b32.xlu0 %v10282_v24, %s9781_s26  ;;  %v10601_v41 = vpop.permute.xlu1 %7106 }
  0x87   :  { %v10603_v27 = vpop.permute.xlu0 %7101  ;;  %7396 = vrot.lane.b32.xlu1 %v10326_v61, %s9782_s27 }
  0x89   :  { %7391 = vrot.lane.b32.xlu0 %v10302_v17, %s9782_s27  ;;  %v10609_v63 = vpop.permute.xlu1 %7116 }
  0x8b   :  { %v10611_v10 = vpop.permute.xlu0 %7111  ;;  %7406 = vrot.lane.b32.xlu1 %v10344_v7, %s9782_s27 }
  0x8d   :  { %7401 = vrot.lane.b32.xlu0 %v10318_v9, %s9782_s27  ;;  %v10617_v49 = vpop.permute.xlu1 %7126 }
  0x8f   :  { %v10619_v16 = vpop.permute.xlu0 %7121  ;;  %7416 = vrot.lane.b32.xlu1 %v10362_v40, %s9782_s27 }
  0x91   :  { %7411 = vrot.lane.b32.xlu0 %v19470_v42, %s9782_s27  ;;  %v10625_v17 = vpop.permute.xlu1 %7136 }
  0x93   :  { %v10627_v48 = vpop.permute.xlu0 %7131  ;;  %7426 = vrot.lane.b32.xlu1 %v10380_v6, %s9782_s27 }
  0x95   :  { %7421 = vrot.lane.b32.xlu0 %v19471_v46, %s9782_s27  ;;  %v10633_v13 = vpop.permute.xlu1 %7146 }
  0x97   :  { %v10635_v28 = vpop.permute.xlu0 %7141  ;;  %7436 = vrot.lane.b32.xlu1 %v10398_v15, %s9782_s27 }
  0x99   :  { %7431 = vrot.lane.b32.xlu0 %v10371_v47, %s9782_s27  ;;  %v10641_v43 = vpop.permute.xlu1 %7156 }
  0x9b   :  { %v10643_v35 = vpop.permute.xlu0 %7151  ;;  %7446 = vrot.lane.b32.xlu1 %v10413_v23, %s9782_s27 }
  0x9d   :  { %7441 = vrot.lane.b32.xlu0 %v10389_v21, %s9782_s27  ;;  %v10649_v30 = vpop.permute.xlu1 %7166 }
  0x9f   :  { %v10651_v6 = vpop.permute.xlu0 %7161  ;;  %7456 = vrot.lane.b32.xlu1 %v10441_v38, %s9782_s27 }
  0xa1   :  { %7451 = vrot.lane.b32.xlu0 %v10407_v53, %s9782_s27  ;;  %v10657_v15 = vpop.permute.xlu1 %7176 }
  0xa3   :  { %v10659_v47 = vpop.permute.xlu0 %7171  ;;  %7466 = vrot.lane.b32.xlu1 %v10445_v45, %s9782_s27 }
  0xa5   :  { %7461 = vrot.lane.b32.xlu0 %v10434_v31, %s9782_s27  ;;  %v10665_v23 = vpop.permute.xlu1 %7186 }
  0xa7   :  { %v10667_v21 = vpop.permute.xlu0 %7181  ;;  %7476 = vrot.lane.b32.xlu1 %v10470_v0, %s9783_s28 }
  0xa9   :  { %7471 = vrot.lane.b32.xlu0 %v10451_v54, %s9783_s28  ;;  %v10673_v38 = vpop.permute.xlu1 %7196 }
  0xaa   :  { %19472 = vst [vmem:[#allocation18_spill] sm:$0xff] %v10673_v38 }
  0xab   :  { %v10675_v53 = vpop.permute.xlu0 %7191  ;;  %7486 = vrot.lane.b32.xlu1 %v10482_v18, %s9783_s28 }
  0xac   :  { %19473 = vst [vmem:[#allocation8_spill] sm:$0xff] %v10675_v53 }
  0xad   :  { %7481 = vrot.lane.b32.xlu0 %v10465_v3, %s9783_s28  ;;  %v10681_v45 = vpop.permute.xlu1 %7206 }
  0xae   :  { %19474 = vst [vmem:[#allocation25_spill] sm:$0xff] %v10681_v45  ;;  %v7103_v45 = vunpack.i.l.bf16 %v10603_v27 }
  0xaf   :  { %v10683_v31 = vpop.permute.xlu0 %7201  ;;  %7496 = vrot.lane.b32.xlu1 %v10494_v12, %s9783_s28 }
  0xb0   :  { %19475 = vst [vmem:[#allocation15_spill] sm:$0xff] %v10683_v31 }
  0xb1   :  { %7491 = vrot.lane.b32.xlu0 %v10476_v1, %s9783_s28  ;;  %v10689_v54 = vpop.permute.xlu1 %7216 }
  0xb2   :  { %19476 = vst [vmem:[#allocation33_spill] sm:$0xff] %v10689_v54 }
  0xb3   :  { %v10691_v0 = vpop.permute.xlu0 %7211  ;;  %7506 = vrot.lane.b32.xlu1 %v10506_v25, %s9783_s28  ;;  %v10719_v25 = vld [vmem:[%s18748_s0 + $0x1a0] sm:$0xff] }
  0xb4   :  { %19477 = vst [vmem:[#allocation20_spill] sm:$0xff] %v10691_v0 }
  0xb5   :  { %7501 = vrot.lane.b32.xlu0 %v10488_v8, %s9783_s28  ;;  %v10697_v3 = vpop.permute.xlu1 %7226  ;;  %v10714_v8 = vld [vmem:[%s18748_s0 + $0x198] sm:$0xff] }
  0xb6   :  { %19478 = vst [vmem:[#allocation28_spill] sm:$0xff] %v10697_v3 }
  0xb7   :  { %v10699_v18 = vpop.permute.xlu0 %7221  ;;  %7516 = vrot.lane.b32.xlu1 %v10518_v32, %s9783_s28 }
  0xb8   :  { %19479 = vst [vmem:[#allocation36_spill] sm:$0xff] %v10699_v18  ;;  %v9645_v18 = vld [vmem:[%s18748_s0 + $0x48] sm:$0xff] }
  0xb9   :  { %7511 = vrot.lane.b32.xlu0 %v10500_v19, %s9783_s28  ;;  %v10705_v1 = vpop.permute.xlu1 %7236 }
  0xba   :  { %19480 = vst [vmem:[#allocation45_spill] sm:$0xff] %v10705_v1 }
  0xbb   :  { %v10707_v12 = vpop.permute.xlu0 %7231  ;;  %7526 = vrot.lane.b32.xlu1 %v10530_v34, %s9783_s28  ;;  %v7545_v34 = vpack.i.bf16 %v10719_v25, %v10714_v8 }
  0xbc   :  { %19481 = vst [vmem:[#allocation46_spill] sm:$0xff] %v10707_v12 }
  0xbd   :  { %7521 = vrot.lane.b32.xlu0 %v10512_v26, %s9783_s28  ;;  %v10723_v19 = vpop.permute.xlu1 %7246 }
  0xbe   :  { %19482 = vst [vmem:[#allocation54_spill] sm:$0xff] %v10723_v19 }
  0xbf   :  { %v10725_v32 = vpop.permute.xlu0 %7241  ;;  %7536 = vrot.lane.b32.xlu1 %v10538_v39, %s9783_s28  ;;  %v10745_v39 = vld [vmem:[%s18748_s0 + $0x1a8] sm:$0x3] }
  0xc0   :  { %19483 = vst [vmem:[#allocation55_spill] sm:$0xff] %v10725_v32 }
  0xc1   :  { %7531 = vrot.lane.b32.xlu0 %v10524_v37, %s9783_s28  ;;  %v10733_v12 = vpop.permute.xlu1 %7256  ;;  %v334_v37 = vrot.slane %v10719_v25, 1 }
  0xc2   :  { %19484 = vst [vmem:[#allocation56_spill] sm:$0xff] %v10733_v12 }
  0xc3   :  { %v10735_v1 = vpop.permute.xlu0 %7251  ;;  %7546 = vrot.lane.b32.xlu1 %v7545_v34, %s9783_s28  ;;  %v333_v34 = vrot.slane %v10714_v8, 1 }
  0xc4   :  { %19485 = vst [vmem:[#allocation57_spill] sm:$0xff] %v10735_v1  ;;  %v336_v1 = vrot.slane %v10745_v39, 1 }
  0xc5   :  { %7541 = vrot.lane.b32.xlu0 %v10459_v2, %s9783_s28  ;;  %v10740_v26 = vpop.permute.xlu1 %7266 }
  0xc6   :  { %19486 = vst [vmem:[#allocation58_spill] sm:$0xff] %v10740_v26  ;;  %v10767_v12 = vsel %vm123_vm0, %v334_v37, %v336_v1  ;;  %v7088_v1 = vunpack.i.l.bf16 %v10581_v29 }
  0xc7   :  { %v10747_v32 = vpop.permute.xlu0 %7261  ;;  %7556 = vrot.lane.b32.xlu1 %v19461_v57, %s9784_s10  ;;  %v10764_v57 = vsel %vm123_vm0, %v333_v34, %v334_v37  ;;  %v7083_v37 = vunpack.i.l.bf16 %v10567_v60  ;;  %v7074_v34 = vunpack.i.h.bf16 %v10569_v36 }
  0xc8   :  { %19487 = vst [vmem:[#allocation59_spill] sm:$0xff] %v10747_v32  ;;  %v339_v32 = vrot.slane %v10719_v25, 2  ;;  %v7084_v25 = vunpack.i.h.bf16 %v10567_v60  ;;  %v9640_v60 = vld [vmem:[%s18748_s0 + $0x38] sm:$0xff]  ;;  %v10861_v3 = vsel %vm1111_vm2, %v9645_v18, %v7088_v1  ;;  %v10879_v18 = vld [vmem:[%s18748_s0 + $0x1b0] sm:$0xff] }
  0xc9   :  { %7551 = vrot.lane.b32.xlu0 %v19458_v44, %s9784_s10  ;;  %v10756_v2 = vpop.permute.xlu1 %7276  ;;  %v9630_v44 = vld [vmem:[%s18749_s1] sm:$0xff]   ;;  %19499 = vst [vmem:[#allocation71_spill] sm:$0xff] %v10879_v18  ;;  %v1478_v54 = vrot.slane %v10879_v18, 1 }
  0xca   :  { %19488 = vst [vmem:[#allocation60_spill] sm:$0xff] %v10756_v2  ;;  %6911 = vmatprep.subr.bf16.mxu0 %v9630_v44 }
  0xcb   :  { %v10758_v26 = vpop.permute.xlu0 %7271  ;;  %7566 = vrot.lane.b32.xlu1 %v19463_v62, %s9784_s10  ;;  %v338_v62 = vrot.slane %v10714_v8, 2  ;;  %6912 = vmatpush3.bf16.msra.mxu0 %v9630_v44  ;;  %v7089_v44 = vunpack.i.h.bf16 %v10581_v29  ;;  %v341_v29 = vrot.slane %v10745_v39, 2 }
  0xcc   :  { %19489 = vst [vmem:[#allocation61_spill] sm:$0xff] %v10758_v26 }
  0xcd   :  { %7561 = vrot.lane.b32.xlu0 %v19460_v51, %s9784_s10  ;;  %v10774_v2 = vpop.permute.xlu1 %7286  ;;  %v9631_v51 = vld [vmem:[%s18749_s1 + $0x8] sm:$0xff]  }
  0xce   :  { %19490 = vst [vmem:[#allocation62_spill] sm:$0xff] %v10774_v2  ;;  %6913 = vmatprep.subr.bf16.mxu0 %v9631_v51  ;;  %v9644_v2 = vld [vmem:[%s18748_s0 + $0x50] sm:$0xff] }
  0xcf   :  { %v10777_v26 = vpop.permute.xlu0 %7281  ;;  %7576 = vrot.lane.b32.xlu1 %v19465_v11, %s9784_s10  ;;  %v7073_v11 = vunpack.i.l.bf16 %v10569_v36  ;;  %6914 = vmatpush3.bf16.msra.mxu0 %v9631_v51  ;;  %v9641_v36 = vld [vmem:[%s18748_s0 + $0x30] sm:$0xff]  ;;  %v9642_v51 = vld [vmem:[%s18748_s0 + $0x8] sm:$0xff]  ;;  %v10855_v19 = vsel %vm1111_vm2, %v9644_v2, %v7089_v44 }
  0xd0   :  { %19491 = vst [vmem:[#allocation63_spill] sm:$0xff] %v10777_v26 }
  0xd1   :  { %7571 = vrot.lane.b32.xlu0 %v19462_v58, %s9784_s10  ;;  %v10791_v8 = vpop.permute.xlu1 %7296  ;;  %v10804_v58 = vsel %vm1111_vm2, %v9640_v60, %v7084_v25  ;;  %v10820_v25 = vsel %vm1111_vm2, %v9642_v51, %v7074_v34  ;;  %v7079_v60 = vunpack.i.h.bf16 %v10583_v56  ;;  %v10837_v34 = vld [vmem:[%s18748_s0 + $0x1d0] sm:$0xff] }
  0xd2   :  { %19492 = vst [vmem:[#allocation64_spill] sm:$0xff] %v10791_v8  ;;  %v10810_v8 = vsel %vm1111_vm2, %v9641_v36, %v7083_v37  ;;  %v7099_v37 = vunpack.i.h.bf16 %v10593_v33  ;;  %v10832_v36 = vld [vmem:[%s18748_s0 + $0x1c8] sm:$0xff]  ;;  %19496 = vst [vmem:[#allocation68_spill] sm:$0xff] %v10837_v34  ;;  %v1484_v44 = vrot.slane %v10837_v34, 1  ;;  %v7094_v34 = vunpack.i.h.bf16 %v10595_v59 }
  0xd3   :  { %v10796_v26 = vpop.permute.xlu0 %7291  ;;  %7586 = vrot.lane.b32.xlu1 %v19466_v55, %s9784_s10  ;;  %v9632_v55 = vld [vmem:[%s18749_s1 + $0x10] sm:$0xff]   ;;  %19495 = vst [vmem:[#allocation67_spill] sm:$0xff] %v10832_v36  ;;  %v1483_v2 = vrot.slane %v10832_v36, 1  ;;  %v10934_v36 = vld [vmem:[%s18748_s0 + $0x200] sm:$0xff] }
  0xd4   :  { %19493 = vst [vmem:[#allocation65_spill] sm:$0xff] %v10796_v26  ;;  %v7078_v26 = vunpack.i.l.bf16 %v10583_v56  ;;  %v10842_v56 = vld [vmem:[%s18748_s0 + $0x1d8] sm:$0x3]  ;;  %6915 = vmatprep.subr.bf16.mxu0 %v9632_v55  ;;  %19504 = vst [vmem:[#allocation76_spill] sm:$0xff] %v10934_v36 }
  0xd5   :  { %7581 = vrot.lane.b32.xlu0 %v19464_v4, %s9784_s10  ;;  %v10827_v39 = vpop.permute.xlu1 %7306  ;;  %19497 = vst [vmem:[#allocation69_spill] sm:$0xff] %v10842_v56  ;;  %v9643_v4 = vld [vmem:[%s18748_s0] sm:$0xff]  ;;  %6916 = vmatpush3.bf16.msra.mxu0 %v9632_v55  ;;  %v10952_v53 = vsel %vm123_vm0, %v1483_v2, %v1484_v44  ;;  %v1494_v2 = vrot.slane %v10934_v36, 1 }
  0xd6   :  { %19494 = vst [vmem:[#allocation66_spill] sm:$0xff] %v10827_v39  ;;  %v10848_v51 = vsel %vm1111_vm2, %v9643_v4, %v7073_v11  ;;  %v7098_v39 = vunpack.i.l.bf16 %v10593_v33  ;;  %v10868_v33 = vsel %vm204_vm1, %v338_v62, %v339_v32  ;;  %v10871_v11 = vsel %vm204_vm1, %v339_v32, %v341_v29  ;;  %v9633_v32 = vld [vmem:[%s18749_s1 + $0x18] sm:$0xff]   ;;  %v9646_v62 = vld [vmem:[%s18748_s0 + $0x20] sm:$0xff]  ;;  %19507 = vst [vmem:[#allocation79_spill] sm:$0xff] %v10952_v53 }
  0xd7   :  { %v10863_v0 = vpop.permute.xlu0 %7301  ;;  %7596 = vrot.lane.b32.xlu1 %v19469_v5, %s9784_s10  ;;  %v1486_v4 = vrot.slane %v10842_v56, 1  ;;  %v10884_v5 = vld [vmem:[%s18748_s0 + $0x1b8] sm:$0xff]  ;;  %v10893_v1 = vsel %vm1111_vm2, %v9646_v62, %v7079_v60  ;;  %v10915_v62 = vld [vmem:[%s18748_s0 + $0x1c0] sm:$0x3]  ;;  %6917 = vmatprep.subr.bf16.mxu0 %v9633_v32 }
  0xd8   :  { %19498 = vst [vmem:[#allocation70_spill] sm:$0xff] %v10863_v0  ;;  %19500 = vst [vmem:[#allocation72_spill] sm:$0xff] %v10884_v5  ;;  %v9647_v29 = vld [vmem:[%s18748_s0 + $0x18] sm:$0xff]  ;;  %v9648_v0 = vld [vmem:[%s18748_s0 + $0x80] sm:$0xff]  ;;  %v1479_v31 = vrot.slane %v10884_v5, 1 }
  0xd9   :  { %v10899_v55 = vsel %vm1111_vm2, %v9647_v29, %v7078_v26  ;;  %v10905_v56 = vsel %vm1111_vm2, %v9648_v0, %v7099_v37  ;;  %7591 = vrot.lane.b32.xlu0 %v10237_v20, %s9784_s10  ;;  %v10910_v60 = vpop.permute.xlu1 %7316  ;;  %19502 = vst [vmem:[#allocation74_spill] sm:$0xff] %v10915_v62  ;;  %v9649_v26 = vld [vmem:[%s18748_s0 + $0x78] sm:$0xff]  ;;  %v7093_v0 = vunpack.i.l.bf16 %v10595_v59  ;;  %v7109_v37 = vunpack.i.h.bf16 %v10601_v41  ;;  %6918 = vmatpush3.bf16.msra.mxu0 %v9633_v32  ;;  %v11021_v5 = vld [vmem:[%s18748_s0 + $0x1f0] sm:$0x3] }
  0xda   :  { %19501 = vst [vmem:[#allocation73_spill] sm:$0xff] %v10910_v60  ;;  %v10921_v29 = vsel %vm1111_vm2, %v9649_v26, %v7098_v39  ;;  %v7108_v20 = vunpack.i.l.bf16 %v10601_v41  ;;  %v10929_v60 = vld [vmem:[%s18748_s0 + $0x1f8] sm:$0xff]  ;;  %v10939_v39 = vld [vmem:[%s18748_s0 + $0x208] sm:$0x3]  ;;  %v7104_v59 = vunpack.i.h.bf16 %v10603_v27  ;;  %v10955_v38 = vsel %vm123_vm0, %v1484_v44, %v1486_v4  ;;  %v9651_v4 = vld [vmem:[%s18748_s0 + $0x60] sm:$0xff] }
  0xdb   :  { %19503 = vst [vmem:[#allocation75_spill] sm:$0xff] %v10929_v60  ;;  %19505 = vst [vmem:[#allocation77_spill] sm:$0xff] %v10939_v39  ;;  %v10942_v26 = vpop.permute.xlu0 %7311  ;;  %7606 = vrot.lane.b32.xlu1 %v10252_v52, %s9784_s10  ;;  %v9650_v52 = vld [vmem:[%s18748_s0 + $0x68] sm:$0xff]  ;;  %v1493_v27 = vrot.slane %v10929_v60, 1  ;;  %v1496_v44 = vrot.slane %v10939_v39, 1  ;;  %v7119_v39 = vunpack.i.h.bf16 %v10609_v63  ;;  %v11013_v36 = vpack.i.bf16 %v10955_v38, %v10952_v53  ;;  %v11042_v53 = vld [vmem:[%s18748_s0 + $0x230] sm:$0xff] }
  0xdc   :  { %19506 = vst [vmem:[#allocation78_spill] sm:$0xff] %v10942_v26  ;;  %19508 = vst [vmem:[#allocation80_spill] sm:$0xff] %v10955_v38  ;;  %v1481_v26 = vrot.slane %v10915_v62, 1  ;;  %v10962_v41 = vsel %vm1111_vm2, %v9650_v52, %v7094_v34  ;;  %v10975_v62 = vsel %vm1111_vm2, %v9651_v4, %v7093_v0  ;;  %v9652_v34 = vld [vmem:[%s18748_s0 + $0xb0] sm:$0xff]  ;;  %v9653_v52 = vld [vmem:[%s18748_s0 + $0xa8] sm:$0xff]  ;;  %v11016_v60 = vsel %vm123_vm0, %v1478_v54, %v1479_v31 }
  0xdd   :  { %7601 = vrot.lane.b32.xlu0 %v10267_v50, %s9784_s10  ;;  %v10966_v32 = vpop.permute.xlu1 %7326  ;;  %v10981_v50 = vsel %vm1111_vm2, %v9652_v34, %v7109_v37  ;;  %v10993_v0 = vld [vmem:[%s18748_s0 + $0x1e0] sm:$0xff]  ;;  %v10998_v4 = vld [vmem:[%s18748_s0 + $0x1e8] sm:$0xff]  ;;  %v9654_v37 = vld [vmem:[%s18748_s0 + $0x98] sm:$0xff]  ;;  %19513 = vst [vmem:[#allocation85_spill] sm:$0xff] %v11013_v36 }
  0xde   :  { %19509 = vst [vmem:[#allocation81_spill] sm:$0xff] %v10966_v32  ;;  %v10987_v32 = vsel %vm1111_vm2, %v9653_v52, %v7108_v20  ;;  %19510 = vst [vmem:[#allocation82_spill] sm:$0xff] %v10993_v0  ;;  %v11004_v34 = vsel %vm1111_vm2, %v9654_v37, %v7104_v59  ;;  %v7118_v20 = vunpack.i.l.bf16 %v10609_v63  ;;  %v9655_v63 = vld [vmem:[%s18748_s0 + $0x90] sm:$0xff]  ;;  %v7113_v37 = vunpack.i.l.bf16 %v10611_v10  ;;  %v11037_v54 = vld [vmem:[%s18748_s0 + $0x228] sm:$0xff] }
  0xdf   :  { %19511 = vst [vmem:[#allocation83_spill] sm:$0xff] %v10998_v4  ;;  %v11007_v52 = vpop.permute.xlu0 %7321  ;;  %7616 = vrot.lane.b32.xlu1 %v10282_v24, %s9784_s10  ;;  %19514 = vst [vmem:[#allocation86_spill] sm:$0xff] %v11016_v60  ;;  %v11027_v59 = vsel %vm1111_vm2, %v9655_v63, %v7103_v45  ;;  %v7114_v24 = vunpack.i.h.bf16 %v10611_v10  ;;  %v11032_v38 = vsel %vm123_vm0, %v1479_v31, %v1481_v26  ;;  %v1488_v26 = vrot.slane %v10993_v0, 1  ;;  %v9658_v36 = vld [vmem:[%s18748_s0 + $0xc8] sm:$0xff]  ;;  %v9663_v60 = vld [vmem:[%s18748_s0 + $0xf0] sm:$0xff] }
  0xe0   :  { %19512 = vst [vmem:[#allocation84_spill] sm:$0xff] %v11007_v52  ;;  %19515 = vst [vmem:[#allocation87_spill] sm:$0xff] %v11021_v5  ;;  %v11049_v10 = vsel %vm123_vm0, %v1493_v27, %v1494_v2  ;;  %v11052_v31 = vsel %vm123_vm0, %v1494_v2, %v1496_v44  ;;  %v1489_v63 = vrot.slane %v10998_v4, 1  ;;  %v11059_v52 = vld [vmem:[%s18748_s0 + $0x238] sm:$0x3]  ;;  %v7129_v27 = vunpack.i.h.bf16 %v10617_v49 }
  0xe1   :  { %19516 = vst [vmem:[#allocation88_spill] sm:$0xff] %v11037_v54  ;;  %19517 = vst [vmem:[#allocation89_spill] sm:$0xff] %v11042_v53  ;;  %7611 = vrot.lane.b32.xlu0 %v10293_v14, %s9784_s10  ;;  %v11046_v45 = vpop.permute.xlu1 %7336  ;;  %v9656_v14 = vld [vmem:[%s18748_s0 + $0xe0] sm:$0xff]  ;;  %v7128_v2 = vunpack.i.l.bf16 %v10617_v49  ;;  %v1491_v44 = vrot.slane %v11021_v5, 1  ;;  %v9657_v4 = vld [vmem:[%s18748_s0 + $0xd8] sm:$0xff]  ;;  %v1503_v49 = vrot.slane %v11037_v54, 1  ;;  %v7134_v54 = vunpack.i.h.bf16 %v10627_v48 }
  0xe2   :  { %19518 = vst [vmem:[#allocation90_spill] sm:$0xff] %v11046_v45  ;;  %19519 = vst [vmem:[#allocation91_spill] sm:$0xff] %v11049_v10  ;;  %v11065_v45 = vsel %vm1111_vm2, %v9656_v14, %v7119_v39  ;;  %v11074_v0 = vsel %vm1111_vm2, %v9657_v4, %v7118_v20  ;;  %v19523_v39 = vpack.i.bf16 %v10767_v12, %v10764_v57  ;;  %v1504_v5 = vrot.slane %v11042_v53, 1  ;;  %v9659_v20 = vld [vmem:[%s18748_s0 + $0xc0] sm:$0xff]  ;;  %v11106_v14 = vld [vmem:[%s18748_s0 + $0x210] sm:$0xff] }
  0xe3   :  { %19520 = vst [vmem:[#allocation92_spill] sm:$0xff] %v11052_v31  ;;  %19521 = vst [vmem:[#allocation93_spill] sm:$0xff] %v11059_v52  ;;  %v11076_v18 = vpop.permute.xlu0 %7331  ;;  %v11090_v4 = vsel %vm1111_vm2, %v9658_v36, %v7114_v24  ;;  %v11096_v12 = vsel %vm1111_vm2, %v9659_v20, %v7113_v37  ;;  %v11100_v57 = vpack.i.bf16 %v11052_v31, %v11049_v10  ;;  %v11111_v36 = vld [vmem:[%s18748_s0 + $0x218] sm:$0xff]  ;;  %v7124_v24 = vunpack.i.h.bf16 %v10619_v16 }
  0xe4   :  { %19522 = vst [vmem:[#allocation94_spill] sm:$0xff] %v11076_v18  ;;  %7626 = vrot.lane.b32.xlu1 %v19523_v39, %s9784_s10  ;;  %v1506_v39 = vrot.slane %v11059_v52, 1  ;;  %19525 = vst [vmem:[#allocation96_spill] sm:$0xff] %v11106_v14  ;;  %v7123_v37 = vunpack.i.l.bf16 %v10619_v16  ;;  %v7139_v20 = vunpack.i.h.bf16 %v10625_v17  ;;  %v11121_v10 = vsel %vm123_vm0, %v1488_v26, %v1489_v63  ;;  %v11126_v18 = vld [vmem:[%s18748_s0 + $0x220] sm:$0x3]  ;;  %v9660_v52 = vld [vmem:[%s18748_s0 + $0x110] sm:$0xff] }
  0xe5   :  { %19524 = vst [vmem:[#allocation95_spill] sm:$0xff] %v11100_v57  ;;  %19526 = vst [vmem:[#allocation97_spill] sm:$0xff] %v11111_v36  ;;  %7621 = vrot.lane.b32.xlu0 %v10589_v22, %s9784_s10  ;;  %v11118_v31 = vpop.permute.xlu1 %7346  ;;  %v11132_v16 = vsel %vm1111_vm2, %v9660_v52, %v7129_v27  ;;  %v9661_v22 = vld [vmem:[%s18748_s0 + $0x108] sm:$0xff]  ;;  %v7138_v26 = vunpack.i.l.bf16 %v10625_v17  ;;  %v11142_v53 = vsel %vm123_vm0, %v1489_v63, %v1491_v44  ;;  %v1498_v27 = vrot.slane %v11106_v14, 1  ;;  %v11157_v17 = vld [vmem:[%s18748_s0 + $0x258] sm:$0xff] }
  0xe6   :  { %19527 = vst [vmem:[#allocation98_spill] sm:$0xff] %v11118_v31  ;;  %19528 = vst [vmem:[#allocation99_spill] sm:$0xff] %v11121_v10  ;;  %v11138_v31 = vsel %vm1111_vm2, %v9661_v22, %v7128_v2  ;;  %v11150_v52 = vsel %vm123_vm0, %v1503_v49, %v1504_v5  ;;  %v1499_v2 = vrot.slane %v11111_v36, 1  ;;  %v11162_v63 = vld [vmem:[%s18748_s0 + $0x260] sm:$0xff]  ;;  %v7133_v44 = vunpack.i.l.bf16 %v10627_v48  ;;  %v9662_v36 = vld [vmem:[%s18748_s0 + $0xf8] sm:$0xff] }
  0xe7   :  { %19529 = vst [vmem:[#allocation100_spill] sm:$0xff] %v11126_v18  ;;  %19530 = vst [vmem:[#allocation101_spill] sm:$0xff] %v11142_v53  ;;  %v11145_v57 = vpop.permute.xlu0 %7341  ;;  %v7149_v49 = vunpack.i.h.bf16 %v10633_v13  ;;  %v11172_v22 = vsel %vm123_vm0, %v1504_v5, %v1506_v39  ;;  %v11179_v14 = vsel %vm1111_vm2, %v9662_v36, %v7124_v24  ;;  %v11185_v48 = vsel %vm1111_vm2, %v9663_v60, %v7123_v37  ;;  %v9664_v5 = vld [vmem:[%s18748_s0 + $0x140] sm:$0xff]  ;;  %v9665_v24 = vld [vmem:[%s18748_s0 + $0x138] sm:$0xff] }
  0xe8   :  { %19531 = vst [vmem:[#allocation102_spill] sm:$0xff] %v11145_v57  ;;  %7636 = vrot.lane.b32.xlu1 %v10318_v9, %s9785_s8  ;;  %19532 = vst [vmem:[#allocation103_spill] sm:$0xff] %v11150_v52  ;;  %v11167_v9 = vld [vmem:[%s18748_s0 + $0x268] sm:$0x3]  ;;  %v1501_v57 = vrot.slane %v11126_v18, 1  ;;  %v11191_v39 = vsel %vm1111_vm2, %v9664_v5, %v7139_v20  ;;  %v11199_v36 = vpack.i.bf16 %v11142_v53, %v11121_v10  ;;  %v11204_v60 = vld [vmem:[%s18748_s0 + $0x240] sm:$0xff] }
  0xe9   :  { %19533 = vst [vmem:[#allocation104_spill] sm:$0xff] %v11157_v17  ;;  %19534 = vst [vmem:[#allocation105_spill] sm:$0xff] %v11162_v63  ;;  %7631 = vrot.lane.b32.xlu0 %v10326_v61, %s9785_s8  ;;  %v11195_v18 = vpop.permute.xlu1 %7356  ;;  %v11210_v37 = vsel %vm1111_vm2, %v9665_v24, %v7138_v26  ;;  %v1513_v61 = vrot.slane %v11157_v17, 1  ;;  %v1514_v20 = vrot.slane %v11162_v63, 1  ;;  %v1516_v5 = vrot.slane %v11167_v9, 1  ;;  %v11218_v53 = vld [vmem:[%s18748_s0 + $0x248] sm:$0xff] }
  0xea   :  { %19535 = vst [vmem:[#allocation106_spill] sm:$0xff] %v11167_v9  ;;  %19536 = vst [vmem:[#allocation107_spill] sm:$0xff] %v11172_v22  ;;  %v9634_v10 = vld [vmem:[%s18749_s1 + $0x20] ss:$0 sps:$4 sm:$0xff]   ;;  %v9666_v26 = vld [vmem:[%s18748_s0 + $0x128] sm:$0xff]  ;;  %v11236_v9 = vpack.i.bf16 %v11172_v22, %v11150_v52  ;;  %v11239_v17 = vsel %vm123_vm0, %v1498_v27, %v1499_v2  ;;  %v1508_v22 = vrot.slane %v11204_v60, 1 }
  0xeb   :  { %19537 = vst [vmem:[#allocation108_spill] sm:$0xff] %v11195_v18  ;;  %19538 = vst [vmem:[#allocation109_spill] sm:$0xff] %v11199_v36  ;;  %v11227_v24 = vsel %vm1111_vm2, %v9666_v26, %v7134_v54  ;;  %v7148_v18 = vunpack.i.l.bf16 %v10633_v13  ;;  %v11230_v63 = vpop.permute.xlu0 %7351  ;;  %v9667_v36 = vld [vmem:[%s18748_s0 + $0x120] sm:$0xff]  ;;  %v9668_v13 = vld [vmem:[%s18748_s0 + $0x170] sm:$0xff]  ;;  %v11254_v26 = vsel %vm123_vm0, %v1499_v2, %v1501_v57  ;;  %7059 = vmatprep.subr.msk.bf16.mxu0 %vm2892_vm4, %v9634_v10 }
  0xec   :  { %19539 = vst [vmem:[#allocation110_spill] sm:$0xff] %v11204_v60  ;;  %19540 = vst [vmem:[#allocation111_spill] sm:$0xff] %v11218_v53  ;;  %7646 = vrot.lane.b32.xlu1 %v19470_v42, %s9785_s8  ;;  %v11245_v54 = vsel %vm1111_vm2, %v9667_v36, %v7133_v44  ;;  %v11251_v42 = vsel %vm1111_vm2, %v9668_v13, %v7149_v49  ;;  %v11259_v27 = vld [vmem:[%s18748_s0 + $0x250] sm:$0x3]  ;;  %v7144_v44 = vunpack.i.h.bf16 %v10635_v28  ;;  %v7143_v36 = vunpack.i.l.bf16 %v10635_v28  ;;  %v11272_v57 = vld [vmem:[%s18748_s0 + $0x288] sm:$0xff] }
  0xed   :  { %19541 = vst [vmem:[#allocation112_spill] sm:$0xff] %v11230_v63  ;;  %19542 = vst [vmem:[#allocation113_spill] sm:$0xff] %v11236_v9  ;;  %7641 = vrot.lane.b32.xlu0 %v10344_v7, %s9785_s8  ;;  %v11266_v52 = vpop.permute.xlu1 %7366  ;;  %v1509_v49 = vrot.slane %v11218_v53, 1  ;;  %v11277_v2 = vld [vmem:[%s18748_s0 + $0x290] sm:$0xff]  ;;  %v11282_v28 = vld [vmem:[%s18748_s0 + $0x298] sm:$0x3]  ;;  %v7159_v7 = vunpack.i.h.bf16 %v10641_v43  ;;  %v7158_v13 = vunpack.i.l.bf16 %v10641_v43  ;;  %v11290_v63 = vsel %vm123_vm0, %v1514_v20, %v1516_v5 }
  0xee   :  { %19543 = vst [vmem:[#allocation114_spill] sm:$0xff] %v11239_v17  ;;  %19544 = vst [vmem:[#allocation115_spill] sm:$0xff] %v11251_v42  ;;  %v9669_v53 = vld [vmem:[%s18748_s0 + $0x168] sm:$0xff]  ;;  %v7153_v9 = vunpack.i.l.bf16 %v10643_v35  ;;  %v1511_v43 = vrot.slane %v11259_v27, 1  ;;  %v1523_v5 = vrot.slane %v11272_v57, 1 }
  0xef   :  { %19545 = vst [vmem:[#allocation116_spill] sm:$0xff] %v11254_v26  ;;  %19546 = vst [vmem:[#allocation117_spill] sm:$0xff] %v11259_v27  ;;  %v11297_v60 = vsel %vm1111_vm2, %v9669_v53, %v7148_v18  ;;  %v11300_v42 = vpop.permute.xlu0 %7361  ;;  %v1524_v53 = vrot.slane %v11277_v2, 1  ;;  %v1526_v18 = vrot.slane %v11282_v28, 1 }
  0xf0   :  { %19547 = vst [vmem:[#allocation118_spill] sm:$0xff] %v11266_v52  ;;  %19548 = vst [vmem:[#allocation119_spill] sm:$0xff] %v11272_v57  ;;  %v11287_v52 = vsel %vm123_vm0, %v1513_v61, %v1514_v20  ;;  %7656 = vrot.lane.b32.xlu1 %v19471_v46, %s9785_s8  ;;  %v2894_v61 = vsel %vm2892_vm4, %v9634_v10, 0  ;;  %v11308_v20 = vpack.i.bf16 %v11254_v26, %v11239_v17  ;;  %v9670_v46 = vld [vmem:[%s18748_s0 + $0x158] sm:$0xff]  ;;  %v9671_v26 = vld [vmem:[%s18748_s0 + $0x150] sm:$0xff] }
  0xf1   :  { %19549 = vst [vmem:[#allocation120_spill] sm:$0xff] %v11277_v2  ;;  %19550 = vst [vmem:[#allocation121_spill] sm:$0xff] %v11282_v28  ;;  %6920 = vmatpush3.bf16.msra.mxu0 %v2894_v61  ;;  %v11322_v10 = vsel %vm1111_vm2, %v9670_v46, %v7144_v44  ;;  %v11328_v17 = vsel %vm1111_vm2, %v9671_v26, %v7143_v36  ;;  %7651 = vrot.lane.b32.xlu0 %v10362_v40, %s9785_s8  ;;  %v11332_v28 = vpop.permute.xlu1 %7376  ;;  %v11344_v44 = vld [vmem:[%s18748_s0 + $0x278] sm:$0xff]  ;;  %v7154_v36 = vunpack.i.h.bf16 %v10643_v35  ;;  %v11387_v57 = vld [vmem:[%s18748_s0 + $0x2c8] sm:$0x3] }
  0xf2   :  { %19551 = vst [vmem:[#allocation122_spill] sm:$0xff] %v11287_v52  ;;  %19552 = vst [vmem:[#allocation123_spill] sm:$0xff] %v11290_v63  ;;  %v11336_v61 = vpack.i.bf16 %v11290_v63, %v11287_v52  ;;  %v11339_v2 = vsel %vm123_vm0, %v1508_v22, %v1509_v49  ;;  %v11348_v26 = vsel %vm1144_vm3, %v10899_v55, %v7158_v13  ;;  %v7169_v46 = vunpack.i.h.bf16 %v10649_v30  ;;  %v11359_v22 = vld [vmem:[%s18748_s0 + $0x280] sm:$0x3]  ;;  %v11364_v63 = vld [vmem:[%s18748_s0 + $0x2b8] sm:$0xff] }
  0xf3   :  { %19553 = vst [vmem:[#allocation124_spill] sm:$0xff] %v11300_v42  ;;  %19554 = vst [vmem:[#allocation125_spill] sm:$0xff] %v11308_v20  ;;  %v11316_v42 = vld [vmem:[%s18748_s0 + $0x270] sm:$0xff]  ;;  %v11352_v40 = vsel %vm1144_vm3, %v10893_v1, %v7159_v7  ;;  %v11369_v55 = vld [vmem:[%s18748_s0 + $0x2c0] sm:$0xff]  ;;  %v11373_v35 = vsel %vm1144_vm3, %v10848_v51, %v7153_v9  ;;  %v7168_v1 = vunpack.i.l.bf16 %v10649_v30  ;;  %v11376_v7 = vpop.permute.xlu0 %7371  ;;  %v11381_v52 = vsel %vm123_vm0, %v1509_v49, %v1511_v43 }
  0xf4   :  { %19555 = vst [vmem:[#allocation126_spill] sm:$0xff] %v11316_v42  ;;  %19556 = vst [vmem:[#allocation127_spill] sm:$0xff] %v11332_v28  ;;  %v19565_v13 = vld [vmem:[#allocation47_spill] sm:$0xff]  ;;  %v1518_v28 = vrot.slane %v11316_v42, 1  ;;  %v7164_v51 = vunpack.i.h.bf16 %v10651_v6  ;;  %v11391_v9 = vsel %vm123_vm0, %v1523_v5, %v1524_v53  ;;  %v11394_v30 = vsel %vm123_vm0, %v1524_v53, %v1526_v18  ;;  %v19570_v43 = vld [vmem:[#allocation48_spill] sm:$0xff] }
  0xf5   :  { %19557 = vst [vmem:[#allocation128_spill] sm:$0xff] %v11336_v61  ;;  %19558 = vst [vmem:[#allocation129_spill] sm:$0xff] %v11339_v2  ;;  %7666 = vrot.lane.b32.xlu1 %v19565_v13, %s9785_s8  ;;  %v1519_v13 = vrot.slane %v11344_v44, 1  ;;  %v7163_v49 = vunpack.i.l.bf16 %v10651_v6  ;;  %7661 = vrot.lane.b32.xlu0 %v19570_v43, %s9785_s8  ;;  %v1521_v42 = vrot.slane %v11359_v22, 1  ;;  %v1533_v27 = vrot.slane %v11364_v63, 1 }
  0xf6   :  { %19559 = vst [vmem:[#allocation130_spill] sm:$0xff] %v11344_v44  ;;  %19560 = vst [vmem:[#allocation131_spill] sm:$0xff] %v11359_v22  ;;  %v11407_v5 = vsel %vm1144_vm3, %v10820_v25, %v7154_v36  ;;  %v11411_v53 = vsel %vm1144_vm3, %v10855_v19, %v7169_v46  ;;  %v11415_v6 = vpack.i.bf16 %v11381_v52, %v11339_v2  ;;  %v1536_v18 = vrot.slane %v11387_v57, 1  ;;  %v19574_v36 = vld [vmem:[#allocation49_spill] sm:$0xff]  ;;  %v11435_v46 = vld [vmem:[%s18748_s0 + $0x2a0] sm:$0xff] }
  0xf7   :  { %19561 = vst [vmem:[#allocation132_spill] sm:$0xff] %v11364_v63  ;;  %19562 = vst [vmem:[#allocation133_spill] sm:$0xff] %v11369_v55  ;;  %v11420_v43 = vsel %vm1144_vm3, %v10861_v3, %v7168_v1  ;;  %v11424_v25 = vpop.permute.xlu0 %7381  ;;  %v11430_v19 = vpack.i.bf16 %v11394_v30, %v11391_v9  ;;  %v11440_v3 = vld [vmem:[%s18748_s0 + $0x2a8] sm:$0xff]  ;;  %v11449_v1 = vsel %vm1144_vm3, %v10804_v58, %v7164_v51  ;;  %v11464_v2 = vld [vmem:[%s18748_s0 + $0x2f0] sm:$0xff]  ;;  %v7189_v51 = vunpack.i.h.bf16 %v10665_v23 }
  0xf8   :  { %19563 = vst [vmem:[#allocation134_spill] sm:$0xff] %v11373_v35  ;;  %19564 = vst [vmem:[#allocation135_spill] sm:$0xff] %v11376_v7  ;;  %v11400_v7 = vpop.permute.xlu1 %7386  ;;  %v1534_v35 = vrot.slane %v11369_v55, 1  ;;  %v7178_v55 = vunpack.i.l.bf16 %v10657_v15  ;;  %v11468_v58 = vsel %vm1144_vm3, %v10810_v8, %v7163_v49  ;;  %v11484_v63 = vld [vmem:[%s18748_s0 + $0x2f8] sm:$0x3]  ;;  %v1528_v49 = vrot.slane %v11435_v46, 1 }
  0xf9   :  { %19566 = vst [vmem:[#allocation47_spill] sm:$0xff] %v11381_v52  ;;  %19567 = vst [vmem:[#allocation136_spill] sm:$0xff] %v11387_v57  ;;  %7676 = vrot.lane.b32.xlu1 %v19574_v36, %s9785_s8  ;;  %v7174_v36 = vunpack.i.h.bf16 %v10659_v47  ;;  %v11459_v52 = vld [vmem:[%s18748_s0 + $0x2e8] sm:$0xff] }
  0xfa   :  { %19568 = vst [vmem:[#allocation137_spill] sm:$0xff] %v11391_v9  ;;  %19569 = vst [vmem:[#allocation138_spill] sm:$0xff] %v11394_v30  ;;  %v7173_v30 = vunpack.i.l.bf16 %v10659_v47  ;;  %v11454_v9 = vsel %vm123_vm0, %v1518_v28, %v1519_v13  ;;  %v19582_v47 = vld [vmem:[#allocation31_spill] sm:$0xff]  ;;  %v11479_v57 = vsel %vm123_vm0, %v1533_v27, %v1534_v35  ;;  %v11487_v8 = vsel %vm123_vm0, %v1534_v35, %v1536_v18  ;;  %v19589_v22 = vld [vmem:[#allocation32_spill] sm:$0xff] }
  0xfb   :  { %19571 = vst [vmem:[#allocation48_spill] sm:$0xff] %v11400_v7  ;;  %19572 = vst [vmem:[#allocation139_spill] sm:$0xff] %v11415_v6  ;;  %v7179_v7 = vunpack.i.h.bf16 %v10657_v15  ;;  %v11445_v15 = vld [vmem:[%s18748_s0 + $0x2b0] sm:$0x3]  ;;  %7671 = vrot.lane.b32.xlu0 %v19582_v47, %s9785_s8  ;;  %v1529_v47 = vrot.slane %v11440_v3, 1  ;;  %v11498_v27 = vsel %vm1144_vm3, %v10921_v29, %v7178_v55  ;;  %v1543_v35 = vrot.slane %v11459_v52, 1 }
  0xfc   :  { %19573 = vst [vmem:[#allocation140_spill] sm:$0xff] %v11424_v25  ;;  %19575 = vst [vmem:[#allocation49_spill] sm:$0xff] %v11430_v19  ;;  %v11473_v28 = vpop.permute.xlu1 %7396  ;;  %v11476_v25 = vsel %vm123_vm0, %v1519_v13, %v1521_v42  ;;  %v11500_v13 = vpop.permute.xlu0 %7391  ;;  %v1544_v18 = vrot.slane %v11464_v2, 1  ;;  %v1546_v55 = vrot.slane %v11484_v63, 1  ;;  %v19609_v44 = vld [vmem:[#allocation52_spill] sm:$0xff] }
  0xfd   :  { %19576 = vst [vmem:[#allocation141_spill] sm:$0xff] %v11435_v46  ;;  %19577 = vst [vmem:[#allocation142_spill] sm:$0xff] %v11440_v3  ;;  %v11494_v42 = vsel %vm1144_vm3, %v10905_v56, %v7179_v7  ;;  %7686 = vrot.lane.b32.xlu1 %v19589_v22, %s9785_s8  ;;  %v11512_v56 = vsel %vm1144_vm3, %v10962_v41, %v7174_v36  ;;  %v11516_v29 = vpack.i.bf16 %v11476_v25, %v11454_v9  ;;  %v11536_v36 = vld [vmem:[%s18748_s0 + $0x2d0] sm:$0xff]  ;;  %v11579_v3 = vld [vmem:[%s18748_s0 + $0x328] sm:$0x3] }
  0xfe   :  { %19578 = vst [vmem:[#allocation143_spill] sm:$0xff] %v11445_v15  ;;  %19579 = vst [vmem:[#allocation144_spill] sm:$0xff] %v11454_v9  ;;  %v11521_v22 = vsel %vm1144_vm3, %v10981_v50, %v7189_v51  ;;  %v7188_v7 = vunpack.i.l.bf16 %v10665_v23  ;;  %v11531_v41 = vpack.i.bf16 %v11487_v8, %v11479_v57  ;;  %v11541_v23 = vld [vmem:[%s18748_s0 + $0x2d8] sm:$0xff]  ;;  %v11546_v50 = vld [vmem:[%s18748_s0 + $0x2e0] sm:$0x3]  ;;  %v7184_v51 = vunpack.i.h.bf16 %v10667_v21 }
  0xff   :  { %19580 = vst [vmem:[#allocation145_spill] sm:$0xff] %v11459_v52  ;;  %19581 = vst [vmem:[#allocation146_spill] sm:$0xff] %v11464_v2  ;;  %v11559_v9 = vld [vmem:[%s18748_s0 + $0x318] sm:$0xff]  ;;  %v11582_v46 = vsel %vm123_vm0, %v1544_v18, %v1546_v55 }
 0x100   :  { %19583 = vst [vmem:[#allocation31_spill] sm:$0xff] %v11473_v28  ;;  %19584 = vst [vmem:[#allocation147_spill] sm:$0xff] %v11476_v25  ;;  %v1531_v28 = vrot.slane %v11445_v15, 1  ;;  %v11508_v15 = vsel %vm1144_vm3, %v10975_v62, %v7173_v30  ;;  %v19592_v62 = vld [vmem:[#allocation50_spill] sm:$0xff]  ;;  %v11527_v30 = vpop.permute.xlu1 %7406  ;;  %v11569_v52 = vpop.permute.xlu0 %7401 }
 0x101   :  { %19585 = vst [vmem:[#allocation148_spill] sm:$0xff] %v11479_v57  ;;  %19586 = vst [vmem:[#allocation149_spill] sm:$0xff] %v11484_v63  ;;  %7681 = vrot.lane.b32.xlu0 %v19592_v62, %s9785_s8  ;;  %v19598_v62 = vld [vmem:[#allocation18_spill] sm:$0xff]  ;;  %v11551_v57 = vsel %vm123_vm0, %v1528_v49, %v1529_v47  ;;  %v19603_v63 = vld [vmem:[#allocation8_spill] sm:$0xff] }
 0x102   :  { %19587 = vst [vmem:[#allocation150_spill] sm:$0xff] %v11487_v8  ;;  %19588 = vst [vmem:[#allocation151_spill] sm:$0xff] %v11500_v13  ;;  %v7183_v13 = vunpack.i.l.bf16 %v10667_v21  ;;  %v7199_v8 = vunpack.i.h.bf16 %v19598_v62  ;;  %v11554_v25 = vsel %vm123_vm0, %v1529_v47, %v1531_v28  ;;  %v7198_v21 = vunpack.i.l.bf16 %v19598_v62  ;;  %v19605_v28 = vld [vmem:[#allocation51_spill] sm:$0xff] }
 0x103   :  { %19590 = vst [vmem:[#allocation32_spill] sm:$0xff] %v11516_v29  ;;  %19591 = vst [vmem:[#allocation152_spill] sm:$0xff] %v11521_v22  ;;  %v7194_v2 = vunpack.i.h.bf16 %v19603_v63  ;;  %v7193_v49 = vunpack.i.l.bf16 %v19603_v63  ;;  %7696 = vrot.lane.b32.xlu1 %v19605_v28, %s9785_s8  ;;  %v11574_v47 = vsel %vm123_vm0, %v1543_v35, %v1544_v18  ;;  %v1538_v62 = vrot.slane %v11536_v36, 1 }
 0x104   :  { %19593 = vst [vmem:[#allocation50_spill] sm:$0xff] %v11527_v30  ;;  %19594 = vst [vmem:[#allocation153_spill] sm:$0xff] %v11531_v41  ;;  %v11564_v30 = vld [vmem:[%s18748_s0 + $0x320] sm:$0xff]  ;;  %v1539_v63 = vrot.slane %v11541_v23, 1  ;;  %v11589_v28 = vsel %vm1144_vm3, %v10987_v32, %v7188_v7  ;;  %v11593_v35 = vsel %vm1144_vm3, %v11027_v59, %v7183_v13  ;;  %v11597_v22 = vpop.permute.xlu1 %7416  ;;  %v1553_v18 = vrot.slane %v11559_v9, 1 }
 0x105   :  { %19595 = vst [vmem:[#allocation154_spill] sm:$0xff] %v11536_v36  ;;  %19596 = vst [vmem:[#allocation155_spill] sm:$0xff] %v11541_v23  ;;  %7691 = vrot.lane.b32.xlu0 %v19609_v44, %s9785_s8  ;;  %v1554_v55 = vrot.slane %v11564_v30, 1  ;;  %v11607_v32 = vsel %vm1144_vm3, %v11065_v45, %v7199_v8  ;;  %v11611_v59 = vpack.i.bf16 %v11554_v25, %v11551_v57  ;;  %v1556_v44 = vrot.slane %v11579_v3, 1  ;;  %v11626_v45 = vpop.permute.xlu0 %7411  ;;  %v19631_v36 = vld [vmem:[#allocation68_spill] sm:$0xff] }
 0x106   :  { %19597 = vst [vmem:[#allocation156_spill] sm:$0xff] %v11546_v50  ;;  %19599 = vst [vmem:[#allocation18_spill] sm:$0xff] %v11551_v57  ;;  %v11616_v13 = vsel %vm1144_vm3, %v11074_v0, %v7198_v21  ;;  %v11620_v7 = vsel %vm1144_vm3, %v11096_v12, %v7193_v49  ;;  %v19613_v8 = vpack.i.bf16 %v10871_v11, %v10868_v33  ;;  %v11639_v0 = vld [vmem:[%s18748_s0 + $0x300] sm:$0xff]  ;;  %v19617_v12 = vld [vmem:[#allocation25_spill] sm:$0xff] }
 0x107   :  { %19600 = vst [vmem:[#allocation157_spill] sm:$0xff] %v11554_v25  ;;  %19601 = vst [vmem:[#allocation158_spill] sm:$0xff] %v11559_v9  ;;  %v7208_v21 = vunpack.i.l.bf16 %v19617_v12  ;;  %v11649_v33 = vsel %vm123_vm0, %v1538_v62, %v1539_v63  ;;  %v11657_v49 = vld [vmem:[%s18748_s0 + $0x310] sm:$0x3]  ;;  %v11667_v62 = vsel %vm123_vm0, %v1553_v18, %v1554_v55  ;;  %v19630_v18 = vld [vmem:[#allocation67_spill] sm:$0xff] }
 0x108   :  { %19602 = vst [vmem:[#allocation159_spill] sm:$0xff] %v11564_v30  ;;  %19604 = vst [vmem:[#allocation8_spill] sm:$0xff] %v11569_v52  ;;  %v1541_v52 = vrot.slane %v11546_v50, 1  ;;  %v11603_v50 = vsel %vm1144_vm3, %v11004_v34, %v7184_v51  ;;  %v11624_v34 = vsel %vm1144_vm3, %v11090_v4, %v7194_v2  ;;  %7706 = vrot.lane.b32.xlu1 %v19613_v8, %s9785_s8  ;;  %v11644_v4 = vld [vmem:[%s18748_s0 + $0x308] sm:$0xff]  ;;  %v7209_v2 = vunpack.i.h.bf16 %v19617_v12  ;;  %v19621_v8 = vld [vmem:[#allocation15_spill] sm:$0xff]  ;;  %v11664_v12 = vpop.permute.xlu1 %7426 }
 0x109   :  { %19606 = vst [vmem:[#allocation51_spill] sm:$0xff] %v11574_v47  ;;  %19607 = vst [vmem:[#allocation160_spill] sm:$0xff] %v11579_v3  ;;  %v11634_v51 = vpack.i.bf16 %v11582_v46, %v11574_v47  ;;  %v7203_v47 = vunpack.i.l.bf16 %v19621_v8  ;;  %v19622_v25 = vld [vmem:[#allocation33_spill] sm:$0xff]  ;;  %v1549_v3 = vrot.slane %v11644_v4, 1  ;;  %v11676_v9 = vpop.permute.xlu0 %7421  ;;  %v1563_v23 = vrot.slane %v19630_v18, 2 }
 0x10a   :  { %19608 = vst [vmem:[#allocation161_spill] sm:$0xff] %v11582_v46  ;;  %19610 = vst [vmem:[#allocation52_spill] sm:$0xff] %v11597_v22  ;;  %v11652_v11 = vsel %vm123_vm0, %v1539_v63, %v1541_v52  ;;  %v7204_v46 = vunpack.i.h.bf16 %v19621_v8  ;;  %v7219_v57 = vunpack.i.h.bf16 %v19622_v25  ;;  %v7218_v52 = vunpack.i.l.bf16 %v19622_v25  ;;  %v19627_v8 = vld [vmem:[#allocation20_spill] sm:$0xff] }
 0x10b   :  { %19611 = vst [vmem:[#allocation162_spill] sm:$0xff] %v11611_v59  ;;  %19612 = vst [vmem:[#allocation163_spill] sm:$0xff] %v11626_v45  ;;  %v19623_v45 = vld [vmem:[#allocation53_spill] sm:$0xff]  ;;  %v11671_v63 = vsel %vm123_vm0, %v1554_v55, %v1556_v44  ;;  %v1548_v22 = vrot.slane %v11639_v0, 1  ;;  %v7213_v30 = vunpack.i.l.bf16 %v19627_v8  ;;  %v1564_v25 = vrot.slane %v19631_v36, 2 }
 0x10c   :  { %19614 = vst [vmem:[#allocation164_spill] sm:$0xff] %v11634_v51  ;;  %19615 = vst [vmem:[#allocation165_spill] sm:$0xff] %v11639_v0  ;;  %7701 = vrot.lane.b32.xlu0 %v19623_v45, %s9785_s8  ;;  %v19629_v45 = vld [vmem:[#allocation85_spill] sm:$0xff]  ;;  %v11685_v55 = vsel %vm1144_vm3, %v11132_v16, %v7209_v2  ;;  %v11689_v44 = vsel %vm1144_vm3, %v11138_v31, %v7208_v21  ;;  %v11698_v18 = vsel %vm1144_vm3, %v11185_v48, %v7203_v47  ;;  %v19634_v31 = vld [vmem:[#allocation86_spill] sm:$0xff]  ;;  %v11712_v21 = vpop.permute.xlu1 %7436 }
 0x10d   :  { %19616 = vst [vmem:[#allocation166_spill] sm:$0xff] %v11644_v4  ;;  %19618 = vst [vmem:[#allocation25_spill] sm:$0xff] %v11649_v33  ;;  %7716 = vrot.lane.b32.xlu1 %v19629_v45, %s9778_s25  ;;  %v19633_v45 = vld [vmem:[#allocation69_spill] sm:$0xff]  ;;  %v11702_v36 = vsel %vm1144_vm3, %v11179_v14, %v7204_v46  ;;  %v11706_v16 = vsel %vm1144_vm3, %v11191_v39, %v7219_v57  ;;  %v19635_v2 = vpack.i.bf16 %v11032_v38, %v19634_v31  ;;  %v19638_v46 = vld [vmem:[#allocation28_spill] sm:$0xff]  ;;  %v11732_v31 = vpop.permute.xlu0 %7431 }
 0x10e   :  { %19619 = vst [vmem:[#allocation167_spill] sm:$0xff] %v11652_v11  ;;  %19620 = vst [vmem:[#allocation168_spill] sm:$0xff] %v11657_v49  ;;  %v1566_v4 = vrot.slane %v19633_v45, 2  ;;  %v11716_v45 = vpack.i.bf16 %v11671_v63, %v11667_v62  ;;  %v11720_v48 = vsel %vm1144_vm3, %v11210_v37, %v7218_v52  ;;  %v7214_v14 = vunpack.i.h.bf16 %v19627_v8  ;;  %v19643_v8 = vld [vmem:[#allocation36_spill] sm:$0xff]  ;;  %v19664_v0 = vld [vmem:[#allocation87_spill] sm:$0xff] }
 0x10f   :  { %19624 = vst [vmem:[#allocation15_spill] sm:$0xff] %v11664_v12  ;;  %19625 = vst [vmem:[#allocation33_spill] sm:$0xff] %v11667_v62  ;;  %v1551_v12 = vrot.slane %v11657_v49, 1  ;;  %v7229_v39 = vunpack.i.h.bf16 %v19638_v46  ;;  %v11725_v57 = vsel %vm123_vm0, %v1548_v22, %v1549_v3  ;;  %v11729_v38 = vsel %vm1144_vm3, %v11245_v54, %v7213_v30  ;;  %v19644_v54 = vld [vmem:[#allocation71_spill] sm:$0xff] }
 0x110   :  { %19626 = vst [vmem:[#allocation53_spill] sm:$0xff] %v11671_v63  ;;  %19628 = vst [vmem:[#allocation20_spill] sm:$0xff] %v11676_v9  ;;  %v11693_v9 = vpack.i.bf16 %v11652_v11, %v11649_v33  ;;  %7711 = vrot.lane.b32.xlu0 %v19635_v2, %s9778_s25  ;;  %v7228_v47 = vunpack.i.l.bf16 %v19638_v46  ;;  %v19641_v2 = vld [vmem:[#allocation95_spill] sm:$0xff]  ;;  %v1565_v52 = vsel %vm204_vm1, %v1563_v23, %v1564_v25  ;;  %v7224_v63 = vunpack.i.h.bf16 %v19643_v8  ;;  %v19645_v46 = vld [vmem:[#allocation109_spill] sm:$0xff]  ;;  %v11746_v11 = vpop.permute.xlu1 %7446 }
 0x111   :  { %19636 = vst [vmem:[#allocation68_spill] sm:$0xff] %v11712_v21  ;;  %19637 = vst [vmem:[#allocation69_spill] sm:$0xff] %v11716_v45  ;;  %7726 = vrot.lane.b32.xlu1 %v19641_v2, %s9778_s25  ;;  %v11737_v37 = vsel %vm123_vm0, %v1549_v3, %v1551_v12  ;;  %v7223_v22 = vunpack.i.l.bf16 %v19643_v8  ;;  %v1567_v62 = vsel %vm204_vm1, %v1564_v25, %v1566_v4  ;;  %v1558_v30 = vrot.slane %v19644_v54, 2  ;;  %v19647_v33 = vld [vmem:[#allocation72_spill] sm:$0xff]  ;;  %v19649_v12 = vld [vmem:[#allocation75_spill] sm:$0xff] }
 0x112   :  { %19632 = vst [vmem:[#allocation67_spill] sm:$0xff] %v11693_v9  ;;  %19639 = vst [vmem:[#allocation86_spill] sm:$0xff] %v11725_v57  ;;  %v1559_v2 = vrot.slane %v19647_v33, 2  ;;  %v1573_v21 = vrot.slane %v19649_v12, 2  ;;  %v19650_v23 = vld [vmem:[#allocation76_spill] sm:$0xff]  ;;  %v11754_v8 = vsel %vm1144_vm3, %v11227_v24, %v7214_v14  ;;  %v19651_v4 = vld [vmem:[#allocation115_spill] sm:$0xff]  ;;  %v11762_v54 = vpack.i.bf16 %v11737_v37, %v11725_v57  ;;  %v11771_v24 = vpop.permute.xlu0 %7441 }
 0x113   :  { %19640 = vst [vmem:[#allocation28_spill] sm:$0xff] %v11732_v31  ;;  %19642 = vst [vmem:[#allocation169_spill] sm:$0xff] %v11737_v37  ;;  %v19648_v31 = vld [vmem:[#allocation74_spill] sm:$0xff]  ;;  %v1574_v49 = vrot.slane %v19650_v23, 2  ;;  %v11758_v25 = vsel %vm1144_vm3, %v19651_v4, %v7229_v39  ;;  %v19654_v12 = vld [vmem:[#allocation45_spill] sm:$0xff]  ;;  %v11775_v39 = vpack.i.bf16 %v1567_v62, %v1565_v52  ;;  %v11779_v4 = vsel %vm1144_vm3, %v11328_v17, %v7223_v22 }
 0x114   :  { %7721 = vrot.lane.b32.xlu0 %v19645_v46, %s9778_s25  ;;  %19646 = vst [vmem:[#allocation36_spill] sm:$0xff] %v11746_v11  ;;  %v1561_v3 = vrot.slane %v19648_v31, 2  ;;  %19652 = vst [vmem:[#allocation71_spill] sm:$0xff] %v11762_v54  ;;  %v19653_v11 = vld [vmem:[#allocation77_spill] sm:$0xff]  ;;  %v11767_v31 = vsel %vm1144_vm3, %v11297_v60, %v7228_v47  ;;  %v7239_v23 = vunpack.i.h.bf16 %v19654_v12  ;;  %v7238_v46 = vunpack.i.l.bf16 %v19654_v12  ;;  %v19659_v60 = vld [vmem:[#allocation46_spill] sm:$0xff] }
 0x115   :  { %v1576_v33 = vrot.slane %v19653_v11, 2  ;;  %19655 = vst [vmem:[#allocation72_spill] sm:$0xff] %v11771_v24  ;;  %v19656_v14 = vld [vmem:[#allocation113_spill] sm:$0xff]  ;;  %19657 = vst [vmem:[#allocation74_spill] sm:$0xff] %v11775_v39  ;;  %v11783_v11 = vsel %vm1144_vm3, %v11322_v10, %v7224_v63  ;;  %v7234_v47 = vunpack.i.h.bf16 %v19659_v60  ;;  %v7233_v37 = vunpack.i.l.bf16 %v19659_v60  ;;  %v19660_v12 = vld [vmem:[#allocation54_spill] sm:$0xff]  ;;  %v11790_v24 = vpop.permute.xlu1 %7456 }
 0x116   :  { %7736 = vrot.lane.b32.xlu1 %v19656_v14, %s9778_s25  ;;  %19658 = vst [vmem:[#allocation75_spill] sm:$0xff] %v11783_v11  ;;  %v7248_v57 = vunpack.i.l.bf16 %v19660_v12  ;;  %19661 = vst [vmem:[#allocation76_spill] sm:$0xff] %v11790_v24  ;;  %v11793_v62 = vsel %vm204_vm1, %v1558_v30, %v1559_v2  ;;  %v11796_v17 = vsel %vm204_vm1, %v1559_v2, %v1561_v3  ;;  %v19662_v52 = vld [vmem:[#allocation82_spill] sm:$0xff]  ;;  %v19663_v60 = vld [vmem:[#allocation83_spill] sm:$0xff]  ;;  %v1571_v11 = vrot.slane %v19664_v0, 2  ;;  %v11811_v2 = vpop.permute.xlu0 %7451 }
 0x117   :  { %v1575_v10 = vsel %vm204_vm1, %v1573_v21, %v1574_v49  ;;  %v1577_v63 = vsel %vm204_vm1, %v1574_v49, %v1576_v33  ;;  %v1568_v22 = vrot.slane %v19662_v52, 2  ;;  %v1569_v14 = vrot.slane %v19663_v60, 2  ;;  %19665 = vst [vmem:[#allocation115_spill] sm:$0xff] %v11811_v2  ;;  %v19666_v49 = vld [vmem:[#allocation88_spill] sm:$0xff]  ;;  %v19667_v3 = vld [vmem:[#allocation89_spill] sm:$0xff]  ;;  %v19668_v24 = vld [vmem:[#allocation134_spill] sm:$0xff] }
 0x118   :  { %7731 = vrot.lane.b32.xlu0 %v11308_v20, %s9778_s25  ;;  %v11805_v20 = vsel %vm1177_vm5, %v11348_v26, %v7238_v46  ;;  %v11809_v30 = vsel %vm1177_vm5, %v11352_v40, %v7239_v23  ;;  %v1583_v21 = vrot.slane %v19666_v49, 2  ;;  %v1584_v33 = vrot.slane %v19667_v3, 2  ;;  %v19670_v46 = vld [vmem:[#allocation93_spill] sm:$0xff]  ;;  %v19672_v3 = vld [vmem:[#allocation55_spill] sm:$0xff] }
 0x119   :  { %v11819_v0 = vsel %vm1177_vm5, %v19668_v24, %v7233_v37  ;;  %v11823_v26 = vsel %vm1177_vm5, %v11407_v5, %v7234_v47  ;;  %v1586_v23 = vrot.slane %v19670_v46, 2  ;;  %v7249_v2 = vunpack.i.h.bf16 %v19660_v12  ;;  %v11836_v37 = vpop.permute.xlu1 %7466  ;;  %v19675_v47 = vld [vmem:[#allocation56_spill] sm:$0xff] }
 0x11a   :  { %7746 = vrot.lane.b32.xlu1 %v11336_v61, %s9778_s25  ;;  %19669 = vst [vmem:[#allocation77_spill] sm:$0xff] %v11823_v26  ;;  %v11831_v61 = vsel %vm1177_vm5, %v11420_v43, %v7248_v57  ;;  %v7244_v49 = vunpack.i.h.bf16 %v19672_v3  ;;  %19673 = vst [vmem:[#allocation46_spill] sm:$0xff] %v11836_v37  ;;  %v11838_v5 = vpack.i.bf16 %v1577_v63, %v1575_v10  ;;  %v7243_v24 = vunpack.i.l.bf16 %v19672_v3  ;;  %v19676_v57 = vld [vmem:[#allocation57_spill] sm:$0xff]  ;;  %v19678_v3 = vld [vmem:[#allocation96_spill] sm:$0xff] }
 0x11b   :  { %19671 = vst [vmem:[#allocation45_spill] sm:$0xff] %v11831_v61  ;;  %v7258_v40 = vunpack.i.l.bf16 %v19675_v47  ;;  %v1570_v46 = vsel %vm204_vm1, %v1568_v22, %v1569_v14  ;;  %v1572_v12 = vsel %vm204_vm1, %v1569_v14, %v1571_v11  ;;  %v7259_v43 = vunpack.i.h.bf16 %v19675_v47  ;;  %v11847_v61 = vpop.permute.xlu0 %7461  ;;  %v19679_v22 = vld [vmem:[#allocation97_spill] sm:$0xff]  ;;  %v19680_v14 = vld [vmem:[#allocation100_spill] sm:$0xff] }
 0x11c   :  { %7741 = vrot.lane.b32.xlu0 %v11415_v6, %s9778_s25  ;;  %19674 = vst [vmem:[#allocation54_spill] sm:$0xff] %v11838_v5  ;;  %v7254_v60 = vunpack.i.h.bf16 %v19676_v57  ;;  %v7253_v52 = vunpack.i.l.bf16 %v19676_v57  ;;  %19677 = vst [vmem:[#allocation87_spill] sm:$0xff] %v11847_v61  ;;  %v1585_v10 = vsel %vm204_vm1, %v1583_v21, %v1584_v33  ;;  %v1587_v63 = vsel %vm204_vm1, %v1584_v33, %v1586_v23  ;;  %v19682_v61 = vld [vmem:[#allocation104_spill] sm:$0xff]  ;;  %v19683_v21 = vld [vmem:[#allocation105_spill] sm:$0xff] }
 0x11d   :  { %v1578_v37 = vrot.slane %v19678_v3, 2  ;;  %v1579_v6 = vrot.slane %v19679_v22, 2  ;;  %v1581_v11 = vrot.slane %v19680_v14, 2  ;;  %v11858_v47 = vsel %vm1177_vm5, %v11411_v53, %v7249_v2  ;;  %v11862_v57 = vpop.permute.xlu1 %7476  ;;  %v19684_v33 = vld [vmem:[#allocation106_spill] sm:$0xff] }
 0x11e   :  { %7756 = vrot.lane.b32.xlu1 %v11430_v19, %s9778_s25  ;;  %19681 = vst [vmem:[#allocation134_spill] sm:$0xff] %v11862_v57  ;;  %v1593_v19 = vrot.slane %v19682_v61, 2  ;;  %v1594_v26 = vrot.slane %v19683_v21, 2  ;;  %v1596_v23 = vrot.slane %v19684_v33, 2  ;;  %v11869_v22 = vsel %vm1177_vm5, %v11468_v58, %v7243_v24  ;;  %v19699_v61 = vld [vmem:[#allocation152_spill] sm:$0xff] }
 0x11f   :  { %v11873_v14 = vsel %vm1177_vm5, %v11449_v1, %v7244_v49  ;;  %v11877_v53 = vsel %vm1177_vm5, %v11498_v27, %v7258_v40  ;;  %v11879_v2 = vpack.i.bf16 %v1572_v12, %v1570_v46  ;;  %v11887_v33 = vsel %vm1177_vm5, %v11508_v15, %v7253_v52  ;;  %v11893_v1 = vpop.permute.xlu0 %7471  ;;  %v19688_v49 = vld [vmem:[#allocation58_spill] sm:$0xff]  ;;  %v19689_v52 = vld [vmem:[#allocation59_spill] sm:$0xff] }
 0x120   :  { %7751 = vrot.lane.b32.xlu0 %v11516_v29, %s9778_s25  ;;  %v11883_v29 = vsel %vm1177_vm5, %v11494_v42, %v7259_v43  ;;  %v11891_v58 = vsel %vm1177_vm5, %v11512_v56, %v7254_v60  ;;  %19686 = vst [vmem:[#allocation55_spill] sm:$0xff] %v11893_v1  ;;  %v11897_v27 = vpack.i.bf16 %v1587_v63, %v1585_v10  ;;  %v7269_v40 = vunpack.i.h.bf16 %v19688_v49  ;;  %v19691_v10 = vld [vmem:[#allocation60_spill] sm:$0xff]  ;;  %v19694_v1 = vld [vmem:[#allocation61_spill] sm:$0xff] }
 0x121   :  { %19685 = vst [vmem:[#allocation93_spill] sm:$0xff] %v11879_v2  ;;  %v7268_v42 = vunpack.i.l.bf16 %v19688_v49  ;;  %v1580_v24 = vsel %vm204_vm1, %v1578_v37, %v1579_v6  ;;  %v1582_v15 = vsel %vm204_vm1, %v1579_v6, %v1581_v11  ;;  %v7264_v46 = vunpack.i.h.bf16 %v19689_v52  ;;  %v11907_v60 = vpop.permute.xlu1 %7486  ;;  %v19692_v37 = vld [vmem:[#allocation110_spill] sm:$0xff]  ;;  %v19693_v6 = vld [vmem:[#allocation111_spill] sm:$0xff] }
 0x122   :  { %7766 = vrot.lane.b32.xlu1 %v11531_v41, %s9778_s25  ;;  %19687 = vst [vmem:[#allocation56_spill] sm:$0xff] %v11897_v27  ;;  %v7263_v56 = vunpack.i.l.bf16 %v19689_v52  ;;  %19690 = vst [vmem:[#allocation57_spill] sm:$0xff] %v11907_v60  ;;  %v1595_v12 = vsel %vm204_vm1, %v1593_v19, %v1594_v26  ;;  %v1597_v43 = vsel %vm204_vm1, %v1594_v26, %v1596_v23  ;;  %v7279_v63 = vunpack.i.h.bf16 %v19691_v10  ;;  %v19697_v19 = vld [vmem:[#allocation119_spill] sm:$0xff]  ;;  %v19698_v26 = vld [vmem:[#allocation120_spill] sm:$0xff] }
 0x123   :  { %v7278_v49 = vunpack.i.l.bf16 %v19691_v10  ;;  %v1588_v41 = vrot.slane %v19692_v37, 2  ;;  %v1589_v11 = vrot.slane %v19693_v6, 2  ;;  %v7273_v57 = vunpack.i.l.bf16 %v19694_v1  ;;  %v11916_v52 = vpop.permute.xlu0 %7481 }
 0x124   :  { %7761 = vrot.lane.b32.xlu0 %v11611_v59, %s9778_s25  ;;  %19695 = vst [vmem:[#allocation100_spill] sm:$0xff] %v11916_v52  ;;  %v19696_v59 = vld [vmem:[#allocation117_spill] sm:$0xff]  ;;  %v1603_v21 = vrot.slane %v19697_v19, 2  ;;  %v1604_v23 = vrot.slane %v19698_v26, 2  ;;  %v11925_v10 = vsel %vm1177_vm5, %v11589_v28, %v7268_v42  ;;  %v11929_v6 = vsel %vm1177_vm5, %v19699_v61, %v7269_v40  ;;  %v19704_v42 = vld [vmem:[#allocation62_spill] sm:$0xff] }
 0x125   :  { %v1591_v60 = vrot.slane %v19696_v59, 2  ;;  %v11931_v37 = vpack.i.bf16 %v1582_v15, %v1580_v24  ;;  %v19701_v52 = vld [vmem:[#allocation121_spill] sm:$0xff]  ;;  %v11940_v59 = vsel %vm1177_vm5, %v11603_v50, %v7264_v46  ;;  %v7274_v26 = vunpack.i.h.bf16 %v19694_v1  ;;  %v11945_v28 = vpop.permute.xlu1 %7496 }
 0x126   :  { %7776 = vrot.lane.b32.xlu1 %v11634_v51, %s9778_s25  ;;  %v1606_v3 = vrot.slane %v19701_v52, 2  ;;  %v11936_v51 = vsel %vm1177_vm5, %v11593_v35, %v7263_v56  ;;  %19702 = vst [vmem:[#allocation58_spill] sm:$0xff] %v11945_v28  ;;  %v11947_v61 = vpack.i.bf16 %v1597_v43, %v1595_v12  ;;  %v11951_v40 = vsel %vm1177_vm5, %v11616_v13, %v7278_v49  ;;  %v19706_v12 = vld [vmem:[#allocation126_spill] sm:$0xff]  ;;  %v19708_v52 = vld [vmem:[#allocation131_spill] sm:$0xff] }
 0x127   :  { %19700 = vst [vmem:[#allocation106_spill] sm:$0xff] %v11931_v37  ;;  %v11955_v35 = vsel %vm1177_vm5, %v11607_v32, %v7279_v63  ;;  %v7289_v50 = vunpack.i.h.bf16 %v19704_v42  ;;  %v7288_v24 = vunpack.i.l.bf16 %v19704_v42  ;;  %v11961_v1 = vsel %vm1177_vm5, %v11620_v7, %v7273_v57  ;;  %v11963_v15 = vpop.permute.xlu0 %7491  ;;  %v19707_v63 = vld [vmem:[#allocation130_spill] sm:$0xff]  ;;  %v19709_v42 = vld [vmem:[#allocation63_spill] sm:$0xff] }
 0x128   :  { %7771 = vrot.lane.b32.xlu0 %v11693_v9, %s9778_s25  ;;  %19703 = vst [vmem:[#allocation59_spill] sm:$0xff] %v11947_v61  ;;  %19705 = vst [vmem:[#allocation60_spill] sm:$0xff] %v11963_v15  ;;  %v1590_v13 = vsel %vm204_vm1, %v1588_v41, %v1589_v11  ;;  %v1592_v46 = vsel %vm204_vm1, %v1589_v11, %v1591_v60  ;;  %v1605_v32 = vsel %vm204_vm1, %v1603_v21, %v1604_v23  ;;  %v19710_v9 = vld [vmem:[#allocation64_spill] sm:$0xff] }
 0x129   :  { %v1607_v56 = vsel %vm204_vm1, %v1604_v23, %v1606_v3  ;;  %v1598_v43 = vrot.slane %v19706_v12, 2  ;;  %v1599_v49 = vrot.slane %v19707_v63, 2  ;;  %v1601_v7 = vrot.slane %v19708_v52, 2  ;;  %v11983_v3 = vpop.permute.xlu1 %7506  ;;  %v19713_v23 = vld [vmem:[#allocation65_spill] sm:$0xff] }
 0x12a   :  { %7786 = vrot.lane.b32.xlu1 %v11716_v45, %s9778_s25  ;;  %v11976_v57 = vsel %vm1177_vm5, %v11624_v34, %v7274_v26  ;;  %v7284_v45 = vunpack.i.h.bf16 %v19709_v42  ;;  %v7283_v41 = vunpack.i.l.bf16 %v19709_v42  ;;  %v7298_v60 = vunpack.i.l.bf16 %v19710_v9  ;;  %19711 = vst [vmem:[#allocation61_spill] sm:$0xff] %v11983_v3  ;;  %v19717_v3 = vld [vmem:[#allocation133_spill] sm:$0xff] }
 0x12b   :  { %v11987_v21 = vsel %vm1177_vm5, %v11689_v44, %v7288_v24  ;;  %v11991_v11 = vsel %vm1177_vm5, %v11685_v55, %v7289_v50  ;;  %v7299_v34 = vunpack.i.h.bf16 %v19710_v9  ;;  %v11994_v26 = vpack.i.bf16 %v1592_v46, %v1590_v13  ;;  %v11997_v42 = vpop.permute.xlu0 %7501  ;;  %v19716_v44 = vld [vmem:[#allocation132_spill] sm:$0xff] }
 0x12c   :  { %7781 = vrot.lane.b32.xlu0 %v11762_v54, %s9778_s25  ;;  %v7293_v52 = vunpack.i.l.bf16 %v19713_v23  ;;  %19714 = vst [vmem:[#allocation119_spill] sm:$0xff] %v11997_v42  ;;  %v12001_v54 = vpack.i.bf16 %v1607_v56, %v1605_v32  ;;  %v1613_v24 = vrot.slane %v19716_v44, 2  ;;  %v1614_v28 = vrot.slane %v19717_v3, 2  ;;  %v19718_v13 = vld [vmem:[#allocation136_spill] sm:$0xff] }
 0x12d   :  { %19712 = vst [vmem:[#allocation117_spill] sm:$0xff] %v11994_v26  ;;  %v7294_v55 = vunpack.i.h.bf16 %v19713_v23  ;;  %v1600_v9 = vsel %vm204_vm1, %v1598_v43, %v1599_v49  ;;  %v1602_v50 = vsel %vm204_vm1, %v1599_v49, %v1601_v7  ;;  %v1616_v46 = vrot.slane %v19718_v13, 2  ;;  %v12026_v49 = vpop.permute.xlu1 %7516  ;;  %v19723_v7 = vld [vmem:[#allocation141_spill] sm:$0xff]  ;;  %v19725_v13 = vld [vmem:[#allocation143_spill] sm:$0xff] }
 0x12e   :  { %7796 = vrot.lane.b32.xlu1 %v11775_v39, %s9779_s17  ;;  %19715 = vst [vmem:[#allocation152_spill] sm:$0xff] %v12001_v54  ;;  %v12011_v42 = vsel %vm1177_vm5, %v11698_v18, %v7283_v41  ;;  %v12015_v32 = vsel %vm1177_vm5, %v11702_v36, %v7284_v45  ;;  %v12019_v56 = vsel %vm1177_vm5, %v11720_v48, %v7298_v60  ;;  %v19719_v39 = vld [vmem:[#allocation66_spill] sm:$0xff]  ;;  %19721 = vst [vmem:[#allocation121_spill] sm:$0xff] %v12026_v49  ;;  %v19732_v49 = vld [vmem:[#allocation73_spill] sm:$0xff] }
 0x12f   :  { %v7308_v23 = vunpack.i.l.bf16 %v19719_v39  ;;  %v19720_v43 = vpack.i.bf16 %v11796_v17, %v11793_v62  ;;  %v12030_v18 = vsel %vm1177_vm5, %v11706_v16, %v7299_v34  ;;  %v1608_v36 = vrot.slane %v19723_v7, 2  ;;  %v19724_v45 = vld [vmem:[#allocation142_spill] sm:$0xff]  ;;  %v12040_v62 = vpop.permute.xlu0 %7511 }
 0x130   :  { %19722 = vst [vmem:[#allocation62_spill] sm:$0xff] %v12030_v18  ;;  %v1609_v41 = vrot.slane %v19724_v45, 2  ;;  %v1611_v48 = vrot.slane %v19725_v13, 2  ;;  %v12037_v60 = vsel %vm1177_vm5, %v11729_v38, %v7293_v52  ;;  %v7309_v15 = vunpack.i.h.bf16 %v19719_v39  ;;  %19727 = vst [vmem:[#allocation130_spill] sm:$0xff] %v12040_v62 }
 0x131   :  { %7791 = vrot.lane.b32.xlu0 %v19720_v43, %s9779_s17  ;;  %19726 = vst [vmem:[#allocation126_spill] sm:$0xff] %v12037_v60  ;;  %v12044_v17 = vpack.i.bf16 %v1602_v50, %v1600_v9  ;;  %v1615_v16 = vsel %vm204_vm1, %v1613_v24, %v1614_v28  ;;  %v12049_v34 = vsel %vm1177_vm5, %v11754_v8, %v7294_v55  ;;  %v19730_v43 = vld [vmem:[#allocation70_spill] sm:$0xff]  ;;  %v12061_v24 = vpop.permute.xlu1 %7526  ;;  %v19734_v9 = vld [vmem:[#allocation145_spill] sm:$0xff]  ;;  %v7319_v62 = vunpack.i.h.bf16 %v19732_v49 }
 0x132   :  { %7806 = vrot.lane.b32.xlu1 %v11838_v5, %s9779_s17  ;;  %19729 = vst [vmem:[#allocation63_spill] sm:$0xff] %v12049_v34  ;;  %v7304_v13 = vunpack.i.h.bf16 %v19730_v43  ;;  %v7303_v38 = vunpack.i.l.bf16 %v19730_v43  ;;  %v1617_v52 = vsel %vm204_vm1, %v1614_v28, %v1616_v46  ;;  %v12056_v39 = vsel %vm1177_vm5, %v11767_v31, %v7308_v23  ;;  %19733 = vst [vmem:[#allocation65_spill] sm:$0xff] %v12061_v24  ;;  %v19735_v55 = vld [vmem:[#allocation146_spill] sm:$0xff]  ;;  %v19736_v46 = vld [vmem:[#allocation149_spill] sm:$0xff] }
 0x133   :  { %19728 = vst [vmem:[#allocation131_spill] sm:$0xff] %v12044_v17  ;;  %19731 = vst [vmem:[#allocation64_spill] sm:$0xff] %v12056_v39  ;;  %v7318_v5 = vunpack.i.l.bf16 %v19732_v49  ;;  %v1623_v8 = vrot.slane %v19734_v9, 2  ;;  %v1624_v50 = vrot.slane %v19735_v55, 2  ;;  %v1610_v43 = vsel %vm204_vm1, %v1608_v36, %v1609_v41  ;;  %v19738_v39 = vld [vmem:[#allocation78_spill] sm:$0xff]  ;;  %v12075_v34 = vpop.permute.xlu0 %7521 }
 0x134   :  { %v1612_v28 = vsel %vm204_vm1, %v1609_v41, %v1611_v48  ;;  %v1626_v31 = vrot.slane %v19736_v46, 2  ;;  %v12071_v23 = vsel %vm1177_vm5, %v11758_v25, %v7309_v15  ;;  %v7313_v24 = vunpack.i.l.bf16 %v19738_v39  ;;  %19739 = vst [vmem:[#allocation133_spill] sm:$0xff] %v12075_v34  ;;  %v19742_v41 = vld [vmem:[#allocation75_spill] sm:$0xff]  ;;  %v19744_v25 = vld [vmem:[#allocation154_spill] sm:$0xff] }
 0x135   :  { %7801 = vrot.lane.b32.xlu0 %v11879_v2, %s9779_s17  ;;  %19737 = vst [vmem:[#allocation132_spill] sm:$0xff] %v12071_v23  ;;  %v7314_v2 = vunpack.i.h.bf16 %v19738_v39  ;;  %v12079_v49 = vpack.i.bf16 %v1617_v52, %v1615_v16  ;;  %v12083_v36 = vsel %vm1177_vm5, %v11779_v4, %v7303_v38  ;;  %v12087_v48 = vsel %vm1177_vm5, %v19742_v41, %v7304_v13  ;;  %v19745_v46 = vld [vmem:[#allocation155_spill] sm:$0xff]  ;;  %v12097_v16 = vpop.permute.xlu1 %7536  ;;  %v19749_v38 = vld [vmem:[#allocation156_spill] sm:$0xff] }
 0x136   :  { %7816 = vrot.lane.b32.xlu1 %v11897_v27, %s9779_s17  ;;  %19741 = vst [vmem:[#allocation66_spill] sm:$0xff] %v12083_v36  ;;  %19743 = vst [vmem:[#allocation141_spill] sm:$0xff] %v12087_v48  ;;  %v1618_v15 = vrot.slane %v19744_v25, 2  ;;  %v1619_v23 = vrot.slane %v19745_v46, 2  ;;  %v12093_v39 = vsel %vm1210_vm6, %v11805_v20, %v7318_v5  ;;  %v12099_v52 = vpack.i.bf16 %v1612_v28, %v1610_v43  ;;  %v19751_v27 = vld [vmem:[#allocation81_spill] sm:$0xff]  ;;  %v19752_v5 = vld [vmem:[#allocation158_spill] sm:$0xff] }
 0x137   :  { %19740 = vst [vmem:[#allocation136_spill] sm:$0xff] %v12079_v49  ;;  %19746 = vst [vmem:[#allocation142_spill] sm:$0xff] %v12093_v39  ;;  %v1625_v4 = vsel %vm204_vm1, %v1623_v8, %v1624_v50  ;;  %v1621_v13 = vrot.slane %v19749_v38, 2  ;;  %v12105_v41 = vsel %vm1210_vm6, %v11809_v30, %v7319_v62  ;;  %v7328_v34 = vunpack.i.l.bf16 %v19751_v27  ;;  %v19754_v43 = vld [vmem:[#allocation77_spill] sm:$0xff]  ;;  %v12118_v8 = vpop.permute.xlu0 %7531  ;;  %v19757_v30 = vld [vmem:[#allocation159_spill] sm:$0xff] }
 0x138   :  { %19747 = vst [vmem:[#allocation143_spill] sm:$0xff] %v12097_v16  ;;  %19748 = vst [vmem:[#allocation70_spill] sm:$0xff] %v12099_v52  ;;  %v1627_v20 = vsel %vm204_vm1, %v1624_v50, %v1626_v31  ;;  %v1633_v39 = vrot.slane %v19752_v5, 2  ;;  %v12116_v28 = vsel %vm1210_vm6, %v19754_v43, %v7314_v2  ;;  %v1634_v62 = vrot.slane %v19757_v30, 2  ;;  %v19758_v38 = vld [vmem:[#allocation160_spill] sm:$0xff] }
 0x139   :  { %7811 = vrot.lane.b32.xlu0 %v11931_v37, %s9779_s17  ;;  %19750 = vst [vmem:[#allocation73_spill] sm:$0xff] %v12105_v41  ;;  %v12112_v37 = vsel %vm1210_vm6, %v11819_v0, %v7313_v24  ;;  %19755 = vst [vmem:[#allocation146_spill] sm:$0xff] %v12116_v28  ;;  %v1636_v16 = vrot.slane %v19758_v38, 2  ;;  %v7329_v50 = vunpack.i.h.bf16 %v19751_v27  ;;  %v19759_v31 = vld [vmem:[#allocation84_spill] sm:$0xff]  ;;  %v1620_v24 = vsel %vm204_vm1, %v1618_v15, %v1619_v23  ;;  %v12130_v2 = vpop.permute.xlu1 %7546  ;;  %v19762_v28 = vld [vmem:[#allocation166_spill] sm:$0xff] }
 0x13a   :  { %19753 = vst [vmem:[#allocation145_spill] sm:$0xff] %v12112_v37  ;;  %19756 = vst [vmem:[#allocation149_spill] sm:$0xff] %v12118_v8  ;;  %7826 = vrot.lane.b32.xlu1 %v11947_v61, %s9779_s17  ;;  %v7324_v41 = vunpack.i.h.bf16 %v19759_v31  ;;  %v7323_v0 = vunpack.i.l.bf16 %v19759_v31  ;;  %v1622_v43 = vsel %vm204_vm1, %v1619_v23, %v1621_v13  ;;  %v19761_v61 = vld [vmem:[#allocation165_spill] sm:$0xff]  ;;  %v1629_v37 = vrot.slane %v19762_v28, 2  ;;  %v19763_v38 = vld [vmem:[#allocation168_spill] sm:$0xff] }
 0x13b   :  { %19760 = vst [vmem:[#allocation78_spill] sm:$0xff] %v12130_v2  ;;  %v1628_v8 = vrot.slane %v19761_v61, 2  ;;  %v1631_v48 = vrot.slane %v19763_v38, 2  ;;  %v19764_v27 = vld [vmem:[#allocation45_spill] sm:$0xff]  ;;  %v19765_v31 = vld [vmem:[#allocation90_spill] sm:$0xff]  ;;  %v12142_v18 = vpack.i.bf16 %v1627_v20, %v1625_v4  ;;  %v12146_v13 = vpop.permute.xlu0 %7541  ;;  %v1635_v38 = vsel %vm204_vm1, %v1633_v39, %v1634_v62 }
 0x13c   :  { %v12138_v36 = vsel %vm1210_vm6, %v19764_v27, %v7328_v34  ;;  %v7339_v60 = vunpack.i.h.bf16 %v19765_v31  ;;  %v7338_v15 = vunpack.i.l.bf16 %v19765_v31  ;;  %19768 = vst [vmem:[#allocation155_spill] sm:$0xff] %v12146_v13  ;;  %v1637_v34 = vsel %vm204_vm1, %v1634_v62, %v1636_v16  ;;  %v19770_v31 = vld [vmem:[#allocation98_spill] sm:$0xff] }
 0x13d   :  { %7821 = vrot.lane.b32.xlu0 %v11994_v26, %s9779_s17  ;;  %19766 = vst [vmem:[#allocation75_spill] sm:$0xff] %v12142_v18  ;;  %v19767_v26 = vld [vmem:[#allocation94_spill] sm:$0xff]  ;;  %v12154_v27 = vsel %vm1210_vm6, %v11858_v47, %v7329_v50  ;;  %v12158_v4 = vsel %vm1210_vm6, %v11869_v22, %v7323_v0  ;;  %v12164_v20 = vpack.i.bf16 %v1622_v43, %v1620_v24  ;;  %v12169_v39 = vpop.permute.xlu1 %7556  ;;  %v19773_v22 = vld [vmem:[#allocation83_spill] sm:$0xff]  ;;  %v7349_v0 = vunpack.i.h.bf16 %v19770_v31 }
 0x13e   :  { %v7334_v2 = vunpack.i.h.bf16 %v19767_v26  ;;  %v7333_v23 = vunpack.i.l.bf16 %v19767_v26  ;;  %7836 = vrot.lane.b32.xlu1 %v12001_v54, %s9779_s17  ;;  %v12162_v26 = vsel %vm1210_vm6, %v11873_v14, %v7324_v41  ;;  %v7348_v54 = vunpack.i.l.bf16 %v19770_v31  ;;  %19771 = vst [vmem:[#allocation81_spill] sm:$0xff] %v12169_v39  ;;  %v19772_v62 = vld [vmem:[#allocation82_spill] sm:$0xff]  ;;  %v9675_v31 = vld [vmem:[%s18748_s0 + $0x200] sm:$0xff] }
 0x13f   :  { %19769 = vst [vmem:[#allocation156_spill] sm:$0xff] %v12164_v20  ;;  %v1630_v47 = vsel %vm204_vm1, %v1628_v8, %v1629_v37  ;;  %v1632_v16 = vsel %vm204_vm1, %v1629_v37, %v1631_v48  ;;  %v12177_v14 = vsel %vm1210_vm6, %v11877_v53, %v7338_v15  ;;  %v12181_v41 = vsel %vm1210_vm6, %v11883_v29, %v7339_v60  ;;  %v19775_v48 = vld [vmem:[#allocation102_spill] sm:$0xff]  ;;  %v12195_v53 = vpop.permute.xlu0 %7551  ;;  %v12202_v29 = vld [vmem:[%s18748_s0 + $0x1c8] sm:$0xff] }
 0x140   :  { %v12184_v24 = vpack.i.bf16 %v1637_v34, %v1635_v38  ;;  %v12188_v8 = vsel %vm1210_vm6, %v11887_v33, %v7333_v23  ;;  %v12192_v37 = vsel %vm1210_vm6, %v11891_v58, %v7334_v2  ;;  %v7343_v43 = vunpack.i.l.bf16 %v19775_v48  ;;  %19776 = vst [vmem:[#allocation77_spill] sm:$0xff] %v12195_v53  ;;  %v12207_v33 = vld [vmem:[%s18748_s0 + $0x1d0] sm:$0xff]  ;;  %v19778_v15 = vld [vmem:[#allocation96_spill] sm:$0xff]  ;;  %v9674_v34 = vld [vmem:[%s18748_s0 + $0x1f8] sm:$0xff] }
 0x141   :  { %7831 = vrot.lane.b32.xlu0 %v12044_v17, %s9779_s17  ;;  %v7344_v60 = vunpack.i.h.bf16 %v19775_v48  ;;  %v12212_v2 = vpack.i.bf16 %v1632_v16, %v1630_v47  ;;  %v19779_v23 = vld [vmem:[#allocation97_spill] sm:$0xff]  ;;  %v12222_v50 = vpack.i.bf16 %v9675_v31, %v9674_v34  ;;  %v12226_v58 = vsel %vm1210_vm6, %v11925_v10, %v7348_v54  ;;  %v19782_v48 = vld [vmem:[#allocation108_spill] sm:$0xff]  ;;  %v12232_v38 = vpop.permute.xlu1 %7566  ;;  %v19785_v17 = vld [vmem:[#allocation111_spill] sm:$0xff] }
 0x142   :  { %19774 = vst [vmem:[#allocation158_spill] sm:$0xff] %v12184_v24  ;;  %7846 = vrot.lane.b32.xlu1 %v12079_v49, %s9779_s17  ;;  %19781 = vst [vmem:[#allocation84_spill] sm:$0xff] %v12226_v58  ;;  %v7359_v47 = vunpack.i.h.bf16 %v19782_v48  ;;  %v7358_v16 = vunpack.i.l.bf16 %v19782_v48  ;;  %v19784_v49 = vld [vmem:[#allocation110_spill] sm:$0xff]  ;;  %v12238_v34 = vsel %vm1210_vm6, %v11929_v6, %v7349_v0  ;;  %v19787_v31 = vld [vmem:[#allocation112_spill] sm:$0xff] }
 0x143   :  { %19777 = vst [vmem:[#allocation159_spill] sm:$0xff] %v12212_v2  ;;  %19780 = vst [vmem:[#allocation160_spill] sm:$0xff] %v12222_v50  ;;  %v7353_v53 = vunpack.i.l.bf16 %v19787_v31  ;;  %v19788_v54 = vld [vmem:[#allocation88_spill] sm:$0xff]  ;;  %v19789_v10 = vld [vmem:[#allocation89_spill] sm:$0xff]  ;;  %v12250_v58 = vpop.permute.xlu0 %7561  ;;  %v12260_v48 = vsel %vm1210_vm6, %v11940_v59, %v7344_v60 }
 0x144   :  { %19783 = vst [vmem:[#allocation165_spill] sm:$0xff] %v12232_v38  ;;  %19786 = vst [vmem:[#allocation166_spill] sm:$0xff] %v12238_v34  ;;  %v7354_v38 = vunpack.i.h.bf16 %v19787_v31  ;;  %v19791_v6 = vld [vmem:[#allocation104_spill] sm:$0xff]  ;;  %v19792_v0 = vld [vmem:[#allocation105_spill] sm:$0xff]  ;;  %v12279_v59 = vsel %vm1210_vm6, %v11951_v40, %v7358_v16  ;;  %v12283_v60 = vsel %vm1210_vm6, %v11955_v35, %v7359_v47 }
 0x145   :  { %7841 = vrot.lane.b32.xlu0 %v12099_v52, %s9779_s17  ;;  %v12247_v52 = vsel %vm1210_vm6, %v11936_v51, %v7343_v43  ;;  %19790 = vst [vmem:[#allocation168_spill] sm:$0xff] %v12250_v58  ;;  %v19793_v34 = vld [vmem:[#allocation118_spill] sm:$0xff]  ;;  %v19794_v43 = vld [vmem:[#allocation120_spill] sm:$0xff]  ;;  %v12288_v31 = vpop.permute.xlu1 %7576  ;;  %v12294_v25 = vsel %vm1210_vm6, %v11961_v1, %v7353_v53  ;;  %v19798_v35 = vld [vmem:[#allocation127_spill] sm:$0xff] }
 0x146   :  { %7856 = vrot.lane.b32.xlu1 %v12142_v18, %s9779_s17  ;;  %v7368_v51 = vunpack.i.l.bf16 %v19793_v34  ;;  %v12270_v18 = vld [vmem:[%s18748_s0 + $0x330] sm:$0xff]  ;;  %v12275_v39 = vld [vmem:[%s18748_s0 + $0x338] sm:$0xff]  ;;  %v7369_v58 = vunpack.i.h.bf16 %v19793_v34  ;;  %v19795_v40 = vld [vmem:[#allocation124_spill] sm:$0xff]  ;;  %v12303_v34 = vsel %vm1210_vm6, %v11976_v57, %v7354_v38  ;;  %v7379_v57 = vunpack.i.h.bf16 %v19798_v35 }
 0x147   :  { %v7363_v16 = vunpack.i.l.bf16 %v19795_v40  ;;  %19796 = vst [vmem:[#allocation45_spill] sm:$0xff] %v12303_v34  ;;  %v12306_v13 = vpop.permute.xlu0 %7571  ;;  %v7378_v38 = vunpack.i.l.bf16 %v19798_v35  ;;  %v19800_v34 = vld [vmem:[#allocation135_spill] sm:$0xff]  ;;  %v19804_v35 = vld [vmem:[#allocation140_spill] sm:$0xff] }
 0x148   :  { %v12316_v47 = vsel %vm1210_vm6, %v11987_v21, %v7368_v51  ;;  %v7374_v21 = vunpack.i.h.bf16 %v19800_v34 }
 0x149   :  { %7851 = vrot.lane.b32.xlu0 %v12164_v20, %s9779_s17  ;;  %v7364_v20 = vunpack.i.h.bf16 %v19795_v40  ;;  %19797 = vst [vmem:[#allocation90_spill] sm:$0xff] %v12316_v47  ;;  %v12322_v40 = vsel %vm1210_vm6, %v11991_v11, %v7369_v58  ;;  %v12327_v1 = vpop.permute.xlu1 %7586  ;;  %v12331_v53 = vsel %vm1210_vm6, %v12011_v42, %v7363_v16  ;;  %v7384_v11 = vunpack.i.h.bf16 %v19804_v35  ;;  %v19807_v16 = vld [vmem:[#allocation62_spill] sm:$0xff]  ;;  %v19812_v47 = vld [vmem:[#allocation151_spill] sm:$0xff] }
 0x14a   :  { %7866 = vrot.lane.b32.xlu1 %v12184_v24, %s9779_s17  ;;  %19799 = vst [vmem:[#allocation94_spill] sm:$0xff] %v12322_v40  ;;  %v7373_v24 = vunpack.i.l.bf16 %v19800_v34  ;;  %19801 = vst [vmem:[#allocation98_spill] sm:$0xff] %v12327_v1  ;;  %v7383_v58 = vunpack.i.l.bf16 %v19804_v35  ;;  %v12348_v42 = vsel %vm1210_vm6, %v12019_v56, %v7378_v38  ;;  %v12352_v34 = vsel %vm1210_vm6, %v19807_v16, %v7379_v57  ;;  %v19811_v35 = vld [vmem:[#allocation31_spill] sm:$0xff]  ;;  %v19817_v38 = vld [vmem:[#allocation66_spill] sm:$0xff] }
 0x14b   :  { %19802 = vst [vmem:[#allocation82_spill] sm:$0xff] %v12331_v53  ;;  %v12336_v51 = vsel %vm1210_vm6, %v12015_v32, %v7364_v20  ;;  %v12340_v40 = vpop.permute.xlu0 %7581  ;;  %19806 = vst [vmem:[#allocation102_spill] sm:$0xff] %v12348_v42  ;;  %v19809_v32 = vld [vmem:[#allocation126_spill] sm:$0xff]  ;;  %v7398_v53 = vunpack.i.l.bf16 %v19811_v35  ;;  %v7393_v1 = vunpack.i.l.bf16 %v19812_v47  ;;  %v7394_v57 = vunpack.i.h.bf16 %v19812_v47 }
 0x14c   :  { %19803 = vst [vmem:[#allocation83_spill] sm:$0xff] %v12336_v51  ;;  %19808 = vst [vmem:[#allocation96_spill] sm:$0xff] %v12352_v34  ;;  %v12356_v20 = vsel %vm1210_vm6, %v19809_v32, %v7373_v24  ;;  %v7399_v51 = vunpack.i.h.bf16 %v19811_v35  ;;  %v19815_v24 = vld [vmem:[#allocation63_spill] sm:$0xff]  ;;  %v12379_v16 = vsel %vm1210_vm6, %v19817_v38, %v7383_v58  ;;  %v19819_v32 = vld [vmem:[#allocation141_spill] sm:$0xff]  ;;  %v19821_v35 = vpack.i.bf16 %v19779_v23, %v19778_v15 }
 0x14d   :  { %7861 = vrot.lane.b32.xlu0 %v12212_v2, %s9779_s17  ;;  %v19805_v2 = vpack.i.bf16 %v19773_v22, %v19772_v62  ;;  %19810 = vst [vmem:[#allocation97_spill] sm:$0xff] %v12356_v20  ;;  %v19813_v62 = vpack.i.bf16 %v12207_v33, %v12202_v29  ;;  %v12365_v56 = vpop.permute.xlu1 %7596  ;;  %v12370_v22 = vld [vmem:[%s18748_s0 + $0x340] sm:$0x3]  ;;  %19818 = vst [vmem:[#allocation111_spill] sm:$0xff] %v12379_v16  ;;  %v12383_v29 = vsel %vm1210_vm6, %v19819_v32, %v7384_v11  ;;  %v19823_v38 = vld [vmem:[#allocation142_spill] sm:$0xff] }
 0x14e   :  { %19814 = vst [vmem:[#allocation108_spill] sm:$0xff] %v12370_v22  ;;  %19820 = vst [vmem:[#allocation112_spill] sm:$0xff] %v12383_v29  ;;  %v1642_v47 = vrot.slane %v12275_v39, 1  ;;  %v1644_v58 = vrot.slane %v12370_v22, 1  ;;  %v1246_v16 = vsel %vm1243_vm7, %v19823_v38, %v7398_v53  ;;  %v19824_v11 = vld [vmem:[#allocation73_spill] sm:$0xff] }
 0x14f   :  { %7876 = vrot.lane.b32.xlu1 %v19805_v2, %s9780_s24  ;;  %v12374_v2 = vsel %vm1210_vm6, %v19815_v24, %v7374_v21  ;;  %v12385_v33 = vpop.permute.xlu0 %7591  ;;  %v1641_v24 = vrot.slane %v12270_v18, 1  ;;  %v1247_v32 = vsel %vm1243_vm7, %v19824_v11, %v7399_v51  ;;  %v19825_v29 = vld [vmem:[#allocation145_spill] sm:$0xff]  ;;  %v19829_v51 = vld [vmem:[#allocation52_spill] sm:$0xff] }
 0x150   :  { %19816 = vst [vmem:[#allocation110_spill] sm:$0xff] %v12374_v2  ;;  %v12401_v34 = vsel %vm1243_vm7, %v19825_v29, %v7393_v1  ;;  %v19828_v2 = vld [vmem:[#allocation8_spill] sm:$0xff]  ;;  %v7419_v11 = vunpack.i.h.bf16 %v19829_v51  ;;  %v7418_v1 = vunpack.i.l.bf16 %v19829_v51  ;;  %v19830_v29 = vld [vmem:[#allocation163_spill] sm:$0xff]  ;;  %v12430_v51 = vsel %vm123_vm0, %v1642_v47, %v1644_v58 }
 0x151   :  { %7871 = vrot.lane.b32.xlu0 %v19813_v62, %s9780_s24  ;;  %v19822_v62 = vld [vmem:[#allocation50_spill] sm:$0xff]  ;;  %v12406_v23 = vpop.permute.xlu1 %7606  ;;  %v7404_v53 = vunpack.i.h.bf16 %v19828_v2  ;;  %v7403_v38 = vunpack.i.l.bf16 %v19828_v2  ;;  %v7413_v20 = vunpack.i.l.bf16 %v19830_v29  ;;  %v12427_v2 = vsel %vm123_vm0, %v1641_v24, %v1642_v47  ;;  %19833 = vst [vmem:[#allocation104_spill] sm:$0xff] %v12430_v51 }
 0x152   :  { %v7408_v21 = vunpack.i.l.bf16 %v19822_v62  ;;  %v7409_v15 = vunpack.i.h.bf16 %v19822_v62  ;;  %19826 = vst [vmem:[#allocation88_spill] sm:$0xff] %v12406_v23  ;;  %19832 = vst [vmem:[#allocation89_spill] sm:$0xff] %v12427_v2  ;;  %v19834_v23 = vld [vmem:[#allocation15_spill] sm:$0xff] }
 0x153   :  { %7886 = vrot.lane.b32.xlu1 %v19821_v35, %s9780_s24  ;;  %v19827_v35 = vld [vmem:[#allocation146_spill] sm:$0xff]  ;;  %v12415_v62 = vpop.permute.xlu0 %7601  ;;  %v1248_v47 = vsel %vm1243_vm7, %v12158_v4, %v7403_v38  ;;  %v19837_v4 = vpack.i.bf16 %v19707_v63, %v19706_v12 }
 0x154   :  { %v1245_v22 = vsel %vm1243_vm7, %v19827_v35, %v7394_v57  ;;  %v12423_v57 = vsel %vm1243_vm7, %v12138_v36, %v7408_v21  ;;  %v7414_v35 = vunpack.i.h.bf16 %v19830_v29  ;;  %v12434_v42 = vsel %vm1243_vm7, %v12154_v27, %v7409_v15 }
 0x155   :  { %7881 = vrot.lane.b32.xlu0 %v12222_v50, %s9780_s24  ;;  %v19831_v50 = vpack.i.bf16 %v19785_v17, %v19784_v49  ;;  %v7429_v17 = vunpack.i.h.bf16 %v19834_v23  ;;  %v7428_v49 = vunpack.i.l.bf16 %v19834_v23  ;;  %v19836_v21 = vpack.i.bf16 %v19789_v10, %v19788_v54  ;;  %v12443_v24 = vpop.permute.xlu1 %7616 }
 0x156   :  { %v1249_v27 = vsel %vm1243_vm7, %v12162_v26, %v7404_v53  ;;  %v12452_v15 = vsel %vm1243_vm7, %v12177_v14, %v7418_v1  ;;  %v12456_v23 = vsel %vm1243_vm7, %v12181_v41, %v7419_v11  ;;  %v12460_v54 = vsel %vm1243_vm7, %v12188_v8, %v7413_v20  ;;  %v19838_v41 = vld [vmem:[#allocation134_spill] sm:$0xff]  ;;  %v19839_v20 = vld [vmem:[#allocation84_spill] sm:$0xff] }
 0x157   :  { %7896 = vrot.lane.b32.xlu1 %v19831_v50, %s9780_s24  ;;  %v19835_v50 = vld [vmem:[#allocation20_spill] sm:$0xff]  ;;  %v12462_v10 = vpop.permute.xlu0 %7611  ;;  %v12470_v26 = vpack.i.bf16 %v12430_v51, %v12427_v2  ;;  %v12474_v14 = vsel %vm1243_vm7, %v12192_v37, %v7414_v35  ;;  %v7479_v53 = vunpack.i.h.bf16 %v19838_v41  ;;  %v7478_v8 = vunpack.i.l.bf16 %v19838_v41  ;;  %v19840_v11 = vld [vmem:[#allocation166_spill] sm:$0xff]  ;;  %v19850_v51 = vld [vmem:[#allocation77_spill] sm:$0xff] }
 0x158   :  { %v7423_v36 = vunpack.i.l.bf16 %v19835_v50  ;;  %v7424_v58 = vunpack.i.h.bf16 %v19835_v50  ;;  %v12480_v38 = vsel %vm1243_vm7, %v19839_v20, %v7428_v49  ;;  %v12484_v12 = vsel %vm1243_vm7, %v19840_v11, %v7429_v17  ;;  %v19843_v35 = vld [vmem:[#allocation68_spill] sm:$0xff]  ;;  %v19844_v50 = vld [vmem:[#allocation55_spill] sm:$0xff]  ;;  %v19849_v11 = vld [vmem:[#allocation57_spill] sm:$0xff] }
 0x159   :  { %7891 = vrot.lane.b32.xlu0 %v19836_v21, %s9780_s24  ;;  %v19841_v37 = vpack.i.bf16 %v19792_v0, %v19791_v6  ;;  %v12494_v1 = vpop.permute.xlu1 %7626  ;;  %v7474_v17 = vunpack.i.h.bf16 %v19844_v50  ;;  %v7473_v21 = vunpack.i.l.bf16 %v19844_v50  ;;  %v1280_v20 = vsel %vm1276_vm8, %v1247_v32, %v7479_v53 }
 0x15a   :  { %v12488_v63 = vsel %vm1243_vm7, %v12247_v52, %v7423_v36  ;;  %19842 = vst [vmem:[#allocation105_spill] sm:$0xff] %v12494_v1  ;;  %v12498_v29 = vsel %vm1243_vm7, %v12260_v48, %v7424_v58  ;;  %v19845_v52 = vld [vmem:[#allocation100_spill] sm:$0xff]  ;;  %v19848_v48 = vpack.i.bf16 %v19724_v45, %v19723_v7  ;;  %v1279_v58 = vsel %vm1276_vm8, %v1246_v16, %v7478_v8 }
 0x15b   :  { %7906 = vrot.lane.b32.xlu1 %v19837_v4, %s9780_s24  ;;  %v7483_v36 = vunpack.i.l.bf16 %v19845_v52  ;;  %v19846_v4 = vld [vmem:[#allocation81_spill] sm:$0xff]  ;;  %v12506_v0 = vpop.permute.xlu0 %7621  ;;  %v7488_v50 = vunpack.i.l.bf16 %v19849_v11  ;;  %v7484_v49 = vunpack.i.h.bf16 %v19845_v52  ;;  %v7554_v2 = vunpack.i.h.bf16 %v19850_v51 }
 0x15c   :  { %v7559_v41 = vunpack.i.h.bf16 %v19846_v4  ;;  %v7558_v6 = vunpack.i.l.bf16 %v19846_v4  ;;  %19847 = vst [vmem:[#allocation118_spill] sm:$0xff] %v12506_v0  ;;  %v7553_v4 = vunpack.i.l.bf16 %v19850_v51  ;;  %v19851_v1 = vpack.i.bf16 %v19794_v43, %v19697_v19  ;;  %v19852_v51 = vld [vmem:[#allocation168_spill] sm:$0xff]  ;;  %v19853_v19 = vld [vmem:[#allocation154_spill] sm:$0xff] }
 0x15d   :  { %7901 = vrot.lane.b32.xlu0 %v19841_v37, %s9780_s24  ;;  %v7489_v37 = vunpack.i.h.bf16 %v19849_v11  ;;  %v7637_v7 = vpop.permute.xlu1 %7636  ;;  %v1277_v32 = vsel %vm1276_vm8, %v12401_v34, %v7473_v21  ;;  %v1278_v53 = vsel %vm1276_vm8, %v1245_v22, %v7474_v17  ;;  %v1281_v8 = vsel %vm1276_vm8, %v1248_v47, %v7483_v36 }
 0x15e   :  { %v7639_v45 = vunpack.i.h.bf16 %v7637_v7  ;;  %v7638_v16 = vunpack.i.l.bf16 %v7637_v7  ;;  %v1312_v52 = vsel %vm1309_vm9, %v1279_v58, %v7558_v6  ;;  %v7563_v11 = vunpack.i.l.bf16 %v19852_v51  ;;  %v19856_v58 = vld [vmem:[#allocation60_spill] sm:$0xff] }
 0x15f   :  { %7916 = vrot.lane.b32.xlu1 %v19848_v48, %s9780_s24  ;;  %v1313_v48 = vsel %vm1309_vm9, %v1280_v20, %v7559_v41  ;;  %v7632_v0 = vpop.permute.xlu0 %7631  ;;  %v19854_v43 = vpack.i.bf16 %v19745_v46, %v19853_v19  ;;  %v1282_v47 = vsel %vm1276_vm8, %v1249_v27, %v7484_v49  ;;  %v7564_v17 = vunpack.i.h.bf16 %v19852_v51  ;;  %v19857_v49 = vld [vmem:[#allocation165_spill] sm:$0xff] }
 0x160   :  { %v1346_v34 = vsel %vm1342_vm10, %v1313_v48, %v7639_v45  ;;  %v7634_v21 = vunpack.i.h.bf16 %v7632_v0  ;;  %v7633_v22 = vunpack.i.l.bf16 %v7632_v0  ;;  %v19855_v36 = vpack.i.bf16 %v19717_v3, %v19716_v44 }
 0x161   :  { %7911 = vrot.lane.b32.xlu0 %v19851_v1, %s9780_s24  ;;  %v1345_v1 = vsel %vm1342_vm10, %v1312_v52, %v7638_v16  ;;  %v7647_v41 = vpop.permute.xlu1 %7646  ;;  %v1310_v6 = vsel %vm1309_vm9, %v1277_v32, %v7553_v4  ;;  %v1311_v46 = vsel %vm1309_vm9, %v1278_v53, %v7554_v2  ;;  %v7494_v20 = vunpack.i.h.bf16 %v19856_v58 }
 0x162   :  { %v1343_v7 = vsel %vm1342_vm10, %v1310_v6, %v7633_v22  ;;  %v1344_v0 = vsel %vm1342_vm10, %v1311_v46, %v7634_v21  ;;  %v2721_v45 = vpack.c.bf16 %v1346_v34, %v1345_v1  ;;  %v7493_v27 = vunpack.i.l.bf16 %v19856_v58 }
 0x163   :  { %7926 = vrot.lane.b32.xlu1 %v19854_v43, %s9780_s24  ;;  %v7569_v16 = vunpack.i.h.bf16 %v19857_v49  ;;  %v7568_v52 = vunpack.i.l.bf16 %v19857_v49  ;;  %v7642_v3 = vpop.permute.xlu0 %7641  ;;  %v19858_v44 = vpack.i.bf16 %v19762_v28, %v19761_v61  ;;  %v2720_v2 = vpack.c.bf16 %v1344_v0, %v1343_v7  ;;  %v19863_v7 = vld [vmem:[#allocation28_spill] sm:$0xff]  ;;  %v19864_v49 = vld [vmem:[#allocation58_spill] sm:$0xff] }
 0x164   :  { %v1314_v4 = vsel %vm1309_vm9, %v1281_v8, %v7563_v11  ;;  %v7573_v32 = vunpack.i.l.bf16 %v12306_v13  ;;  %v7644_v53 = vunpack.i.h.bf16 %v7642_v3  ;;  %v7643_v48 = vunpack.i.l.bf16 %v7642_v3 }
 0x165   :  { %7921 = vrot.lane.b32.xlu0 %v19855_v36, %s9780_s24  ;;  %v1315_v51 = vsel %vm1309_vm9, %v1282_v47, %v7564_v17  ;;  %v7574_v19 = vunpack.i.h.bf16 %v12306_v13  ;;  %v7649_v43 = vunpack.i.h.bf16 %v7647_v41  ;;  %v7648_v1 = vunpack.i.l.bf16 %v7647_v41  ;;  %6921 = vmatprep.mubr.msk.bf16.mxu0 %vm2795_vm11, %v2720_v2  ;;  %v12563_v61 = vpop.permute.xlu1 %7656 }
 0x166   :  { %v19859_v34 = vpack.i.bf16 %v19735_v55, %v19734_v9  ;;  %v1283_v28 = vsel %vm1276_vm8, %v12423_v57, %v7488_v50  ;;  %v1284_v8 = vsel %vm1276_vm8, %v12434_v42, %v7489_v37  ;;  %v1347_v11 = vsel %vm1342_vm10, %v1314_v4, %v7643_v48  ;;  %6922 = vmatmul.mubr.msk.bf16.vlgmr.msra.gmra.mrb[0].mxu0 %vm2795_vm11, %v2721_v45 }
 0x167   :  { %7936 = vrot.lane.b32.xlu1 %v19858_v44, %s9780_s24  ;;  %v1348_v13 = vsel %vm1342_vm10, %v1315_v51, %v7644_v53  ;;  %v1285_v9 = vsel %vm1276_vm8, %v12460_v54, %v7493_v27  ;;  %v1286_v55 = vsel %vm1276_vm8, %v12474_v14, %v7494_v20  ;;  %v1316_v21 = vsel %vm1309_vm9, %v1283_v28, %v7568_v52  ;;  %v7652_v22 = vpop.permute.xlu0 %7651 }
 0x168   :  { %v19860_v57 = vpack.i.bf16 %v12275_v39, %v12270_v18  ;;  %v2722_v42 = vpack.c.bf16 %v1348_v13, %v1347_v11  ;;  %v1317_v37 = vsel %vm1309_vm9, %v1284_v8, %v7569_v16  ;;  %v1318_v50 = vsel %vm1309_vm9, %v1285_v9, %v7573_v32 }
 0x169   :  { %7931 = vrot.lane.b32.xlu0 %v19859_v34, %s9780_s24  ;;  %v7654_v47 = vunpack.i.h.bf16 %v7652_v22  ;;  %v7653_v17 = vunpack.i.l.bf16 %v7652_v22  ;;  %v7439_v54 = vunpack.i.h.bf16 %v19843_v35  ;;  %v1319_v36 = vsel %vm1309_vm9, %v1286_v55, %v7574_v19  ;;  %v12592_v46 = vpop.permute.xlu1 %7666  ;;  %v19867_v19 = vld [vmem:[#allocation85_spill] sm:$0xff] }
 0x16a   :  { %v1349_v14 = vsel %vm1342_vm10, %v1316_v21, %v7648_v1  ;;  %v1350_v41 = vsel %vm1342_vm10, %v1317_v37, %v7649_v43  ;;  %v19861_v6 = vpack.i.bf16 %v19757_v30, %v19752_v5  ;;  %6925 = vmatprep.mubr.msk.bf16.mxu0 %vm2795_vm11, %v2722_v42  ;;  %v19862_v58 = vunpack.i.l.bf16 %v19843_v35  ;;  %v19865_v30 = vld [vmem:[#allocation119_spill] sm:$0xff]  ;;  %v19866_v35 = vld [vmem:[#allocation109_spill] sm:$0xff] }
 0x16b   :  { %7946 = vrot.lane.b32.xlu1 %v19860_v57, %s9780_s24  ;;  %v7433_v0 = vunpack.i.l.bf16 %v19863_v7  ;;  %v1351_v45 = vsel %vm1342_vm10, %v1318_v50, %v7653_v17  ;;  %v1352_v27 = vsel %vm1342_vm10, %v1319_v36, %v7654_v47  ;;  %v7499_v16 = vunpack.i.h.bf16 %v19864_v49  ;;  %v7662_v44 = vpop.permute.xlu0 %7661  ;;  %v19870_v50 = vld [vmem:[#allocation95_spill] sm:$0xff]  ;;  %v19872_v17 = vld [vmem:[#allocation36_spill] sm:$0xff] }
 0x16c   :  { %v12598_v20 = vsel %vm1243_vm7, %v12279_v59, %v19862_v58  ;;  %v7498_v5 = vunpack.i.l.bf16 %v19864_v49  ;;  %v7504_v52 = vunpack.i.h.bf16 %v19865_v30  ;;  %v7503_v3 = vunpack.i.l.bf16 %v19865_v30  ;;  %v19875_v49 = vld [vmem:[#allocation139_spill] sm:$0xff] }
 0x16d   :  { %7941 = vrot.lane.b32.xlu0 %v19861_v6, %s9780_s24  ;;  %v7579_v59 = vunpack.i.h.bf16 %v12288_v31  ;;  %v7578_v2 = vunpack.i.l.bf16 %v12288_v31  ;;  %v7584_v4 = vunpack.i.h.bf16 %v12340_v40  ;;  %v2723_v32 = vpack.c.bf16 %v1350_v41, %v1349_v14  ;;  %v12617_v43 = vpop.permute.xlu1 %7676  ;;  %v19873_v41 = vld [vmem:[#allocation61_spill] sm:$0xff] }
 0x16e   :  { %v7583_v53 = vunpack.i.l.bf16 %v12340_v40  ;;  %v7659_v48 = vunpack.i.h.bf16 %v12563_v61  ;;  %v7658_v51 = vunpack.i.l.bf16 %v12563_v61  ;;  %v2724_v1 = vpack.c.bf16 %v1352_v27, %v1351_v45  ;;  %v19868_v40 = vld [vmem:[#allocation48_spill] sm:$0xff] }
 0x16f   :  { %7956 = vrot.lane.b32.xlu1 %v19866_v35, %s9781_s26  ;;  %v12621_v34 = vsel %vm1243_vm7, %v12283_v60, %v7439_v54  ;;  %v7434_v31 = vunpack.i.h.bf16 %v19863_v7  ;;  %v7664_v28 = vunpack.i.h.bf16 %v7662_v44  ;;  %v7663_v8 = vunpack.i.l.bf16 %v7662_v44  ;;  %6926 = vmatmul.mubr.msk.bf16.gmra.mrb[4].mxu0 %vm2795_vm11, %v2723_v32  ;;  %v7672_v55 = vpop.permute.xlu0 %7671  ;;  %v19869_v60 = vld [vmem:[#allocation125_spill] sm:$0xff]  ;;  %v19874_v7 = vld [vmem:[#allocation130_spill] sm:$0xff] }
 0x170   :  { %v7389_v11 = vunpack.i.h.bf16 %v19868_v40  ;;  %v1260_v61 = vsel %vm1243_vm7, %v12294_v25, %v7433_v0  ;;  %v1287_v13 = vsel %vm1276_vm8, %v12452_v15, %v7498_v5  ;;  %v1288_v9 = vsel %vm1276_vm8, %v12456_v23, %v7499_v16  ;;  %6929 = vmatprep.mubr.msk.bf16.mxu0 %vm2795_vm11, %v2724_v1  ;;  %v19876_v16 = vld [vmem:[#allocation98_spill] sm:$0xff] }
 0x171   :  { %7951 = vrot.lane.b32.xlu0 %v19867_v19, %s9781_s26  ;;  %v1289_v21 = vsel %vm1276_vm8, %v12488_v63, %v7503_v3  ;;  %v1290_v22 = vsel %vm1276_vm8, %v12498_v29, %v7504_v52  ;;  %v1320_v25 = vsel %vm1309_vm9, %v1287_v13, %v7578_v2  ;;  %v1321_v57 = vsel %vm1309_vm9, %v1288_v9, %v7579_v59  ;;  %v12647_v47 = vpop.permute.xlu1 %7686  ;;  %v19871_v63 = vld [vmem:[#allocation45_spill] sm:$0xff]  ;;  %v19878_v1 = vld [vmem:[#allocation90_spill] sm:$0xff] }
 0x172   :  { %v1322_v15 = vsel %vm1309_vm9, %v1289_v21, %v7583_v53  ;;  %v1323_v23 = vsel %vm1309_vm9, %v1290_v22, %v7584_v4  ;;  %v1353_v42 = vsel %vm1342_vm10, %v1320_v25, %v7658_v51  ;;  %v1354_v37 = vsel %vm1342_vm10, %v1321_v57, %v7659_v48  ;;  %v19877_v4 = vld [vmem:[#allocation113_spill] sm:$0xff]  ;;  %v19880_v57 = vld [vmem:[#allocation128_spill] sm:$0xff] }
 0x173   :  { %7966 = vrot.lane.b32.xlu1 %v19869_v60, %s9781_s26  ;;  %v1261_v29 = vsel %vm1243_vm7, %v19871_v63, %v7434_v31  ;;  %v7448_v54 = vunpack.i.l.bf16 %v19872_v17  ;;  %v1355_v36 = vsel %vm1342_vm10, %v1322_v15, %v7663_v8  ;;  %v1356_v14 = vsel %vm1342_vm10, %v1323_v23, %v7664_v28  ;;  %v12658_v27 = vpop.permute.xlu0 %7681  ;;  %v19879_v8 = vld [vmem:[#allocation32_spill] sm:$0xff] }
 0x174   :  { %v7509_v6 = vunpack.i.h.bf16 %v19873_v41  ;;  %v7508_v58 = vunpack.i.l.bf16 %v19873_v41  ;;  %v7514_v0 = vunpack.i.h.bf16 %v19874_v7  ;;  %v7513_v45 = vunpack.i.l.bf16 %v19874_v7 }
 0x175   :  { %7961 = vrot.lane.b32.xlu0 %v19870_v50, %s9781_s26  ;;  %v7589_v5 = vunpack.i.h.bf16 %v19876_v16  ;;  %v7588_v30 = vunpack.i.l.bf16 %v19876_v16  ;;  %v7594_v52 = vunpack.i.h.bf16 %v12385_v33  ;;  %v2725_v3 = vpack.c.bf16 %v1354_v37, %v1353_v42  ;;  %v12670_v32 = vpop.permute.xlu1 %7696 }
 0x176   :  { %v7593_v44 = vunpack.i.l.bf16 %v12385_v33  ;;  %v7669_v59 = vunpack.i.h.bf16 %v12592_v46  ;;  %v7668_v2 = vunpack.i.l.bf16 %v12592_v46  ;;  %v2726_v53 = vpack.c.bf16 %v1356_v14, %v1355_v36  ;;  %v19883_v36 = vld [vmem:[#allocation133_spill] sm:$0xff] }
 0x177   :  { %7976 = vrot.lane.b32.xlu1 %v19875_v49, %s9781_s26  ;;  %v7674_v48 = vunpack.i.h.bf16 %v7672_v55  ;;  %v7673_v51 = vunpack.i.l.bf16 %v7672_v55  ;;  %6930 = vmatmul.mubr.msk.bf16.gmra.mrb[8].mxu0 %vm2795_vm11, %v2725_v3  ;;  %v7449_v19 = vunpack.i.h.bf16 %v19872_v17  ;;  %v12676_v31 = vsel %vm1243_vm7, %v19878_v1, %v7448_v54  ;;  %v12682_v28 = vpop.permute.xlu0 %7691  ;;  %v19885_v3 = vld [vmem:[#allocation49_spill] sm:$0xff]  ;;  %v19888_v1 = vld [vmem:[#allocation83_spill] sm:$0xff] }
 0x178   :  { %v1291_v33 = vsel %vm1276_vm8, %v12480_v38, %v7508_v58  ;;  %v1292_v46 = vsel %vm1276_vm8, %v12484_v12, %v7509_v6  ;;  %6933 = vmatprep.mubr.msk.bf16.mxu0 %vm2795_vm11, %v2726_v53  ;;  %v1293_v13 = vsel %vm1276_vm8, %v1260_v61, %v7513_v45  ;;  %v1294_v9 = vsel %vm1276_vm8, %v1261_v29, %v7514_v0  ;;  %v19881_v61 = vld [vmem:[#allocation72_spill] sm:$0xff]  ;;  %v19882_v29 = vld [vmem:[#allocation121_spill] sm:$0xff]  ;;  %v19884_v58 = vld [vmem:[#allocation162_spill] sm:$0xff] }
 0x179   :  { %7971 = vrot.lane.b32.xlu0 %v19877_v4, %s9781_s26  ;;  %v1324_v55 = vsel %vm1309_vm9, %v1291_v33, %v7588_v30  ;;  %v1325_v21 = vsel %vm1309_vm9, %v1292_v46, %v7589_v5  ;;  %v1326_v38 = vsel %vm1309_vm9, %v1293_v13, %v7593_v44  ;;  %v1327_v22 = vsel %vm1309_vm9, %v1294_v9, %v7594_v52  ;;  %v19889_v33 = vld [vmem:[#allocation76_spill] sm:$0xff] }
 0x17a   :  { %v1357_v12 = vsel %vm1342_vm10, %v1324_v55, %v7668_v2  ;;  %v1358_v25 = vsel %vm1342_vm10, %v1325_v21, %v7669_v59  ;;  %v12697_v15 = vpop.permute.xlu1 %7706  ;;  %v7444_v23 = vunpack.i.h.bf16 %v19881_v61  ;;  %v7443_v42 = vunpack.i.l.bf16 %v19881_v61  ;;  %v19886_v2 = vld [vmem:[#allocation94_spill] sm:$0xff]  ;;  %v19890_v55 = vld [vmem:[#allocation67_spill] sm:$0xff]  ;;  %v19891_v61 = vld [vmem:[#allocation153_spill] sm:$0xff] }
 0x17b   :  { %7986 = vrot.lane.b32.xlu1 %v19879_v8, %s9781_s26  ;;  %v1359_v37 = vsel %vm1342_vm10, %v1326_v38, %v7673_v51  ;;  %v1360_v63 = vsel %vm1342_vm10, %v1327_v22, %v7674_v48  ;;  %v7519_v17 = vunpack.i.h.bf16 %v19882_v29  ;;  %v7518_v54 = vunpack.i.l.bf16 %v19882_v29  ;;  %v19887_v48 = vld [vmem:[#allocation82_spill] sm:$0xff] }
 0x17c   :  { %v7524_v14 = vunpack.i.h.bf16 %v19883_v36  ;;  %v7523_v41 = vunpack.i.l.bf16 %v19883_v36  ;;  %v7599_v7 = vunpack.i.h.bf16 %v12365_v56  ;;  %v7598_v0 = vunpack.i.l.bf16 %v12365_v56 }
 0x17d   :  { %7981 = vrot.lane.b32.xlu0 %v19880_v57, %s9781_s26  ;;  %v7604_v45 = vunpack.i.h.bf16 %v12415_v62  ;;  %v2727_v16 = vpack.c.bf16 %v1358_v25, %v1357_v12  ;;  %v7603_v5 = vunpack.i.l.bf16 %v12415_v62  ;;  %v7679_v30 = vunpack.i.h.bf16 %v12617_v43 }
 0x17e   :  { %v12707_v6 = vpop.permute.xlu0 %7701  ;;  %v7678_v52 = vunpack.i.l.bf16 %v12617_v43  ;;  %v2728_v59 = vpack.c.bf16 %v1360_v63, %v1359_v37  ;;  %v1267_v53 = vsel %vm1243_vm7, %v19886_v2, %v7449_v19  ;;  %v1264_v56 = vsel %vm1243_vm7, %v19887_v48, %v7443_v42  ;;  %v19892_v42 = vld [vmem:[#allocation115_spill] sm:$0xff] }
 0x17f   :  { %7996 = vrot.lane.b32.xlu1 %v19884_v58, %s9781_s26  ;;  %v12719_v44 = vpop.permute.xlu1 %7716  ;;  %v7684_v51 = vunpack.i.h.bf16 %v12658_v27  ;;  %v7683_v62 = vunpack.i.l.bf16 %v12658_v27  ;;  %6934 = vmatmul.mubr.msk.bf16.gmra.mrb[12].mxu0 %vm2795_vm11, %v2727_v16  ;;  %v1265_v43 = vsel %vm1243_vm7, %v19888_v1, %v7444_v23  ;;  %v7458_v46 = vunpack.i.l.bf16 %v19889_v33  ;;  %v19895_v16 = vld [vmem:[#allocation71_spill] sm:$0xff] }
 0x180   :  { %v1295_v13 = vsel %vm1276_vm8, %v12598_v20, %v7518_v54  ;;  %v1296_v19 = vsel %vm1276_vm8, %v12621_v34, %v7519_v17  ;;  %6937 = vmatprep.mubr.msk.bf16.mxu0 %vm2795_vm11, %v2728_v59  ;;  %v1297_v27 = vsel %vm1276_vm8, %v1264_v56, %v7523_v41  ;;  %v1298_v21 = vsel %vm1276_vm8, %v1265_v43, %v7524_v14  ;;  %v19893_v54 = vld [vmem:[#allocation65_spill] sm:$0xff] }
 0x181   :  { %7991 = vrot.lane.b32.xlu0 %v19885_v3, %s9781_s26  ;;  %v1328_v38 = vsel %vm1309_vm9, %v1295_v13, %v7598_v0  ;;  %v1329_v22 = vsel %vm1309_vm9, %v1296_v19, %v7599_v7  ;;  %v1330_v20 = vsel %vm1309_vm9, %v1297_v27, %v7603_v5  ;;  %v1331_v12 = vsel %vm1309_vm9, %v1298_v21, %v7604_v45  ;;  %v19894_v41 = vld [vmem:[#allocation149_spill] sm:$0xff]  ;;  %v19896_v5 = vld [vmem:[#allocation88_spill] sm:$0xff]  ;;  %v19898_v13 = vld [vmem:[#allocation102_spill] sm:$0xff] }
 0x182   :  { %v12735_v9 = vpop.permute.xlu0 %7711  ;;  %v1361_v34 = vsel %vm1342_vm10, %v1328_v38, %v7678_v52  ;;  %v1362_v25 = vsel %vm1342_vm10, %v1329_v22, %v7679_v30  ;;  %v7454_v37 = vunpack.i.h.bf16 %v19892_v42  ;;  %v7453_v63 = vunpack.i.l.bf16 %v19892_v42  ;;  %v19899_v27 = vld [vmem:[#allocation97_spill] sm:$0xff]  ;;  %v19900_v22 = vld [vmem:[#allocation110_spill] sm:$0xff] }
 0x183   :  { %8006 = vrot.lane.b32.xlu1 %v19890_v55, %s9781_s26  ;;  %v12750_v23 = vpop.permute.xlu1 %7726  ;;  %v1363_v29 = vsel %vm1342_vm10, %v1330_v20, %v7683_v62  ;;  %v1364_v17 = vsel %vm1342_vm10, %v1331_v12, %v7684_v51  ;;  %v7529_v36 = vunpack.i.h.bf16 %v19893_v54  ;;  %v7528_v14 = vunpack.i.l.bf16 %v19893_v54  ;;  %v19897_v62 = vld [vmem:[#allocation164_spill] sm:$0xff]  ;;  %v19902_v54 = vld [vmem:[#allocation87_spill] sm:$0xff] }
 0x184   :  { %v7534_v7 = vunpack.i.h.bf16 %v19894_v41  ;;  %v7533_v0 = vunpack.i.l.bf16 %v19894_v41  ;;  %v7609_v30 = vunpack.i.h.bf16 %v19896_v5  ;;  %v7608_v52 = vunpack.i.l.bf16 %v19896_v5 }
 0x185   :  { %8001 = vrot.lane.b32.xlu0 %v19891_v61, %s9781_s26  ;;  %v7614_v59 = vunpack.i.h.bf16 %v12462_v10  ;;  %v2729_v2 = vpack.c.bf16 %v1362_v25, %v1361_v34  ;;  %v7613_v48 = vunpack.i.l.bf16 %v12462_v10  ;;  %v7689_v56 = vunpack.i.h.bf16 %v12647_v47 }
 0x186   :  { %v12760_v45 = vpop.permute.xlu0 %7721  ;;  %v7688_v51 = vunpack.i.l.bf16 %v12647_v47  ;;  %v2730_v43 = vpack.c.bf16 %v1364_v17, %v1363_v29  ;;  %v1270_v19 = vsel %vm1243_vm7, %v19898_v13, %v7458_v46  ;;  %v1268_v21 = vsel %vm1243_vm7, %v19899_v27, %v7453_v63  ;;  %v19901_v29 = vld [vmem:[#allocation69_spill] sm:$0xff]  ;;  %v19906_v13 = vld [vmem:[#allocation118_spill] sm:$0xff] }
 0x187   :  { %8016 = vrot.lane.b32.xlu1 %v19895_v16, %s9781_s26  ;;  %v7694_v38 = vunpack.i.h.bf16 %v12682_v28  ;;  %v7693_v10 = vunpack.i.l.bf16 %v12682_v28  ;;  %6938 = vmatmul.mubr.msk.bf16.gmra.mrb[16].mxu0 %vm2795_vm11, %v2729_v2  ;;  %v7459_v47 = vunpack.i.h.bf16 %v19889_v33  ;;  %v1269_v20 = vsel %vm1243_vm7, %v19900_v22, %v7454_v37 }
 0x188   :  { %v12772_v1 = vpop.permute.xlu1 %7736  ;;  %v1299_v12 = vsel %vm1276_vm8, %v12676_v31, %v7528_v14  ;;  %v1300_v34 = vsel %vm1276_vm8, %v1267_v53, %v7529_v36  ;;  %6941 = vmatprep.mubr.msk.bf16.mxu0 %vm2795_vm11, %v2730_v43  ;;  %v1301_v28 = vsel %vm1276_vm8, %v1268_v21, %v7533_v0  ;;  %v1302_v25 = vsel %vm1276_vm8, %v1269_v20, %v7534_v7  ;;  %v19903_v0 = vld [vmem:[#allocation143_spill] sm:$0xff]  ;;  %v19907_v20 = vld [vmem:[#allocation74_spill] sm:$0xff] }
 0x189   :  { %8011 = vrot.lane.b32.xlu0 %v19897_v62, %s9781_s26  ;;  %v1332_v33 = vsel %vm1309_vm9, %v1299_v12, %v7608_v52  ;;  %v1333_v42 = vsel %vm1309_vm9, %v1300_v34, %v7609_v30  ;;  %v1334_v37 = vsel %vm1309_vm9, %v1301_v28, %v7613_v48  ;;  %v1335_v31 = vsel %vm1309_vm9, %v1302_v25, %v7614_v59  ;;  %v19904_v52 = vld [vmem:[#allocation155_spill] sm:$0xff]  ;;  %v19908_v28 = vld [vmem:[#allocation96_spill] sm:$0xff] }
 0x18a   :  { %v12787_v46 = vpop.permute.xlu0 %7731  ;;  %v1365_v53 = vsel %vm1342_vm10, %v1332_v33, %v7688_v51  ;;  %v1366_v63 = vsel %vm1342_vm10, %v1333_v42, %v7689_v56  ;;  %v7464_v36 = vunpack.i.h.bf16 %v19902_v54  ;;  %v7463_v14 = vunpack.i.l.bf16 %v19902_v54  ;;  %v19905_v56 = vld [vmem:[#allocation93_spill] sm:$0xff]  ;;  %v19909_v33 = vld [vmem:[#allocation111_spill] sm:$0xff] }
 0x18b   :  { %8026 = vrot.lane.b32.xlu1 %v12470_v26, %s9781_s26  ;;  %v1367_v41 = vsel %vm1342_vm10, %v1334_v37, %v7693_v10  ;;  %v1368_v7 = vsel %vm1342_vm10, %v1335_v31, %v7694_v38  ;;  %v7539_v5 = vunpack.i.h.bf16 %v19903_v0  ;;  %v7538_v30 = vunpack.i.l.bf16 %v19903_v0  ;;  %v19910_v31 = vld [vmem:[#allocation112_spill] sm:$0xff] }
 0x18c   :  { %v12802_v17 = vpop.permute.xlu1 %7746  ;;  %v7544_v59 = vunpack.i.h.bf16 %v19904_v52  ;;  %v7543_v2 = vunpack.i.l.bf16 %v19904_v52  ;;  %v7619_v51 = vunpack.i.h.bf16 %v12443_v24  ;;  %v7618_v43 = vunpack.i.l.bf16 %v12443_v24  ;;  %v19912_v52 = vld [vmem:[#allocation54_spill] sm:$0xff] }
 0x18d   :  { %8021 = vrot.lane.b32.xlu0 %v19901_v29, %s9781_s26  ;;  %v7624_v27 = vunpack.i.h.bf16 %v19906_v13  ;;  %v2731_v21 = vpack.c.bf16 %v1366_v63, %v1365_v53  ;;  %v7623_v38 = vunpack.i.l.bf16 %v19906_v13  ;;  %v7699_v10 = vunpack.i.h.bf16 %v12670_v32 }
 0x18e   :  { %v12812_v48 = vpop.permute.xlu0 %7741  ;;  %v7698_v22 = vunpack.i.l.bf16 %v12670_v32  ;;  %v2732_v34 = vpack.c.bf16 %v1368_v7, %v1367_v41  ;;  %v1271_v25 = vsel %vm1243_vm7, %v19908_v28, %v7459_v47  ;;  %v1272_v24 = vsel %vm1243_vm7, %v19909_v33, %v7463_v14  ;;  %v19911_v47 = vld [vmem:[#allocation106_spill] sm:$0xff]  ;;  %v19916_v28 = vld [vmem:[#allocation117_spill] sm:$0xff] }
 0x18f   :  { %8036 = vrot.lane.b32.xlu1 %v19905_v56, %s9782_s27  ;;  %v7704_v42 = vunpack.i.h.bf16 %v12707_v6  ;;  %v7703_v37 = vunpack.i.l.bf16 %v12707_v6  ;;  %6942 = vmatmul.mubr.msk.bf16.gmra.mrb[20].mxu0 %vm2795_vm11, %v2731_v21  ;;  %v7388_v32 = vunpack.i.l.bf16 %v19868_v40  ;;  %v1273_v53 = vsel %vm1243_vm7, %v19910_v31, %v7464_v36 }
 0x190   :  { %v12824_v12 = vpop.permute.xlu1 %7756  ;;  %v1303_v63 = vsel %vm1276_vm8, %v1270_v19, %v7538_v30  ;;  %v1304_v54 = vsel %vm1276_vm8, %v1271_v25, %v7539_v5  ;;  %6945 = vmatprep.mubr.msk.bf16.mxu0 %vm2795_vm11, %v2732_v34  ;;  %v1305_v6 = vsel %vm1276_vm8, %v1272_v24, %v7543_v2  ;;  %v1306_v14 = vsel %vm1276_vm8, %v1273_v53, %v7544_v59  ;;  %v19913_v2 = vld [vmem:[#allocation46_spill] sm:$0xff]  ;;  %v19917_v25 = vld [vmem:[#allocation132_spill] sm:$0xff]  ;;  %v19918_v24 = vld [vmem:[#allocation105_spill] sm:$0xff] }
 0x191   :  { %8031 = vrot.lane.b32.xlu0 %v19907_v20, %s9782_s27  ;;  %v1336_v7 = vsel %vm1309_vm9, %v1303_v63, %v7618_v43  ;;  %v1337_v0 = vsel %vm1309_vm9, %v1304_v54, %v7619_v51  ;;  %v1338_v36 = vsel %vm1309_vm9, %v1305_v6, %v7623_v38  ;;  %v1339_v19 = vsel %vm1309_vm9, %v1306_v14, %v7624_v27  ;;  %v19914_v38 = vld [vmem:[#allocation64_spill] sm:$0xff]  ;;  %v19915_v20 = vld [vmem:[#allocation78_spill] sm:$0xff] }
 0x192   :  { %v12838_v41 = vpop.permute.xlu0 %7751  ;;  %v1369_v5 = vsel %vm1342_vm10, %v1336_v7, %v7698_v22  ;;  %v1370_v30 = vsel %vm1342_vm10, %v1337_v0, %v7699_v10  ;;  %v7469_v21 = vunpack.i.h.bf16 %v19913_v2  ;;  %v7468_v59 = vunpack.i.l.bf16 %v19913_v2  ;;  %v19919_v63 = vld [vmem:[#allocation56_spill] sm:$0xff]  ;;  %v19921_v2 = vld [vmem:[#allocation59_spill] sm:$0xff] }
 0x193   :  { %8046 = vrot.lane.b32.xlu1 %v19911_v47, %s9782_s27  ;;  %v1371_v43 = vsel %vm1342_vm10, %v1338_v36, %v7703_v37  ;;  %v1372_v51 = vsel %vm1342_vm10, %v1339_v19, %v7704_v42  ;;  %v1241_v27 = vsel %vm1210_vm6, %v19914_v38, %v7388_v32  ;;  %v7549_v22 = vunpack.i.h.bf16 %v19915_v20 }
 0x194   :  { %v12853_v13 = vpop.permute.xlu1 %7766  ;;  %v7548_v10 = vunpack.i.l.bf16 %v19915_v20  ;;  %v1242_v33 = vsel %vm1210_vm6, %v19917_v25, %v7389_v11  ;;  %v7629_v37 = vunpack.i.h.bf16 %v19918_v24  ;;  %v7628_v42 = vunpack.i.l.bf16 %v19918_v24  ;;  %v19923_v20 = vld [vmem:[#allocation108_spill] sm:$0xff] }
 0x195   :  { %8041 = vrot.lane.b32.xlu0 %v19912_v52, %s9782_s27  ;;  %v2733_v31 = vpack.c.bf16 %v1370_v30, %v1369_v5  ;;  %v7709_v32 = vunpack.i.h.bf16 %v12697_v15  ;;  %v7708_v53 = vunpack.i.l.bf16 %v12697_v15  ;;  %v2734_v6 = vpack.c.bf16 %v1372_v51, %v1371_v43  ;;  %v19920_v15 = vld [vmem:[#allocation131_spill] sm:$0xff]  ;;  %v19922_v43 = vld [vmem:[#allocation70_spill] sm:$0xff]  ;;  %v19926_v24 = vld [vmem:[#allocation156_spill] sm:$0xff] }
 0x196   :  { %v12863_v34 = vpop.permute.xlu0 %7761  ;;  %v1274_v40 = vsel %vm1243_vm7, %v1241_v27, %v7468_v59  ;;  %v1275_v14 = vsel %vm1243_vm7, %v1242_v33, %v7469_v21  ;;  %v1678_v38 = vrot.slane %v12270_v18, 2  ;;  %v1679_v27 = vrot.slane %v12275_v39, 2  ;;  %v19927_v39 = vld [vmem:[#allocation136_spill] sm:$0xff] }
 0x197   :  { %8056 = vrot.lane.b32.xlu1 %v19916_v28, %s9782_s27  ;;  %6946 = vmatmul.mubr.msk.bf16.gmra.mrb[24].mxu0 %vm2795_vm11, %v2733_v31  ;;  %v1307_v11 = vsel %vm1276_vm8, %v1274_v40, %v7548_v10  ;;  %v1308_v7 = vsel %vm1276_vm8, %v1275_v14, %v7549_v22  ;;  %v1681_v22 = vrot.slane %v19923_v20, 2  ;;  %v19924_v10 = vld [vmem:[#allocation152_spill] sm:$0xff]  ;;  %v19951_v47 = vmov 0.0  }
 0x198   :  { %v12877_v54 = vpop.permute.xlu1 %7776  ;;  %6949 = vmatprep.mubr.msk.bf16.mxu0 %vm2795_vm11, %v2734_v6  ;;  %v1340_v36 = vsel %vm1309_vm9, %v1307_v11, %v7628_v42  ;;  %v1341_v19 = vsel %vm1309_vm9, %v1308_v7, %v7629_v37  ;;  %v1680_v37 = vsel %vm204_vm1, %v1678_v38, %v1679_v27  ;;  %v19932_v6 = vld [vmem:[#allocation75_spill] sm:$0xff]  ;;  %v19935_v11 = vld [vmem:[#allocation158_spill] sm:$0xff]  ;;  %v12956_v38 = vld [vmem:[%s18748_s0 + $0x228] sm:$0xff]  ;;  %3258 = vst.msk [vmem:[#allocation2 + $0x40] sm:$0x3] %vm3251_vm12, %v19951_v47 }
 0x199   :  { %8051 = vrot.lane.b32.xlu0 %v19919_v63, %s9782_s27  ;;  %v1373_v5 = vsel %vm1342_vm10, %v1340_v36, %v7708_v53  ;;  %v1374_v30 = vsel %vm1342_vm10, %v1341_v19, %v7709_v32  ;;  %v1682_v18 = vsel %vm204_vm1, %v1679_v27, %v1681_v22  ;;  %v19930_v32 = vld [vmem:[#allocation159_spill] sm:$0xff]  ;;  %v12945_v19 = vld [vmem:[%s18748_s0 + $0x1e8] sm:$0xff]  ;;  %v12961_v27 = vld [vmem:[%s18748_s0 + $0x230] sm:$0xff]  ;;  %3252 = vst.msk [vmem:[#allocation2 + $0x10] sm:$0x3] %vm3251_vm12, %v19951_v47 }
 0x19a   :  { %v12884_v0 = vpop.permute.xlu0 %7771  ;;  %v2735_v51 = vpack.c.bf16 %v1374_v30, %v1373_v5  ;;  %v12923_v53 = vpack.i.bf16 %v1682_v18, %v1680_v37  ;;  %v12940_v36 = vld [vmem:[%s18748_s0 + $0x1e0] sm:$0xff]  ;;  %v8125_v20 = vpack.i.bf16 %v12961_v27, %v12956_v38  ;;  %v12971_v37 = vld [vmem:[%s18748_s0 + $0x210] sm:$0xff]  ;;  %v12976_v18 = vld [vmem:[%s18748_s0 + $0x218] sm:$0xff]  ;;  %3255 = vst.msk [vmem:[#allocation2 + $0x28] sm:$0x3] %vm3251_vm12, %v19951_v47 }
 0x19b   :  { %8066 = vrot.lane.b32.xlu1 %v19920_v15, %s9782_s27  ;;  %v8110_v5 = vpack.i.bf16 %v12945_v19, %v12940_v36  ;;  %v13021_v15 = vld [vmem:[%s18748_s0 + $0x290] sm:$0xff]  ;;  %3261 = vst.msk [vmem:[#allocation2 + $0x58] sm:$0x3] %vm3251_vm12, %v19951_v47  ;;  %3264 = vst.msk [vmem:[#allocation2 + $0x70] sm:$0x3] %vm3251_vm12, %v19951_v47  ;;  %v13353_v63 = vld [vmem:[%s18748_s0 + $0x300] sm:$0xff] }
 0x19c   :  { %v12895_v21 = vpop.permute.xlu1 %7786  ;;  %19931 = vst [vmem:[#allocation135_spill] sm:$0xff] %v12923_v53  ;;  %3267 = vst.msk [vmem:[#allocation2 + $0x88] sm:$0x3] %vm3251_vm12, %v19951_v47 }
 0x19d   :  { %8061 = vrot.lane.b32.xlu0 %v19921_v2, %s9782_s27  ;;  %3270 = vst.msk [vmem:[#allocation2 + $0xa0] sm:$0x3] %vm3251_vm12, %v19951_v47  ;;  %3273 = vst.msk [vmem:[#allocation2 + $0xb8] sm:$0x3] %vm3251_vm12, %v19951_v47 }
 0x19e   :  { %v12897_v59 = vpop.permute.xlu0 %7781  ;;  %3276 = vst.msk [vmem:[#allocation2 + $0xd0] sm:$0x3] %vm3251_vm12, %v19951_v47  ;;  %3279 = vst.msk [vmem:[#allocation2 + $0xe8] sm:$0x3] %vm3251_vm12, %v19951_v47 }
 0x19f   :  { %8076 = vrot.lane.b32.xlu1 %v19922_v43, %s9782_s27  ;;  %6950 = vmatmul.mubr.msk.bf16.gmra.mrb[28].mxu0 %vm2795_vm11, %v2735_v51  ;;  %v19938_v51 = vld [vmem:[#allocation160_spill] sm:$0xff]  ;;  %3282 = vst.msk [vmem:[#allocation2 + $0x100] sm:$0x3] %vm3251_vm12, %v19951_v47  ;;  %3285 = vst.msk [vmem:[#allocation2 + $0x118] sm:$0x3] %vm3251_vm12, %v19951_v47 }
 0x1a0   :  { %v12906_v25 = vpop.permute.xlu1 %7796  ;;  %3288 = vst.msk [vmem:[#allocation2 + $0x130] sm:$0x3] %vm3251_vm12, %v19951_v47  ;;  %3291 = vst.msk [vmem:[#allocation2 + $0x148] sm:$0x3] %vm3251_vm12, %v19951_v47 }
 0x1a1   :  { %8071 = vrot.lane.b32.xlu0 %v19924_v10, %s9782_s27  ;;  %3294 = vst.msk [vmem:[#allocation2 + $0x160] sm:$0x3] %vm3251_vm12, %v19951_v47  ;;  %3297 = vst.msk [vmem:[#allocation2 + $0x178] sm:$0x3] %vm3251_vm12, %v19951_v47 }
 0x1a2   :  { %3300 = vst.msk [vmem:[#allocation2 + $0x190] sm:$0x3] %vm3251_vm12, %v19951_v47  ;;  %3303 = vst.msk [vmem:[#allocation2 + $0x1a8] sm:$0x3] %vm3251_vm12, %v19951_v47 }
 0x1a3   :  { %v12909_v33 = vpop.permute.xlu0 %7791  ;;  %8086 = vrot.lane.b32.xlu1 %v19926_v24, %s9782_s27  ;;  %3306 = vst.msk [vmem:[#allocation2 + $0x1c0] sm:$0x3] %vm3251_vm12, %v19951_v47  ;;  %3309 = vst.msk [vmem:[#allocation2 + $0x1d8] sm:$0x3] %vm3251_vm12, %v19951_v47 }
 0x1a4   :  { %19925 = vst [vmem:[#allocation120_spill] sm:$0xff] %v12909_v33  ;;  %v12917_v42 = vpop.permute.xlu1 %7806  ;;  %3312 = vst.msk [vmem:[#allocation2 + $0x1f0] sm:$0x3] %vm3251_vm12, %v19951_v47 }
 0x1a5   :  { %8081 = vrot.lane.b32.xlu0 %v19927_v39, %s9782_s27  ;;  %19928 = vst [vmem:[#allocation124_spill] sm:$0xff] %v12917_v42  ;;  %3315 = vst.msk [vmem:[#allocation2 + $0x208] sm:$0x3] %vm3251_vm12, %v19951_v47  ;;  %v13333_v42 = vld [vmem:[%s18748_s0 + $0x320] sm:$0xff] }
 0x1a6   :  { %3318 = vst.msk [vmem:[#allocation2 + $0x220] sm:$0x3] %vm3251_vm12, %v19951_v47  ;;  %3321 = vst.msk [vmem:[#allocation2 + $0x238] sm:$0x3] %vm3251_vm12, %v19951_v47 }
 0x1a7   :  { %v12919_v31 = vpop.permute.xlu0 %7801  ;;  %8096 = vrot.lane.b32.xlu1 %v19930_v32, %s9782_s27  ;;  %v12991_v32 = vld [vmem:[%s18748_s0 + $0x260] sm:$0xff]  ;;  %3324 = vst.msk [vmem:[#allocation2 + $0x250] sm:$0x3] %vm3251_vm12, %v19951_v47  ;;  %3327 = vst.msk [vmem:[#allocation2 + $0x268] sm:$0x3] %vm3251_vm12, %v19951_v47 }
 0x1a8   :  { %19929 = vst [vmem:[#allocation127_spill] sm:$0xff] %v12919_v31  ;;  %v12927_v40 = vpop.permute.xlu1 %7816  ;;  %3330 = vst.msk [vmem:[#allocation2 + $0x280] sm:$0x3] %vm3251_vm12, %v19951_v47  ;;  %v13328_v31 = vld [vmem:[%s18748_s0 + $0x318] sm:$0xff] }
 0x1a9   :  { %8091 = vrot.lane.b32.xlu0 %v19932_v6, %s9782_s27  ;;  %19933 = vst [vmem:[#allocation140_spill] sm:$0xff] %v12927_v40  ;;  %v13006_v6 = vld [vmem:[%s18748_s0 + $0x248] sm:$0xff]  ;;  %v19080_v40 = vmov 0.0   ;;  %3333 = vst.msk [vmem:[#allocation2 + $0x298] sm:$0x3] %vm3251_vm12, %v19951_v47 }
 0x1aa   :  { %3256 = vst.msk [vmem:[#allocation2 + $0x30] sm:$0xff] %vm1111_vm2, %v19080_v40  ;;  %3257 = vst.msk [vmem:[#allocation2 + $0x38] sm:$0xff] %vm1111_vm2, %v19080_v40 }
 0x1ab   :  { %v12929_v14 = vpop.permute.xlu0 %7811  ;;  %8106 = vrot.lane.b32.xlu1 %v12923_v53, %s9782_s27  ;;  %3249 = vst.msk [vmem:[#allocation2] sm:$0xff] %vm1111_vm2, %v19080_v40  ;;  %3250 = vst.msk [vmem:[#allocation2 + $0x8] sm:$0xff] %vm1111_vm2, %v19080_v40 }
 0x1ac   :  { %19934 = vst [vmem:[#allocation62_spill] sm:$0xff] %v12929_v14  ;;  %v12935_v7 = vpop.permute.xlu1 %7826  ;;  %3253 = vst.msk [vmem:[#allocation2 + $0x18] sm:$0xff] %vm1111_vm2, %v19080_v40  ;;  %v13238_v14 = vld [vmem:[%s18748_s0 + $0x2d0] sm:$0xff] }
 0x1ad   :  { %8101 = vrot.lane.b32.xlu0 %v19935_v11, %s9782_s27  ;;  %19936 = vst [vmem:[#allocation126_spill] sm:$0xff] %v12935_v7  ;;  %3254 = vst.msk [vmem:[#allocation2 + $0x20] sm:$0xff] %vm1111_vm2, %v19080_v40 }
 0x1ae   :  { %3259 = vst.msk [vmem:[#allocation2 + $0x48] sm:$0xff] %vm1111_vm2, %v19080_v40  ;;  %3260 = vst.msk [vmem:[#allocation2 + $0x50] sm:$0xff] %vm1111_vm2, %v19080_v40 }
 0x1af   :  { %v12949_v30 = vpop.permute.xlu0 %7821  ;;  %8116 = vrot.lane.b32.xlu1 %v19938_v51, %s9783_s28  ;;  %v8120_v51 = vpack.i.bf16 %v12976_v18, %v12971_v37  ;;  %3262 = vst.msk [vmem:[#allocation2 + $0x60] sm:$0xff] %vm1111_vm2, %v19080_v40  ;;  %3263 = vst.msk [vmem:[#allocation2 + $0x68] sm:$0xff] %vm1111_vm2, %v19080_v40 }
 0x1b0   :  { %19937 = vst [vmem:[#allocation31_spill] sm:$0xff] %v12949_v30  ;;  %v12966_v22 = vpop.permute.xlu1 %7836  ;;  %3265 = vst.msk [vmem:[#allocation2 + $0x78] sm:$0xff] %vm1111_vm2, %v19080_v40 }
 0x1b1   :  { %8111 = vrot.lane.b32.xlu0 %v8110_v5, %s9783_s28  ;;  %19939 = vst [vmem:[#allocation151_spill] sm:$0xff] %v12966_v22  ;;  %v12986_v5 = vld [vmem:[%s18748_s0 + $0x258] sm:$0xff]  ;;  %3266 = vst.msk [vmem:[#allocation2 + $0x80] sm:$0xff] %vm1111_vm2, %v19080_v40 }
 0x1b2   :  { %v8135_v11 = vpack.i.bf16 %v12991_v32, %v12986_v5  ;;  %3268 = vst.msk [vmem:[#allocation2 + $0x90] sm:$0xff] %vm1111_vm2, %v19080_v40  ;;  %3269 = vst.msk [vmem:[#allocation2 + $0x98] sm:$0xff] %vm1111_vm2, %v19080_v40 }
 0x1b3   :  { %v12980_v53 = vpop.permute.xlu0 %7831  ;;  %8126 = vrot.lane.b32.xlu1 %v8125_v20, %s9783_s28  ;;  %v13001_v20 = vld [vmem:[%s18748_s0 + $0x240] sm:$0xff]  ;;  %3271 = vst.msk [vmem:[#allocation2 + $0xa8] sm:$0xff] %vm1111_vm2, %v19080_v40  ;;  %3272 = vst.msk [vmem:[#allocation2 + $0xb0] sm:$0xff] %vm1111_vm2, %v19080_v40 }
 0x1b4   :  { %19940 = vst [vmem:[#allocation63_spill] sm:$0xff] %v12980_v53  ;;  %v12996_v24 = vpop.permute.xlu1 %7846  ;;  %v8130_v43 = vpack.i.bf16 %v13006_v6, %v13001_v20  ;;  %3274 = vst.msk [vmem:[#allocation2 + $0xc0] sm:$0xff] %vm1111_vm2, %v19080_v40 }
 0x1b5   :  { %8121 = vrot.lane.b32.xlu0 %v8120_v51, %s9783_s28  ;;  %19941 = vst [vmem:[#allocation66_spill] sm:$0xff] %v12996_v24  ;;  %v13016_v51 = vld [vmem:[%s18748_s0 + $0x288] sm:$0xff]  ;;  %3275 = vst.msk [vmem:[#allocation2 + $0xc8] sm:$0xff] %vm1111_vm2, %v19080_v40 }
 0x1b6   :  { %v8145_v24 = vpack.i.bf16 %v13021_v15, %v13016_v51  ;;  %3277 = vst.msk [vmem:[#allocation2 + $0xd8] sm:$0xff] %vm1111_vm2, %v19080_v40  ;;  %3278 = vst.msk [vmem:[#allocation2 + $0xe0] sm:$0xff] %vm1111_vm2, %v19080_v40 }
 0x1b7   :  { %v13010_v39 = vpop.permute.xlu0 %7841  ;;  %8136 = vrot.lane.b32.xlu1 %v8135_v11, %s9783_s28  ;;  %v13031_v11 = vld [vmem:[%s18748_s0 + $0x270] sm:$0xff]  ;;  %3280 = vst.msk [vmem:[#allocation2 + $0xf0] sm:$0xff] %vm1111_vm2, %v19080_v40  ;;  %3281 = vst.msk [vmem:[#allocation2 + $0xf8] sm:$0xff] %vm1111_vm2, %v19080_v40 }
 0x1b8   :  { %19942 = vst [vmem:[#allocation141_spill] sm:$0xff] %v13010_v39  ;;  %v13026_v53 = vpop.permute.xlu1 %7856  ;;  %v13036_v39 = vld [vmem:[%s18748_s0 + $0x278] sm:$0xff]  ;;  %3283 = vst.msk [vmem:[#allocation2 + $0x108] sm:$0xff] %vm1111_vm2, %v19080_v40 }
 0x1b9   :  { %8131 = vrot.lane.b32.xlu0 %v8130_v43, %s9783_s28  ;;  %19943 = vst [vmem:[#allocation50_spill] sm:$0xff] %v13026_v53  ;;  %v8140_v10 = vpack.i.bf16 %v13036_v39, %v13031_v11  ;;  %v13046_v43 = vld [vmem:[%s18748_s0 + $0x2b8] sm:$0xff]  ;;  %v13051_v53 = vld [vmem:[%s18748_s0 + $0x2c0] sm:$0xff]  ;;  %3284 = vst.msk [vmem:[#allocation2 + $0x110] sm:$0xff] %vm1111_vm2, %v19080_v40 }
 0x1ba   :  { %v8155_v30 = vpack.i.bf16 %v13051_v53, %v13046_v43  ;;  %3286 = vst.msk [vmem:[#allocation2 + $0x120] sm:$0xff] %vm1111_vm2, %v19080_v40  ;;  %3287 = vst.msk [vmem:[#allocation2 + $0x128] sm:$0xff] %vm1111_vm2, %v19080_v40 }
 0x1bb   :  { %v13040_v22 = vpop.permute.xlu0 %7851  ;;  %8146 = vrot.lane.b32.xlu1 %v8145_v24, %s9783_s28  ;;  %v13061_v24 = vld [vmem:[%s18748_s0 + $0x2a0] sm:$0xff]  ;;  %3289 = vst.msk [vmem:[#allocation2 + $0x138] sm:$0xff] %vm1111_vm2, %v19080_v40  ;;  %3290 = vst.msk [vmem:[#allocation2 + $0x140] sm:$0xff] %vm1111_vm2, %v19080_v40 }
 0x1bc   :  { %19944 = vst [vmem:[#allocation142_spill] sm:$0xff] %v13040_v22  ;;  %v13056_v28 = vpop.permute.xlu1 %7866  ;;  %v13066_v22 = vld [vmem:[%s18748_s0 + $0x2a8] sm:$0xff]  ;;  %3292 = vst.msk [vmem:[#allocation2 + $0x150] sm:$0xff] %vm1111_vm2, %v19080_v40 }
 0x1bd   :  { %8141 = vrot.lane.b32.xlu0 %v8140_v10, %s9783_s28  ;;  %19945 = vst [vmem:[#allocation73_spill] sm:$0xff] %v13056_v28  ;;  %v8150_v7 = vpack.i.bf16 %v13066_v22, %v13061_v24  ;;  %v13076_v10 = vld [vmem:[%s18748_s0 + $0x2e8] sm:$0xff]  ;;  %v13081_v28 = vld [vmem:[%s18748_s0 + $0x2f0] sm:$0xff]  ;;  %3293 = vst.msk [vmem:[#allocation2 + $0x158] sm:$0xff] %vm1111_vm2, %v19080_v40 }
 0x1be   :  { %19947 = vst [vmem:[#allocation146_spill] sm:$0xff] %v13076_v10  ;;  %3295 = vst.msk [vmem:[#allocation2 + $0x168] sm:$0xff] %vm1111_vm2, %v19080_v40 }
 0x1bf   :  { %v13070_v2 = vpop.permute.xlu0 %7861  ;;  %8156 = vrot.lane.b32.xlu1 %v8155_v30, %s9783_s28  ;;  %3296 = vst.msk [vmem:[#allocation2 + $0x170] sm:$0xff] %vm1111_vm2, %v19080_v40  ;;  %3298 = vst.msk [vmem:[#allocation2 + $0x180] sm:$0xff] %vm1111_vm2, %v19080_v40 }
 0x1c0   :  { %19946 = vst [vmem:[#allocation145_spill] sm:$0xff] %v13070_v2  ;;  %3299 = vst.msk [vmem:[#allocation2 + $0x188] sm:$0xff] %vm1111_vm2, %v19080_v40  ;;  %v13243_v2 = vld [vmem:[%s18748_s0 + $0x2d8] sm:$0xff] }
 0x1c1   :  { %3301 = vst.msk [vmem:[#allocation2 + $0x198] sm:$0xff] %vm1111_vm2, %v19080_v40  ;;  %3302 = vst.msk [vmem:[#allocation2 + $0x1a0] sm:$0xff] %vm1111_vm2, %v19080_v40  ;;  %8151 = vrot.lane.b32.xlu0 %v8150_v7, %s9783_s28  ;;  %v13233_v30 = vpop.permute.xlu1 %7876 }
 0x1c2   :  { %3304 = vst.msk [vmem:[#allocation2 + $0x1b0] sm:$0xff] %vm1111_vm2, %v19080_v40  ;;  %3305 = vst.msk [vmem:[#allocation2 + $0x1b8] sm:$0xff] %vm1111_vm2, %v19080_v40 }
 0x1c3   :  { %3307 = vst.msk [vmem:[#allocation2 + $0x1c8] sm:$0xff] %vm1111_vm2, %v19080_v40  ;;  %3308 = vst.msk [vmem:[#allocation2 + $0x1d0] sm:$0xff] %vm1111_vm2, %v19080_v40  ;;  %v13319_v7 = vpop.permute.xlu0 %7871 }
 0x1c4   :  { %3310 = vst.msk [vmem:[#allocation2 + $0x1e0] sm:$0xff] %vm1111_vm2, %v19080_v40  ;;  %3311 = vst.msk [vmem:[#allocation2 + $0x1e8] sm:$0xff] %vm1111_vm2, %v19080_v40 }
 0x1c5   :  { %3313 = vst.msk [vmem:[#allocation2 + $0x1f8] sm:$0xff] %vm1111_vm2, %v19080_v40  ;;  %3314 = vst.msk [vmem:[#allocation2 + $0x200] sm:$0xff] %vm1111_vm2, %v19080_v40  ;;  %v13348_v33 = vpop.permute.xlu1 %7886 }
 0x1c6   :  { %3316 = vst.msk [vmem:[#allocation2 + $0x210] sm:$0xff] %vm1111_vm2, %v19080_v40  ;;  %3317 = vst.msk [vmem:[#allocation2 + $0x218] sm:$0xff] %vm1111_vm2, %v19080_v40 }
 0x1c7   :  { %3319 = vst.msk [vmem:[#allocation2 + $0x228] sm:$0xff] %vm1111_vm2, %v19080_v40  ;;  %3320 = vst.msk [vmem:[#allocation2 + $0x230] sm:$0xff] %vm1111_vm2, %v19080_v40 }
 0x1c8   :  { %3322 = vst.msk [vmem:[#allocation2 + $0x240] sm:$0xff] %vm1111_vm2, %v19080_v40  ;;  %3323 = vst.msk [vmem:[#allocation2 + $0x248] sm:$0xff] %vm1111_vm2, %v19080_v40 }
 0x1c9   :  { %3325 = vst.msk [vmem:[#allocation2 + $0x258] sm:$0xff] %vm1111_vm2, %v19080_v40  ;;  %3326 = vst.msk [vmem:[#allocation2 + $0x260] sm:$0xff] %vm1111_vm2, %v19080_v40 }
 0x1ca   :  { %3328 = vst.msk [vmem:[#allocation2 + $0x270] sm:$0xff] %vm1111_vm2, %v19080_v40  ;;  %3329 = vst.msk [vmem:[#allocation2 + $0x278] sm:$0xff] %vm1111_vm2, %v19080_v40 }
 0x1cb   :  { %3331 = vst.msk [vmem:[#allocation2 + $0x288] sm:$0xff] %vm1111_vm2, %v19080_v40  ;;  %3332 = vst.msk [vmem:[#allocation2 + $0x290] sm:$0xff] %vm1111_vm2, %v19080_v40 }
 0x1cc   :  { %3334 = vst.msk [vmem:[#allocation2 + $0x2a0] sm:$0xff] %vm1111_vm2, %v19080_v40  ;;  %3335 = vst.msk [vmem:[#allocation2 + $0x2a8] sm:$0xff] %vm1111_vm2, %v19080_v40 }
 0x1cd   :  { %3337 = vst.msk [vmem:[#allocation2 + $0x2b8] sm:$0xff] %vm1111_vm2, %v19080_v40  ;;  %3338 = vst.msk [vmem:[#allocation2 + $0x2c0] sm:$0xff] %vm1111_vm2, %v19080_v40 }
 0x1ce   :  { %3340 = vst.msk [vmem:[#allocation2 + $0x2d0] sm:$0xff] %vm1111_vm2, %v19080_v40  ;;  %3341 = vst.msk [vmem:[#allocation2 + $0x2d8] sm:$0xff] %vm1111_vm2, %v19080_v40 }
 0x1cf   :  { %3343 = vst.msk [vmem:[#allocation2 + $0x2e8] sm:$0xff] %vm1111_vm2, %v19080_v40  ;;  %3344 = vst.msk [vmem:[#allocation2 + $0x2f0] sm:$0xff] %vm1111_vm2, %v19080_v40 }
 0x1d0   :  { %3346 = vst.msk [vmem:[#allocation2 + $0x300] sm:$0xff] %vm1111_vm2, %v19080_v40  ;;  %3347 = vst.msk [vmem:[#allocation2 + $0x308] sm:$0xff] %vm1111_vm2, %v19080_v40 }
 0x1d1   :  { %3349 = vst.msk [vmem:[#allocation2 + $0x318] sm:$0xff] %vm1111_vm2, %v19080_v40  ;;  %3350 = vst.msk [vmem:[#allocation2 + $0x320] sm:$0xff] %vm1111_vm2, %v19080_v40 }
 0x1d2   :  { %3352 = vst.msk [vmem:[#allocation2 + $0x330] sm:$0xff] %vm1111_vm2, %v19080_v40  ;;  %3353 = vst.msk [vmem:[#allocation2 + $0x338] sm:$0xff] %vm1111_vm2, %v19080_v40 }
 0x1d3   :  { %3355 = vst.msk [vmem:[#allocation2 + $0x348] sm:$0xff] %vm1111_vm2, %v19080_v40  ;;  %3356 = vst.msk [vmem:[#allocation2 + $0x350] sm:$0xff] %vm1111_vm2, %v19080_v40  ;;  %v8160_v40 = vpack.i.bf16 %v13243_v2, %v13238_v14 }
 0x1d4   :  { %19948 = vst [vmem:[#allocation8_spill] sm:$0xff] %v13233_v30  ;;  %19949 = vst [vmem:[#allocation52_spill] sm:$0xff] %v13238_v14  ;;  %v19953_v30 = vpack.i.bf16 %v13081_v28, %v13076_v10  ;;  %v13362_v14 = vpop.permute.xlu0 %7881  ;;  %v9703_v10 = vld [vmem:[%s18748_s0 + $0x338] sm:$0xff] }
 0x1d5   :  { %19950 = vst [vmem:[#allocation163_spill] sm:$0xff] %v13243_v2  ;;  %3336 = vst.msk [vmem:[#allocation2 + $0x2b0] sm:$0x3] %vm3251_vm12, %v19951_v47  ;;  %8161 = vrot.lane.b32.xlu0 %v8160_v40, %s9783_s28  ;;  %v9702_v2 = vld [vmem:[%s18748_s0 + $0x330] sm:$0xff] }
 0x1d6   :  { %3339 = vst.msk [vmem:[#allocation2 + $0x2c8] sm:$0x3] %vm3251_vm12, %v19951_v47  ;;  %3342 = vst.msk [vmem:[#allocation2 + $0x2e0] sm:$0x3] %vm3251_vm12, %v19951_v47  ;;  %8166 = vrot.lane.b32.xlu1 %v19953_v30, %s9783_s28  ;;  %v13345_v30 = vld [vmem:[%s18748_s0 + $0x350] sm:$0xff] }
 0x1d7   :  { %3345 = vst.msk [vmem:[#allocation2 + $0x2f8] sm:$0x3] %vm3251_vm12, %v19951_v47  ;;  %3348 = vst.msk [vmem:[#allocation2 + $0x310] sm:$0x3] %vm3251_vm12, %v19951_v47 }
 0x1d8   :  { %3351 = vst.msk [vmem:[#allocation2 + $0x328] sm:$0x3] %vm3251_vm12, %v19951_v47  ;;  %3354 = vst.msk [vmem:[#allocation2 + $0x340] sm:$0x3] %vm3251_vm12, %v19951_v47 }
 0x1d9   :  { %3357 = vst.msk [vmem:[#allocation2 + $0x358] sm:$0x3] %vm3251_vm12, %v19951_v47  ;;  %19952 = vst [vmem:[#allocation15_spill] sm:$0xff] %v13319_v7  ;;  %v8175_v47 = vpack.i.bf16 %v13333_v42, %v13328_v31  ;;  %v13340_v7 = vld [vmem:[%s18748_s0 + $0x348] sm:$0xff] }
 0x1da   :  { %19954 = vst [vmem:[#allocation20_spill] sm:$0xff] %v13328_v31  ;;  %19955 = vst [vmem:[#allocation134_spill] sm:$0xff] %v13333_v42  ;;  %v13358_v31 = vld [vmem:[%s18748_s0 + $0x308] sm:$0xff]  ;;  %v8185_v40 = vpack.i.bf16 %v13345_v30, %v13340_v7 }
 0x1db   :  { %19956 = vst [vmem:[#allocation84_spill] sm:$0xff] %v13348_v33  ;;  %19957 = vst [vmem:[#allocation166_spill] sm:$0xff] %v13353_v63  ;;  %v8170_v42 = vpack.i.bf16 %v13358_v31, %v13353_v63  ;;  %8176 = vrot.lane.b32.xlu1 %v8175_v47, %s9783_s28  ;;  %v13368_v33 = vpop.permute.xlu1 %7896  ;;  %v8180_v63 = vpack.i.bf16 %v9703_v10, %v9702_v2  ;;  %v6760_v2 = vld [vmem:[%s18748_s0 + $0x358] sm:$0x3]  ;;  %v1686_v10 = vrot.slane %v13340_v7, 1 }
 0x1dc   :  { %19958 = vst [vmem:[#allocation68_spill] sm:$0xff] %v13358_v31  ;;  %19959 = vst [vmem:[#allocation55_spill] sm:$0xff] %v13362_v14  ;;  %v13376_v31 = vpop.permute.xlu0 %7891 }
 0x1dd   :  { %8171 = vrot.lane.b32.xlu0 %v8170_v42, %s9783_s28  ;;  %19960 = vst [vmem:[#allocation100_spill] sm:$0xff] %v13368_v33 }
 0x1df   :  { %8186 = vrot.lane.b32.xlu1 %v8185_v40, %s9783_s28  ;;  %v13380_v47 = vpop.permute.xlu1 %7906  ;;  %v1689_v40 = vrot.slane %v6760_v2, 1 }
 0x1e0   :  { %v13382_v42 = vpop.permute.xlu0 %7901 }
 0x1e1   :  { %8181 = vrot.lane.b32.xlu0 %v8180_v63, %s9783_s28 }
 0x1e3   :  { %8196 = vrot.lane.b32.xlu1 %v19870_v50, %s9784_s10  ;;  %v13388_v33 = vpop.permute.xlu1 %7916 }
 0x1e4   :  { %19961 = vst [vmem:[#allocation81_spill] sm:$0xff] %v13388_v33  ;;  %v13390_v14 = vpop.permute.xlu0 %7911 }
 0x1e5   :  { %8191 = vrot.lane.b32.xlu0 %v19866_v35, %s9784_s10  ;;  %19962 = vst [vmem:[#allocation57_spill] sm:$0xff] %v13390_v14  ;;  %v1687_v35 = vrot.slane %v13345_v30, 1  ;;  %v1692_v14 = vrot.slane %v13345_v30, 2  ;;  %v7713_v30 = vunpack.i.l.bf16 %v12735_v9 }
 0x1e7   :  { %8206 = vrot.lane.b32.xlu1 %v19877_v4, %s9784_s10  ;;  %v13396_v63 = vpop.permute.xlu1 %7926 }
 0x1e8   :  { %19963 = vst [vmem:[#allocation77_spill] sm:$0xff] %v13396_v63  ;;  %v13401_v50 = vpop.permute.xlu0 %7921  ;;  %v1690_v63 = vsel %vm123_vm0, %v1687_v35, %v1689_v40 }
 0x1e9   :  { %8201 = vrot.lane.b32.xlu0 %v19869_v60, %s9784_s10  ;;  %19964 = vst [vmem:[#allocation168_spill] sm:$0xff] %v13401_v50  ;;  %v1688_v50 = vsel %vm123_vm0, %v1686_v10, %v1687_v35  ;;  %v7718_v10 = vunpack.i.l.bf16 %v12719_v44  ;;  %v7714_v35 = vunpack.i.h.bf16 %v12735_v9 }
 0x1eb   :  { %8216 = vrot.lane.b32.xlu1 %v19880_v57, %s9784_s10  ;;  %v13409_v60 = vpop.permute.xlu1 %7936 }
 0x1ec   :  { %v13411_v4 = vpop.permute.xlu0 %7931 }
 0x1ed   :  { %8211 = vrot.lane.b32.xlu0 %v19875_v49, %s9784_s10  ;;  %19965 = vst [vmem:[#allocation154_spill] sm:$0xff] %v13411_v4  ;;  %v1691_v49 = vrot.slane %v13340_v7, 2  ;;  %v8265_v4 = vpack.i.bf16 %v1690_v63, %v1688_v50  ;;  %v7729_v7 = vunpack.i.h.bf16 %v12750_v23  ;;  %v1694_v63 = vrot.slane %v6760_v2, 2  ;;  %v9706_v50 = vld [vmem:[%s18748_s0 + $0x1b8] sm:$0xff]  ;;  %v9707_v2 = vld [vmem:[%s18748_s0 + $0x1b0] sm:$0xff] }
 0x1ef   :  { %8226 = vrot.lane.b32.xlu1 %v19885_v3, %s9784_s10  ;;  %v13419_v57 = vpop.permute.xlu1 %7946  ;;  %v7719_v3 = vunpack.i.h.bf16 %v12719_v44  ;;  %v9704_v44 = vld [vmem:[%s18748_s0 + $0x1d0] sm:$0xff] }
 0x1f0   :  { %v13423_v33 = vpop.permute.xlu0 %7941 }
 0x1f1   :  { %8221 = vrot.lane.b32.xlu0 %v19879_v8, %s9784_s10  ;;  %19966 = vst [vmem:[#allocation60_spill] sm:$0xff] %v13423_v33  ;;  %v13488_v33 = vsel %vm204_vm1, %v1691_v49, %v1692_v14 }
 0x1f3   :  { %8236 = vrot.lane.b32.xlu1 %v19891_v61, %s9784_s10  ;;  %v13432_v8 = vpop.permute.xlu1 %7956  ;;  %v13444_v61 = vsel %vm1111_vm2, %v9704_v44, %v7719_v3  ;;  %v7724_v3 = vunpack.i.h.bf16 %v12760_v45  ;;  %v7723_v44 = vunpack.i.l.bf16 %v12760_v45 }
 0x1f4   :  { %19967 = vst [vmem:[#allocation165_spill] sm:$0xff] %v13432_v8  ;;  %v13436_v40 = vpop.permute.xlu0 %7951 }
 0x1f5   :  { %8231 = vrot.lane.b32.xlu0 %v19884_v58, %s9784_s10  ;;  %19968 = vst [vmem:[#allocation28_spill] sm:$0xff] %v13436_v40  ;;  %v9705_v58 = vld [vmem:[%s18748_s0 + $0x1c8] sm:$0xff]  ;;  %v7728_v40 = vunpack.i.l.bf16 %v12750_v23  ;;  %v9708_v23 = vld [vmem:[%s18748_s0 + $0x200] sm:$0xff] }
 0x1f6   :  { %v13450_v9 = vsel %vm1111_vm2, %v9705_v58, %v7718_v10  ;;  %v13469_v10 = vsel %vm1111_vm2, %v9707_v2, %v7713_v30  ;;  %v13476_v45 = vsel %vm1111_vm2, %v9708_v23, %v7729_v7  ;;  %v7734_v58 = vunpack.i.h.bf16 %v12787_v46 }
 0x1f7   :  { %8246 = vrot.lane.b32.xlu1 %v19897_v62, %s9784_s10  ;;  %v13456_v62 = vsel %vm1111_vm2, %v9706_v50, %v7714_v35  ;;  %v13463_v8 = vpop.permute.xlu1 %7966  ;;  %v7739_v35 = vunpack.i.h.bf16 %v12772_v1  ;;  %v7733_v50 = vunpack.i.l.bf16 %v12787_v46  ;;  %v7749_v30 = vunpack.i.h.bf16 %v12802_v17 }
 0x1f8   :  { %19969 = vst [vmem:[#allocation58_spill] sm:$0xff] %v13463_v8  ;;  %v13481_v8 = vpop.permute.xlu0 %7961  ;;  %v7748_v2 = vunpack.i.l.bf16 %v12802_v17  ;;  %v13491_v7 = vsel %vm204_vm1, %v1692_v14, %v1694_v63  ;;  %v13505_v17 = vsel %vm1111_vm2, %v12940_v36, %v7723_v44  ;;  %v7743_v63 = vunpack.i.l.bf16 %v12812_v48 }
 0x1f9   :  { %8241 = vrot.lane.b32.xlu0 %v19890_v55, %s9784_s10  ;;  %v7738_v55 = vunpack.i.l.bf16 %v12772_v1  ;;  %v9709_v1 = vld [vmem:[%s18748_s0 + $0x1f8] sm:$0xff]  ;;  %v13513_v49 = vsel %vm1111_vm2, %v12961_v27, %v7739_v35  ;;  %v13524_v36 = vsel %vm1111_vm2, %v12976_v18, %v7734_v58  ;;  %v13537_v44 = vsel %vm1111_vm2, %v12991_v32, %v7749_v30 }
 0x1fa   :  { %v13497_v46 = vsel %vm1111_vm2, %v9709_v1, %v7728_v40  ;;  %v7744_v40 = vunpack.i.h.bf16 %v12812_v48  ;;  %v7758_v18 = vunpack.i.l.bf16 %v12824_v12  ;;  %v7753_v35 = vunpack.i.l.bf16 %v12838_v41 }
 0x1fb   :  { %8256 = vrot.lane.b32.xlu1 %v19901_v29, %s9784_s10  ;;  %v13501_v29 = vsel %vm1111_vm2, %v12945_v19, %v7724_v3  ;;  %v13509_v14 = vpop.permute.xlu1 %7976  ;;  %v7759_v19 = vunpack.i.h.bf16 %v12824_v12  ;;  %v13520_v3 = vsel %vm1111_vm2, %v12956_v38, %v7738_v55  ;;  %v13541_v38 = vsel %vm1111_vm2, %v12986_v5, %v7748_v2 }
 0x1fc   :  { %v13530_v27 = vpop.permute.xlu0 %7971  ;;  %v7769_v23 = vunpack.i.h.bf16 %v12853_v13  ;;  %v7764_v55 = vunpack.i.h.bf16 %v12863_v34  ;;  %v13555_v5 = vsel %vm1111_vm2, %v13006_v6, %v7744_v40  ;;  %v13559_v12 = vsel %vm1111_vm2, %v13001_v20, %v7743_v63 }
 0x1fd   :  { %8251 = vrot.lane.b32.xlu0 %v19895_v16, %s9784_s10  ;;  %v13528_v16 = vsel %vm1111_vm2, %v12971_v37, %v7733_v50  ;;  %v7754_v37 = vunpack.i.h.bf16 %v12838_v41  ;;  %v13563_v41 = vsel %vm1111_vm2, %v13021_v15, %v7759_v19  ;;  %v7779_v58 = vunpack.i.h.bf16 %v12877_v54 }
 0x1fe   :  { %v7774_v50 = vunpack.i.h.bf16 %v12884_v0  ;;  %v7773_v30 = vunpack.i.l.bf16 %v12884_v0  ;;  %v13576_v20 = vsel %vm1111_vm2, %v13016_v51, %v7758_v18  ;;  %v7789_v15 = vunpack.i.h.bf16 %v12895_v21 }
 0x1ff   :  { %8266 = vrot.lane.b32.xlu1 %v8265_v4, %s9784_s10  ;;  %v7768_v4 = vunpack.i.l.bf16 %v12853_v13  ;;  %v13551_v32 = vpop.permute.xlu1 %7986  ;;  %v7763_v13 = vunpack.i.l.bf16 %v12863_v34  ;;  %v13580_v34 = vsel %vm1111_vm2, %v13036_v39, %v7754_v37  ;;  %v13586_v0 = vsel %vm1111_vm2, %v13031_v11, %v7753_v35  ;;  %v19976_v37 = vld [vmem:[#allocation134_spill] sm:$0xff]  ;;  %v19977_v35 = vld [vmem:[#allocation20_spill] sm:$0xff] }
 0x200   :  { %v13570_v6 = vpop.permute.xlu0 %7981  ;;  %v13590_v2 = vsel %vm1111_vm2, %v13051_v53, %v7769_v23  ;;  %v13598_v39 = vsel %vm1111_vm2, %v13066_v22, %v7764_v55  ;;  %v7784_v53 = vunpack.i.h.bf16 %v12897_v59  ;;  %v7783_v11 = vunpack.i.l.bf16 %v12897_v59  ;;  %v19971_v22 = vld [vmem:[#allocation146_spill] sm:$0xff]  ;;  %v19975_v59 = vld [vmem:[#allocation56_spill] sm:$0xff] }
 0x201   :  { %8261 = vrot.lane.b32.xlu0 %v12470_v26, %s9784_s10  ;;  %v7778_v26 = vunpack.i.l.bf16 %v12877_v54  ;;  %v7788_v54 = vunpack.i.l.bf16 %v12895_v21  ;;  %v13606_v51 = vsel %vm1111_vm2, %v13061_v24, %v7763_v13  ;;  %v13613_v1 = vsel %vm1111_vm2, %v13081_v28, %v7779_v58  ;;  %v19973_v24 = vld [vmem:[#allocation52_spill] sm:$0xff] }
 0x202   :  { %v13625_v19 = vsel %vm1111_vm2, %v19973_v24, %v7773_v30  ;;  %v13633_v28 = vsel %vm1111_vm2, %v19976_v37, %v7789_v15  ;;  %v19978_v55 = vld [vmem:[#allocation120_spill] sm:$0xff]  ;;  %v19981_v24 = vld [vmem:[#allocation106_spill] sm:$0xff] }
 0x203   :  { %8276 = vrot.lane.b32.xlu1 %v19912_v52, %s9785_s8  ;;  %v13594_v52 = vsel %vm1111_vm2, %v13046_v43, %v7768_v4  ;;  %v13602_v21 = vpop.permute.xlu1 %7996  ;;  %v7798_v43 = vunpack.i.l.bf16 %v12906_v25  ;;  %v13617_v40 = vsel %vm1111_vm2, %v19971_v22, %v7778_v26  ;;  %v13637_v23 = vsel %vm1111_vm2, %v19977_v35, %v7788_v54  ;;  %v19979_v26 = vld [vmem:[#allocation124_spill] sm:$0xff]  ;;  %v19980_v22 = vld [vmem:[#allocation127_spill] sm:$0xff] }
 0x204   :  { %19970 = vst [vmem:[#allocation119_spill] sm:$0xff] %v13602_v21  ;;  %v13627_v18 = vpop.permute.xlu0 %7991  ;;  %v7799_v4 = vunpack.i.h.bf16 %v12906_v25  ;;  %v7793_v13 = vunpack.i.l.bf16 %v19978_v55  ;;  %v7794_v58 = vunpack.i.h.bf16 %v19978_v55  ;;  %v7808_v30 = vunpack.i.l.bf16 %v19979_v26  ;;  %v19984_v25 = vld [vmem:[#allocation166_spill] sm:$0xff] }
 0x205   :  { %8271 = vrot.lane.b32.xlu0 %v19905_v56, %s9785_s8  ;;  %v19972_v56 = vld [vmem:[#allocation163_spill] sm:$0xff]  ;;  %19974 = vst [vmem:[#allocation109_spill] sm:$0xff] %v13627_v18  ;;  %v13655_v37 = vsel %vm1111_vm2, %v19984_v25, %v7783_v11  ;;  %v13659_v35 = vsel %vm1144_vm3, %v13450_v9, %v7798_v43  ;;  %v7804_v55 = vunpack.i.h.bf16 %v19980_v22  ;;  %v19986_v18 = vld [vmem:[#allocation62_spill] sm:$0xff] }
 0x206   :  { %v13621_v63 = vsel %vm1111_vm2, %v19972_v56, %v7774_v50  ;;  %v7809_v50 = vunpack.i.h.bf16 %v19979_v26  ;;  %v7803_v56 = vunpack.i.l.bf16 %v19980_v22  ;;  %v19985_v26 = vld [vmem:[#allocation140_spill] sm:$0xff]  ;;  %v7813_v21 = vunpack.i.l.bf16 %v19986_v18  ;;  %v19989_v43 = vld [vmem:[#allocation126_spill] sm:$0xff] }
 0x207   :  { %8286 = vrot.lane.b32.xlu1 %v19975_v59, %s9785_s8  ;;  %v13647_v15 = vpop.permute.xlu1 %8006  ;;  %v19983_v59 = vld [vmem:[#allocation68_spill] sm:$0xff]  ;;  %v7819_v48 = vunpack.i.h.bf16 %v19985_v26  ;;  %v13672_v11 = vsel %vm1144_vm3, %v13444_v61, %v7799_v4  ;;  %v13676_v9 = vsel %vm1144_vm3, %v13469_v10, %v7793_v13  ;;  %v7829_v22 = vunpack.i.h.bf16 %v19989_v43  ;;  %v19990_v4 = vld [vmem:[#allocation117_spill] sm:$0xff] }
 0x208   :  { %19982 = vst [vmem:[#allocation85_spill] sm:$0xff] %v13647_v15  ;;  %v13651_v54 = vsel %vm1111_vm2, %v19983_v59, %v7784_v53  ;;  %v7814_v15 = vunpack.i.h.bf16 %v19986_v18  ;;  %v13666_v53 = vpop.permute.xlu0 %8001  ;;  %v19988_v59 = vld [vmem:[#allocation59_spill] sm:$0xff]  ;;  %v7828_v25 = vunpack.i.l.bf16 %v19989_v43  ;;  %v13682_v18 = vsel %vm1144_vm3, %v13456_v62, %v7794_v58  ;;  %v19995_v43 = vld [vmem:[#allocation152_spill] sm:$0xff] }
 0x209   :  { %8281 = vrot.lane.b32.xlu0 %v19981_v24, %s9785_s8  ;;  %v7818_v24 = vunpack.i.l.bf16 %v19985_v26  ;;  %19987 = vst [vmem:[#allocation48_spill] sm:$0xff] %v13666_v53  ;;  %v13686_v26 = vsel %vm1144_vm3, %v13497_v46, %v7808_v30  ;;  %v13690_v61 = vsel %vm1144_vm3, %v13476_v45, %v7809_v50  ;;  %v13694_v10 = vsel %vm1144_vm3, %v13505_v17, %v7803_v56  ;;  %v19992_v58 = vld [vmem:[#allocation31_spill] sm:$0xff] }
 0x20a   :  { %v13702_v62 = vsel %vm1144_vm3, %v13501_v29, %v7804_v55  ;;  %v7824_v46 = vunpack.i.h.bf16 %v19992_v58  ;;  %v7823_v30 = vunpack.i.l.bf16 %v19992_v58  ;;  %v13713_v17 = vsel %vm1144_vm3, %v13513_v49, %v7819_v48  ;;  %v19996_v48 = vld [vmem:[#allocation63_spill] sm:$0xff]  ;;  %v19998_v58 = vld [vmem:[#allocation141_spill] sm:$0xff] }
 0x20b   :  { %8296 = vrot.lane.b32.xlu1 %v19988_v59, %s9785_s8  ;;  %v13698_v13 = vpop.permute.xlu1 %8016  ;;  %v19993_v59 = vld [vmem:[#allocation151_spill] sm:$0xff]  ;;  %v13709_v50 = vsel %vm1144_vm3, %v13520_v3, %v7818_v24  ;;  %v13717_v56 = vsel %vm1144_vm3, %v13528_v16, %v7813_v21  ;;  %v13721_v29 = vsel %vm1144_vm3, %v13524_v36, %v7814_v15  ;;  %v13729_v3 = vsel %vm1144_vm3, %v13541_v38, %v7828_v25  ;;  %v19997_v15 = vld [vmem:[#allocation66_spill] sm:$0xff] }
 0x20c   :  { %19991 = vst [vmem:[#allocation125_spill] sm:$0xff] %v13698_v13  ;;  %v7838_v45 = vunpack.i.l.bf16 %v19993_v59  ;;  %v13723_v55 = vpop.permute.xlu0 %8011  ;;  %v13733_v49 = vsel %vm1144_vm3, %v13537_v44, %v7829_v22  ;;  %v7839_v16 = vunpack.i.h.bf16 %v19993_v59  ;;  %v7833_v21 = vunpack.i.l.bf16 %v19996_v48  ;;  %v20002_v13 = vld [vmem:[#allocation142_spill] sm:$0xff] }
 0x20d   :  { %8291 = vrot.lane.b32.xlu0 %v19990_v4, %s9785_s8  ;;  %19994 = vst [vmem:[#allocation95_spill] sm:$0xff] %v13723_v55  ;;  %v7834_v36 = vunpack.i.h.bf16 %v19996_v48  ;;  %v7849_v24 = vunpack.i.h.bf16 %v19997_v15  ;;  %v7848_v4 = vunpack.i.l.bf16 %v19997_v15  ;;  %v19999_v55 = vld [vmem:[#allocation131_spill] sm:$0xff]  ;;  %v13747_v44 = vsel %vm1144_vm3, %v13559_v12, %v7823_v30  ;;  %v20001_v48 = vld [vmem:[#allocation50_spill] sm:$0xff]  ;;  %v20004_v30 = vld [vmem:[#allocation136_spill] sm:$0xff] }
 0x20e   :  { %v13751_v22 = vsel %vm1144_vm3, %v13555_v5, %v7824_v46  ;;  %v13755_v25 = vsel %vm1144_vm3, %v13576_v20, %v7838_v45  ;;  %v7844_v59 = vunpack.i.h.bf16 %v19998_v58  ;;  %v7859_v15 = vunpack.i.h.bf16 %v20001_v48  ;;  %v20005_v46 = vld [vmem:[#allocation73_spill] sm:$0xff] }
 0x20f   :  { %8306 = vrot.lane.b32.xlu1 %v19995_v43, %s9785_s8  ;;  %v7843_v43 = vunpack.i.l.bf16 %v19998_v58  ;;  %v13743_v38 = vpop.permute.xlu1 %8026  ;;  %v7853_v53 = vunpack.i.l.bf16 %v20002_v13  ;;  %v13768_v5 = vsel %vm1144_vm3, %v13563_v41, %v7839_v16  ;;  %v13772_v20 = vsel %vm1144_vm3, %v13586_v0, %v7833_v21  ;;  %v20006_v16 = vld [vmem:[#allocation70_spill] sm:$0xff] }
 0x210   :  { %20000 = vst [vmem:[#allocation45_spill] sm:$0xff] %v13743_v38  ;;  %v7854_v38 = vunpack.i.h.bf16 %v20002_v13  ;;  %v13762_v12 = vpop.permute.xlu0 %8021  ;;  %v7869_v45 = vunpack.i.h.bf16 %v20005_v46  ;;  %v7868_v58 = vunpack.i.l.bf16 %v20005_v46  ;;  %v13778_v13 = vsel %vm1144_vm3, %v13580_v34, %v7834_v36  ;;  %v20008_v36 = vld [vmem:[#allocation145_spill] sm:$0xff]  ;;  %v13805_v46 = vld [vmem:[#allocation2 + $0x8] sm:$0xff] }
 0x211   :  { %8301 = vrot.lane.b32.xlu0 %v19999_v55, %s9785_s8  ;;  %v7858_v55 = vunpack.i.l.bf16 %v20001_v48  ;;  %20003 = vst [vmem:[#allocation36_spill] sm:$0xff] %v13762_v12  ;;  %v13782_v48 = vsel %vm1144_vm3, %v13594_v52, %v7848_v4  ;;  %v13786_v41 = vsel %vm1144_vm3, %v13590_v2, %v7849_v24  ;;  %v13790_v0 = vsel %vm1144_vm3, %v13606_v51, %v7843_v43  ;;  %v13803_v24 = vld [vmem:[#allocation2] sm:$0xff]  ;;  %v13807_v51 = vld [vmem:[#allocation2 + $0x10] sm:$0x3] }
 0x212   :  { %v13798_v34 = vsel %vm1144_vm3, %v13598_v39, %v7844_v59  ;;  %v7864_v52 = vunpack.i.h.bf16 %v20008_v36  ;;  %v7863_v4 = vunpack.i.l.bf16 %v20008_v36  ;;  %20010 = vst [vmem:[#allocation130_spill] sm:$0xff] %v13803_v24  ;;  %20011 = vst [vmem:[#allocation139_spill] sm:$0xff] %v13805_v46  ;;  %v13815_v39 = vsel %vm1144_vm3, %v13613_v1, %v7859_v15 }
 0x213   :  { %8316 = vrot.lane.b32.xlu1 %v20004_v30, %s9785_s8  ;;  %v13794_v21 = vpop.permute.xlu1 %8036  ;;  %v20009_v30 = vld [vmem:[#allocation8_spill] sm:$0xff]  ;;  %20012 = vst [vmem:[#allocation98_spill] sm:$0xff] %v13807_v51  ;;  %v13811_v43 = vsel %vm1144_vm3, %v13617_v40, %v7858_v55  ;;  %v13819_v59 = vsel %vm1144_vm3, %v13625_v19, %v7853_v53  ;;  %v13831_v40 = vsel %vm1144_vm3, %v13637_v23, %v7868_v58  ;;  %v20015_v53 = vld [vmem:[#allocation15_spill] sm:$0xff]  ;;  %v3526_v23 = vrot.slane %v13805_v46, 1 }
 0x214   :  { %20007 = vst [vmem:[#allocation61_spill] sm:$0xff] %v13794_v21  ;;  %v7878_v2 = vunpack.i.l.bf16 %v20009_v30  ;;  %v13825_v36 = vpop.permute.xlu0 %8031  ;;  %v20014_v21 = vld [vmem:[#allocation75_spill] sm:$0xff]  ;;  %v13835_v1 = vsel %vm1144_vm3, %v13633_v28, %v7869_v45  ;;  %v7879_v19 = vunpack.i.h.bf16 %v20009_v30  ;;  %v7874_v15 = vunpack.i.h.bf16 %v20015_v53 }
 0x215   :  { %8311 = vrot.lane.b32.xlu0 %v20006_v16, %s9785_s8  ;;  %v13823_v16 = vsel %vm1144_vm3, %v13621_v63, %v7854_v38  ;;  %20013 = vst [vmem:[#allocation113_spill] sm:$0xff] %v13825_v36  ;;  %v7873_v63 = vunpack.i.l.bf16 %v20015_v53  ;;  %v20016_v38 = vld [vmem:[#allocation156_spill] sm:$0xff]  ;;  %v3528_v58 = vrot.slane %v13807_v51, 1  ;;  %v13849_v28 = vsel %vm1144_vm3, %v13655_v37, %v7863_v4  ;;  %v20022_v4 = vld [vmem:[#allocation158_spill] sm:$0xff] }
 0x216   :  { %v13853_v45 = vsel %vm1144_vm3, %v13651_v54, %v7864_v52  ;;  %v13857_v30 = vsel %vm1177_vm5, %v13659_v35, %v7878_v2  ;;  %v20018_v53 = vld [vmem:[#allocation84_spill] sm:$0xff]  ;;  %v13870_v54 = vsel %vm1177_vm5, %v13672_v11, %v7879_v19  ;;  %v7894_v52 = vunpack.i.h.bf16 %v13376_v31 }
 0x217   :  { %8326 = vrot.lane.b32.xlu1 %v20014_v21, %s9785_s8  ;;  %v13842_v55 = vpop.permute.xlu1 %8046  ;;  %v3525_v21 = vrot.slane %v13803_v24, 1  ;;  %v7889_v24 = vunpack.i.h.bf16 %v20018_v53  ;;  %v20020_v36 = vld [vmem:[#allocation100_spill] sm:$0xff]  ;;  %v7893_v2 = vunpack.i.l.bf16 %v13376_v31  ;;  %v7908_v19 = vunpack.i.l.bf16 %v13380_v47 }
 0x218   :  { %20017 = vst [vmem:[#allocation90_spill] sm:$0xff] %v13842_v55  ;;  %v20019_v55 = vld [vmem:[#allocation55_spill] sm:$0xff]  ;;  %v7898_v12 = vunpack.i.l.bf16 %v20020_v36  ;;  %v13864_v37 = vpop.permute.xlu0 %8041  ;;  %v7899_v35 = vunpack.i.h.bf16 %v20020_v36  ;;  %v3529_v36 = vsel %vm123_vm0, %v3526_v23, %v3528_v58 }
 0x219   :  { %8321 = vrot.lane.b32.xlu0 %v20016_v38, %s9785_s8  ;;  %v7888_v38 = vunpack.i.l.bf16 %v20018_v53  ;;  %v7884_v46 = vunpack.i.h.bf16 %v20019_v55  ;;  %v7883_v51 = vunpack.i.l.bf16 %v20019_v55  ;;  %20021 = vst [vmem:[#allocation32_spill] sm:$0xff] %v13864_v37  ;;  %v13877_v55 = vsel %vm1177_vm5, %v13676_v9, %v7873_v63 }
 0x21a   :  { %v13881_v53 = vsel %vm1177_vm5, %v13682_v18, %v7874_v15  ;;  %v3527_v11 = vsel %vm123_vm0, %v3525_v21, %v3526_v23  ;;  %v7909_v9 = vunpack.i.h.bf16 %v13380_v47  ;;  %v7903_v18 = vunpack.i.l.bf16 %v13382_v42 }
 0x21b   :  { %8336 = vrot.lane.b32.xlu1 %v20022_v4, %s9785_s8  ;;  %v20023_v4 = vld [vmem:[#allocation159_spill] sm:$0xff]  ;;  %v13885_v37 = vpop.permute.xlu1 %8056  ;;  %v13891_v31 = vsel %vm1177_vm5, %v13686_v26, %v7888_v38  ;;  %v13898_v15 = vsel %vm1177_vm5, %v13690_v61, %v7889_v24  ;;  %v13902_v63 = vsel %vm1177_vm5, %v13694_v10, %v7883_v51  ;;  %v13906_v21 = vsel %vm1177_vm5, %v13702_v62, %v7884_v46  ;;  %v20025_v24 = vld [vmem:[#allocation81_spill] sm:$0xff] }
 0x21c   :  { %v13910_v26 = vsel %vm1177_vm5, %v13709_v50, %v7898_v12  ;;  %v13912_v23 = vpop.permute.xlu0 %8051  ;;  %v20024_v47 = vpack.i.bf16 %v13491_v7, %v13488_v33  ;;  %v13920_v61 = vsel %vm1177_vm5, %v13713_v17, %v7899_v35  ;;  %v13924_v10 = vsel %vm1177_vm5, %v13717_v56, %v7893_v2  ;;  %v20026_v7 = vld [vmem:[#allocation57_spill] sm:$0xff]  ;;  %v20027_v17 = vld [vmem:[#allocation135_spill] sm:$0xff] }
 0x21d   :  { %8331 = vrot.lane.b32.xlu0 %v20023_v4, %s9785_s8  ;;  %v13928_v62 = vsel %vm1177_vm5, %v13721_v29, %v7894_v52  ;;  %v8350_v50 = vpack.i.bf16 %v3529_v36, %v3527_v11  ;;  %v7904_v12 = vunpack.i.h.bf16 %v13382_v42  ;;  %v7919_v46 = vunpack.i.h.bf16 %v20025_v24  ;;  %v20028_v35 = vld [vmem:[#allocation77_spill] sm:$0xff]  ;;  %v20029_v4 = vld [vmem:[#allocation168_spill] sm:$0xff] }
 0x21e   :  { %v7918_v33 = vunpack.i.l.bf16 %v20025_v24  ;;  %v7913_v51 = vunpack.i.l.bf16 %v20026_v7  ;;  %v13940_v56 = vsel %vm1177_vm5, %v13729_v3, %v7908_v19  ;;  %v13944_v29 = vsel %vm1177_vm5, %v13733_v49, %v7909_v9  ;;  %v20030_v9 = vld [vmem:[#allocation154_spill] sm:$0xff] }
 0x21f   :  { %8346 = vrot.lane.b32.xlu1 %v20024_v47, %s9785_s8  ;;  %v13936_v58 = vpop.permute.xlu1 %8066  ;;  %v13948_v42 = vsel %vm1177_vm5, %v13747_v44, %v7903_v18  ;;  %v7914_v38 = vunpack.i.h.bf16 %v20026_v7  ;;  %v7929_v52 = vunpack.i.h.bf16 %v20028_v35  ;;  %v7928_v2 = vunpack.i.l.bf16 %v20028_v35 }
 0x220   :  { %v7924_v11 = vunpack.i.h.bf16 %v20029_v4  ;;  %v7923_v36 = vunpack.i.l.bf16 %v20029_v4  ;;  %v13955_v3 = vpop.permute.xlu0 %8061  ;;  %v7939_v19 = vunpack.i.h.bf16 %v13409_v60  ;;  %v7938_v49 = vunpack.i.l.bf16 %v13409_v60 }
 0x221   :  { %8341 = vrot.lane.b32.xlu0 %v20027_v17, %s9785_s8  ;;  %v7934_v47 = vunpack.i.h.bf16 %v20030_v9  ;;  %v7933_v44 = vunpack.i.l.bf16 %v20030_v9  ;;  %v13963_v18 = vsel %vm1177_vm5, %v13751_v22, %v7904_v12  ;;  %v13967_v24 = vsel %vm1177_vm5, %v13755_v25, %v7918_v33  ;;  %v20031_v33 = vld [vmem:[#allocation60_spill] sm:$0xff] }
 0x222   :  { %v13971_v7 = vsel %vm1177_vm5, %v13768_v5, %v7919_v46  ;;  %v13975_v17 = vsel %vm1177_vm5, %v13772_v20, %v7913_v51  ;;  %v13982_v22 = vsel %vm1177_vm5, %v13778_v13, %v7914_v38  ;;  %v7949_v12 = vunpack.i.h.bf16 %v13419_v57  ;;  %v20032_v51 = vld [vmem:[#allocation165_spill] sm:$0xff] }
 0x223   :  { %v13977_v60 = vpop.permute.xlu1 %8076  ;;  %v7948_v25 = vunpack.i.l.bf16 %v13419_v57  ;;  %v7943_v35 = vunpack.i.l.bf16 %v20031_v33  ;;  %v13989_v5 = vsel %vm1177_vm5, %v13782_v48, %v7928_v2  ;;  %v13993_v20 = vsel %vm1177_vm5, %v13786_v41, %v7929_v52 }
 0x224   :  { %v14001_v13 = vsel %vm1177_vm5, %v13798_v34, %v7924_v11  ;;  %v14003_v46 = vpop.permute.xlu0 %8071  ;;  %v14007_v57 = vsel %vm1177_vm5, %v13811_v43, %v7938_v49  ;;  %v14011_v48 = vsel %vm1177_vm5, %v13815_v39, %v7939_v19  ;;  %v14015_v41 = vsel %vm1177_vm5, %v13819_v59, %v7933_v44  ;;  %v20033_v43 = vld [vmem:[#allocation28_spill] sm:$0xff] }
 0x225   :  { %8351 = vrot.lane.b32.xlu0 %v8350_v50, %s9778_s25  ;;  %v13997_v50 = vsel %vm1177_vm5, %v13790_v0, %v7923_v36  ;;  %v14019_v0 = vsel %vm1177_vm5, %v13823_v16, %v7934_v47  ;;  %v7944_v34 = vunpack.i.h.bf16 %v20031_v33  ;;  %v7959_v38 = vunpack.i.h.bf16 %v20032_v51  ;;  %v20034_v36 = vld [vmem:[#allocation58_spill] sm:$0xff] }
 0x226   :  { %v7958_v52 = vunpack.i.l.bf16 %v20032_v51  ;;  %v7953_v2 = vunpack.i.l.bf16 %v20033_v43  ;;  %v14029_v39 = vsel %vm1177_vm5, %v13831_v40, %v7948_v25  ;;  %v14033_v59 = vsel %vm1177_vm5, %v13835_v1, %v7949_v12 }
 0x227   :  { %v14025_v4 = vpop.permute.xlu1 %8086  ;;  %v14037_v16 = vsel %vm1177_vm5, %v13849_v28, %v7943_v35  ;;  %v7954_v11 = vunpack.i.h.bf16 %v20033_v43  ;;  %v7969_v19 = vunpack.i.h.bf16 %v20034_v36  ;;  %v7968_v49 = vunpack.i.l.bf16 %v20034_v36 }
 0x228   :  { %v7964_v9 = vunpack.i.h.bf16 %v13481_v8  ;;  %v7963_v47 = vunpack.i.l.bf16 %v13481_v8  ;;  %v14044_v40 = vpop.permute.xlu0 %8081  ;;  %v7979_v44 = vunpack.i.h.bf16 %v13509_v14  ;;  %v7978_v1 = vunpack.i.l.bf16 %v13509_v14 }
 0x229   :  { %v7974_v12 = vunpack.i.h.bf16 %v13530_v27  ;;  %v7973_v28 = vunpack.i.l.bf16 %v13530_v27  ;;  %v14052_v25 = vsel %vm1177_vm5, %v13853_v45, %v7944_v34  ;;  %v14056_v33 = vsel %vm1210_vm6, %v13857_v30, %v7958_v52  ;;  %v20035_v52 = vld [vmem:[#allocation119_spill] sm:$0xff] }
 0x22a   :  { %v14060_v8 = vsel %vm1210_vm6, %v13870_v54, %v7959_v38  ;;  %v14064_v35 = vsel %vm1210_vm6, %v13877_v55, %v7953_v2  ;;  %v14070_v27 = vsel %vm1210_vm6, %v13881_v53, %v7954_v11  ;;  %v7989_v45 = vunpack.i.h.bf16 %v13551_v32 }
 0x22b   :  { %v14066_v14 = vpop.permute.xlu1 %8096  ;;  %v7988_v34 = vunpack.i.l.bf16 %v13551_v32  ;;  %v7983_v30 = vunpack.i.l.bf16 %v13570_v6  ;;  %v14077_v54 = vsel %vm1210_vm6, %v13891_v31, %v7968_v49  ;;  %v14081_v55 = vsel %vm1210_vm6, %v13898_v15, %v7969_v19  ;;  %v20037_v19 = vld [vmem:[#allocation85_spill] sm:$0xff] }
 0x22c   :  { %v14085_v51 = vsel %vm1210_vm6, %v13902_v63, %v7963_v47  ;;  %v14089_v53 = vsel %vm1210_vm6, %v13906_v21, %v7964_v9  ;;  %v14091_v38 = vpop.permute.xlu0 %8091  ;;  %v14095_v32 = vsel %vm1210_vm6, %v13910_v26, %v7978_v1  ;;  %v14099_v31 = vsel %vm1210_vm6, %v13920_v61, %v7979_v44  ;;  %v20036_v26 = vld [vmem:[#allocation109_spill] sm:$0xff]  ;;  %v20038_v47 = vld [vmem:[#allocation48_spill] sm:$0xff] }
 0x22d   :  { %v14103_v15 = vsel %vm1210_vm6, %v13924_v10, %v7973_v28  ;;  %v14107_v63 = vsel %vm1210_vm6, %v13928_v62, %v7974_v12  ;;  %v7984_v21 = vunpack.i.h.bf16 %v13570_v6  ;;  %v7999_v43 = vunpack.i.h.bf16 %v20035_v52  ;;  %v20039_v12 = vld [vmem:[#allocation125_spill] sm:$0xff] }
 0x22e   :  { %v7998_v2 = vunpack.i.l.bf16 %v20035_v52  ;;  %v7993_v11 = vunpack.i.l.bf16 %v20036_v26  ;;  %v14117_v61 = vsel %vm1210_vm6, %v13940_v56, %v7988_v34  ;;  %v14121_v10 = vsel %vm1210_vm6, %v13944_v29, %v7989_v45  ;;  %v20040_v45 = vld [vmem:[#allocation95_spill] sm:$0xff] }
 0x22f   :  { %v14113_v36 = vpop.permute.xlu1 %8106  ;;  %v14125_v62 = vsel %vm1210_vm6, %v13948_v42, %v7983_v30  ;;  %v7994_v6 = vunpack.i.h.bf16 %v20036_v26  ;;  %v8009_v49 = vunpack.i.h.bf16 %v20037_v19  ;;  %v8008_v9 = vunpack.i.l.bf16 %v20037_v19 }
 0x230   :  { %v8004_v44 = vunpack.i.h.bf16 %v20038_v47  ;;  %v8003_v1 = vunpack.i.l.bf16 %v20038_v47  ;;  %v14132_v56 = vpop.permute.xlu0 %8101  ;;  %v8019_v28 = vunpack.i.h.bf16 %v20039_v12  ;;  %v8018_v29 = vunpack.i.l.bf16 %v20039_v12 }
 0x231   :  { %v8014_v34 = vunpack.i.h.bf16 %v20040_v45  ;;  %v8013_v42 = vunpack.i.l.bf16 %v20040_v45  ;;  %v14140_v30 = vsel %vm1210_vm6, %v13963_v18, %v7984_v21  ;;  %v14144_v52 = vsel %vm1210_vm6, %v13967_v24, %v7998_v2  ;;  %v20041_v18 = vld [vmem:[#allocation45_spill] sm:$0xff]  ;;  %v20042_v24 = vld [vmem:[#allocation36_spill] sm:$0xff] }
 0x232   :  { %v14148_v26 = vsel %vm1210_vm6, %v13971_v7, %v7999_v43  ;;  %v14152_v19 = vsel %vm1210_vm6, %v13975_v17, %v7993_v11  ;;  %v14158_v12 = vsel %vm1210_vm6, %v13982_v22, %v7994_v6  ;;  %v8029_v21 = vunpack.i.h.bf16 %v20041_v18 }
 0x233   :  { %v14154_v47 = vpop.permute.xlu1 %8116  ;;  %v8028_v45 = vunpack.i.l.bf16 %v20041_v18  ;;  %v8023_v2 = vunpack.i.l.bf16 %v20042_v24  ;;  %v14165_v7 = vsel %vm1210_vm6, %v13989_v5, %v8008_v9  ;;  %v14169_v17 = vsel %vm1210_vm6, %v13993_v20, %v8009_v49  ;;  %v20044_v49 = vld [vmem:[#allocation61_spill] sm:$0xff] }
 0x234   :  { %v14173_v43 = vsel %vm1210_vm6, %v13997_v50, %v8003_v1  ;;  %v14177_v22 = vsel %vm1210_vm6, %v14001_v13, %v8004_v44  ;;  %v14179_v11 = vpop.permute.xlu0 %8111  ;;  %v14183_v6 = vsel %vm1210_vm6, %v14007_v57, %v8018_v29  ;;  %v14187_v5 = vsel %vm1210_vm6, %v14011_v48, %v8019_v28  ;;  %v20045_v57 = vld [vmem:[#allocation113_spill] sm:$0xff] }
 0x235   :  { %v14191_v20 = vsel %vm1210_vm6, %v14015_v41, %v8013_v42  ;;  %v14195_v50 = vsel %vm1210_vm6, %v14019_v0, %v8014_v34  ;;  %v8024_v13 = vunpack.i.h.bf16 %v20042_v24  ;;  %v8039_v9 = vunpack.i.h.bf16 %v20044_v49  ;;  %v20047_v34 = vld [vmem:[#allocation90_spill] sm:$0xff]  ;;  %v20048_v24 = vld [vmem:[#allocation32_spill] sm:$0xff] }
 0x236   :  { %20043 = vst [vmem:[#allocation128_spill] sm:$0xff] %v14195_v50  ;;  %v8038_v44 = vunpack.i.l.bf16 %v20044_v49  ;;  %v8033_v1 = vunpack.i.l.bf16 %v20045_v57  ;;  %v14205_v48 = vsel %vm1210_vm6, %v14029_v39, %v8028_v45  ;;  %v14209_v41 = vsel %vm1210_vm6, %v14033_v59, %v8029_v21 }
 0x237   :  { %v14201_v29 = vpop.permute.xlu1 %8126  ;;  %v14213_v0 = vsel %vm1210_vm6, %v14037_v16, %v8023_v2  ;;  %v8034_v28 = vunpack.i.h.bf16 %v20045_v57  ;;  %v8049_v42 = vunpack.i.h.bf16 %v20047_v34  ;;  %v8048_v18 = vunpack.i.l.bf16 %v20047_v34 }
 0x238   :  { %20046 = vst [vmem:[#allocation72_spill] sm:$0xff] %v14213_v0  ;;  %v8044_v49 = vunpack.i.h.bf16 %v20048_v24  ;;  %v8043_v50 = vunpack.i.l.bf16 %v20048_v24  ;;  %v14220_v39 = vpop.permute.xlu0 %8121  ;;  %v8059_v45 = vunpack.i.h.bf16 %v13885_v37  ;;  %v8058_v59 = vunpack.i.l.bf16 %v13885_v37 }
 0x239   :  { %v8054_v21 = vunpack.i.h.bf16 %v13912_v23  ;;  %v8053_v16 = vunpack.i.l.bf16 %v13912_v23  ;;  %v14228_v2 = vsel %vm1210_vm6, %v14052_v25, %v8024_v13  ;;  %v14232_v57 = vsel %vm1243_vm7, %v14056_v33, %v8038_v44  ;;  %v20050_v25 = vld [vmem:[#allocation130_spill] sm:$0xff] }
 0x23a   :  { %20049 = vst [vmem:[#allocation121_spill] sm:$0xff] %v14228_v2  ;;  %v14236_v34 = vsel %vm1243_vm7, %v14060_v8, %v8039_v9  ;;  %v14240_v24 = vsel %vm1243_vm7, %v14064_v35, %v8033_v1  ;;  %v14246_v23 = vsel %vm1243_vm7, %v14070_v27, %v8034_v28  ;;  %v3605_v13 = vrot.slane %v20050_v25, 2  ;;  %v20051_v2 = vld [vmem:[#allocation139_spill] sm:$0xff]  ;;  %v20052_v33 = vld [vmem:[#allocation98_spill] sm:$0xff] }
 0x23b   :  { %v14242_v37 = vpop.permute.xlu1 %8136  ;;  %v3606_v0 = vrot.slane %v20051_v2, 2  ;;  %v3608_v44 = vrot.slane %v20052_v33, 2  ;;  %v14253_v8 = vsel %vm1243_vm7, %v14077_v54, %v8048_v18  ;;  %v14257_v35 = vsel %vm1243_vm7, %v14081_v55, %v8049_v42 }
 0x23c   :  { %v14261_v9 = vsel %vm1243_vm7, %v14085_v51, %v8043_v50  ;;  %v14265_v27 = vsel %vm1243_vm7, %v14089_v53, %v8044_v49  ;;  %v14267_v1 = vpop.permute.xlu0 %8131  ;;  %v14271_v28 = vsel %vm1243_vm7, %v14095_v32, %v8058_v59  ;;  %v14275_v54 = vsel %vm1243_vm7, %v14099_v31, %v8059_v45 }
 0x23d   :  { %v14279_v55 = vsel %vm1243_vm7, %v14103_v15, %v8053_v16  ;;  %v14283_v51 = vsel %vm1243_vm7, %v14107_v63, %v8054_v21  ;;  %v8069_v53 = vunpack.i.h.bf16 %v13936_v58  ;;  %v8068_v50 = vunpack.i.l.bf16 %v13936_v58 }
 0x23e   :  { %v8064_v42 = vunpack.i.h.bf16 %v13955_v3  ;;  %v8063_v32 = vunpack.i.l.bf16 %v13955_v3  ;;  %v8079_v31 = vunpack.i.h.bf16 %v13977_v60  ;;  %v8078_v49 = vunpack.i.l.bf16 %v13977_v60 }
 0x23f   :  { %v14289_v18 = vpop.permute.xlu1 %8146  ;;  %v14294_v15 = vsel %vm204_vm1, %v3605_v13, %v3606_v0  ;;  %v14297_v63 = vsel %vm204_vm1, %v3606_v0, %v3608_v44  ;;  %v8074_v45 = vunpack.i.h.bf16 %v14003_v46  ;;  %v8073_v58 = vunpack.i.l.bf16 %v14003_v46 }
 0x240   :  { %20053 = vst [vmem:[#allocation133_spill] sm:$0xff] %v14294_v15  ;;  %20054 = vst [vmem:[#allocation162_spill] sm:$0xff] %v14297_v63  ;;  %v8089_v59 = vunpack.i.h.bf16 %v14025_v4  ;;  %v8088_v3 = vunpack.i.l.bf16 %v14025_v4  ;;  %v14303_v21 = vpop.permute.xlu0 %8141  ;;  %v8084_v16 = vunpack.i.h.bf16 %v14044_v40  ;;  %v8083_v60 = vunpack.i.l.bf16 %v14044_v40 }
 0x241   :  { %v8099_v2 = vunpack.i.h.bf16 %v14066_v14  ;;  %v8098_v25 = vunpack.i.l.bf16 %v14066_v14  ;;  %v14311_v0 = vsel %vm1243_vm7, %v14117_v61, %v8068_v50  ;;  %v14315_v46 = vsel %vm1243_vm7, %v14121_v10, %v8069_v53 }
 0x242   :  { %v14319_v4 = vsel %vm1243_vm7, %v14125_v62, %v8063_v32  ;;  %v8093_v13 = vunpack.i.l.bf16 %v14091_v38  ;;  %v14326_v40 = vsel %vm1243_vm7, %v14140_v30, %v8064_v42  ;;  %v14330_v14 = vsel %vm1243_vm7, %v14144_v52, %v8078_v49 }
 0x243   :  { %v14322_v33 = vpop.permute.xlu1 %8156  ;;  %v14334_v61 = vsel %vm1243_vm7, %v14148_v26, %v8079_v31  ;;  %v14340_v62 = vsel %vm1243_vm7, %v14152_v19, %v8073_v58  ;;  %v14344_v44 = vsel %vm1243_vm7, %v14158_v12, %v8074_v45  ;;  %v14348_v30 = vsel %vm1243_vm7, %v14165_v7, %v8088_v3 }
 0x244   :  { %v14352_v52 = vsel %vm1243_vm7, %v14169_v17, %v8089_v59  ;;  %v14354_v26 = vpop.permute.xlu0 %8151  ;;  %v14358_v53 = vsel %vm1243_vm7, %v14173_v43, %v8083_v60  ;;  %v14362_v19 = vsel %vm1243_vm7, %v14177_v22, %v8084_v16  ;;  %v14366_v12 = vsel %vm1243_vm7, %v14183_v6, %v8098_v25  ;;  %v20055_v16 = vld [vmem:[#allocation128_spill] sm:$0xff] }
 0x245   :  { %v14370_v7 = vsel %vm1243_vm7, %v14187_v5, %v8099_v2  ;;  %v8094_v17 = vunpack.i.h.bf16 %v14091_v38  ;;  %v14375_v50 = vsel %vm1243_vm7, %v14191_v20, %v8093_v13  ;;  %v8109_v43 = vunpack.i.h.bf16 %v14113_v36 }
 0x246   :  { %v8108_v42 = vunpack.i.l.bf16 %v14113_v36  ;;  %v8104_v32 = vunpack.i.h.bf16 %v14132_v56  ;;  %v8103_v6 = vunpack.i.l.bf16 %v14132_v56  ;;  %v8119_v31 = vunpack.i.h.bf16 %v14154_v47 }
 0x247   :  { %v8118_v5 = vunpack.i.l.bf16 %v14154_v47  ;;  %v8114_v38 = vunpack.i.h.bf16 %v14179_v11  ;;  %v8113_v49 = vunpack.i.l.bf16 %v14179_v11  ;;  %v8129_v20 = vunpack.i.h.bf16 %v14201_v29 }
 0x248   :  { %v14379_v22 = vpop.permute.xlu1 %8166  ;;  %v8128_v45 = vunpack.i.l.bf16 %v14201_v29  ;;  %v14389_v58 = vpop.permute.xlu0 %8161  ;;  %v8124_v36 = vunpack.i.h.bf16 %v14220_v39  ;;  %v8123_v59 = vunpack.i.l.bf16 %v14220_v39  ;;  %v8139_v56 = vunpack.i.h.bf16 %v14242_v37  ;;  %v20056_v39 = vld [vmem:[#allocation72_spill] sm:$0xff] }
 0x249   :  { %v8138_v3 = vunpack.i.l.bf16 %v14242_v37  ;;  %v14397_v47 = vsel %vm1243_vm7, %v20055_v16, %v8094_v17  ;;  %v14401_v11 = vsel %vm1243_vm7, %v14205_v48, %v8108_v42  ;;  %v14405_v29 = vsel %vm1243_vm7, %v14209_v41, %v8109_v43  ;;  %v20057_v37 = vld [vmem:[#allocation121_spill] sm:$0xff] }
 0x24a   :  { %v8133_v60 = vunpack.i.l.bf16 %v14267_v1  ;;  %v14412_v25 = vsel %vm1243_vm7, %v20056_v39, %v8103_v6  ;;  %v14416_v13 = vsel %vm1243_vm7, %v20057_v37, %v8104_v32  ;;  %v14420_v48 = vsel %vm1276_vm8, %v14232_v57, %v8118_v5 }
 0x24b   :  { %v14424_v41 = vsel %vm1276_vm8, %v14236_v34, %v8119_v31  ;;  %v14428_v17 = vsel %vm1276_vm8, %v14240_v24, %v8113_v49  ;;  %v14432_v43 = vsel %vm1276_vm8, %v14246_v23, %v8114_v38  ;;  %v14436_v42 = vsel %vm1276_vm8, %v14253_v8, %v8128_v45  ;;  %v14447_v34 = vld [vmem:[%s18750_s2] ss:$0 sm:$0xff] }
 0x24c   :  { %v14440_v57 = vsel %vm1276_vm8, %v14257_v35, %v8129_v20  ;;  %v14451_v24 = vsel %vm1276_vm8, %v14261_v9, %v8123_v59  ;;  %v14455_v23 = vsel %vm1276_vm8, %v14265_v27, %v8124_v36  ;;  %v14459_v8 = vsel %vm1276_vm8, %v14271_v28, %v8138_v3  ;;  %v6923_v27 = vpop.f32.mrb[0].mxu0 }
 0x24d   :  { %v14408_v2 = vpop.permute.xlu1 %8176  ;;  %v14463_v35 = vsel %vm1276_vm8, %v14275_v54, %v8139_v56  ;;  %v8134_v6 = vunpack.i.h.bf16 %v14267_v1  ;;  %v14468_v31 = vsel %vm1276_vm8, %v14279_v55, %v8133_v60  ;;  %v8149_v9 = vunpack.i.h.bf16 %v14289_v18  ;;  %v2930_v1 = vpop.f32.mrb[1].mxu0 }
 0x24e   :  { %v8148_v5 = vunpack.i.l.bf16 %v14289_v18  ;;  %v8144_v28 = vunpack.i.h.bf16 %v14303_v21  ;;  %v8143_v49 = vunpack.i.l.bf16 %v14303_v21  ;;  %v8159_v54 = vunpack.i.h.bf16 %v14322_v33  ;;  %v6924_v56 = vpop.f32.mrb[2].mxu0 }
 0x24f   :  { %v14442_v32 = vpop.permute.xlu0 %8171  ;;  %v2939_v20 = vadd.f32 %v6923_v27, %v14447_v34  ;;  %v8158_v45 = vunpack.i.l.bf16 %v14322_v33  ;;  %v8154_v55 = vunpack.i.h.bf16 %v14354_v26  ;;  %v8153_v36 = vunpack.i.l.bf16 %v14354_v26  ;;  %v2933_v39 = vpop.f32.mrb[3].mxu0 }
 0x250   :  { %v2931_v18 = vadd.f32 %v14447_v34, %v2930_v1  ;;  %v8169_v3 = vunpack.i.h.bf16 %v14379_v22  ;;  %v8168_v21 = vunpack.i.l.bf16 %v14379_v22  ;;  %v8164_v16 = vunpack.i.h.bf16 %v14389_v58 }
 0x251   :  { %v14472_v38 = vpop.permute.xlu1 %8186  ;;  %v3187_v60 = vmax.f32 %v2939_v20, 0.0  ;;  %v8163_v37 = vunpack.i.l.bf16 %v14389_v58  ;;  %v2942_v27 = vadd.f32 %v6924_v56, %v14447_v34  ;;  %v2934_v26 = vadd.f32 %v14447_v34, %v2933_v39 }
 0x252   :  { %v3185_v33 = vmax.f32 %v2931_v18, 0.0  ;;  %v14492_v1 = vsel %vm1276_vm8, %v14283_v51, %v8134_v6  ;;  %v14496_v15 = vsel %vm1276_vm8, %v14311_v0, %v8148_v5  ;;  %v14500_v22 = vsel %vm1276_vm8, %v14315_v46, %v8149_v9 }
 0x253   :  { %v14482_v59 = vpop.permute.xlu0 %8181  ;;  %v14504_v58 = vsel %vm1276_vm8, %v14319_v4, %v8143_v49  ;;  %3361 = vst.msk [vmem:[#allocation2 + $0x31] sm:$0xff] %vm1111_vm2, %v3187_v60  ;;  %v14509_v20 = vsel %vm1276_vm8, %v14326_v40, %v8144_v28  ;;  %v14513_v51 = vsel %vm1276_vm8, %v14330_v14, %v8158_v45  ;;  %v3188_v0 = vmax.f32 %v2942_v27, 0.0 }
 0x254   :  { %3359 = vst.msk [vmem:[#allocation2 + $0x19] sm:$0xff] %vm1111_vm2, %v3185_v33  ;;  %v3186_v6 = vmax.f32 %v2934_v26, 0.0  ;;  %v14520_v4 = vsel %vm1276_vm8, %v14334_v61, %v8159_v54  ;;  %v14524_v9 = vsel %vm1276_vm8, %v14340_v62, %v8153_v36  ;;  %v14528_v40 = vsel %vm1276_vm8, %v14344_v44, %v8154_v55  ;;  %v6927_v44 = vpop.f32.mrb[4].mxu0 }
 0x255   :  { %v8197_v10 = vpop.permute.xlu1 %8196  ;;  %v14532_v14 = vsel %vm1276_vm8, %v14348_v30, %v8168_v21  ;;  %v14536_v5 = vsel %vm1276_vm8, %v14352_v52, %v8169_v3  ;;  %v14540_v61 = vsel %vm1276_vm8, %v14358_v53, %v8163_v37  ;;  %v14544_v62 = vsel %vm1276_vm8, %v14362_v19, %v8164_v16  ;;  %3362 = vst.msk [vmem:[#allocation2 + $0x39] sm:$0xff] %vm1111_vm2, %v3188_v0  ;;  %v2946_v45 = vpop.f32.mrb[5].mxu0 }
 0x256   :  { %v8178_v28 = vunpack.i.l.bf16 %v14408_v2  ;;  %3360 = vst.msk [vmem:[#allocation2 + $0x21] sm:$0xff] %vm1111_vm2, %v3186_v6  ;;  %v8179_v52 = vunpack.i.h.bf16 %v14408_v2  ;;  %v8174_v49 = vunpack.i.h.bf16 %v14442_v32  ;;  %v8173_v53 = vunpack.i.l.bf16 %v14442_v32  ;;  %v6928_v3 = vpop.f32.mrb[6].mxu0 }
 0x257   :  { %v14516_v46 = vpop.permute.xlu0 %8191  ;;  %v2955_v54 = vadd.f32 %v6927_v44, %v14447_v34  ;;  %v8189_v19 = vunpack.i.h.bf16 %v14472_v38  ;;  %v8188_v55 = vunpack.i.l.bf16 %v14472_v38  ;;  %v8184_v36 = vunpack.i.h.bf16 %v14482_v59  ;;  %v2949_v32 = vpop.f32.mrb[7].mxu0 }
 0x258   :  { %v2947_v18 = vadd.f32 %v14447_v34, %v2946_v45  ;;  %v8183_v2 = vunpack.i.l.bf16 %v14482_v59  ;;  %v8199_v21 = vunpack.i.h.bf16 %v8197_v10  ;;  %v8198_v16 = vunpack.i.l.bf16 %v8197_v10 }
 0x259   :  { %v14549_v30 = vpop.permute.xlu1 %8206  ;;  %v3191_v60 = vmax.f32 %v2955_v54, 0.0  ;;  %v14564_v39 = vsel %vm1276_vm8, %v14366_v12, %v8178_v28  ;;  %v2958_v38 = vadd.f32 %v6928_v3, %v14447_v34  ;;  %v2950_v33 = vadd.f32 %v14447_v34, %v2949_v32 }
 0x25a   :  { %v3189_v37 = vmax.f32 %v2947_v18, 0.0  ;;  %v14572_v26 = vsel %vm1276_vm8, %v14370_v7, %v8179_v52  ;;  %v14576_v10 = vsel %vm1276_vm8, %v14375_v50, %v8173_v53  ;;  %v14580_v59 = vsel %vm1276_vm8, %v14397_v47, %v8174_v49  ;;  %v14584_v0 = vld [vmem:[#allocation2 + $0x30] sm:$0xff] }
 0x25b   :  { %v14559_v56 = vpop.permute.xlu0 %8201  ;;  %v8193_v12 = vunpack.i.l.bf16 %v14516_v46  ;;  %3365 = vst.msk [vmem:[#allocation2 + $0x61] sm:$0xff] %vm1111_vm2, %v3191_v60  ;;  %v14588_v6 = vsel %vm1276_vm8, %v14401_v11, %v8188_v55  ;;  %v14592_v7 = vsel %vm1276_vm8, %v14405_v29, %v8189_v19  ;;  %v3192_v50 = vmax.f32 %v2958_v38, 0.0 }
 0x25c   :  { %20058 = vst [vmem:[#allocation49_spill] sm:$0xff] %v14588_v6  ;;  %20059 = vst [vmem:[#allocation94_spill] sm:$0xff] %v14592_v7  ;;  %v3190_v28 = vmax.f32 %v2950_v33, 0.0  ;;  %v14599_v44 = vsel %vm1276_vm8, %v14412_v25, %v8183_v2  ;;  %v14603_v52 = vsel %vm1276_vm8, %v14416_v13, %v8184_v36  ;;  %v14607_v11 = vsel %vm1309_vm9, %v14420_v48, %v8198_v16  ;;  %v14613_v49 = vld [vmem:[#allocation2 + $0x38] sm:$0xff]  ;;  %v14615_v53 = vld [vmem:[#allocation2 + $0x40] sm:$0x3] }
 0x25d   :  { %v14568_v27 = vpop.permute.xlu1 %8216  ;;  %3363 = vst.msk [vmem:[#allocation2 + $0x49] sm:$0xff] %vm1111_vm2, %v3189_v37  ;;  %v14611_v29 = vsel %vm1309_vm9, %v14424_v41, %v8199_v21  ;;  %v14617_v54 = vld [vmem:[#allocation2 + $0x20] sm:$0xff]  ;;  %v8194_v25 = vunpack.i.h.bf16 %v14516_v46  ;;  %3366 = vst.msk [vmem:[#allocation2 + $0x69] sm:$0xff] %vm1111_vm2, %v3192_v50  ;;  %v6931_v13 = vpop.f32.mrb[8].mxu0  ;;  %v3535_v48 = vrot.slane %v14584_v0, 1  ;;  %v3536_v41 = vrot.slane %v14613_v49, 1 }
 0x25e   :  { %20060 = vst [vmem:[#allocation82_spill] sm:$0xff] %v14617_v54  ;;  %3364 = vst.msk [vmem:[#allocation2 + $0x51] sm:$0xff] %vm1111_vm2, %v3190_v28  ;;  %v3538_v19 = vrot.slane %v14615_v53, 1  ;;  %v14629_v55 = vsel %vm1309_vm9, %v14428_v17, %v8193_v12  ;;  %v8209_v36 = vunpack.i.h.bf16 %v14549_v30  ;;  %v8208_v46 = vunpack.i.l.bf16 %v14549_v30  ;;  %v2962_v3 = vpop.f32.mrb[9].mxu0  ;;  %v14634_v2 = vld [vmem:[#allocation2 + $0x18] sm:$0xff] }
 0x25f   :  { %v14595_v47 = vpop.permute.xlu0 %8211  ;;  %v2971_v18 = vadd.f32 %v6931_v13, %v14447_v34  ;;  %20061 = vst [vmem:[#allocation83_spill] sm:$0xff] %v14634_v2  ;;  %v2963_v21 = vadd.f32 %v14447_v34, %v2962_v3  ;;  %v6932_v60 = vpop.f32.mrb[10].mxu0  ;;  %v3537_v32 = vsel %vm123_vm0, %v3535_v48, %v3536_v41  ;;  %v3531_v17 = vrot.slane %v14617_v54, 1  ;;  %v14645_v28 = vld [vmem:[#allocation2 + $0x28] sm:$0x3] }
 0x260   :  { %v3539_v37 = vsel %vm123_vm0, %v3536_v41, %v3538_v19  ;;  %v8204_v38 = vunpack.i.h.bf16 %v14559_v56  ;;  %v8203_v30 = vunpack.i.l.bf16 %v14559_v56  ;;  %v8218_v33 = vunpack.i.l.bf16 %v14568_v27  ;;  %v2965_v50 = vpop.f32.mrb[11].mxu0  ;;  %20062 = vst [vmem:[#allocation76_spill] sm:$0xff] %v14645_v28 }
 0x261   :  { %v14622_v45 = vpop.permute.xlu1 %8226  ;;  %v3195_v12 = vmax.f32 %v2971_v18, 0.0  ;;  %v3193_v13 = vmax.f32 %v2963_v21, 0.0  ;;  %v2974_v3 = vadd.f32 %v6932_v60, %v14447_v34  ;;  %v2966_v7 = vadd.f32 %v14447_v34, %v2965_v50 }
 0x262   :  { %v3530_v48 = vrot.slane %v14634_v2, 1  ;;  %v8219_v19 = vunpack.i.h.bf16 %v14568_v27  ;;  %v8214_v6 = vunpack.i.h.bf16 %v14595_v47  ;;  %v8213_v56 = vunpack.i.l.bf16 %v14595_v47 }
 0x263   :  { %v14637_v16 = vpop.permute.xlu0 %8221  ;;  %3369 = vst.msk [vmem:[#allocation2 + $0x91] sm:$0xff] %vm1111_vm2, %v3195_v12  ;;  %v14656_v18 = vpack.i.bf16 %v3539_v37, %v3537_v32  ;;  %3367 = vst.msk [vmem:[#allocation2 + $0x79] sm:$0xff] %vm1111_vm2, %v3193_v13  ;;  %v3196_v21 = vmax.f32 %v2974_v3, 0.0  ;;  %v3194_v60 = vmax.f32 %v2966_v7, 0.0  ;;  %v3533_v54 = vrot.slane %v14645_v28, 1  ;;  %v14681_v37 = vld [vmem:[#allocation2 + $0x60] sm:$0xff] }
 0x264   :  { %v3532_v50 = vsel %vm123_vm0, %v3530_v48, %v3531_v17  ;;  %v14665_v27 = vsel %vm1309_vm9, %v14432_v43, %v8194_v25  ;;  %v14669_v47 = vsel %vm1309_vm9, %v14436_v42, %v8208_v46  ;;  %v14673_v32 = vsel %vm1309_vm9, %v14440_v57, %v8209_v36  ;;  %20064 = vst [vmem:[#allocation153_spill] sm:$0xff] %v14681_v37  ;;  %v14683_v12 = vld [vmem:[#allocation2 + $0x68] sm:$0xff]  ;;  %v14685_v43 = vld [vmem:[#allocation2 + $0x70] sm:$0x3]  ;;  %v6935_v25 = vpop.f32.mrb[12].mxu0 }
 0x265   :  { %v14650_v41 = vpop.permute.xlu1 %8236  ;;  %20063 = vst [vmem:[#allocation67_spill] sm:$0xff] %v14656_v18  ;;  %v14677_v7 = vsel %vm1309_vm9, %v14451_v24, %v8203_v30  ;;  %8361 = vrot.lane.b32.xlu0 %v14656_v18, %s9778_s25  ;;  %20065 = vst [vmem:[#allocation115_spill] sm:$0xff] %v14685_v43  ;;  %v14689_v42 = vsel %vm1309_vm9, %v14455_v23, %v8204_v38  ;;  %v14693_v57 = vsel %vm1309_vm9, %v14459_v8, %v8218_v33 }
 0x266   :  { %3370 = vst.msk [vmem:[#allocation2 + $0x99] sm:$0xff] %vm1111_vm2, %v3196_v21  ;;  %3368 = vst.msk [vmem:[#allocation2 + $0x81] sm:$0xff] %vm1111_vm2, %v3194_v60  ;;  %v3534_v24 = vsel %vm123_vm0, %v3531_v17, %v3533_v54  ;;  %v3546_v46 = vrot.slane %v14683_v12, 1  ;;  %v14703_v30 = vsel %vm1309_vm9, %v14463_v35, %v8219_v19  ;;  %v14707_v23 = vsel %vm1309_vm9, %v14468_v31, %v8213_v56  ;;  %v2978_v54 = vpop.f32.mrb[13].mxu0  ;;  %v14727_v21 = vld [vmem:[#allocation2 + $0x48] sm:$0xff]  ;;  %v14729_v60 = vld [vmem:[#allocation2 + $0x50] sm:$0xff] }
 0x267   :  { %v14661_v2 = vpop.permute.xlu0 %8231  ;;  %v14711_v8 = vsel %vm1309_vm9, %v14492_v1, %v8214_v6  ;;  %v14713_v38 = vpack.i.bf16 %v3534_v24, %v3532_v50  ;;  %v2987_v17 = vadd.f32 %v6935_v25, %v14447_v34  ;;  %v2979_v33 = vadd.f32 %v14447_v34, %v2978_v54  ;;  %v6936_v3 = vpop.f32.mrb[14].mxu0  ;;  %20067 = vst [vmem:[#allocation149_spill] sm:$0xff] %v14727_v21  ;;  %v14731_v50 = vld [vmem:[#allocation2 + $0x58] sm:$0x3] }
 0x268   :  { %v3545_v35 = vrot.slane %v14681_v37, 1  ;;  %v3548_v48 = vrot.slane %v14685_v43, 1  ;;  %v8229_v31 = vunpack.i.h.bf16 %v14622_v45  ;;  %v8228_v19 = vunpack.i.l.bf16 %v14622_v45  ;;  %v2981_v56 = vpop.f32.mrb[15].mxu0  ;;  %20068 = vst [vmem:[#allocation71_spill] sm:$0xff] %v14729_v60  ;;  %20069 = vst [vmem:[#allocation88_spill] sm:$0xff] %v14731_v50 }
 0x269   :  { %v14698_v36 = vpop.permute.xlu1 %8246  ;;  %20066 = vst [vmem:[#allocation65_spill] sm:$0xff] %v14713_v38  ;;  %v8224_v1 = vunpack.i.h.bf16 %v14637_v16  ;;  %8356 = vrot.lane.b32.xlu1 %v14713_v38, %s9778_s25  ;;  %v2990_v6 = vadd.f32 %v6936_v3, %v14447_v34  ;;  %v8223_v24 = vunpack.i.l.bf16 %v14637_v16  ;;  %v3199_v25 = vmax.f32 %v2987_v17, 0.0 }
 0x26a   :  { %v3197_v54 = vmax.f32 %v2979_v33, 0.0  ;;  %v3547_v45 = vsel %vm123_vm0, %v3545_v35, %v3546_v46  ;;  %v8239_v28 = vunpack.i.h.bf16 %v14650_v41  ;;  %v8238_v38 = vunpack.i.l.bf16 %v14650_v41 }
 0x26b   :  { %v14717_v13 = vpop.permute.xlu0 %8241  ;;  %v3200_v3 = vmax.f32 %v2990_v6, 0.0  ;;  %v2982_v37 = vadd.f32 %v14447_v34, %v2981_v56  ;;  %3373 = vst.msk [vmem:[#allocation2 + $0xc1] sm:$0xff] %vm1111_vm2, %v3199_v25  ;;  %v3549_v63 = vsel %vm123_vm0, %v3546_v46, %v3548_v48  ;;  %v3540_v16 = vrot.slane %v14727_v21, 1 }
 0x26c   :  { %3371 = vst.msk [vmem:[#allocation2 + $0xa9] sm:$0xff] %vm1111_vm2, %v3197_v54  ;;  %v3541_v17 = vrot.slane %v14729_v60, 1  ;;  %v3543_v33 = vrot.slane %v14731_v50, 1  ;;  %v8234_v43 = vunpack.i.h.bf16 %v14661_v2  ;;  %v8233_v41 = vunpack.i.l.bf16 %v14661_v2  ;;  %v6939_v50 = vpop.f32.mrb[16].mxu0 }
 0x26d   :  { %v14735_v18 = vpop.permute.xlu1 %8256  ;;  %3374 = vst.msk [vmem:[#allocation2 + $0xc9] sm:$0xff] %vm1111_vm2, %v3200_v3  ;;  %v3198_v6 = vmax.f32 %v2982_v37, 0.0  ;;  %v14751_v56 = vpack.i.bf16 %v3549_v63, %v3547_v45  ;;  %v14755_v46 = vsel %vm1309_vm9, %v14496_v15, %v8228_v19  ;;  %v14759_v48 = vsel %vm1309_vm9, %v14500_v22, %v8229_v31  ;;  %v2994_v37 = vpop.f32.mrb[17].mxu0 }
 0x26e   :  { %v3542_v25 = vsel %vm123_vm0, %v3540_v16, %v3541_v17  ;;  %v3544_v54 = vsel %vm123_vm0, %v3541_v17, %v3543_v33  ;;  %v8249_v2 = vunpack.i.h.bf16 %v14698_v36  ;;  %v8248_v63 = vunpack.i.l.bf16 %v14698_v36  ;;  %v6940_v16 = vpop.f32.mrb[18].mxu0  ;;  %v14788_v17 = vld [vmem:[#allocation2 + $0x90] sm:$0xff] }
 0x26f   :  { %v14746_v35 = vpop.permute.xlu0 %8251  ;;  %20070 = vst [vmem:[#allocation164_spill] sm:$0xff] %v14751_v56  ;;  %3372 = vst.msk [vmem:[#allocation2 + $0xb1] sm:$0xff] %vm1111_vm2, %v3198_v6  ;;  %8371 = vrot.lane.b32.xlu0 %v14751_v56, %s9778_s25  ;;  %v14770_v15 = vpack.i.bf16 %v3544_v54, %v3542_v25  ;;  %v3003_v22 = vadd.f32 %v6939_v50, %v14447_v34  ;;  %v14775_v31 = vsel %vm1309_vm9, %v14504_v58, %v8223_v24  ;;  %v14806_v24 = vld [vmem:[#allocation2 + $0xa0] sm:$0x3] }
 0x270   :  { %v14779_v19 = vsel %vm1309_vm9, %v14509_v20, %v8224_v1  ;;  %v14783_v36 = vsel %vm1309_vm9, %v14520_v4, %v8239_v28  ;;  %v2995_v45 = vadd.f32 %v14447_v34, %v2994_v37  ;;  %20073 = vst [vmem:[#allocation110_spill] sm:$0xff] %v14788_v17  ;;  %v14792_v50 = vsel %vm1309_vm9, %v14513_v51, %v8238_v38  ;;  %v2997_v28 = vpop.f32.mrb[19].mxu0  ;;  %v14804_v1 = vld [vmem:[#allocation2 + $0x98] sm:$0xff] }
 0x271   :  { %v14763_v21 = vpop.permute.xlu1 %8266  ;;  %20072 = vst [vmem:[#allocation97_spill] sm:$0xff] %v14770_v15  ;;  %v14796_v58 = vsel %vm1309_vm9, %v14524_v9, %v8233_v41  ;;  %v14800_v20 = vsel %vm1309_vm9, %v14528_v40, %v8234_v43  ;;  %8366 = vrot.lane.b32.xlu1 %v14770_v15, %s9778_s25  ;;  %v3203_v4 = vmax.f32 %v3003_v22, 0.0  ;;  %20074 = vst [vmem:[#allocation69_spill] sm:$0xff] %v14804_v1  ;;  %v8243_v51 = vunpack.i.l.bf16 %v14717_v13  ;;  %v14811_v41 = vld [vmem:[#allocation2 + $0x78] sm:$0xff]  ;;  %v14813_v40 = vld [vmem:[#allocation2 + $0x80] sm:$0xff]  ;;  %v6943_v15 = vpop.f32.mrb[20].mxu0 }
 0x272   :  { %20071 = vst [vmem:[#allocation102_spill] sm:$0xff] %v14763_v21  ;;  %20075 = vst [vmem:[#allocation87_spill] sm:$0xff] %v14806_v24  ;;  %v3201_v38 = vmax.f32 %v2995_v45, 0.0  ;;  %v3006_v33 = vadd.f32 %v6940_v16, %v14447_v34  ;;  %v2998_v9 = vadd.f32 %v14447_v34, %v2997_v28  ;;  %v14815_v43 = vld [vmem:[#allocation2 + $0x88] sm:$0x3]  ;;  %v14819_v25 = vsel %vm1309_vm9, %v14532_v14, %v8248_v63 }
 0x273   :  { %v14786_v3 = vpop.permute.xlu0 %8261  ;;  %20076 = vst [vmem:[#allocation143_spill] sm:$0xff] %v14811_v41  ;;  %20077 = vst [vmem:[#allocation155_spill] sm:$0xff] %v14813_v40  ;;  %v14823_v54 = vsel %vm1309_vm9, %v14536_v5, %v8249_v2  ;;  %v3555_v37 = vrot.slane %v14788_v17, 1  ;;  %v3556_v28 = vrot.slane %v14804_v1, 1  ;;  %v3558_v56 = vrot.slane %v14806_v24, 1 }
 0x274   :  { %20078 = vst [vmem:[#allocation93_spill] sm:$0xff] %v14815_v43  ;;  %3377 = vst.msk [vmem:[#allocation2 + $0xf1] sm:$0xff] %vm1111_vm2, %v3203_v4  ;;  %v3204_v45 = vmax.f32 %v3006_v33, 0.0  ;;  %v3202_v16 = vmax.f32 %v2998_v9, 0.0  ;;  %v3550_v63 = vrot.slane %v14811_v41, 1  ;;  %v3551_v5 = vrot.slane %v14813_v40, 1 }
 0x275   :  { %v8277_v6 = vpop.permute.xlu1 %8276  ;;  %3375 = vst.msk [vmem:[#allocation2 + $0xd9] sm:$0xff] %vm1111_vm2, %v3201_v38  ;;  %v3553_v2 = vrot.slane %v14815_v43, 1  ;;  %v14836_v4 = vsel %vm1309_vm9, %v14540_v61, %v8243_v51  ;;  %v3557_v38 = vsel %vm123_vm0, %v3555_v37, %v3556_v28  ;;  %v3559_v33 = vsel %vm123_vm0, %v3556_v28, %v3558_v56  ;;  %v3010_v51 = vpop.f32.mrb[21].mxu0 }
 0x276   :  { %v8279_v22 = vunpack.i.h.bf16 %v8277_v6  ;;  %3378 = vst.msk [vmem:[#allocation2 + $0xf9] sm:$0xff] %vm1111_vm2, %v3204_v45  ;;  %3376 = vst.msk [vmem:[#allocation2 + $0xe1] sm:$0xff] %vm1111_vm2, %v3202_v16  ;;  %v14844_v41 = vpack.i.bf16 %v3559_v33, %v3557_v38  ;;  %v3552_v43 = vsel %vm123_vm0, %v3550_v63, %v3551_v5  ;;  %v8278_v61 = vunpack.i.l.bf16 %v8277_v6  ;;  %v6944_v28 = vpop.f32.mrb[22].mxu0  ;;  %v14866_v33 = vld [vmem:[#allocation2 + $0xc0] sm:$0xff]  ;;  %v14884_v24 = vld [vmem:[#allocation2 + $0xb8] sm:$0x3] }
 0x277   :  { %v8272_v14 = vpop.permute.xlu0 %8271  ;;  %v3554_v40 = vsel %vm123_vm0, %v3551_v5, %v3553_v2  ;;  %v8258_v16 = vunpack.i.l.bf16 %v14735_v18  ;;  %v3019_v6 = vadd.f32 %v6943_v15, %v14447_v34  ;;  %v3011_v5 = vadd.f32 %v14447_v34, %v3010_v51  ;;  %v3013_v2 = vpop.f32.mrb[23].mxu0  ;;  %v14870_v15 = vld [vmem:[#allocation2 + $0xd0] sm:$0x3] }
 0x278   :  { %v8274_v9 = vunpack.i.h.bf16 %v8272_v14  ;;  %20079 = vst [vmem:[#allocation118_spill] sm:$0xff] %v14844_v41  ;;  %v14850_v60 = vpack.i.bf16 %v3554_v40, %v3552_v43  ;;  %v8273_v37 = vunpack.i.l.bf16 %v8272_v14  ;;  %8381 = vrot.lane.b32.xlu0 %v14844_v41, %s9778_s25  ;;  %v2691_v63 = vsel %vm1342_vm10, %v14611_v29, %v8279_v22  ;;  %v14868_v29 = vld [vmem:[#allocation2 + $0xc8] sm:$0xff]  ;;  %v6947_v1 = vpop.f32.mrb[24].mxu0 }
 0x279   :  { %v14842_v21 = vpop.permute.xlu1 %8286  ;;  %v3022_v38 = vadd.f32 %v6944_v28, %v14447_v34  ;;  %v2690_v51 = vsel %vm1342_vm10, %v14607_v11, %v8278_v61  ;;  %v3207_v17 = vmax.f32 %v3019_v6, 0.0  ;;  %v3205_v45 = vmax.f32 %v3011_v5, 0.0 }
 0x27a   :  { %20080 = vst [vmem:[#allocation74_spill] sm:$0xff] %v14850_v60  ;;  %8376 = vrot.lane.b32.xlu1 %v14850_v60, %s9778_s25  ;;  %v2688_v40 = vsel %vm1342_vm10, %v14629_v55, %v8273_v37  ;;  %v2689_v43 = vsel %vm1342_vm10, %v14665_v27, %v8274_v9  ;;  %v14876_v37 = vld [vmem:[#allocation2 + $0xa8] sm:$0xff]  ;;  %v14878_v27 = vld [vmem:[#allocation2 + $0xb0] sm:$0xff]  ;;  %v8253_v9 = vunpack.i.l.bf16 %v14746_v35  ;;  %v3014_v60 = vadd.f32 %v14447_v34, %v3013_v2 }
 0x27b   :  { %v8282_v56 = vpop.permute.xlu0 %8281  ;;  %20081 = vst [vmem:[#allocation96_spill] sm:$0xff] %v14876_v37  ;;  %v3208_v41 = vmax.f32 %v3022_v38, 0.0  ;;  %3381 = vst.msk [vmem:[#allocation2 + $0x121] sm:$0xff] %vm1111_vm2, %v3207_v17  ;;  %v2736_v11 = vpack.c.bf16 %v2689_v43, %v2688_v40  ;;  %v3565_v61 = vrot.slane %v14866_v33, 1  ;;  %v3568_v6 = vrot.slane %v14870_v15, 1 }
 0x27c   :  { %v8283_v14 = vunpack.i.l.bf16 %v8282_v56  ;;  %v8284_v55 = vunpack.i.h.bf16 %v8282_v56  ;;  %3379 = vst.msk [vmem:[#allocation2 + $0x109] sm:$0xff] %vm1111_vm2, %v3205_v45  ;;  %v3566_v56 = vrot.slane %v14868_v29, 1  ;;  %v3206_v5 = vmax.f32 %v3014_v60, 0.0 }
 0x27d   :  { %v14872_v22 = vpop.permute.xlu1 %8296  ;;  %3382 = vst.msk [vmem:[#allocation2 + $0x129] sm:$0xff] %vm1111_vm2, %v3208_v41  ;;  %v3561_v2 = vrot.slane %v14878_v27, 1  ;;  %6953 = vmatprep.mubr.msk.bf16.mxu0 %vm2795_vm11, %v2736_v11  ;;  %v3563_v43 = vrot.slane %v14884_v24, 1  ;;  %v3026_v41 = vpop.f32.mrb[25].mxu0  ;;  %v8289_v60 = vunpack.i.h.bf16 %v14842_v21 }
 0x27e   :  { %v2692_v28 = vsel %vm1342_vm10, %v14677_v7, %v8283_v14  ;;  %v2737_v7 = vpack.c.bf16 %v2691_v63, %v2690_v51  ;;  %v3560_v14 = vrot.slane %v14876_v37, 1  ;;  %v2693_v17 = vsel %vm1342_vm10, %v14689_v42, %v8284_v55  ;;  %3380 = vst.msk [vmem:[#allocation2 + $0x111] sm:$0xff] %vm1111_vm2, %v3206_v5  ;;  %v6948_v11 = vpop.f32.mrb[26].mxu0 }
 0x27f   :  { %v8292_v38 = vpop.permute.xlu0 %8291  ;;  %v3567_v45 = vsel %vm123_vm0, %v3565_v61, %v3566_v56  ;;  %v3569_v40 = vsel %vm123_vm0, %v3566_v56, %v3568_v6  ;;  %v8288_v63 = vunpack.i.l.bf16 %v14842_v21  ;;  %v20083_v61 = vunpack.i.h.bf16 %v14717_v13 }
 0x280   :  { %v14903_v51 = vpack.i.bf16 %v3569_v40, %v3567_v45  ;;  %6954 = vmatmul.mubr.msk.bf16.gmra.mrb[32].mxu0 %vm2795_vm11, %v2737_v7  ;;  %v3562_v42 = vsel %vm123_vm0, %v3560_v14, %v3561_v2  ;;  %v14917_v21 = vsel %vm1309_vm9, %v14564_v39, %v8258_v16  ;;  %v3564_v6 = vsel %vm123_vm0, %v3561_v2, %v3563_v43  ;;  %v3029_v7 = vpop.f32.mrb[27].mxu0  ;;  %v14942_v2 = vld [vmem:[#allocation2 + $0xf0] sm:$0xff] }
 0x281   :  { %v14907_v55 = vpop.permute.xlu1 %8306  ;;  %v14913_v56 = vsel %vm1309_vm9, %v14544_v62, %v20083_v61  ;;  %v3035_v5 = vadd.f32 %v6947_v1, %v14447_v34  ;;  %v20084_v14 = vunpack.i.h.bf16 %v14735_v18  ;;  %v14929_v62 = vpack.i.bf16 %v3564_v6, %v3562_v42  ;;  %v14964_v42 = vld [vmem:[#allocation2 + $0xe8] sm:$0x3] }
 0x282   :  { %20082 = vst [vmem:[#allocation111_spill] sm:$0xff] %v14903_v51  ;;  %8391 = vrot.lane.b32.xlu0 %v14903_v51, %s9778_s25  ;;  %v8294_v13 = vunpack.i.h.bf16 %v8292_v38  ;;  %v2738_v40 = vpack.c.bf16 %v2693_v17, %v2692_v28  ;;  %v14933_v39 = vsel %vm1309_vm9, %v14576_v10, %v8253_v9  ;;  %v20086_v1 = vunpack.i.h.bf16 %v14746_v35  ;;  %v14952_v9 = vld [vmem:[#allocation2 + $0xf8] sm:$0xff]  ;;  %v14954_v17 = vld [vmem:[#allocation2 + $0x100] sm:$0x3]  ;;  %20088 = vst [vmem:[#allocation46_spill] sm:$0xff] %v14964_v42 }
 0x283   :  { %v14925_v45 = vsel %vm1309_vm9, %v14572_v26, %v20084_v14  ;;  %20085 = vst [vmem:[#allocation112_spill] sm:$0xff] %v14929_v62  ;;  %v3211_v16 = vmax.f32 %v3035_v5, 0.0  ;;  %v3027_v26 = vadd.f32 %v14447_v34, %v3026_v41  ;;  %v2694_v43 = vsel %vm1342_vm10, %v14669_v47, %v8288_v63  ;;  %8386 = vrot.lane.b32.xlu1 %v14929_v62, %s9778_s25  ;;  %v8302_v35 = vpop.permute.xlu0 %8301  ;;  %v14960_v63 = vld [vmem:[#allocation2 + $0xd8] sm:$0xff] }
 0x284   :  { %v14939_v18 = vsel %vm1309_vm9, %v14580_v59, %v20086_v1  ;;  %v2695_v28 = vsel %vm1342_vm10, %v14673_v32, %v8289_v60  ;;  %v8293_v10 = vunpack.i.l.bf16 %v8292_v38  ;;  %6957 = vmatprep.mubr.msk.bf16.mxu0 %vm2795_vm11, %v2738_v40  ;;  %v3038_v59 = vadd.f32 %v6948_v11, %v14447_v34  ;;  %20087 = vst [vmem:[#allocation54_spill] sm:$0xff] %v14960_v63  ;;  %v14962_v38 = vld [vmem:[#allocation2 + $0xe0] sm:$0xff]  ;;  %v6951_v40 = vpop.f32.mrb[28].mxu0 }
 0x285   :  { %v8263_v41 = vunpack.i.l.bf16 %v14786_v3  ;;  %v8299_v47 = vunpack.i.h.bf16 %v14872_v22  ;;  %3385 = vst.msk [vmem:[#allocation2 + $0x151] sm:$0xff] %vm1111_vm2, %v3211_v16  ;;  %v3209_v32 = vmax.f32 %v3027_v26, 0.0  ;;  %v3030_v60 = vadd.f32 %v14447_v34, %v3029_v7  ;;  %v14970_v14 = vpop.permute.xlu1 %8316  ;;  %v3042_v51 = vpop.f32.mrb[29].mxu0 }
 0x286   :  { %v8298_v11 = vunpack.i.l.bf16 %v14872_v22  ;;  %v2697_v61 = vsel %vm1342_vm10, %v14711_v8, %v8294_v13  ;;  %v3212_v6 = vmax.f32 %v3038_v59, 0.0  ;;  %v3575_v5 = vrot.slane %v14942_v2, 1  ;;  %v6952_v62 = vpop.f32.mrb[30].mxu0 }
 0x287   :  { %3383 = vst.msk [vmem:[#allocation2 + $0x139] sm:$0xff] %vm1111_vm2, %v3209_v32  ;;  %v3210_v7 = vmax.f32 %v3030_v60, 0.0  ;;  %v3576_v1 = vrot.slane %v14952_v9, 1  ;;  %v3578_v16 = vrot.slane %v14954_v17, 1  ;;  %v2739_v26 = vpack.c.bf16 %v2695_v28, %v2694_v43 }
 0x288   :  { %v2696_v22 = vsel %vm1342_vm10, %v14707_v23, %v8293_v10  ;;  %3386 = vst.msk [vmem:[#allocation2 + $0x159] sm:$0xff] %vm1111_vm2, %v3212_v6  ;;  %v3570_v8 = vrot.slane %v14960_v63, 1  ;;  %v3571_v13 = vrot.slane %v14962_v38, 1  ;;  %v3573_v59 = vrot.slane %v14964_v42, 1  ;;  %v3045_v23 = vpop.f32.mrb[31].mxu0  ;;  %v14990_v42 = vpop.permute.xlu0 %8311 }
 0x289   :  { %v8304_v32 = vunpack.i.h.bf16 %v8302_v35  ;;  %v8303_v60 = vunpack.i.l.bf16 %v8302_v35  ;;  %3384 = vst.msk [vmem:[#allocation2 + $0x141] sm:$0xff] %vm1111_vm2, %v3210_v7  ;;  %v3577_v37 = vsel %vm123_vm0, %v3575_v5, %v3576_v1  ;;  %v3579_v43 = vsel %vm123_vm0, %v3576_v1, %v3578_v16  ;;  %6958 = vmatmul.mubr.msk.bf16.gmra.mrb[36].mxu0 %vm2795_vm11, %v2739_v26 }
 0x28a   :  { %v8264_v28 = vunpack.i.h.bf16 %v14786_v3  ;;  %v14986_v10 = vpack.i.bf16 %v3579_v43, %v3577_v37  ;;  %v3572_v6 = vsel %vm123_vm0, %v3570_v8, %v3571_v13  ;;  %v3574_v63 = vsel %vm123_vm0, %v3571_v13, %v3573_v59 }
 0x28b   :  { %v14994_v35 = vsel %vm1309_vm9, %v14599_v44, %v8263_v41  ;;  %v2698_v5 = vsel %vm1342_vm10, %v14693_v57, %v8298_v11  ;;  %v2699_v7 = vsel %vm1342_vm10, %v14703_v30, %v8299_v47  ;;  %v15000_v1 = vpack.i.bf16 %v3574_v63, %v3572_v6  ;;  %v8327_v44 = vpop.permute.xlu1 %8326  ;;  %v15015_v63 = vld [vmem:[#allocation2 + $0x120] sm:$0xff]  ;;  %v15017_v11 = vld [vmem:[#allocation2 + $0x128] sm:$0xff] }
 0x28c   :  { %20089 = vst [vmem:[#allocation64_spill] sm:$0xff] %v14986_v10  ;;  %v8309_v3 = vunpack.i.h.bf16 %v14907_v55  ;;  %8401 = vrot.lane.b32.xlu0 %v14986_v10, %s9778_s25  ;;  %v2740_v37 = vpack.c.bf16 %v2697_v61, %v2696_v22  ;;  %v3051_v16 = vadd.f32 %v6951_v40, %v14447_v34  ;;  %v3043_v26 = vadd.f32 %v14447_v34, %v3042_v51  ;;  %v15019_v61 = vld [vmem:[#allocation2 + $0x130] sm:$0x3] }
 0x28d   :  { %20090 = vst [vmem:[#allocation78_spill] sm:$0xff] %v15000_v1  ;;  %v8308_v41 = vunpack.i.l.bf16 %v14907_v55  ;;  %v2700_v57 = vsel %vm1342_vm10, %v14775_v31, %v8303_v60  ;;  %v2701_v30 = vsel %vm1342_vm10, %v14779_v19, %v8304_v32  ;;  %8396 = vrot.lane.b32.xlu1 %v15000_v1, %s9778_s25  ;;  %v8319_v47 = vunpack.i.h.bf16 %v14970_v14  ;;  %v15024_v19 = vld [vmem:[#allocation2 + $0x108] sm:$0xff]  ;;  %v15026_v22 = vld [vmem:[#allocation2 + $0x110] sm:$0xff]  ;;  %v15031_v60 = vld [vmem:[#allocation2 + $0x118] sm:$0x3] }
 0x28e   :  { %v8318_v51 = vunpack.i.l.bf16 %v14970_v14  ;;  %6961 = vmatprep.mubr.msk.bf16.mxu0 %vm2795_vm11, %v2740_v37  ;;  %v3215_v55 = vmax.f32 %v3051_v16, 0.0  ;;  %v3213_v31 = vmax.f32 %v3043_v26, 0.0  ;;  %v3054_v40 = vadd.f32 %v6952_v62, %v14447_v34  ;;  %v8322_v14 = vpop.permute.xlu0 %8321 }
 0x28f   :  { %v8314_v8 = vunpack.i.h.bf16 %v14990_v42  ;;  %v8313_v13 = vunpack.i.l.bf16 %v14990_v42  ;;  %v8329_v59 = vunpack.i.h.bf16 %v8327_v44  ;;  %v3046_v32 = vadd.f32 %v14447_v34, %v3045_v23 }
 0x290   :  { %3389 = vst.msk [vmem:[#allocation2 + $0x181] sm:$0xff] %vm1111_vm2, %v3215_v55  ;;  %3387 = vst.msk [vmem:[#allocation2 + $0x169] sm:$0xff] %vm1111_vm2, %v3213_v31  ;;  %v3216_v43 = vmax.f32 %v3054_v40, 0.0  ;;  %v3585_v62 = vrot.slane %v15015_v63, 1  ;;  %v3586_v6 = vrot.slane %v15017_v11, 1  ;;  %v3588_v37 = vrot.slane %v15019_v61, 1 }
 0x291   :  { %v3214_v16 = vmax.f32 %v3046_v32, 0.0  ;;  %v2741_v26 = vpack.c.bf16 %v2699_v7, %v2698_v5  ;;  %v3580_v42 = vrot.slane %v15024_v19, 1  ;;  %v3581_v34 = vrot.slane %v15026_v22, 1 }
 0x292   :  { %v8328_v23 = vunpack.i.l.bf16 %v8327_v44  ;;  %3390 = vst.msk [vmem:[#allocation2 + $0x189] sm:$0xff] %vm1111_vm2, %v3216_v43  ;;  %v3587_v55 = vsel %vm123_vm0, %v3585_v62, %v3586_v6  ;;  %v3589_v31 = vsel %vm123_vm0, %v3586_v6, %v3588_v37  ;;  %v3583_v40 = vrot.slane %v15031_v60, 1  ;;  %v15056_v6 = vld [vmem:[#allocation2 + $0x150] sm:$0xff] }
 0x293   :  { %v15046_v10 = vsel %vm1309_vm9, %v14603_v52, %v8264_v28  ;;  %v8323_v1 = vunpack.i.l.bf16 %v8322_v14  ;;  %3388 = vst.msk [vmem:[#allocation2 + $0x171] sm:$0xff] %vm1111_vm2, %v3214_v16  ;;  %v15049_v5 = vpack.i.bf16 %v3589_v31, %v3587_v55  ;;  %6962 = vmatmul.mubr.msk.bf16.gmra.mrb[40].mxu0 %vm2795_vm11, %v2741_v26  ;;  %v3582_v7 = vsel %vm123_vm0, %v3580_v42, %v3581_v34  ;;  %v15058_v52 = vld [vmem:[#allocation2 + $0x158] sm:$0xff]  ;;  %v15060_v28 = vld [vmem:[#allocation2 + $0x160] sm:$0x3] }
 0x294   :  { %v2703_v44 = vsel %vm1342_vm10, %v14759_v48, %v8309_v3  ;;  %v8324_v32 = vunpack.i.h.bf16 %v8322_v14  ;;  %v3584_v43 = vsel %vm123_vm0, %v3581_v34, %v3583_v40  ;;  %v2742_v62 = vpack.c.bf16 %v2701_v30, %v2700_v57  ;;  %v8337_v57 = vpop.permute.xlu1 %8336 }
 0x295   :  { %20091 = vst [vmem:[#allocation132_spill] sm:$0xff] %v15049_v5  ;;  %v2702_v37 = vsel %vm1342_vm10, %v14755_v46, %v8308_v41  ;;  %v15066_v16 = vsel %vm1342_vm10, %v14792_v50, %v8318_v51  ;;  %v15070_v48 = vsel %vm1342_vm10, %v14783_v36, %v8319_v47  ;;  %8411 = vrot.lane.b32.xlu0 %v15049_v5, %s9778_s25  ;;  %v15089_v41 = vld [vmem:[#allocation2 + $0x138] sm:$0xff]  ;;  %v15091_v47 = vld [vmem:[#allocation2 + $0x140] sm:$0xff]  ;;  %v3598_v51 = vrot.slane %v15060_v28, 1 }
 0x296   :  { %v15074_v3 = vpack.i.bf16 %v3584_v43, %v3582_v7  ;;  %v2704_v30 = vsel %vm1342_vm10, %v14796_v58, %v8313_v13  ;;  %v2705_v46 = vsel %vm1342_vm10, %v14800_v20, %v8314_v8  ;;  %v15082_v50 = vsel %vm1342_vm10, %v14819_v25, %v8328_v23  ;;  %6965 = vmatprep.mubr.msk.bf16.mxu0 %vm2795_vm11, %v2742_v62  ;;  %v15099_v20 = vpop.permute.xlu0 %8331  ;;  %v15104_v8 = vld [vmem:[#allocation2 + $0x148] sm:$0x3] }
 0x297   :  { %v15086_v36 = vsel %vm1342_vm10, %v14823_v54, %v8329_v59  ;;  %v15095_v58 = vsel %vm1342_vm10, %v14836_v4, %v8323_v1  ;;  %v3595_v25 = vrot.slane %v15056_v6, 1  ;;  %v3596_v54 = vrot.slane %v15058_v52, 1  ;;  %v15114_v23 = vld [vmem:[#allocation2 + $0x168] sm:$0xff] }
 0x298   :  { %20092 = vst [vmem:[#allocation105_spill] sm:$0xff] %v15074_v3  ;;  %8406 = vrot.lane.b32.xlu1 %v15074_v3, %s9778_s25  ;;  %v15108_v13 = vsel %vm1342_vm10, %v14913_v56, %v8324_v32  ;;  %v8339_v59 = vunpack.i.h.bf16 %v8337_v57  ;;  %v8338_v4 = vunpack.i.l.bf16 %v8337_v57  ;;  %v2743_v1 = vpack.c.bf16 %v2703_v44, %v2702_v37  ;;  %20093 = vst [vmem:[#allocation108_spill] sm:$0xff] %v15114_v23 }
 0x299   :  { %v3597_v14 = vsel %vm123_vm0, %v3595_v25, %v3596_v54  ;;  %v3599_v26 = vsel %vm123_vm0, %v3596_v54, %v3598_v51  ;;  %v3590_v42 = vrot.slane %v15089_v41, 1  ;;  %v3591_v34 = vrot.slane %v15091_v47, 1 }
 0x29a   :  { %v8334_v55 = vunpack.i.h.bf16 %v15099_v20  ;;  %v15117_v31 = vpack.i.bf16 %v3599_v26, %v3597_v14  ;;  %v3593_v56 = vrot.slane %v15104_v8, 1  ;;  %v2744_v40 = vpack.c.bf16 %v2705_v46, %v2704_v30  ;;  %v15120_v7 = vld [vmem:[#allocation2 + $0x170] sm:$0xff]  ;;  %v15122_v44 = vld [vmem:[#allocation2 + $0x178] sm:$0x3] }
 0x29b   :  { %20095 = vst [vmem:[#allocation146_spill] sm:$0xff] %v15120_v7  ;;  %6966 = vmatmul.mubr.msk.bf16.gmra.mrb[44].mxu0 %vm2795_vm11, %v2743_v1  ;;  %v3592_v32 = vsel %vm123_vm0, %v3590_v42, %v3591_v34  ;;  %v3615_v43 = vrot.slane %v14584_v0, 2  ;;  %v3616_v62 = vrot.slane %v14613_v49, 2  ;;  %v3618_v37 = vrot.slane %v14615_v53, 2  ;;  %v8342_v42 = vpop.permute.xlu0 %8341 }
 0x29c   :  { %20094 = vst [vmem:[#allocation160_spill] sm:$0xff] %v15117_v31  ;;  %8421 = vrot.lane.b32.xlu0 %v15117_v31, %s9778_s25  ;;  %v3594_v57 = vsel %vm123_vm0, %v3591_v34, %v3593_v56  ;;  %6969 = vmatprep.mubr.msk.bf16.mxu0 %vm2795_vm11, %v2744_v40  ;;  %v3600_v30 = vrot.slane %v15114_v23, 1  ;;  %v3601_v46 = vrot.slane %v15120_v7, 1  ;;  %v3603_v25 = vrot.slane %v15122_v44, 1  ;;  %v20099_v34 = vld [vmem:[#allocation162_spill] sm:$0xff]  ;;  %v20100_v56 = vld [vmem:[#allocation133_spill] sm:$0xff] }
 0x29d   :  { %v15138_v0 = vsel %vm1342_vm10, %v14917_v21, %v8338_v4  ;;  %v15142_v49 = vsel %vm1342_vm10, %v14925_v45, %v8339_v59  ;;  %v8333_v53 = vunpack.i.l.bf16 %v15099_v20  ;;  %v15145_v54 = vpack.i.bf16 %v3594_v57, %v3592_v32  ;;  %v20098_v59 = vld [vmem:[#allocation115_spill] sm:$0xff]  ;;  %v20102_v32 = vld [vmem:[#allocation153_spill] sm:$0xff]  ;;  %v20104_v57 = vld [vmem:[#allocation82_spill] sm:$0xff] }
 0x29e   :  { %v3617_v51 = vsel %vm204_vm1, %v3615_v43, %v3616_v62  ;;  %v3619_v1 = vsel %vm204_vm1, %v3616_v62, %v3618_v37  ;;  %v3602_v14 = vsel %vm123_vm0, %v3600_v30, %v3601_v46  ;;  %v3604_v26 = vsel %vm123_vm0, %v3601_v46, %v3603_v25  ;;  %v20103_v62 = vld [vmem:[#allocation83_spill] sm:$0xff]  ;;  %v20105_v46 = vld [vmem:[#allocation76_spill] sm:$0xff]  ;;  %v20107_v25 = vld [vmem:[#allocation69_spill] sm:$0xff] }
 0x29f   :  { %20096 = vst [vmem:[#allocation163_spill] sm:$0xff] %v15145_v54  ;;  %8416 = vrot.lane.b32.xlu1 %v15145_v54, %s9778_s25  ;;  %v2745_v21 = vpack.c.bf16 %v15070_v48, %v15066_v16  ;;  %v15155_v45 = vpack.i.bf16 %v3604_v26, %v3602_v14  ;;  %v3626_v20 = vrot.slane %v14683_v12, 2  ;;  %v3628_v4 = vrot.slane %v20098_v59, 2  ;;  %v20108_v26 = vld [vmem:[#allocation87_spill] sm:$0xff] }
 0x2a0   :  { %v20101_v40 = vpack.i.bf16 %v20099_v34, %v20100_v56  ;;  %v3625_v43 = vrot.slane %v20102_v32, 2  ;;  %v3610_v37 = vrot.slane %v20103_v62, 2  ;;  %v3611_v30 = vrot.slane %v20104_v57, 2 }
 0x2a1   :  { %20097 = vst [vmem:[#allocation52_spill] sm:$0xff] %v15155_v45  ;;  %v3613_v16 = vrot.slane %v20105_v46, 2  ;;  %v15167_v48 = vpack.i.bf16 %v3619_v1, %v3617_v51  ;;  %v2746_v12 = vpack.c.bf16 %v15108_v13, %v15095_v58  ;;  %v3636_v14 = vrot.slane %v20107_v25, 2  ;;  %v20109_v58 = vld [vmem:[#allocation110_spill] sm:$0xff]  ;;  %v20110_v1 = vld [vmem:[#allocation71_spill] sm:$0xff] }
 0x2a2   :  { %8431 = vrot.lane.b32.xlu0 %v20101_v40, %s9779_s17  ;;  %v3638_v59 = vrot.slane %v20108_v26, 2  ;;  %v3627_v34 = vsel %vm204_vm1, %v3625_v43, %v3626_v20  ;;  %v3629_v56 = vsel %vm204_vm1, %v3626_v20, %v3628_v4  ;;  %v3612_v40 = vsel %vm204_vm1, %v3610_v37, %v3611_v30  ;;  %v20112_v43 = vld [vmem:[#allocation88_spill] sm:$0xff] }
 0x2a3   :  { %20106 = vst [vmem:[#allocation56_spill] sm:$0xff] %v15167_v48  ;;  %v3614_v32 = vsel %vm204_vm1, %v3611_v30, %v3613_v16  ;;  %v2713_v62 = vsel %vm1342_vm10, %v14939_v18, %v8334_v55  ;;  %v8343_v51 = vunpack.i.l.bf16 %v8342_v42  ;;  %6970 = vmatmul.mubr.msk.bf16.gmra.mrb[48].mxu0 %vm2795_vm11, %v2745_v21  ;;  %8426 = vrot.lane.b32.xlu1 %v15155_v45, %s9778_s25  ;;  %v3635_v13 = vrot.slane %v20109_v58, 2  ;;  %v20111_v18 = vld [vmem:[#allocation149_spill] sm:$0xff] }
 0x2a4   :  { %v3621_v57 = vrot.slane %v20110_v1, 2  ;;  %v2712_v20 = vsel %vm1342_vm10, %v14933_v39, %v8333_v53  ;;  %v8344_v4 = vunpack.i.h.bf16 %v8342_v42  ;;  %6973 = vmatprep.mubr.msk.bf16.mxu0 %vm2795_vm11, %v2746_v12  ;;  %v3620_v55 = vrot.slane %v20111_v18, 2  ;;  %v20114_v42 = vld [vmem:[#allocation155_spill] sm:$0xff] }
 0x2a5   :  { %v3623_v21 = vrot.slane %v20112_v43, 2  ;;  %v15191_v37 = vpack.i.bf16 %v3629_v56, %v3627_v34  ;;  %v15193_v30 = vpack.i.bf16 %v3614_v32, %v3612_v40  ;;  %v3637_v46 = vsel %vm204_vm1, %v3635_v13, %v3636_v14 }
 0x2a6   :  { %8441 = vrot.lane.b32.xlu0 %v15167_v48, %s9779_s17  ;;  %v3639_v16 = vsel %vm204_vm1, %v3636_v14, %v3638_v59  ;;  %v3622_v39 = vsel %vm204_vm1, %v3620_v55, %v3621_v57  ;;  %v3631_v26 = vrot.slane %v20114_v42, 2  ;;  %v20115_v48 = vld [vmem:[#allocation93_spill] sm:$0xff]  ;;  %v15203_v31 = vsel %vm1342_vm10, %v14994_v35, %v8343_v51  ;;  %v20116_v14 = vld [vmem:[#allocation143_spill] sm:$0xff] }
 0x2a7   :  { %20113 = vst [vmem:[#allocation134_spill] sm:$0xff] %v15191_v37  ;;  %v3624_v53 = vsel %vm204_vm1, %v3621_v57, %v3623_v21  ;;  %v3633_v12 = vrot.slane %v20115_v48, 2  ;;  %8436 = vrot.lane.b32.xlu1 %v15193_v30, %s9779_s17  ;;  %v3646_v34 = vrot.slane %v14868_v29, 2  ;;  %v3648_v56 = vrot.slane %v14870_v15, 2 }
 0x2a8   :  { %v3630_v59 = vrot.slane %v20116_v14, 2  ;;  %v15212_v40 = vpack.i.bf16 %v3639_v16, %v3637_v46  ;;  %v2747_v48 = vpack.c.bf16 %v15086_v36, %v15082_v50  ;;  %v3656_v35 = vrot.slane %v14952_v9, 2  ;;  %v20119_v16 = vld [vmem:[#allocation96_spill] sm:$0xff] }
 0x2a9   :  { %v3658_v32 = vrot.slane %v14954_v17, 2  ;;  %v15218_v51 = vpack.i.bf16 %v3624_v53, %v3622_v39  ;;  %v3645_v13 = vrot.slane %v14866_v33, 2  ;;  %v3634_v57 = vsel %vm204_vm1, %v3631_v26, %v3633_v12  ;;  %v8347_v53 = vpop.permute.xlu1 %8346 }
 0x2aa   :  { %8451 = vrot.lane.b32.xlu0 %v15191_v37, %s9779_s17  ;;  %20117 = vst [vmem:[#allocation20_spill] sm:$0xff] %v15212_v40  ;;  %v3632_v15 = vsel %vm204_vm1, %v3630_v59, %v3631_v26  ;;  %v2748_v55 = vpack.c.bf16 %v2713_v62, %v2712_v20  ;;  %v3655_v43 = vrot.slane %v14942_v2, 2  ;;  %v3641_v21 = vrot.slane %v14878_v27, 2  ;;  %v20120_v20 = vld [vmem:[#allocation102_spill] sm:$0xff] }
 0x2ab   :  { %20118 = vst [vmem:[#allocation120_spill] sm:$0xff] %v15218_v51  ;;  %v3643_v46 = vrot.slane %v14884_v24, 2  ;;  %v2717_v50 = vsel %vm1342_vm10, %v15046_v10, %v8344_v4  ;;  %6974 = vmatmul.mubr.msk.bf16.gmra.mrb[52].mxu0 %vm2795_vm11, %v2747_v48  ;;  %8446 = vrot.lane.b32.xlu1 %v15218_v51, %s9779_s17  ;;  %v3647_v17 = vsel %vm204_vm1, %v3645_v13, %v3646_v34  ;;  %v3640_v62 = vrot.slane %v20119_v16, 2 }
 0x2ac   :  { %v3649_v36 = vsel %vm204_vm1, %v3646_v34, %v3648_v56  ;;  %v8269_v39 = vunpack.i.h.bf16 %v20120_v20  ;;  %6977 = vmatprep.mubr.msk.bf16.mxu0 %vm2795_vm11, %v2748_v55  ;;  %v15238_v24 = vpack.i.bf16 %v3634_v57, %v3632_v15  ;;  %v3657_v10 = vsel %vm204_vm1, %v3655_v43, %v3656_v35  ;;  %v20123_v15 = vld [vmem:[#allocation46_spill] sm:$0xff] }
 0x2ad   :  { %v3659_v4 = vsel %vm204_vm1, %v3656_v35, %v3658_v32  ;;  %v3642_v26 = vsel %vm204_vm1, %v3640_v62, %v3641_v21  ;;  %v3644_v12 = vsel %vm204_vm1, %v3641_v21, %v3643_v46  ;;  %v3666_v34 = vrot.slane %v15017_v11, 2 }
 0x2ae   :  { %8461 = vrot.lane.b32.xlu0 %v15212_v40, %s9779_s17  ;;  %20121 = vst [vmem:[#allocation124_spill] sm:$0xff] %v15238_v24  ;;  %v3668_v56 = vrot.slane %v15019_v61, 2  ;;  %v8268_v59 = vunpack.i.l.bf16 %v20120_v20  ;;  %v15247_v48 = vpack.i.bf16 %v3649_v36, %v3647_v17  ;;  %v3651_v13 = vrot.slane %v14962_v38, 2  ;;  %v20126_v17 = vld [vmem:[#allocation54_spill] sm:$0xff] }
 0x2af   :  { %v3653_v57 = vrot.slane %v20123_v15, 2  ;;  %v8349_v55 = vunpack.i.h.bf16 %v8347_v53  ;;  %v8348_v43 = vunpack.i.l.bf16 %v8347_v53  ;;  %8456 = vrot.lane.b32.xlu1 %v15238_v24, %s9779_s17  ;;  %v2749_v35 = vpack.c.bf16 %v15142_v49, %v15138_v0 }
 0x2b0   :  { %20122 = vst [vmem:[#allocation127_spill] sm:$0xff] %v15247_v48  ;;  %v3665_v32 = vrot.slane %v15015_v63, 2  ;;  %v15258_v61 = vpack.i.bf16 %v3659_v4, %v3657_v10  ;;  %v15260_v21 = vpack.i.bf16 %v3644_v12, %v3642_v26  ;;  %v2750_v46 = vpack.c.bf16 %v2717_v50, %v15203_v31  ;;  %v20127_v26 = vld [vmem:[#allocation49_spill] sm:$0xff]  ;;  %v20128_v50 = vld [vmem:[#allocation94_spill] sm:$0xff] }
 0x2b1   :  { %v3650_v36 = vrot.slane %v20126_v17, 2  ;;  %v3669_v20 = vsel %vm204_vm1, %v3666_v34, %v3668_v56  ;;  %v3676_v53 = vrot.slane %v15058_v52, 2  ;;  %v3678_v0 = vrot.slane %v15060_v28, 2 }
 0x2b2   :  { %8471 = vrot.lane.b32.xlu0 %v15247_v48, %s9779_s17  ;;  %20124 = vst [vmem:[#allocation106_spill] sm:$0xff] %v15258_v61  ;;  %20125 = vst [vmem:[#allocation68_spill] sm:$0xff] %v15260_v21  ;;  %v3667_v62 = vsel %vm204_vm1, %v3665_v32, %v3666_v34  ;;  %v3654_v15 = vsel %vm204_vm1, %v3651_v13, %v3653_v57  ;;  %v3661_v10 = vrot.slane %v15026_v22, 2  ;;  %v3663_v4 = vrot.slane %v15031_v60, 2 }
 0x2b3   :  { %v3652_v49 = vsel %vm204_vm1, %v3650_v36, %v3651_v13  ;;  %v2686_v31 = vsel %vm1309_vm9, %v20127_v26, %v8268_v59  ;;  %v2687_v12 = vsel %vm1309_vm9, %v20128_v50, %v8269_v39  ;;  %6978 = vmatmul.mubr.msk.bf16.gmra.mrb[56].mxu0 %vm2795_vm11, %v2749_v35  ;;  %8466 = vrot.lane.b32.xlu1 %v15260_v21, %s9779_s17  ;;  %v3675_v28 = vrot.slane %v15056_v6, 2 }
 0x2b4   :  { %v2718_v34 = vsel %vm1342_vm10, %v2686_v31, %v8348_v43  ;;  %v2719_v56 = vsel %vm1342_vm10, %v2687_v12, %v8349_v55  ;;  %6981 = vmatprep.mubr.msk.bf16.mxu0 %vm2795_vm11, %v2750_v46  ;;  %v3660_v60 = vrot.slane %v15024_v19, 2  ;;  %v15286_v59 = vpack.i.bf16 %v3669_v20, %v3667_v62 }
 0x2b5   :  { %v15288_v39 = vpack.i.bf16 %v3654_v15, %v3652_v49  ;;  %v3677_v13 = vsel %vm204_vm1, %v3675_v28, %v3676_v53  ;;  %v3679_v57 = vsel %vm204_vm1, %v3676_v53, %v3678_v0  ;;  %v3664_v43 = vsel %vm204_vm1, %v3661_v10, %v3663_v4  ;;  %v15314_v15 = vld [vmem:[#allocation2 + $0x20] sm:$0xff] }
 0x2b6   :  { %8481 = vrot.lane.b32.xlu0 %v15258_v61, %s9779_s17  ;;  %20129 = vst [vmem:[#allocation166_spill] sm:$0xff] %v15286_v59  ;;  %v3662_v35 = vsel %vm204_vm1, %v3660_v60, %v3661_v10  ;;  %v3671_v55 = vrot.slane %v15091_v47, 2  ;;  %v3673_v32 = vrot.slane %v15104_v8, 2  ;;  %v3670_v46 = vrot.slane %v15089_v41, 2  ;;  %v15316_v10 = vld [vmem:[#allocation2 + $0x18] sm:$0xff]  ;;  %v3471_v60 = vld [vmem:[#allocation2 + $0x180] sm:$0xff] }
 0x2b7   :  { %20130 = vst [vmem:[#allocation140_spill] sm:$0xff] %v15288_v39  ;;  %8476 = vrot.lane.b32.xlu1 %v15288_v39, %s9779_s17  ;;  %v15301_v36 = vpack.i.bf16 %v3679_v57, %v3677_v13  ;;  %v2751_v62 = vpack.c.bf16 %v2719_v56, %v2718_v34  ;;  %v15303_v20 = vpack.i.bf16 %v3664_v43, %v3662_v35  ;;  %v3681_v49 = vrot.slane %v15120_v7, 2  ;;  %v3472_v34 = vld [vmem:[#allocation2 + $0x188] sm:$0xff]  ;;  %v3473_v56 = vld [vmem:[#allocation2 + $0x190] sm:$0x3]  ;;  %v15337_v57 = vld [vmem:[#allocation2 + $0x38] sm:$0xff] }
 0x2b8   :  { %v3672_v53 = vsel %vm204_vm1, %v3670_v46, %v3671_v55  ;;  %v3674_v0 = vsel %vm204_vm1, %v3671_v55, %v3673_v32  ;;  %v3683_v8 = vrot.slane %v15122_v44, 2  ;;  %v8510_v4 = vpack.i.bf16 %v15314_v15, %v15316_v10  ;;  %v15335_v13 = vld [vmem:[#allocation2 + $0x30] sm:$0xff] }
 0x2b9   :  { %20131 = vst [vmem:[#allocation62_spill] sm:$0xff] %v15301_v36  ;;  %20132 = vst [vmem:[#allocation59_spill] sm:$0xff] %v15303_v20  ;;  %v3680_v26 = vrot.slane %v15114_v23, 2  ;;  %v15321_v31 = vpack.i.bf16 %v3674_v0, %v3672_v53  ;;  %v8520_v28 = vpack.i.bf16 %v20110_v1, %v20111_v18  ;;  %v15341_v35 = vpack.i.bf16 %v15337_v57, %v15335_v13  ;;  %v15350_v53 = vld [vmem:[#allocation2 + $0x60] sm:$0xff]  ;;  %v15352_v0 = vld [vmem:[#allocation2 + $0x68] sm:$0xff] }
 0x2ba   :  { %8491 = vrot.lane.b32.xlu0 %v15286_v59, %s9779_s17  ;;  %v3684_v50 = vsel %vm204_vm1, %v3681_v49, %v3683_v8  ;;  %v3689_v43 = vrot.slane %v3472_v34, 1  ;;  %v3691_v55 = vrot.slane %v3473_v56, 1  ;;  %v8530_v1 = vpack.i.bf16 %v20114_v42, %v20116_v14 }
 0x2bb   :  { %6982 = vmatmul.mubr.msk.bf16.gmra.mrb[60].mxu0 %vm2795_vm11, %v2751_v62  ;;  %8486 = vrot.lane.b32.xlu1 %v15303_v20, %s9779_s17  ;;  %20133 = vst [vmem:[#allocation126_spill] sm:$0xff] %v15321_v31  ;;  %v3682_v44 = vsel %vm204_vm1, %v3680_v26, %v3681_v49  ;;  %v3688_v18 = vrot.slane %v3471_v60, 1  ;;  %v3694_v32 = vrot.slane %v3472_v34, 2  ;;  %v3696_v46 = vrot.slane %v3473_v56, 2  ;;  %v20143_v56 = vld [vmem:[#allocation118_spill] sm:$0xff] }
 0x2bc   :  { %v15328_v12 = vpack.i.bf16 %v3684_v50, %v3682_v44  ;;  %v15347_v62 = vpack.i.bf16 %v3472_v34, %v3471_v60  ;;  %v15356_v49 = vpack.i.bf16 %v15352_v0, %v15350_v53  ;;  %v3692_v14 = vsel %vm123_vm0, %v3689_v43, %v3691_v55  ;;  %v20145_v55 = vld [vmem:[#allocation111_spill] sm:$0xff] }
 0x2bd   :  { %v3690_v42 = vsel %vm123_vm0, %v3688_v18, %v3689_v43  ;;  %v3693_v8 = vrot.slane %v3471_v60, 2  ;;  %v15364_v26 = vpack.i.bf16 %v14962_v38, %v20126_v17  ;;  %v8535_v44 = vpack.i.bf16 %v20107_v25, %v20109_v58  ;;  %v20142_v17 = vld [vmem:[#allocation112_spill] sm:$0xff]  ;;  %v15435_v60 = vpop.permute.xlu0 %8351  ;;  %v20144_v43 = vld [vmem:[#allocation78_spill] sm:$0xff] }
 0x2be   :  { %8501 = vrot.lane.b32.xlu0 %v15301_v36, %s9779_s17  ;;  %20134 = vst [vmem:[#allocation117_spill] sm:$0xff] %v15328_v12  ;;  %v15373_v34 = vpack.i.bf16 %v3692_v14, %v3690_v42  ;;  %v8545_v38 = vpack.i.bf16 %v14868_v29, %v14866_v33  ;;  %v15384_v25 = vpack.i.bf16 %v15026_v22, %v15024_v19  ;;  %v20140_v19 = vld [vmem:[#allocation74_spill] sm:$0xff]  ;;  %v20141_v22 = vld [vmem:[#allocation164_spill] sm:$0xff] }
 0x2bf   :  { %8496 = vrot.lane.b32.xlu1 %v15321_v31, %s9779_s17  ;;  %v3695_v50 = vsel %vm204_vm1, %v3693_v8, %v3694_v32  ;;  %v15391_v58 = vpack.i.bf16 %v14952_v9, %v14942_v2  ;;  %v15403_v33 = vpack.i.bf16 %v15017_v11, %v15015_v63  ;;  %v15407_v29 = vpack.i.bf16 %v15120_v7, %v15114_v23  ;;  %v20137_v9 = vld [vmem:[#allocation65_spill] sm:$0xff]  ;;  %v20139_v11 = vld [vmem:[#allocation67_spill] sm:$0xff]  ;;  %v20146_v18 = vld [vmem:[#allocation64_spill] sm:$0xff] }
 0x2c0   :  { %20135 = vst [vmem:[#allocation31_spill] sm:$0xff] %v15373_v34  ;;  %v15415_v2 = vpack.i.bf16 %v15058_v52, %v15056_v6  ;;  %v20138_v63 = vld [vmem:[#allocation97_spill] sm:$0xff]  ;;  %v20147_v8 = vld [vmem:[#allocation160_spill] sm:$0xff] }
 0x2c2   :  { %8511 = vrot.lane.b32.xlu0 %v8510_v4, %s9780_s24  ;;  %v8540_v4 = vpack.i.bf16 %v14878_v27, %v20119_v16  ;;  %v15395_v16 = vpack.i.bf16 %v15091_v47, %v15089_v41 }
 0x2c3   :  { %8506 = vrot.lane.b32.xlu1 %v15328_v12, %s9779_s17 }
 0x2c6   :  { %8521 = vrot.lane.b32.xlu0 %v8520_v28, %s9780_s24  ;;  %v3697_v28 = vsel %vm204_vm1, %v3694_v32, %v3696_v46 }
 0x2c7   :  { %8516 = vrot.lane.b32.xlu1 %v15341_v35, %s9780_s24  ;;  %v15378_v27 = vpack.i.bf16 %v3697_v28, %v3695_v50 }
 0x2c9   :  { %20136 = vst [vmem:[#allocation151_spill] sm:$0xff] %v15378_v27 }
 0x2ca   :  { %8531 = vrot.lane.b32.xlu0 %v8530_v1, %s9780_s24 }
 0x2cb   :  { %8526 = vrot.lane.b32.xlu1 %v15356_v49, %s9780_s24 }
 0x2ce   :  { %8541 = vrot.lane.b32.xlu0 %v8540_v4, %s9780_s24 }
 0x2cf   :  { %8536 = vrot.lane.b32.xlu1 %v8535_v44, %s9780_s24 }
 0x2d2   :  { %8551 = vrot.lane.b32.xlu0 %v15364_v26, %s9780_s24 }
 0x2d3   :  { %8546 = vrot.lane.b32.xlu1 %v8545_v38, %s9780_s24  ;;  %v20148_v38 = vld [vmem:[#allocation56_spill] sm:$0xff] }
 0x2d6   :  { %8561 = vrot.lane.b32.xlu0 %v15384_v25, %s9780_s24 }
 0x2d7   :  { %8556 = vrot.lane.b32.xlu1 %v15391_v58, %s9780_s24  ;;  %v15443_v1 = vpop.permute.xlu0 %8361 }
 0x2da   :  { %8571 = vrot.lane.b32.xlu0 %v15395_v16, %s9780_s24 }
 0x2db   :  { %8566 = vrot.lane.b32.xlu1 %v15403_v33, %s9780_s24  ;;  %v15449_v32 = vpop.permute.xlu1 %8356 }
 0x2de   :  { %8581 = vrot.lane.b32.xlu0 %v15407_v29, %s9780_s24 }
 0x2df   :  { %8576 = vrot.lane.b32.xlu1 %v15415_v2, %s9780_s24 }
 0x2e1   :  { %v15451_v46 = vpop.permute.xlu0 %8371 }
 0x2e2   :  { %8591 = vrot.lane.b32.xlu0 %v20137_v9, %s9781_s26 }
 0x2e3   :  { %8586 = vrot.lane.b32.xlu1 %v15347_v62, %s9780_s24  ;;  %v15457_v42 = vpop.permute.xlu1 %8366 }
 0x2e4   :  { %v8369_v23 = vunpack.i.h.bf16 %v15457_v42 }
 0x2e6   :  { %8601 = vrot.lane.b32.xlu0 %v20138_v63, %s9781_s26 }
 0x2e7   :  { %8596 = vrot.lane.b32.xlu1 %v20139_v11, %s9781_s26 }
 0x2ea   :  { %8611 = vrot.lane.b32.xlu0 %v20140_v19, %s9781_s26  ;;  %v15459_v14 = vpop.permute.xlu0 %8381 }
 0x2eb   :  { %8606 = vrot.lane.b32.xlu1 %v20141_v22, %s9781_s26 }
 0x2ec   :  { %v15465_v4 = vpop.permute.xlu1 %8376 }
 0x2ee   :  { %8621 = vrot.lane.b32.xlu0 %v20142_v17, %s9781_s26 }
 0x2ef   :  { %8616 = vrot.lane.b32.xlu1 %v20143_v56, %s9781_s26 }
 0x2f2   :  { %8631 = vrot.lane.b32.xlu0 %v20144_v43, %s9781_s26 }
 0x2f3   :  { %8626 = vrot.lane.b32.xlu1 %v20145_v55, %s9781_s26 }
 0x2f4   :  { %v15467_v44 = vpop.permute.xlu0 %8391 }
 0x2f5   :  { %v15473_v50 = vpop.permute.xlu1 %8386 }
 0x2f6   :  { %8641 = vrot.lane.b32.xlu0 %v15074_v3, %s9781_s26  ;;  %v15567_v3 = vld [vmem:[#allocation2 + $0xc8] sm:$0xff] }
 0x2f7   :  { %8636 = vrot.lane.b32.xlu1 %v20146_v18, %s9781_s26 }
 0x2fa   :  { %8651 = vrot.lane.b32.xlu0 %v15145_v54, %s9781_s26  ;;  %v15547_v54 = vld [vmem:[#allocation2 + $0x90] sm:$0xff] }
 0x2fb   :  { %8646 = vrot.lane.b32.xlu1 %v15049_v5, %s9781_s26 }
 0x2fe   :  { %8661 = vrot.lane.b32.xlu0 %v15155_v45, %s9781_s26  ;;  %v15475_v28 = vpop.permute.xlu0 %8401 }
 0x2ff   :  { %8656 = vrot.lane.b32.xlu1 %v20147_v8, %s9781_s26 }
 0x302   :  { %8671 = vrot.lane.b32.xlu0 %v15193_v30, %s9782_s27  ;;  %v15481_v30 = vpop.permute.xlu1 %8396 }
 0x303   :  { %8666 = vrot.lane.b32.xlu1 %v15373_v34, %s9781_s26  ;;  %v15541_v34 = vld [vmem:[#allocation2 + $0x50] sm:$0xff] }
 0x306   :  { %8681 = vrot.lane.b32.xlu0 %v15218_v51, %s9782_s27 }
 0x307   :  { %8676 = vrot.lane.b32.xlu1 %v20148_v38, %s9782_s27  ;;  %v15483_v9 = vpop.permute.xlu0 %8411 }
 0x30a   :  { %8691 = vrot.lane.b32.xlu0 %v15238_v24, %s9782_s27  ;;  %v15489_v51 = vpop.permute.xlu1 %8406 }
 0x30b   :  { %8686 = vrot.lane.b32.xlu1 %v15191_v37, %s9782_s27 }
 0x30e   :  { %8701 = vrot.lane.b32.xlu0 %v15260_v21, %s9782_s27  ;;  %v15491_v45 = vpop.permute.xlu0 %8421 }
 0x30f   :  { %8696 = vrot.lane.b32.xlu1 %v15212_v40, %s9782_s27 }
 0x311   :  { %v15497_v24 = vpop.permute.xlu1 %8416 }
 0x312   :  { %8711 = vrot.lane.b32.xlu0 %v15288_v39, %s9782_s27 }
 0x313   :  { %8706 = vrot.lane.b32.xlu1 %v15247_v48, %s9782_s27 }
 0x314   :  { %v15499_v38 = vpop.permute.xlu0 %8431 }
 0x315   :  { %v15505_v21 = vpop.permute.xlu1 %8426 }
 0x316   :  { %8721 = vrot.lane.b32.xlu0 %v15303_v20, %s9782_s27 }
 0x317   :  { %8716 = vrot.lane.b32.xlu1 %v15258_v61, %s9782_s27 }
 0x318   :  { %v15507_v37 = vpop.permute.xlu0 %8441 }
 0x319   :  { %v15513_v39 = vpop.permute.xlu1 %8436 }
 0x31a   :  { %8731 = vrot.lane.b32.xlu0 %v15321_v31, %s9782_s27  ;;  %20149 = vst [vmem:[#allocation152_spill] sm:$0xff] %v15513_v39 }
 0x31b   :  { %8726 = vrot.lane.b32.xlu1 %v15286_v59, %s9782_s27  ;;  %v15539_v59 = vld [vmem:[#allocation2 + $0x48] sm:$0xff] }
 0x31c   :  { %v15515_v40 = vpop.permute.xlu0 %8451 }
 0x31d   :  { %20150 = vst [vmem:[#allocation63_spill] sm:$0xff] %v15515_v40  ;;  %v15521_v20 = vpop.permute.xlu1 %8446 }
 0x31e   :  { %8741 = vrot.lane.b32.xlu0 %v15328_v12, %s9782_s27  ;;  %20151 = vst [vmem:[#allocation66_spill] sm:$0xff] %v15521_v20  ;;  %v15577_v20 = vld [vmem:[#allocation2 + $0xb0] sm:$0xff] }
 0x31f   :  { %8736 = vrot.lane.b32.xlu1 %v15301_v36, %s9782_s27  ;;  %v8755_v36 = vpack.i.bf16 %v15541_v34, %v15539_v59 }
 0x320   :  { %v15523_v48 = vpop.permute.xlu0 %8461 }
 0x321   :  { %20152 = vst [vmem:[#allocation141_spill] sm:$0xff] %v15523_v48  ;;  %v15529_v31 = vpop.permute.xlu1 %8456  ;;  %v15565_v48 = vld [vmem:[#allocation2 + $0xc0] sm:$0xff] }
 0x322   :  { %8751 = vrot.lane.b32.xlu0 %v15341_v35, %s9783_s28  ;;  %20153 = vst [vmem:[#allocation131_spill] sm:$0xff] %v15529_v31  ;;  %v15559_v31 = vld [vmem:[#allocation2 + $0x80] sm:$0xff] }
 0x323   :  { %8746 = vrot.lane.b32.xlu1 %v15378_v27, %s9782_s27 }
 0x324   :  { %v15531_v61 = vpop.permute.xlu0 %8471 }
 0x325   :  { %20154 = vst [vmem:[#allocation50_spill] sm:$0xff] %v15531_v61  ;;  %v15537_v12 = vpop.permute.xlu1 %8466  ;;  %v15549_v61 = vld [vmem:[#allocation2 + $0x98] sm:$0xff] }
 0x326   :  { %8761 = vrot.lane.b32.xlu0 %v15356_v49, %s9783_s28  ;;  %20155 = vst [vmem:[#allocation142_spill] sm:$0xff] %v15537_v12  ;;  %v8770_v27 = vpack.i.bf16 %v15549_v61, %v15547_v54  ;;  %v15557_v12 = vld [vmem:[#allocation2 + $0x78] sm:$0xff] }
 0x327   :  { %8756 = vrot.lane.b32.xlu1 %v8755_v36, %s9783_s28  ;;  %v8780_v36 = vpack.i.bf16 %v15567_v3, %v15565_v48 }
 0x328   :  { %v15545_v35 = vpop.permute.xlu0 %8481 }
 0x329   :  { %20156 = vst [vmem:[#allocation136_spill] sm:$0xff] %v15545_v35  ;;  %v15555_v49 = vpop.permute.xlu1 %8476  ;;  %v8765_v35 = vpack.i.bf16 %v15559_v31, %v15557_v12 }
 0x32a   :  { %8771 = vrot.lane.b32.xlu0 %v8770_v27, %s9783_s28  ;;  %20157 = vst [vmem:[#allocation73_spill] sm:$0xff] %v15555_v49  ;;  %v15575_v49 = vld [vmem:[#allocation2 + $0xa8] sm:$0xff] }
 0x32b   :  { %8766 = vrot.lane.b32.xlu1 %v8765_v35, %s9783_s28 }
 0x32c   :  { %v15563_v8 = vpop.permute.xlu0 %8491 }
 0x32d   :  { %20158 = vst [vmem:[#allocation70_spill] sm:$0xff] %v15563_v8  ;;  %v15573_v27 = vpop.permute.xlu1 %8486  ;;  %v8775_v8 = vpack.i.bf16 %v15577_v20, %v15575_v49 }
 0x32e   :  { %8781 = vrot.lane.b32.xlu0 %v8780_v36, %s9783_s28  ;;  %20159 = vst [vmem:[#allocation145_spill] sm:$0xff] %v15573_v27 }
 0x32f   :  { %8776 = vrot.lane.b32.xlu1 %v8775_v8, %s9783_s28  ;;  %v8354_v8 = vunpack.i.h.bf16 %v15435_v60 }
 0x330   :  { %v15581_v40 = vpop.permute.xlu0 %8501 }
 0x331   :  { %20160 = vst [vmem:[#allocation8_spill] sm:$0xff] %v15581_v40  ;;  %v15586_v5 = vpop.permute.xlu1 %8496  ;;  %v8363_v40 = vunpack.i.l.bf16 %v15443_v1 }
 0x332   :  { %8791 = vrot.lane.b32.xlu0 %v15391_v58, %s9783_s28  ;;  %20161 = vst [vmem:[#allocation75_spill] sm:$0xff] %v15586_v5  ;;  %v8353_v58 = vunpack.i.l.bf16 %v15435_v60 }
 0x333   :  { %8786 = vrot.lane.b32.xlu1 %v15364_v26, %s9783_s28 }
 0x334   :  { %v15588_v35 = vpop.permute.xlu0 %8511 }
 0x335   :  { %20162 = vst [vmem:[#allocation15_spill] sm:$0xff] %v15588_v35  ;;  %v15594_v36 = vpop.permute.xlu1 %8506  ;;  %v9727_v35 = vld [vmem:[#allocation2] sm:$0xff] }
 0x336   :  { %8801 = vrot.lane.b32.xlu0 %v15403_v33, %s9783_s28  ;;  %20163 = vst [vmem:[#allocation156_spill] sm:$0xff] %v15594_v36  ;;  %v15610_v33 = vld [vmem:[#allocation2 + $0x198] sm:$0xff]  ;;  %v9726_v36 = vld [vmem:[#allocation2 + $0x8] sm:$0xff]  ;;  %v15618_v60 = vsel %vm1111_vm2, %v9727_v35, %v8353_v58  ;;  %v8374_v58 = vunpack.i.h.bf16 %v15451_v46 }
 0x337   :  { %8796 = vrot.lane.b32.xlu1 %v15384_v25, %s9783_s28  ;;  %v15615_v25 = vsel %vm1111_vm2, %v9726_v36, %v8354_v8  ;;  %v8359_v8 = vunpack.i.h.bf16 %v15449_v32  ;;  %v3706_v36 = vrot.slane %v15610_v33, 2 }
 0x338   :  { %v15596_v27 = vpop.permute.xlu0 %8521 }
 0x339   :  { %20164 = vst [vmem:[#allocation84_spill] sm:$0xff] %v15596_v27  ;;  %v15604_v5 = vpop.permute.xlu1 %8516  ;;  %v15612_v27 = vld [vmem:[#allocation2 + $0x1a0] sm:$0xff] }
 0x33a   :  { %8811 = vrot.lane.b32.xlu0 %v15415_v2, %s9783_s28  ;;  %20165 = vst [vmem:[#allocation55_spill] sm:$0xff] %v15604_v5  ;;  %v8364_v5 = vunpack.i.h.bf16 %v15443_v1  ;;  %v8825_v35 = vpack.i.bf16 %v15612_v27, %v15610_v33  ;;  %v8373_v1 = vunpack.i.l.bf16 %v15451_v46 }
 0x33b   :  { %8806 = vrot.lane.b32.xlu1 %v15395_v16, %s9783_s28  ;;  %v15625_v16 = vld [vmem:[#allocation2 + $0x1a8] sm:$0x3] }
 0x33c   :  { %v15606_v26 = vpop.permute.xlu0 %8531 }
 0x33d   :  { %20166 = vst [vmem:[#allocation100_spill] sm:$0xff] %v15606_v26  ;;  %v15622_v2 = vpop.permute.xlu1 %8526  ;;  %v3702_v26 = vrot.slane %v15612_v27, 1 }
 0x33e   :  { %8821 = vrot.lane.b32.xlu0 %v15347_v62, %s9783_s28  ;;  %20167 = vst [vmem:[#allocation158_spill] sm:$0xff] %v15622_v2  ;;  %v8358_v62 = vunpack.i.l.bf16 %v15449_v32  ;;  %v3701_v2 = vrot.slane %v15610_v33, 1  ;;  %v15650_v32 = vsel %vm1111_vm2, %v15337_v57, %v8364_v5  ;;  %v8368_v5 = vunpack.i.l.bf16 %v15457_v42 }
 0x33f   :  { %8816 = vrot.lane.b32.xlu1 %v15407_v29, %s9783_s28  ;;  %v15654_v29 = vsel %vm1111_vm2, %v15335_v13, %v8363_v40  ;;  %v15674_v40 = vsel %vm1111_vm2, %v15350_v53, %v8373_v1  ;;  %v8384_v13 = vunpack.i.h.bf16 %v15459_v14  ;;  %v15687_v57 = vsel %vm1111_vm2, %v15541_v34, %v8369_v23 }
 0x340   :  { %v15629_v39 = vpop.permute.xlu0 %8541  ;;  %v15664_v33 = vsel %vm1111_vm2, %v15316_v10, %v8358_v62  ;;  %v8379_v53 = vunpack.i.h.bf16 %v15465_v4  ;;  %v8378_v42 = vunpack.i.l.bf16 %v15465_v4  ;;  %v8389_v23 = vunpack.i.h.bf16 %v15473_v50 }
 0x341   :  { %20168 = vst [vmem:[#allocation159_spill] sm:$0xff] %v15629_v39  ;;  %v3704_v39 = vrot.slane %v15625_v16, 1  ;;  %v15646_v7 = vpop.permute.xlu1 %8536  ;;  %v8388_v34 = vunpack.i.l.bf16 %v15473_v50  ;;  %v15708_v4 = vsel %vm1111_vm2, %v15539_v59, %v8368_v5  ;;  %v8404_v62 = vunpack.i.h.bf16 %v15475_v28 }
 0x342   :  { %8831 = vrot.lane.b32.xlu0 %v20139_v11, %s9784_s10  ;;  %20169 = vst [vmem:[#allocation81_spill] sm:$0xff] %v15646_v7  ;;  %v15660_v11 = vsel %vm1111_vm2, %v15314_v15, %v8359_v8  ;;  %v15668_v7 = vsel %vm1111_vm2, %v15352_v0, %v8374_v58  ;;  %v15680_v15 = vsel %vm123_vm0, %v3701_v2, %v3702_v26  ;;  %v8383_v0 = vunpack.i.l.bf16 %v15459_v14  ;;  %v15694_v8 = vld [vmem:[#allocation2 + $0x1b0] sm:$0xff]  ;;  %v15698_v2 = vld [vmem:[#allocation2 + $0x1c0] sm:$0x3] }
 0x343   :  { %8826 = vrot.lane.b32.xlu1 %v8825_v35, %s9783_s28  ;;  %v15683_v10 = vsel %vm123_vm0, %v3702_v26, %v3704_v39  ;;  %v8394_v39 = vunpack.i.h.bf16 %v15467_v44  ;;  %v8393_v26 = vunpack.i.l.bf16 %v15467_v44  ;;  %v8403_v58 = vunpack.i.l.bf16 %v15475_v28 }
 0x344   :  { %v15656_v46 = vpop.permute.xlu0 %8551  ;;  %v15718_v1 = vsel %vm1111_vm2, %v15549_v61, %v8384_v13  ;;  %v4838_v59 = vrot.slane %v15694_v8, 1  ;;  %v4841_v5 = vrot.slane %v15698_v2, 1  ;;  %v15727_v28 = vsel %vm1111_vm2, %v15547_v54, %v8383_v0 }
 0x345   :  { %v15692_v35 = vpop.permute.xlu1 %8546  ;;  %v15735_v61 = vsel %vm1111_vm2, %v15557_v12, %v8378_v42  ;;  %v15742_v44 = vsel %vm1111_vm2, %v15567_v3, %v8394_v39  ;;  %v15746_v54 = vsel %vm1111_vm2, %v15565_v48, %v8393_v26  ;;  %v15754_v12 = vsel %vm1111_vm2, %v15575_v49, %v8388_v34  ;;  %v9729_v3 = vld [vmem:[#allocation2 + $0xf0] sm:$0xff] }
 0x346   :  { %8841 = vrot.lane.b32.xlu0 %v20141_v22, %s9784_s10  ;;  %v15696_v22 = vld [vmem:[#allocation2 + $0x1b8] sm:$0xff]  ;;  %v15762_v42 = vsel %vm1111_vm2, %v9729_v3, %v8403_v58  ;;  %v8399_v48 = vunpack.i.h.bf16 %v15481_v30  ;;  %v8398_v39 = vunpack.i.l.bf16 %v15481_v30  ;;  %v8413_v30 = vunpack.i.l.bf16 %v15483_v9  ;;  %v9730_v3 = vld [vmem:[#allocation2 + $0xe0] sm:$0xff] }
 0x347   :  { %8836 = vrot.lane.b32.xlu1 %v20138_v63, %s9784_s10  ;;  %v4839_v50 = vrot.slane %v15696_v22, 1  ;;  %v15731_v63 = vsel %vm1111_vm2, %v15559_v31, %v8379_v53  ;;  %v15750_v31 = vsel %vm1111_vm2, %v15577_v20, %v8389_v23  ;;  %v9728_v53 = vld [vmem:[#allocation2 + $0xf8] sm:$0xff]  ;;  %v8414_v20 = vunpack.i.h.bf16 %v15483_v9 }
 0x348   :  { %v15704_v14 = vpop.permute.xlu0 %8561  ;;  %v20174_v23 = vrot.slane %v15612_v27, 2 }
 0x349   :  { %v15737_v13 = vpop.permute.xlu1 %8556  ;;  %v15772_v49 = vsel %vm123_vm0, %v4838_v59, %v4839_v50  ;;  %v15775_v26 = vsel %vm123_vm0, %v4839_v50, %v4841_v5  ;;  %v8424_v50 = vunpack.i.h.bf16 %v15491_v45  ;;  %v8423_v5 = vunpack.i.l.bf16 %v15491_v45 }
 0x34a   :  { %8851 = vrot.lane.b32.xlu0 %v20143_v56, %s9784_s10  ;;  %20170 = vst [vmem:[#allocation57_spill] sm:$0xff] %v15737_v13  ;;  %v3709_v56 = vrot.slane %v15625_v16, 2  ;;  %v15759_v16 = vsel %vm1111_vm2, %v9728_v53, %v8404_v62  ;;  %20172 = vst [vmem:[#allocation77_spill] sm:$0xff] %v15772_v49  ;;  %v15780_v34 = vsel %vm204_vm1, %v3706_v36, %v20174_v23  ;;  %v8408_v62 = vunpack.i.l.bf16 %v15489_v51 }
 0x34b   :  { %8846 = vrot.lane.b32.xlu1 %v20140_v19, %s9784_s10  ;;  %20173 = vst [vmem:[#allocation168_spill] sm:$0xff] %v15775_v26  ;;  %20175 = vst [vmem:[#allocation154_spill] sm:$0xff] %v15780_v34  ;;  %v8409_v19 = vunpack.i.h.bf16 %v15489_v51  ;;  %v8419_v36 = vunpack.i.h.bf16 %v15497_v24  ;;  %v8418_v53 = vunpack.i.l.bf16 %v15497_v24  ;;  %v15799_v51 = vsel %vm1111_vm2, %v9730_v3, %v8399_v48  ;;  %v9732_v3 = vld [vmem:[#allocation2 + $0x128] sm:$0xff] }
 0x34c   :  { %v15756_v0 = vpop.permute.xlu0 %8571  ;;  %v8429_v45 = vunpack.i.h.bf16 %v15505_v21  ;;  %v8428_v24 = vunpack.i.l.bf16 %v15505_v21 }
 0x34d   :  { %20171 = vst [vmem:[#allocation135_spill] sm:$0xff] %v15756_v0  ;;  %v15785_v58 = vpop.permute.xlu1 %8566 }
 0x34e   :  { %8861 = vrot.lane.b32.xlu0 %v20145_v55, %s9784_s10  ;;  %20176 = vst [vmem:[#allocation60_spill] sm:$0xff] %v15785_v58  ;;  %v20177_v55 = vmov %v20174_v23  ;;  %v9731_v23 = vld [vmem:[#allocation2 + $0xd8] sm:$0xff]  ;;  %v9735_v58 = vld [vmem:[#allocation2 + $0x108] sm:$0xff] }
 0x34f   :  { %v15790_v59 = vsel %vm204_vm1, %v20177_v55, %v3709_v56  ;;  %v15802_v27 = vsel %vm1111_vm2, %v9731_v23, %v8398_v39  ;;  %v8434_v56 = vunpack.i.h.bf16 %v15499_v38  ;;  %v8433_v55 = vunpack.i.l.bf16 %v15499_v38  ;;  %8856 = vrot.lane.b32.xlu1 %v20142_v17, %s9784_s10  ;;  %v9733_v38 = vld [vmem:[#allocation2 + $0x120] sm:$0xff] }
 0x350   :  { %20178 = vst [vmem:[#allocation165_spill] sm:$0xff] %v15790_v59  ;;  %v15796_v9 = vpop.permute.xlu0 %8581  ;;  %v15817_v23 = vsel %vm1111_vm2, %v9732_v3, %v8414_v20  ;;  %v15820_v17 = vsel %vm1111_vm2, %v9733_v38, %v8413_v30  ;;  %v15832_v39 = vsel %vm1111_vm2, %v15058_v52, %v8424_v50  ;;  %v15836_v20 = vsel %vm1111_vm2, %v15056_v6, %v8423_v5 }
 0x351   :  { %20179 = vst [vmem:[#allocation28_spill] sm:$0xff] %v15796_v9  ;;  %v9734_v9 = vld [vmem:[#allocation2 + $0x110] sm:$0xff]  ;;  %v15828_v48 = vpop.permute.xlu1 %8576  ;;  %v15840_v30 = vsel %vm1111_vm2, %v15091_v47, %v8419_v36  ;;  %v15854_v52 = vsel %vm1144_vm3, %v15618_v60, %v8433_v55  ;;  %v8444_v6 = vunpack.i.h.bf16 %v15507_v37  ;;  %v8443_v50 = vunpack.i.l.bf16 %v15507_v37  ;;  %v20183_v36 = vld [vmem:[#allocation108_spill] sm:$0xff]  ;;  %v15874_v37 = vld [vmem:[%s18750_s2] ss:$0 sm:$0xff] }
 0x352   :  { %8871 = vrot.lane.b32.xlu0 %v20146_v18, %s9784_s10  ;;  %v15823_v21 = vsel %vm1111_vm2, %v9734_v9, %v8409_v19  ;;  %v15826_v18 = vsel %vm1111_vm2, %v9735_v58, %v8408_v62  ;;  %20180 = vst [vmem:[#allocation58_spill] sm:$0xff] %v15828_v48  ;;  %v15844_v19 = vsel %vm1111_vm2, %v15089_v41, %v8418_v53  ;;  %v20182_v41 = vld [vmem:[#allocation146_spill] sm:$0xff]  ;;  %v20184_v53 = vld [vmem:[#allocation152_spill] sm:$0xff]  ;;  %v20186_v55 = vld [vmem:[#allocation63_spill] sm:$0xff] }
 0x353   :  { %v15850_v58 = vsel %vm1144_vm3, %v15615_v25, %v8434_v56  ;;  %8866 = vrot.lane.b32.xlu1 %v20144_v43, %s9784_s10  ;;  %v6955_v47 = vpop.f32.mrb[32].mxu0  ;;  %v15862_v5 = vsel %vm1111_vm2, %v20182_v41, %v8429_v45  ;;  %v15866_v25 = vsel %vm1111_vm2, %v20183_v36, %v8428_v24  ;;  %v8439_v9 = vunpack.i.h.bf16 %v20184_v53  ;;  %v20185_v60 = vld [vmem:[#allocation132_spill] sm:$0xff] }
 0x354   :  { %v15846_v62 = vpop.permute.xlu0 %8591  ;;  %v3067_v43 = vadd.f32 %v15874_v37, %v6955_v47  ;;  %v3058_v56 = vpop.f32.mrb[33].mxu0  ;;  %v8454_v45 = vunpack.i.h.bf16 %v20186_v55  ;;  %v8453_v3 = vunpack.i.l.bf16 %v20186_v55  ;;  %v8438_v24 = vunpack.i.l.bf16 %v20184_v53  ;;  %v20190_v55 = vld [vmem:[#allocation105_spill] sm:$0xff] }
 0x355   :  { %20181 = vst [vmem:[#allocation119_spill] sm:$0xff] %v15846_v62  ;;  %v15880_v38 = vpop.permute.xlu1 %8586  ;;  %v3059_v41 = vadd.f32 %v15874_v37, %v3058_v56  ;;  %v6956_v36 = vpop.f32.mrb[34].mxu0  ;;  %v4919_v56 = vrot.slane %v15696_v22, 2  ;;  %v15895_v13 = vsel %vm1144_vm3, %v15650_v32, %v8444_v6 }
 0x356   :  { %8881 = vrot.lane.b32.xlu0 %v20185_v60, %s9784_s10  ;;  %20187 = vst [vmem:[#allocation109_spill] sm:$0xff] %v15880_v38  ;;  %v20188_v60 = vld [vmem:[#allocation66_spill] sm:$0xff]  ;;  %v3219_v59 = vmax.f32 %v3067_v43, 0.0  ;;  %v3070_v47 = vadd.f32 %v15874_v37, %v6956_v36  ;;  %v3061_v49 = vpop.f32.mrb[35].mxu0  ;;  %v4918_v38 = vrot.slane %v15694_v8, 2  ;;  %v9635_v8 = vld [vmem:[%s18751_s3] sm:$0xff]  }
 0x357   :  { %v8449_v62 = vunpack.i.h.bf16 %v20188_v60  ;;  %v8448_v48 = vunpack.i.l.bf16 %v20188_v60  ;;  %v3217_v26 = vmax.f32 %v3059_v41, 0.0  ;;  %8876 = vrot.lane.b32.xlu1 %v20190_v55, %s9784_s10  ;;  %v3062_v53 = vadd.f32 %v15874_v37, %v3061_v49  ;;  %v20191_v60 = vld [vmem:[#allocation141_spill] sm:$0xff]  ;;  %v20192_v41 = vld [vmem:[#allocation160_spill] sm:$0xff]  ;;  %v20193_v49 = vld [vmem:[#allocation131_spill] sm:$0xff]  ;;  %6985 = vmatprep.subr.bf16.mxu1 %v9635_v8 }
 0x358   :  { %v15885_v34 = vpop.permute.xlu0 %8601  ;;  %v8463_v43 = vunpack.i.l.bf16 %v20191_v60  ;;  %3393 = vst.msk [vmem:[#allocation2 + $0x1e1] sm:$0xff] %vm1111_vm2, %v3219_v59  ;;  %v3220_v36 = vmax.f32 %v3070_v47, 0.0  ;;  %v8459_v22 = vunpack.i.h.bf16 %v20193_v49  ;;  %v8458_v55 = vunpack.i.l.bf16 %v20193_v49  ;;  %6986 = vmatpush3.bf16.msra.mxu1 %v9635_v8 }
 0x359   :  { %20189 = vst [vmem:[#allocation85_spill] sm:$0xff] %v15885_v34  ;;  %v8464_v34 = vunpack.i.h.bf16 %v20191_v60  ;;  %3391 = vst.msk [vmem:[#allocation2 + $0x1c9] sm:$0xff] %vm1111_vm2, %v3217_v26  ;;  %v3218_v32 = vmax.f32 %v3062_v53, 0.0  ;;  %v15908_v6 = vpop.permute.xlu1 %8596  ;;  %v4921_v60 = vrot.slane %v15698_v2, 2  ;;  %v15913_v59 = vsel %vm1144_vm3, %v15654_v29, %v8443_v50  ;;  %v9636_v2 = vld [vmem:[%s18751_s3 + $0x8] sm:$0xff]   ;;  %v20198_v50 = vld [vmem:[#allocation31_spill] sm:$0xff] }
 0x35a   :  { %8891 = vrot.lane.b32.xlu0 %v20192_v41, %s9784_s10  ;;  %20194 = vst [vmem:[#allocation48_spill] sm:$0xff] %v15908_v6  ;;  %v15917_v47 = vsel %vm1144_vm3, %v15668_v7, %v8454_v45  ;;  %v15921_v41 = vsel %vm1144_vm3, %v15664_v33, %v8438_v24  ;;  %v15925_v26 = vsel %vm1144_vm3, %v15660_v11, %v8439_v9  ;;  %3394 = vst.msk [vmem:[#allocation2 + $0x1e9] sm:$0xff] %vm1111_vm2, %v3220_v36  ;;  %v20196_v11 = vld [vmem:[#allocation163_spill] sm:$0xff] }
 0x35b   :  { %v15932_v29 = vsel %vm1144_vm3, %v15674_v40, %v8453_v3  ;;  %v15936_v7 = vsel %vm1144_vm3, %v15708_v4, %v8448_v48  ;;  %v15940_v33 = vsel %vm1144_vm3, %v15687_v57, %v8449_v62  ;;  %3392 = vst.msk [vmem:[#allocation2 + $0x1d1] sm:$0xff] %vm1111_vm2, %v3218_v32  ;;  %8886 = vrot.lane.b32.xlu1 %v20196_v11, %s9784_s10  ;;  %v20197_v57 = vld [vmem:[#allocation50_spill] sm:$0xff] }
 0x35c   :  { %v15928_v53 = vpop.permute.xlu0 %8611  ;;  %v15950_v40 = vsel %vm1144_vm3, %v15718_v1, %v8464_v34  ;;  %v15954_v4 = vsel %vm1144_vm3, %v15727_v28, %v8463_v43  ;;  %v8474_v48 = vunpack.i.h.bf16 %v20197_v57  ;;  %v8473_v62 = vunpack.i.l.bf16 %v20197_v57  ;;  %v6959_v9 = vpop.f32.mrb[36].mxu0  ;;  %6987 = vmatprep.subr.bf16.mxu1 %v9636_v2  ;;  %v20203_v43 = vld [vmem:[#allocation142_spill] sm:$0xff] }
 0x35d   :  { %20195 = vst [vmem:[#allocation125_spill] sm:$0xff] %v15928_v53  ;;  %v15962_v45 = vsel %vm1144_vm3, %v15735_v61, %v8458_v55  ;;  %v15966_v1 = vsel %vm1144_vm3, %v15731_v63, %v8459_v22  ;;  %v15968_v34 = vpop.permute.xlu1 %8606  ;;  %v3083_v28 = vadd.f32 %v15874_v37, %v6959_v9  ;;  %v3074_v3 = vpop.f32.mrb[37].mxu0  ;;  %v15972_v24 = vsel %vm204_vm1, %v4918_v38, %v4919_v56  ;;  %v20205_v22 = vld [vmem:[#allocation136_spill] sm:$0xff]  ;;  %v20210_v53 = vld [vmem:[#allocation145_spill] sm:$0xff] }
 0x35e   :  { %8901 = vrot.lane.b32.xlu0 %v20198_v50, %s9784_s10  ;;  %20199 = vst [vmem:[#allocation95_spill] sm:$0xff] %v15962_v45  ;;  %20200 = vst [vmem:[#allocation45_spill] sm:$0xff] %v15966_v1  ;;  %v8469_v36 = vunpack.i.h.bf16 %v20203_v43  ;;  %v8468_v8 = vunpack.i.l.bf16 %v20203_v43  ;;  %v3075_v61 = vadd.f32 %v15874_v37, %v3074_v3  ;;  %v6960_v55 = vpop.f32.mrb[38].mxu0  ;;  %v15980_v63 = vsel %vm204_vm1, %v4919_v56, %v4921_v60  ;;  %v20206_v38 = vld [vmem:[#allocation52_spill] sm:$0xff]  ;;  %v9637_v3 = vld [vmem:[%s18751_s3 + $0x10] sm:$0xff]  }
 0x35f   :  { %20201 = vst [vmem:[#allocation36_spill] sm:$0xff] %v15968_v34  ;;  %20202 = vst [vmem:[#allocation61_spill] sm:$0xff] %v15972_v24  ;;  %v8484_v32 = vunpack.i.h.bf16 %v20205_v22  ;;  %v8483_v11 = vunpack.i.l.bf16 %v20205_v22  ;;  %v3223_v57 = vmax.f32 %v3083_v28, 0.0  ;;  %8896 = vrot.lane.b32.xlu1 %v20206_v38, %s9784_s10  ;;  %v3086_v50 = vadd.f32 %v15874_v37, %v6960_v55  ;;  %v3077_v9 = vpop.f32.mrb[39].mxu0  ;;  %6988 = vmatpush3.bf16.msra.mxu1 %v9636_v2  ;;  %v20207_v43 = vld [vmem:[#allocation73_spill] sm:$0xff]  ;;  %v20208_v60 = vld [vmem:[#allocation56_spill] sm:$0xff] }
 0x360   :  { %v15976_v49 = vpop.permute.xlu0 %8621  ;;  %v8478_v56 = vunpack.i.l.bf16 %v20207_v43  ;;  %v3221_v22 = vmax.f32 %v3075_v61, 0.0  ;;  %v3078_v28 = vadd.f32 %v15874_v37, %v3077_v9  ;;  %v20209_v34 = vld [vmem:[#allocation70_spill] sm:$0xff]  ;;  %v8489_v2 = vunpack.i.h.bf16 %v20210_v53  ;;  %6989 = vmatprep.subr.bf16.mxu1 %v9637_v3  ;;  %v20211_v1 = vld [vmem:[#allocation8_spill] sm:$0xff] }
 0x361   :  { %20204 = vst [vmem:[#allocation113_spill] sm:$0xff] %v15976_v49  ;;  %v8479_v49 = vunpack.i.h.bf16 %v20207_v43  ;;  %v8494_v38 = vunpack.i.h.bf16 %v20209_v34  ;;  %v8493_v55 = vunpack.i.l.bf16 %v20209_v34  ;;  %3397 = vst.msk [vmem:[#allocation2 + $0x211] sm:$0xff] %vm1111_vm2, %v3223_v57  ;;  %v3224_v6 = vmax.f32 %v3086_v50, 0.0  ;;  %v15999_v0 = vpop.permute.xlu1 %8616 }
 0x362   :  { %8911 = vrot.lane.b32.xlu0 %v20208_v60, %s9785_s8  ;;  %v8504_v43 = vunpack.i.h.bf16 %v20211_v1  ;;  %v8503_v45 = vunpack.i.l.bf16 %v20211_v1  ;;  %v8488_v61 = vunpack.i.l.bf16 %v20210_v53  ;;  %3395 = vst.msk [vmem:[#allocation2 + $0x1f9] sm:$0xff] %vm1111_vm2, %v3221_v22  ;;  %v3222_v60 = vmax.f32 %v3078_v28, 0.0 }
 0x363   :  { %v16009_v34 = vsel %vm1144_vm3, %v15742_v44, %v8474_v48  ;;  %v16013_v57 = vsel %vm1144_vm3, %v15746_v54, %v8473_v62  ;;  %3398 = vst.msk [vmem:[#allocation2 + $0x219] sm:$0xff] %vm1111_vm2, %v3224_v6  ;;  %v20212_v1 = vpack.i.bf16 %v15683_v10, %v15680_v15  ;;  %6990 = vmatpush3.bf16.msra.mxu1 %v9637_v3  ;;  %v9638_v44 = vld [vmem:[%s18751_s3 + $0x18] sm:$0xff]   ;;  %v20216_v3 = vld [vmem:[#allocation120_spill] sm:$0xff] }
 0x364   :  { %v16005_v9 = vpop.permute.xlu0 %8631  ;;  %v16027_v48 = vsel %vm1144_vm3, %v15759_v16, %v8484_v32  ;;  %v16031_v54 = vsel %vm1144_vm3, %v15762_v42, %v8483_v11  ;;  %v16035_v15 = vsel %vm1144_vm3, %v15754_v12, %v8468_v8  ;;  %v16039_v10 = vsel %vm1144_vm3, %v15750_v31, %v8469_v36  ;;  %3396 = vst.msk [vmem:[#allocation2 + $0x201] sm:$0xff] %vm1111_vm2, %v3222_v60  ;;  %v20213_v6 = vld [vmem:[#allocation134_spill] sm:$0xff]  ;;  %v20215_v11 = vld [vmem:[#allocation75_spill] sm:$0xff] }
 0x365   :  { %8906 = vrot.lane.b32.xlu1 %v20212_v1, %s9784_s10  ;;  %v16046_v16 = vsel %vm1144_vm3, %v15817_v23, %v8494_v38  ;;  %v16050_v42 = vsel %vm1144_vm3, %v15820_v17, %v8493_v55  ;;  %v16054_v12 = vsel %vm1144_vm3, %v15802_v27, %v8478_v56  ;;  %v16058_v31 = vsel %vm1144_vm3, %v15799_v51, %v8479_v49  ;;  %v16060_v62 = vpop.permute.xlu1 %8626  ;;  %v20214_v49 = vld [vmem:[#allocation15_spill] sm:$0xff]  ;;  %v20217_v56 = vld [vmem:[#allocation156_spill] sm:$0xff] }
 0x366   :  { %8921 = vrot.lane.b32.xlu0 %v20213_v6, %s9785_s8  ;;  %6991 = vmatprep.subr.bf16.mxu1 %v9638_v44  ;;  %v16064_v36 = vsel %vm1144_vm3, %v15836_v20, %v8503_v45  ;;  %v16068_v23 = vsel %vm1144_vm3, %v15832_v39, %v8504_v43  ;;  %v16072_v17 = vsel %vm1144_vm3, %v15826_v18, %v8488_v61  ;;  %v6963_v8 = vpop.f32.mrb[40].mxu0  ;;  %v8514_v32 = vunpack.i.h.bf16 %v20214_v49  ;;  %v20218_v38 = vld [vmem:[#allocation20_spill] sm:$0xff] }
 0x367   :  { %v16076_v27 = vsel %vm1144_vm3, %v15823_v21, %v8489_v2  ;;  %v8499_v20 = vunpack.i.h.bf16 %v20215_v11  ;;  %v8498_v45 = vunpack.i.l.bf16 %v20215_v11  ;;  %v3099_v39 = vadd.f32 %v15874_v37, %v6963_v8  ;;  %v3090_v50 = vpop.f32.mrb[41].mxu0  ;;  %6992 = vmatpush3.bf16.msra.mxu1 %v9638_v44  ;;  %v9639_v21 = vld [vmem:[%s18751_s3 + $0x20] ss:$0 sps:$4 sm:$0xff]   ;;  %v20219_v43 = vld [vmem:[#allocation84_spill] sm:$0xff] }
 0x368   :  { %v16078_v51 = vpop.permute.xlu0 %8641  ;;  %v8513_v18 = vunpack.i.l.bf16 %v20214_v49  ;;  %v8509_v22 = vunpack.i.h.bf16 %v20217_v56  ;;  %v8508_v28 = vunpack.i.l.bf16 %v20217_v56  ;;  %v3091_v55 = vadd.f32 %v15874_v37, %v3090_v50  ;;  %v6964_v2 = vpop.f32.mrb[42].mxu0  ;;  %7060 = vmatprep.subr.msk.bf16.mxu1 %vm2892_vm4, %v9639_v21  ;;  %v20220_v49 = vld [vmem:[#allocation55_spill] sm:$0xff] }
 0x369   :  { %8916 = vrot.lane.b32.xlu1 %v20216_v3, %s9785_s8  ;;  %v8524_v61 = vunpack.i.h.bf16 %v20219_v43  ;;  %v8523_v60 = vunpack.i.l.bf16 %v20219_v43  ;;  %v3227_v1 = vmax.f32 %v3099_v39, 0.0  ;;  %v3102_v44 = vadd.f32 %v15874_v37, %v6964_v2  ;;  %v3093_v6 = vpop.f32.mrb[43].mxu0  ;;  %v16098_v8 = vpop.permute.xlu1 %8636 }
 0x36a   :  { %8931 = vrot.lane.b32.xlu0 %v20218_v38, %s9785_s8  ;;  %v8519_v11 = vunpack.i.h.bf16 %v20220_v49  ;;  %v8518_v3 = vunpack.i.l.bf16 %v20220_v49  ;;  %v3225_v56 = vmax.f32 %v3091_v55, 0.0  ;;  %v3094_v50 = vadd.f32 %v15874_v37, %v3093_v6  ;;  %v20222_v55 = vld [vmem:[#allocation124_spill] sm:$0xff] }
 0x36b   :  { %v16108_v43 = vsel %vm1177_vm5, %v15850_v58, %v8514_v32  ;;  %v16112_v39 = vsel %vm1144_vm3, %v15844_v19, %v8498_v45  ;;  %v16116_v21 = vsel %vm1144_vm3, %v15840_v30, %v8499_v20  ;;  %3401 = vst.msk [vmem:[#allocation2 + $0x241] sm:$0xff] %vm1111_vm2, %v3227_v1  ;;  %v3228_v2 = vmax.f32 %v3102_v44, 0.0  ;;  %v20224_v32 = vld [vmem:[#allocation127_spill] sm:$0xff] }
 0x36c   :  { %v16103_v38 = vpop.permute.xlu0 %8651  ;;  %v16123_v6 = vsel %vm1177_vm5, %v15854_v52, %v8513_v18  ;;  %v16127_v58 = vsel %vm1144_vm3, %v15866_v25, %v8508_v28  ;;  %v16131_v19 = vsel %vm1144_vm3, %v15862_v5, %v8509_v22  ;;  %3399 = vst.msk [vmem:[#allocation2 + $0x229] sm:$0xff] %vm1111_vm2, %v3225_v56  ;;  %v3226_v30 = vmax.f32 %v3094_v50, 0.0  ;;  %v20225_v25 = vld [vmem:[#allocation100_spill] sm:$0xff]  ;;  %v20227_v28 = vld [vmem:[#allocation158_spill] sm:$0xff]  ;;  %v20229_v44 = vld [vmem:[#allocation159_spill] sm:$0xff] }
 0x36d   :  { %20221 = vst [vmem:[#allocation90_spill] sm:$0xff] %v16103_v38  ;;  %8926 = vrot.lane.b32.xlu1 %v20222_v55, %s9785_s8  ;;  %20223 = vst [vmem:[#allocation32_spill] sm:$0xff] %v16131_v19  ;;  %v16138_v20 = vsel %vm1177_vm5, %v15895_v13, %v8524_v61  ;;  %v16142_v52 = vsel %vm1177_vm5, %v15913_v59, %v8523_v60  ;;  %v8534_v45 = vunpack.i.h.bf16 %v20225_v25  ;;  %v8533_v18 = vunpack.i.l.bf16 %v20225_v25  ;;  %v16147_v5 = vpop.permute.xlu1 %8646  ;;  %v20230_v50 = vld [vmem:[#allocation81_spill] sm:$0xff] }
 0x36e   :  { %8941 = vrot.lane.b32.xlu0 %v20224_v32, %s9785_s8  ;;  %3402 = vst.msk [vmem:[#allocation2 + $0x249] sm:$0xff] %vm1111_vm2, %v3228_v2  ;;  %20226 = vst [vmem:[#allocation130_spill] sm:$0xff] %v16147_v5  ;;  %v16151_v22 = vsel %vm1177_vm5, %v15921_v41, %v8518_v3  ;;  %v16155_v13 = vsel %vm1177_vm5, %v15925_v26, %v8519_v11  ;;  %v8529_v61 = vunpack.i.h.bf16 %v20227_v28  ;;  %v8528_v59 = vunpack.i.l.bf16 %v20227_v28  ;;  %v6967_v1 = vpop.f32.mrb[44].mxu0  ;;  %v20231_v26 = vld [vmem:[#allocation68_spill] sm:$0xff]  ;;  %v20232_v32 = vld [vmem:[#allocation106_spill] sm:$0xff] }
 0x36f   :  { %3400 = vst.msk [vmem:[#allocation2 + $0x231] sm:$0xff] %vm1111_vm2, %v3226_v30  ;;  %v8544_v49 = vunpack.i.h.bf16 %v20229_v44  ;;  %v8543_v56 = vunpack.i.l.bf16 %v20229_v44  ;;  %v8539_v41 = vunpack.i.h.bf16 %v20230_v50  ;;  %v3115_v3 = vadd.f32 %v15874_v37, %v6967_v1  ;;  %v3106_v2 = vpop.f32.mrb[45].mxu0 }
 0x370   :  { %v16160_v60 = vpop.permute.xlu0 %8661  ;;  %v8554_v11 = vunpack.i.h.bf16 %v15656_v46  ;;  %v8553_v55 = vunpack.i.l.bf16 %v15656_v46  ;;  %v8538_v30 = vunpack.i.l.bf16 %v20230_v50  ;;  %v3107_v25 = vadd.f32 %v15874_v37, %v3106_v2  ;;  %v6968_v28 = vpop.f32.mrb[46].mxu0 }
 0x371   :  { %20228 = vst [vmem:[#allocation139_spill] sm:$0xff] %v16160_v60  ;;  %8936 = vrot.lane.b32.xlu1 %v20231_v26, %s9785_s8  ;;  %v8549_v44 = vunpack.i.h.bf16 %v15692_v35  ;;  %v8548_v1 = vunpack.i.l.bf16 %v15692_v35  ;;  %v3231_v53 = vmax.f32 %v3115_v3, 0.0  ;;  %v3118_v19 = vadd.f32 %v15874_v37, %v6968_v28  ;;  %v3109_v26 = vpop.f32.mrb[47].mxu0  ;;  %v16177_v60 = vpop.permute.xlu1 %8656 }
 0x372   :  { %8951 = vrot.lane.b32.xlu0 %v20232_v32, %s9785_s8  ;;  %20233 = vst [vmem:[#allocation98_spill] sm:$0xff] %v16177_v60  ;;  %v8564_v46 = vunpack.i.h.bf16 %v15704_v14  ;;  %v8563_v50 = vunpack.i.l.bf16 %v15704_v14  ;;  %v3229_v5 = vmax.f32 %v3107_v25, 0.0  ;;  %v3110_v2 = vadd.f32 %v15874_v37, %v3109_v26  ;;  %v20235_v25 = vld [vmem:[#allocation140_spill] sm:$0xff]  ;;  %v20244_v26 = vld [vmem:[#allocation59_spill] sm:$0xff] }
 0x373   :  { %v16186_v32 = vsel %vm1177_vm5, %v15917_v47, %v8534_v45  ;;  %v16190_v35 = vsel %vm1177_vm5, %v15932_v29, %v8533_v18  ;;  %v16194_v3 = vsel %vm1177_vm5, %v15936_v7, %v8528_v59  ;;  %3405 = vst.msk [vmem:[#allocation2 + $0x271] sm:$0xff] %vm1111_vm2, %v3231_v53  ;;  %v3232_v14 = vmax.f32 %v3118_v19, 0.0  ;;  %v20236_v53 = vld [vmem:[#allocation166_spill] sm:$0xff] }
 0x374   :  { %v16181_v38 = vpop.permute.xlu0 %8671  ;;  %v16201_v28 = vsel %vm1177_vm5, %v15950_v40, %v8544_v49  ;;  %v16205_v47 = vsel %vm1177_vm5, %v15954_v4, %v8543_v56  ;;  %v16209_v29 = vsel %vm1177_vm5, %v15940_v33, %v8529_v61  ;;  %3403 = vst.msk [vmem:[#allocation2 + $0x259] sm:$0xff] %vm1111_vm2, %v3229_v5  ;;  %v3230_v7 = vmax.f32 %v3110_v2, 0.0  ;;  %v20237_v4 = vld [vmem:[#allocation95_spill] sm:$0xff]  ;;  %v20238_v33 = vld [vmem:[#allocation45_spill] sm:$0xff] }
 0x375   :  { %20234 = vst [vmem:[#allocation128_spill] sm:$0xff] %v16181_v38  ;;  %8946 = vrot.lane.b32.xlu1 %v20235_v25, %s9785_s8  ;;  %v16216_v19 = vsel %vm1177_vm5, %v16009_v34, %v8554_v11  ;;  %v16220_v40 = vsel %vm1177_vm5, %v16013_v57, %v8553_v55  ;;  %v16224_v45 = vsel %vm1177_vm5, %v20237_v4, %v8538_v30  ;;  %3406 = vst.msk [vmem:[#allocation2 + $0x279] sm:$0xff] %vm1111_vm2, %v3232_v14  ;;  %v16231_v5 = vpop.permute.xlu1 %8666  ;;  %v20243_v55 = vld [vmem:[#allocation57_spill] sm:$0xff]  ;;  %v20247_v25 = vld [vmem:[#allocation62_spill] sm:$0xff] }
 0x376   :  { %8961 = vrot.lane.b32.xlu0 %v20236_v53, %s9785_s8  ;;  %v16228_v18 = vsel %vm1177_vm5, %v20238_v33, %v8539_v41  ;;  %20239 = vst [vmem:[#allocation72_spill] sm:$0xff] %v16231_v5  ;;  %v16235_v34 = vsel %vm1177_vm5, %v16027_v48, %v8564_v46  ;;  %v16239_v57 = vsel %vm1177_vm5, %v16031_v54, %v8563_v50  ;;  %3404 = vst.msk [vmem:[#allocation2 + $0x261] sm:$0xff] %vm1111_vm2, %v3230_v7  ;;  %v6971_v56 = vpop.f32.mrb[48].mxu0  ;;  %v16252_v41 = vld [vmem:[#allocation2 + $0x1e8] sm:$0xff]  ;;  %v20242_v48 = vld [vmem:[#allocation135_spill] sm:$0xff] }
 0x377   :  { %20240 = vst [vmem:[#allocation121_spill] sm:$0xff] %v16239_v57  ;;  %v16243_v61 = vsel %vm1177_vm5, %v16035_v15, %v8548_v1  ;;  %v16247_v59 = vsel %vm1177_vm5, %v16039_v10, %v8549_v44  ;;  %v8574_v11 = vunpack.i.h.bf16 %v20242_v48  ;;  %v8559_v54 = vunpack.i.h.bf16 %v20243_v55  ;;  %v3122_v1 = vpop.f32.mrb[49].mxu0  ;;  %v16260_v10 = vld [vmem:[#allocation2 + $0x1f0] sm:$0x3]  ;;  %v20246_v50 = vld [vmem:[#allocation60_spill] sm:$0xff] }
 0x378   :  { %v16250_v49 = vpop.permute.xlu0 %8681  ;;  %v8558_v30 = vunpack.i.l.bf16 %v20243_v55  ;;  %v3131_v15 = vadd.f32 %v15874_v37, %v6971_v56  ;;  %v16262_v44 = vld [vmem:[#allocation2 + $0x1d0] sm:$0xff]  ;;  %v8573_v46 = vunpack.i.l.bf16 %v20242_v48  ;;  %v8569_v2 = vunpack.i.h.bf16 %v20246_v50  ;;  %v6972_v53 = vpop.f32.mrb[50].mxu0  ;;  %v16270_v4 = vld [vmem:[#allocation2 + $0x1d8] sm:$0x3]  ;;  %v20249_v33 = vld [vmem:[#allocation28_spill] sm:$0xff] }
 0x379   :  { %20241 = vst [vmem:[#allocation115_spill] sm:$0xff] %v16250_v49  ;;  %8956 = vrot.lane.b32.xlu1 %v20244_v26, %s9785_s8  ;;  %20245 = vst [vmem:[#allocation162_spill] sm:$0xff] %v16262_v44  ;;  %v8568_v14 = vunpack.i.l.bf16 %v20246_v50  ;;  %v3123_v7 = vadd.f32 %v15874_v37, %v3122_v1  ;;  %v8584_v56 = vunpack.i.h.bf16 %v20249_v33  ;;  %v3134_v26 = vadd.f32 %v15874_v37, %v6972_v53  ;;  %v3125_v5 = vpop.f32.mrb[51].mxu0  ;;  %v16274_v49 = vpop.permute.xlu1 %8676  ;;  %v16276_v48 = vld [vmem:[#allocation2 + $0x1e0] sm:$0xff]  ;;  %v16279_v38 = vld [vmem:[#allocation2 + $0x1c8] sm:$0xff] }
 0x37a   :  { %8971 = vrot.lane.b32.xlu0 %v20247_v25, %s9785_s8  ;;  %20248 = vst [vmem:[#allocation133_spill] sm:$0xff] %v16270_v4  ;;  %v3235_v55 = vmax.f32 %v3131_v15, 0.0  ;;  %20250 = vst [vmem:[#allocation153_spill] sm:$0xff] %v16274_v49  ;;  %v4849_v50 = vrot.slane %v16252_v41, 1  ;;  %v3126_v1 = vadd.f32 %v15874_v37, %v3125_v5  ;;  %v4851_v57 = vrot.slane %v16260_v10, 1 }
 0x37b   :  { %20251 = vst [vmem:[#allocation83_spill] sm:$0xff] %v16276_v48  ;;  %20252 = vst [vmem:[#allocation82_spill] sm:$0xff] %v16279_v38  ;;  %v3233_v25 = vmax.f32 %v3123_v7, 0.0  ;;  %v4844_v15 = vrot.slane %v16262_v44, 1  ;;  %v16288_v53 = vsel %vm1177_vm5, %v16054_v12, %v8558_v30  ;;  %v16292_v49 = vsel %vm1177_vm5, %v16058_v31, %v8559_v54  ;;  %v20254_v7 = vld [vmem:[#allocation126_spill] sm:$0xff]  ;;  %v20256_v30 = vld [vmem:[#allocation151_spill] sm:$0xff] }
 0x37c   :  { %v16281_v60 = vpop.permute.xlu0 %8691  ;;  %3409 = vst.msk [vmem:[#allocation2 + $0x2a1] sm:$0xff] %vm1111_vm2, %v3235_v55  ;;  %v3236_v24 = vmax.f32 %v3134_v26, 0.0  ;;  %v4846_v5 = vrot.slane %v16270_v4, 1  ;;  %v3234_v12 = vmax.f32 %v3126_v1, 0.0  ;;  %v4848_v31 = vrot.slane %v16276_v48, 1  ;;  %v16306_v54 = vld [vmem:[#allocation2 + $0x218] sm:$0xff] }
 0x37d   :  { %20253 = vst [vmem:[#allocation76_spill] sm:$0xff] %v16281_v60  ;;  %8966 = vrot.lane.b32.xlu1 %v20254_v7, %s9785_s8  ;;  %v16300_v60 = vsel %vm1177_vm5, %v16046_v16, %v8574_v11  ;;  %3407 = vst.msk [vmem:[#allocation2 + $0x289] sm:$0xff] %vm1111_vm2, %v3233_v25  ;;  %v16308_v55 = vld [vmem:[#allocation2 + $0x220] sm:$0x3]  ;;  %v4843_v26 = vrot.slane %v16279_v38, 1  ;;  %v16313_v7 = vsel %vm1177_vm5, %v16050_v42, %v8573_v46  ;;  %v8583_v16 = vunpack.i.l.bf16 %v20249_v33  ;;  %v16325_v1 = vpop.permute.xlu1 %8686  ;;  %v16329_v4 = vld [vmem:[#allocation2 + $0x248] sm:$0xff] }
 0x37e   :  { %20255 = vst [vmem:[#allocation69_spill] sm:$0xff] %v16300_v60  ;;  %8981 = vrot.lane.b32.xlu0 %v20256_v30, %s9785_s8  ;;  %20257 = vst [vmem:[#allocation87_spill] sm:$0xff] %v16306_v54  ;;  %v16318_v11 = vsel %vm1177_vm5, %v16072_v17, %v8568_v14  ;;  %v16322_v25 = vsel %vm1177_vm5, %v16076_v27, %v8569_v2  ;;  %v16327_v30 = vld [vmem:[#allocation2 + $0x210] sm:$0xff]  ;;  %v16331_v42 = vld [vmem:[#allocation2 + $0x200] sm:$0xff]  ;;  %v16335_v46 = vsel %vm1177_vm5, %v16068_v23, %v8584_v56  ;;  %v6975_v27 = vpop.f32.mrb[52].mxu0 }
 0x37f   :  { %20258 = vst [vmem:[#allocation110_spill] sm:$0xff] %v16308_v55  ;;  %20259 = vst [vmem:[#allocation71_spill] sm:$0xff] %v16313_v7  ;;  %v4850_v2 = vsel %vm123_vm0, %v4848_v31, %v4849_v50  ;;  %v4845_v14 = vsel %vm123_vm0, %v4843_v26, %v4844_v15  ;;  %v16343_v33 = vld [vmem:[#allocation2 + $0x250] sm:$0x3]  ;;  %v4859_v56 = vrot.slane %v16306_v54, 1  ;;  %v4847_v31 = vsel %vm123_vm0, %v4844_v15, %v4846_v5  ;;  %v16361_v38 = vld [vmem:[#allocation2 + $0x240] sm:$0xff] }
 0x380   :  { %20260 = vst [vmem:[#allocation149_spill] sm:$0xff] %v16318_v11  ;;  %20261 = vst [vmem:[#allocation88_spill] sm:$0xff] %v16322_v25  ;;  %v16338_v17 = vpop.permute.xlu0 %8701  ;;  %v3147_v25 = vadd.f32 %v15874_v37, %v6975_v27  ;;  %v3138_v11 = vpop.f32.mrb[53].mxu0  ;;  %v20270_v23 = vld [vmem:[#allocation117_spill] sm:$0xff]  ;;  %v4858_v44 = vrot.slane %v16327_v30, 1 }
 0x381   :  { %3410 = vst.msk [vmem:[#allocation2 + $0x2a9] sm:$0xff] %vm1111_vm2, %v3236_v24  ;;  %20262 = vst [vmem:[#allocation155_spill] sm:$0xff] %v16325_v1  ;;  %v4852_v24 = vsel %vm123_vm0, %v4849_v50, %v4851_v57  ;;  %v16345_v1 = vld [vmem:[#allocation2 + $0x208] sm:$0x3]  ;;  %8976 = vrot.lane.b32.xlu1 %v20270_v23, %s9785_s8  ;;  %v20273_v50 = vld [vmem:[#allocation77_spill] sm:$0xff]  ;;  %v6976_v27 = vpop.f32.mrb[54].mxu0  ;;  %v16366_v60 = vpop.permute.xlu1 %8696 }
 0x382   :  { %20263 = vst [vmem:[#allocation93_spill] sm:$0xff] %v16327_v30  ;;  %20264 = vst [vmem:[#allocation143_spill] sm:$0xff] %v16329_v4  ;;  %v20272_v57 = vld [vmem:[#allocation168_spill] sm:$0xff]  ;;  %v4869_v23 = vrot.slane %v16329_v4, 1  ;;  %v3239_v7 = vmax.f32 %v3147_v25, 0.0  ;;  %v3150_v15 = vadd.f32 %v15874_v37, %v6976_v27  ;;  %v3141_v5 = vpop.f32.mrb[55].mxu0  ;;  %v16373_v30 = vpack.i.bf16 %v4852_v24, %v4850_v2 }
 0x383   :  { %20265 = vst [vmem:[#allocation96_spill] sm:$0xff] %v16331_v42  ;;  %20266 = vst [vmem:[#allocation102_spill] sm:$0xff] %v16335_v46  ;;  %v20274_v26 = vpack.i.bf16 %v20272_v57, %v20273_v50  ;;  %v3139_v46 = vadd.f32 %v15874_v37, %v3138_v11  ;;  %v4871_v57 = vrot.slane %v16343_v33, 1  ;;  %v4856_v50 = vrot.slane %v16345_v1, 1  ;;  %v20280_v27 = vld [vmem:[#allocation165_spill] sm:$0xff] }
 0x384   :  { %3408 = vst.msk [vmem:[#allocation2 + $0x291] sm:$0xff] %vm1111_vm2, %v3234_v12  ;;  %20267 = vst [vmem:[#allocation46_spill] sm:$0xff] %v16338_v17  ;;  %v4861_v12 = vrot.slane %v16308_v55, 1  ;;  %v16353_v17 = vld [vmem:[#allocation2 + $0x1f8] sm:$0xff]  ;;  %v4854_v55 = vrot.slane %v16331_v42, 1  ;;  %v3142_v54 = vadd.f32 %v15874_v37, %v3141_v5  ;;  %v16376_v42 = vld [vmem:[#allocation2 + $0x230] sm:$0xff]  ;;  %v16390_v24 = vsel %vm1177_vm5, %v16064_v36, %v8583_v16 }
 0x385   :  { %20268 = vst [vmem:[#allocation54_spill] sm:$0xff] %v16343_v33  ;;  %20269 = vst [vmem:[#allocation49_spill] sm:$0xff] %v16345_v1  ;;  %8991 = vrot.lane.b32.xlu0 %v20274_v26, %s9778_s25  ;;  %v3237_v11 = vmax.f32 %v3139_v46, 0.0  ;;  %v16370_v26 = vpop.permute.xlu0 %8711  ;;  %v4853_v4 = vrot.slane %v16353_v17, 1  ;;  %v3240_v25 = vmax.f32 %v3150_v15, 0.0  ;;  %v4860_v46 = vsel %vm123_vm0, %v4858_v44, %v4859_v56  ;;  %v16405_v36 = vpop.permute.xlu1 %8706 }
 0x386   :  { %20271 = vst [vmem:[#allocation94_spill] sm:$0xff] %v16353_v17  ;;  %20275 = vst [vmem:[#allocation65_spill] sm:$0xff] %v16361_v38  ;;  %v4868_v5 = vrot.slane %v16361_v38, 1  ;;  %v16386_v2 = vld [vmem:[#allocation2 + $0x238] sm:$0x3]  ;;  %v4857_v15 = vsel %vm123_vm0, %v4854_v55, %v4856_v50  ;;  %v16442_v17 = vld [vmem:[#allocation2 + $0x2a0] sm:$0xff] }
 0x387   :  { %20276 = vst [vmem:[#allocation97_spill] sm:$0xff] %v16366_v60  ;;  %20277 = vst [vmem:[#allocation67_spill] sm:$0xff] %v16370_v26  ;;  %v20281_v60 = vld [vmem:[#allocation154_spill] sm:$0xff]  ;;  %v4862_v26 = vsel %vm123_vm0, %v4859_v56, %v4861_v12  ;;  %v4855_v44 = vsel %vm123_vm0, %v4853_v4, %v4854_v55  ;;  %v16400_v56 = vld [vmem:[#allocation2 + $0x280] sm:$0x3] }
 0x388   :  { %20278 = vst [vmem:[#allocation74_spill] sm:$0xff] %v16373_v30  ;;  %20279 = vst [vmem:[#allocation164_spill] sm:$0xff] %v16376_v42  ;;  %v20282_v33 = vpack.i.bf16 %v20280_v27, %v20281_v60  ;;  %v16395_v60 = vpack.i.bf16 %v4847_v31, %v4845_v14  ;;  %v16402_v12 = vld [vmem:[#allocation2 + $0x228] sm:$0xff]  ;;  %v4870_v16 = vsel %vm123_vm0, %v4868_v5, %v4869_v23  ;;  %v4864_v14 = vrot.slane %v16376_v42, 1  ;;  %v20290_v31 = vld [vmem:[#allocation58_spill] sm:$0xff] }
 0x389   :  { %3413 = vst.msk [vmem:[#allocation2 + $0x2d1] sm:$0xff] %vm1111_vm2, %v3239_v7  ;;  %20283 = vst [vmem:[#allocation112_spill] sm:$0xff] %v16386_v2  ;;  %v3238_v7 = vmax.f32 %v3142_v54, 0.0  ;;  %9001 = vrot.lane.b32.xlu0 %v16373_v30, %s9778_s25  ;;  %v4872_v54 = vsel %vm123_vm0, %v4869_v23, %v4871_v57  ;;  %v8579_v4 = vunpack.i.h.bf16 %v20290_v31  ;;  %v16414_v27 = vpop.permute.xlu0 %8721  ;;  %v6979_v30 = vpop.f32.mrb[56].mxu0  ;;  %v4866_v5 = vrot.slane %v16386_v2, 1 }
 0x38a   :  { %8986 = vrot.lane.b32.xlu1 %v20282_v33, %s9785_s8  ;;  %20284 = vst [vmem:[#allocation118_spill] sm:$0xff] %v16390_v24  ;;  %3411 = vst.msk [vmem:[#allocation2 + $0x2b9] sm:$0xff] %vm1111_vm2, %v3237_v11  ;;  %v16398_v33 = vld [vmem:[#allocation2 + $0x278] sm:$0xff]  ;;  %v8578_v11 = vunpack.i.l.bf16 %v20290_v31  ;;  %v3163_v23 = vadd.f32 %v15874_v37, %v6979_v30  ;;  %v3154_v55 = vpop.f32.mrb[57].mxu0  ;;  %v4881_v50 = vrot.slane %v16400_v56, 1  ;;  %v16427_v31 = vld [vmem:[#allocation2 + $0x2a8] sm:$0xff]  ;;  %v16433_v2 = vpack.i.bf16 %v4872_v54, %v4870_v16  ;;  %v16438_v24 = vpop.permute.xlu1 %8716 }
 0x38b   :  { %20285 = vst [vmem:[#allocation78_spill] sm:$0xff] %v16395_v60  ;;  %20286 = vst [vmem:[#allocation111_spill] sm:$0xff] %v16398_v33  ;;  %v4879_v57 = vrot.slane %v16398_v33, 1  ;;  %v6980_v30 = vpop.f32.mrb[58].mxu0  ;;  %v16435_v42 = vpack.i.bf16 %v4857_v15, %v4855_v44  ;;  %v4867_v16 = vsel %vm123_vm0, %v4864_v14, %v4866_v5  ;;  %v4889_v54 = vrot.slane %v16427_v31, 1  ;;  %v16451_v15 = vld [vmem:[#allocation2 + $0x260] sm:$0xff] }
 0x38c   :  { %20287 = vst [vmem:[#allocation64_spill] sm:$0xff] %v16400_v56  ;;  %20288 = vst [vmem:[#allocation146_spill] sm:$0xff] %v16402_v12  ;;  %v3166_v33 = vadd.f32 %v15874_v37, %v6980_v30  ;;  %v3157_v56 = vpop.f32.mrb[59].mxu0  ;;  %v16468_v5 = vld [vmem:[#allocation2 + $0x258] sm:$0xff] }
 0x38d   :  { %3414 = vst.msk [vmem:[#allocation2 + $0x2d9] sm:$0xff] %vm1111_vm2, %v3240_v25  ;;  %20289 = vst [vmem:[#allocation108_spill] sm:$0xff] %v16405_v36  ;;  %v16416_v25 = vpack.i.bf16 %v4862_v26, %v4860_v46  ;;  %v16418_v36 = vld [vmem:[#allocation2 + $0x270] sm:$0xff]  ;;  %v20295_v26 = vld [vmem:[#allocation119_spill] sm:$0xff]  ;;  %v16446_v38 = vpop.permute.xlu0 %8731  ;;  %v3158_v44 = vadd.f32 %v15874_v37, %v3157_v56  ;;  %v4882_v30 = vsel %vm123_vm0, %v4879_v57, %v4881_v50 }
 0x38e   :  { %3412 = vst.msk [vmem:[#allocation2 + $0x2c1] sm:$0xff] %vm1111_vm2, %v3238_v7  ;;  %20291 = vst [vmem:[#allocation152_spill] sm:$0xff] %v16414_v27  ;;  %8996 = vrot.lane.b32.xlu1 %v16395_v60, %s9778_s25  ;;  %v4863_v7 = vrot.slane %v16402_v12, 1  ;;  %v8594_v46 = vunpack.i.h.bf16 %v20295_v26  ;;  %v3155_v27 = vadd.f32 %v15874_v37, %v3154_v55  ;;  %v3243_v60 = vmax.f32 %v3163_v23, 0.0 }
 0x38f   :  { %20292 = vst [vmem:[#allocation132_spill] sm:$0xff] %v16416_v25  ;;  %20293 = vst [vmem:[#allocation63_spill] sm:$0xff] %v16418_v36  ;;  %9011 = vrot.lane.b32.xlu0 %v16416_v25, %s9778_s25  ;;  %v4878_v12 = vrot.slane %v16418_v36, 1  ;;  %v16444_v25 = vld [vmem:[#allocation2 + $0x2b0] sm:$0x3]  ;;  %v8593_v23 = vunpack.i.l.bf16 %v20295_v26  ;;  %v16461_v56 = vsel %vm1177_vm5, %v16112_v39, %v8578_v11 }
 0x390   :  { %20294 = vst [vmem:[#allocation66_spill] sm:$0xff] %v16427_v31  ;;  %20296 = vst [vmem:[#allocation105_spill] sm:$0xff] %v16433_v2  ;;  %v4865_v1 = vsel %vm123_vm0, %v4863_v7, %v4864_v14  ;;  %v3241_v55 = vmax.f32 %v3155_v27, 0.0  ;;  %v3244_v7 = vmax.f32 %v3166_v33, 0.0  ;;  %v3242_v14 = vmax.f32 %v3158_v44, 0.0  ;;  %v20300_v39 = vld [vmem:[#allocation109_spill] sm:$0xff] }
 0x391   :  { %20297 = vst [vmem:[#allocation141_spill] sm:$0xff] %v16435_v42  ;;  %20298 = vst [vmem:[#allocation160_spill] sm:$0xff] %v16438_v24  ;;  %v4880_v27 = vsel %vm123_vm0, %v4878_v12, %v4879_v57  ;;  %v4891_v33 = vrot.slane %v16444_v25, 1  ;;  %v16470_v26 = vld [vmem:[#allocation2 + $0x268] sm:$0x3]  ;;  %v16474_v12 = vsel %vm1177_vm5, %v16116_v21, %v8579_v4  ;;  %v8588_v11 = vunpack.i.l.bf16 %v20300_v39  ;;  %v16478_v57 = vpop.permute.xlu1 %8726  ;;  %v20303_v44 = vld [vmem:[#allocation85_spill] sm:$0xff] }
 0x392   :  { %20299 = vst [vmem:[#allocation131_spill] sm:$0xff] %v16446_v38  ;;  %3417 = vst.msk [vmem:[#allocation2 + $0x301] sm:$0xff] %vm1111_vm2, %v3243_v60  ;;  %9006 = vrot.lane.b32.xlu1 %v16435_v42, %s9778_s25  ;;  %v4888_v60 = vrot.slane %v16442_v17, 1  ;;  %v16480_v50 = vpack.i.bf16 %v4867_v16, %v4865_v1  ;;  %v8603_v42 = vunpack.i.l.bf16 %v20303_v44  ;;  %v16486_v38 = vpop.permute.xlu0 %8741  ;;  %v6983_v21 = vpop.f32.mrb[60].mxu0  ;;  %v16488_v4 = vpack.i.bf16 %v4882_v30, %v4880_v27 }
 0x393   :  { %3415 = vst.msk [vmem:[#allocation2 + $0x2e9] sm:$0xff] %vm1111_vm2, %v3241_v55  ;;  %9021 = vrot.lane.b32.xlu0 %v16433_v2, %s9778_s25  ;;  %3418 = vst.msk [vmem:[#allocation2 + $0x309] sm:$0xff] %vm1111_vm2, %v3244_v7  ;;  %v4874_v55 = vrot.slane %v16451_v15, 1  ;;  %v8604_v2 = vunpack.i.h.bf16 %v20303_v44  ;;  %v3179_v7 = vadd.f32 %v15874_v37, %v6983_v21  ;;  %v4892_v1 = vsel %vm123_vm0, %v4889_v54, %v4891_v33 }
 0x394   :  { %20301 = vst [vmem:[#allocation163_spill] sm:$0xff] %v16478_v57  ;;  %20302 = vst [vmem:[#allocation50_spill] sm:$0xff] %v16480_v50  ;;  %v4890_v24 = vsel %vm123_vm0, %v4888_v60, %v4889_v54  ;;  %v3170_v57 = vpop.f32.mrb[61].mxu0  ;;  %v4873_v16 = vrot.slane %v16468_v5, 1  ;;  %v4876_v44 = vrot.slane %v16470_v26, 1  ;;  %v16503_v27 = vsel %vm1210_vm6, %v16123_v6, %v8593_v23 }
 0x395   :  { %3416 = vst.msk [vmem:[#allocation2 + $0x2f1] sm:$0xff] %vm1111_vm2, %v3242_v14  ;;  %20304 = vst [vmem:[#allocation31_spill] sm:$0xff] %v16486_v38  ;;  %v16499_v14 = vsel %vm1210_vm6, %v16108_v43, %v8594_v46  ;;  %v3171_v60 = vadd.f32 %v15874_v37, %v3170_v57  ;;  %v6984_v54 = vpop.f32.mrb[62].mxu0  ;;  %v16511_v33 = vsel %vm1177_vm5, %v16127_v58, %v8588_v11  ;;  %v3247_v21 = vmax.f32 %v3179_v7, 0.0  ;;  %v16526_v58 = vld [vmem:[#allocation2 + $0x2d0] sm:$0xff]  ;;  %v16528_v11 = vld [vmem:[#allocation2 + $0x2d8] sm:$0xff] }
 0x396   :  { %20305 = vst [vmem:[#allocation142_spill] sm:$0xff] %v16488_v4  ;;  %9016 = vrot.lane.b32.xlu1 %v16480_v50, %s9778_s25  ;;  %20306 = vst [vmem:[#allocation136_spill] sm:$0xff] %v16511_v33  ;;  %v3182_v43 = vadd.f32 %v15874_v37, %v6984_v54  ;;  %v3173_v46 = vpop.f32.mrb[63].mxu0  ;;  %v16514_v50 = vpop.permute.xlu1 %8736  ;;  %v4875_v6 = vsel %vm123_vm0, %v4873_v16, %v4874_v55  ;;  %v16519_v23 = vsel %vm1210_vm6, %v16138_v20, %v8604_v2  ;;  %v16530_v7 = vld [vmem:[#allocation2 + $0x2e0] sm:$0x3]  ;;  %v20310_v54 = vld [vmem:[#allocation48_spill] sm:$0xff] }
 0x397   :  { %9031 = vrot.lane.b32.xlu0 %v16488_v4, %s9778_s25  ;;  %20307 = vst [vmem:[#allocation52_spill] sm:$0xff] %v16514_v50  ;;  %v3245_v30 = vmax.f32 %v3171_v60, 0.0  ;;  %v16521_v4 = vpop.permute.xlu0 %8751  ;;  %v3174_v57 = vadd.f32 %v15874_v37, %v3173_v46  ;;  %v16524_v39 = vpack.i.bf16 %v4892_v1, %v4890_v24  ;;  %v16534_v16 = vsel %vm1210_vm6, %v16142_v52, %v8603_v42  ;;  %v16539_v37 = vld [vmem:[#allocation2 + $0x288] sm:$0xff]  ;;  %v16541_v24 = vld [vmem:[#allocation2 + $0x290] sm:$0xff]  ;;  %v16543_v1 = vld [vmem:[#allocation2 + $0x298] sm:$0x3] }
 0x398   :  { %20308 = vst [vmem:[#allocation73_spill] sm:$0xff] %v16521_v4  ;;  %v8598_v20 = vunpack.i.l.bf16 %v20310_v54  ;;  %3421 = vst.msk [vmem:[#allocation2 + $0x331] sm:$0xff] %vm1111_vm2, %v3247_v21  ;;  %v3248_v2 = vmax.f32 %v3182_v43, 0.0  ;;  %v4877_v60 = vsel %vm123_vm0, %v4874_v55, %v4876_v44  ;;  %v20314_v46 = vld [vmem:[#allocation125_spill] sm:$0xff]  ;;  %v8599_v50 = vunpack.i.h.bf16 %v20310_v54  ;;  %v20317_v4 = vld [vmem:[#allocation36_spill] sm:$0xff] }
 0x399   :  { %20309 = vst [vmem:[#allocation56_spill] sm:$0xff] %v16524_v39  ;;  %20311 = vst [vmem:[#allocation70_spill] sm:$0xff] %v16539_v37  ;;  %v8614_v33 = vunpack.i.h.bf16 %v20314_v46  ;;  %v3246_v52 = vmax.f32 %v3174_v57, 0.0  ;;  %v16550_v42 = vpack.i.bf16 %v4877_v60, %v4875_v6  ;;  %v8613_v55 = vunpack.i.l.bf16 %v20314_v46  ;;  %v16575_v38 = vld [vmem:[#allocation2 + $0x300] sm:$0xff] }
 0x39a   :  { %20312 = vst [vmem:[#allocation145_spill] sm:$0xff] %v16541_v24  ;;  %20313 = vst [vmem:[#allocation8_spill] sm:$0xff] %v16543_v1  ;;  %v16554_v44 = vpop.permute.xlu1 %8746  ;;  %v4898_v21 = vrot.slane %v16526_v58, 1  ;;  %v4899_v43 = vrot.slane %v16528_v11, 1  ;;  %v4901_v54 = vrot.slane %v16530_v7, 1  ;;  %v4883_v57 = vrot.slane %v16539_v37, 1 }
 0x39b   :  { %3419 = vst.msk [vmem:[#allocation2 + $0x319] sm:$0xff] %vm1111_vm2, %v3245_v30  ;;  %9041 = vrot.lane.b32.xlu0 %v16524_v39, %s9778_s25  ;;  %20315 = vst [vmem:[#allocation134_spill] sm:$0xff] %v16550_v42  ;;  %v8608_v30 = vunpack.i.l.bf16 %v20317_v4  ;;  %9026 = vrot.lane.b32.xlu1 %v16550_v42, %s9778_s25  ;;  %v16563_v6 = vpop.permute.xlu0 %8761  ;;  %v4886_v60 = vrot.slane %v16543_v1, 1  ;;  %v16570_v46 = vsel %vm1210_vm6, %v16151_v22, %v8598_v20  ;;  %v8609_v39 = vunpack.i.h.bf16 %v20317_v4  ;;  %v16577_v42 = vld [vmem:[#allocation2 + $0x308] sm:$0xff]  ;;  %v16587_v20 = vld [vmem:[#allocation2 + $0x310] sm:$0x3] }
 0x39c   :  { %3422 = vst.msk [vmem:[#allocation2 + $0x339] sm:$0xff] %vm1111_vm2, %v3248_v2  ;;  %20316 = vst [vmem:[#allocation15_spill] sm:$0xff] %v16554_v44  ;;  %v4884_v2 = vrot.slane %v16541_v24, 1  ;;  %v4900_v44 = vsel %vm123_vm0, %v4898_v21, %v4899_v43  ;;  %v20319_v24 = vld [vmem:[#allocation113_spill] sm:$0xff]  ;;  %v16591_v4 = vsel %vm1210_vm6, %v16186_v32, %v8614_v33  ;;  %v16595_v21 = vsel %vm1210_vm6, %v16190_v35, %v8613_v55  ;;  %v16617_v55 = vld [vmem:[#allocation2 + $0x2c8] sm:$0x3] }
 0x39d   :  { %3420 = vst.msk [vmem:[#allocation2 + $0x321] sm:$0xff] %vm1111_vm2, %v3246_v52  ;;  %20318 = vst [vmem:[#allocation75_spill] sm:$0xff] %v16563_v6  ;;  %v4902_v52 = vsel %vm123_vm0, %v4899_v43, %v4901_v54  ;;  %v16581_v6 = vsel %vm1210_vm6, %v16155_v13, %v8599_v50  ;;  %v8624_v1 = vunpack.i.h.bf16 %v20319_v24  ;;  %v8623_v43 = vunpack.i.l.bf16 %v20319_v24  ;;  %v16603_v54 = vld [vmem:[#allocation2 + $0x2c0] sm:$0xff] }
 0x39e   :  { %v16584_v37 = vpack.i.bf16 %v4902_v52, %v4900_v44  ;;  %v4885_v22 = vsel %vm123_vm0, %v4883_v57, %v4884_v2  ;;  %v4887_v13 = vsel %vm123_vm0, %v4884_v2, %v4886_v60  ;;  %v16599_v50 = vpop.permute.xlu1 %8756  ;;  %v16601_v44 = vld [vmem:[#allocation2 + $0x2b8] sm:$0xff]  ;;  %20323 = vst [vmem:[#allocation84_spill] sm:$0xff] %v16603_v54  ;;  %v16607_v57 = vsel %vm1210_vm6, %v16194_v3, %v8608_v30 }
 0x39f   :  { %20321 = vst [vmem:[#allocation156_spill] sm:$0xff] %v16599_v50  ;;  %20322 = vst [vmem:[#allocation20_spill] sm:$0xff] %v16601_v44  ;;  %v16611_v32 = vpack.i.bf16 %v4887_v13, %v4885_v22  ;;  %v16613_v35 = vpop.permute.xlu0 %8771  ;;  %v4908_v33 = vrot.slane %v16575_v38, 1  ;;  %v4909_v24 = vrot.slane %v16577_v42, 1  ;;  %v16621_v2 = vsel %vm1210_vm6, %v16209_v29, %v8609_v39 }
 0x3a0   :  { %20320 = vst [vmem:[#allocation120_spill] sm:$0xff] %v16584_v37  ;;  %9051 = vrot.lane.b32.xlu0 %v16584_v37, %s9778_s25  ;;  %20325 = vst [vmem:[#allocation124_spill] sm:$0xff] %v16613_v35  ;;  %v8619_v3 = vunpack.i.h.bf16 %v15999_v0  ;;  %v8618_v30 = vunpack.i.l.bf16 %v15999_v0  ;;  %v4911_v60 = vrot.slane %v16587_v20, 1  ;;  %v16628_v52 = vsel %vm1210_vm6, %v16201_v28, %v8624_v1  ;;  %v16641_v28 = vld [vmem:[#allocation2 + $0x2e8] sm:$0xff]  ;;  %v16643_v1 = vld [vmem:[#allocation2 + $0x2f0] sm:$0xff] }
 0x3a1   :  { %20324 = vst [vmem:[#allocation55_spill] sm:$0xff] %v16611_v32  ;;  %9036 = vrot.lane.b32.xlu1 %v16611_v32, %s9778_s25  ;;  %v4910_v22 = vsel %vm123_vm0, %v4908_v33, %v4909_v24  ;;  %v4893_v13 = vrot.slane %v16601_v44, 1  ;;  %v4894_v29 = vrot.slane %v16603_v54, 1  ;;  %v8634_v39 = vunpack.i.h.bf16 %v16005_v9 }
 0x3a2   :  { %v8633_v37 = vunpack.i.l.bf16 %v16005_v9  ;;  %v4912_v0 = vsel %vm123_vm0, %v4909_v24, %v4911_v60  ;;  %v4896_v50 = vrot.slane %v16617_v55, 1  ;;  %v16639_v35 = vpop.permute.xlu1 %8766  ;;  %v16647_v33 = vsel %vm1210_vm6, %v16205_v47, %v8623_v43  ;;  %v16655_v24 = vld [vmem:[#allocation2 + $0x2f8] sm:$0x3] }
 0x3a3   :  { %20326 = vst [vmem:[#allocation127_spill] sm:$0xff] %v16639_v35  ;;  %v8628_v32 = vunpack.i.l.bf16 %v16060_v62  ;;  %v16650_v54 = vpack.i.bf16 %v4912_v0, %v4910_v22  ;;  %v4895_v9 = vsel %vm123_vm0, %v4893_v13, %v4894_v29  ;;  %v16653_v44 = vpop.permute.xlu0 %8781  ;;  %v16659_v60 = vsel %vm1210_vm6, %v16224_v45, %v8618_v30 }
 0x3a4   :  { %20328 = vst [vmem:[#allocation158_spill] sm:$0xff] %v16653_v44  ;;  %v16663_v35 = vsel %vm1210_vm6, %v16228_v18, %v8619_v3  ;;  %v8629_v47 = vunpack.i.h.bf16 %v16060_v62  ;;  %v4897_v43 = vsel %vm123_vm0, %v4894_v29, %v4896_v50  ;;  %v8644_v22 = vunpack.i.h.bf16 %v16078_v51  ;;  %v20339_v44 = vld [vmem:[#allocation90_spill] sm:$0xff] }
 0x3a5   :  { %20327 = vst [vmem:[#allocation100_spill] sm:$0xff] %v16650_v54  ;;  %9061 = vrot.lane.b32.xlu0 %v16650_v54, %s9778_s25  ;;  %v16670_v13 = vpack.i.bf16 %v4897_v43, %v4895_v9  ;;  %v4903_v0 = vrot.slane %v16641_v28, 1  ;;  %v4904_v45 = vrot.slane %v16643_v1, 1  ;;  %v16676_v30 = vsel %vm1210_vm6, %v16216_v19, %v8634_v39  ;;  %v16703_v54 = vld [vmem:[#allocation2 + $0x320] sm:$0xff] }
 0x3a6   :  { %v16680_v62 = vsel %vm1210_vm6, %v16220_v40, %v8633_v37  ;;  %v8643_v18 = vunpack.i.l.bf16 %v16078_v51  ;;  %v4906_v50 = vrot.slane %v16655_v24, 1  ;;  %v16684_v3 = vpop.permute.xlu1 %8776  ;;  %v16688_v29 = vsel %vm1210_vm6, %v16243_v61, %v8628_v32  ;;  %v16701_v32 = vld [vmem:[#allocation2 + $0x318] sm:$0xff]  ;;  %20333 = vst [vmem:[#allocation140_spill] sm:$0xff] %v16703_v54 }
 0x3a7   :  { %20329 = vst [vmem:[#allocation159_spill] sm:$0xff] %v16670_v13  ;;  %20330 = vst [vmem:[#allocation81_spill] sm:$0xff] %v16684_v3  ;;  %9046 = vrot.lane.b32.xlu1 %v16670_v13, %s9778_s25  ;;  %v4905_v19 = vsel %vm123_vm0, %v4903_v0, %v4904_v45  ;;  %v16693_v39 = vpop.permute.xlu0 %8791  ;;  %v4928_v40 = vrot.slane %v16276_v48, 2  ;;  %v4929_v37 = vrot.slane %v16252_v41, 2  ;;  %v8639_v51 = vunpack.i.h.bf16 %v16098_v8  ;;  %v16705_v13 = vld [vmem:[#allocation2 + $0x328] sm:$0x3] }
 0x3a8   :  { %20331 = vst [vmem:[#allocation68_spill] sm:$0xff] %v16693_v39  ;;  %v8638_v9 = vunpack.i.l.bf16 %v16098_v8  ;;  %v4907_v43 = vsel %vm123_vm0, %v4904_v45, %v4906_v50  ;;  %v4931_v61 = vrot.slane %v16260_v10, 2  ;;  %20332 = vst [vmem:[#allocation106_spill] sm:$0xff] %v16701_v32  ;;  %v16709_v0 = vsel %vm1210_vm6, %v16235_v34, %v8644_v22  ;;  %v20335_v8 = vld [vmem:[#allocation61_spill] sm:$0xff] }
 0x3a9   :  { %20334 = vst [vmem:[#allocation166_spill] sm:$0xff] %v16705_v13  ;;  %v16713_v41 = vsel %vm1210_vm6, %v16247_v59, %v8629_v47  ;;  %v20336_v45 = vpack.i.bf16 %v15980_v63, %v20335_v8  ;;  %v16719_v10 = vpack.i.bf16 %v4907_v43, %v4905_v19  ;;  %v4930_v50 = vsel %vm204_vm1, %v4928_v40, %v4929_v37  ;;  %v20338_v39 = vld [vmem:[#allocation121_spill] sm:$0xff]  ;;  %v20345_v43 = vld [vmem:[#allocation130_spill] sm:$0xff] }
 0x3aa   :  { %v16724_v3 = vsel %vm1210_vm6, %v20338_v39, %v8643_v18  ;;  %v8654_v34 = vunpack.i.h.bf16 %v20339_v44  ;;  %v8653_v22 = vunpack.i.l.bf16 %v20339_v44  ;;  %v4932_v59 = vsel %vm204_vm1, %v4929_v37, %v4931_v61  ;;  %v16729_v47 = vpop.permute.xlu1 %8786 }
 0x3ab   :  { %9071 = vrot.lane.b32.xlu0 %v20336_v45, %s9779_s17  ;;  %20337 = vst [vmem:[#allocation95_spill] sm:$0xff] %v16719_v10  ;;  %20340 = vst [vmem:[#allocation45_spill] sm:$0xff] %v16729_v47  ;;  %9056 = vrot.lane.b32.xlu1 %v16719_v10, %s9778_s25  ;;  %v16733_v63 = vpack.i.bf16 %v4932_v59, %v4930_v50  ;;  %v4913_v19 = vrot.slane %v16701_v32, 1  ;;  %v4914_v40 = vrot.slane %v16703_v54, 1  ;;  %v4916_v18 = vrot.slane %v16705_v13, 1  ;;  %v16738_v39 = vpop.permute.xlu0 %8801  ;;  %v20346_v59 = vld [vmem:[#allocation93_spill] sm:$0xff] }
 0x3ac   :  { %20342 = vst [vmem:[#allocation57_spill] sm:$0xff] %v16738_v39  ;;  %v16742_v44 = vsel %vm1210_vm6, %v16288_v53, %v8638_v9  ;;  %v16746_v37 = vsel %vm1210_vm6, %v16292_v49, %v8639_v51  ;;  %v8649_v61 = vunpack.i.h.bf16 %v20345_v43  ;;  %v8648_v8 = vunpack.i.l.bf16 %v20345_v43  ;;  %v20347_v39 = vld [vmem:[#allocation87_spill] sm:$0xff]  ;;  %v20348_v9 = vld [vmem:[#allocation69_spill] sm:$0xff]  ;;  %v20357_v13 = vld [vmem:[#allocation162_spill] sm:$0xff] }
 0x3ad   :  { %20341 = vst [vmem:[#allocation135_spill] sm:$0xff] %v16733_v63  ;;  %20343 = vst [vmem:[#allocation59_spill] sm:$0xff] %v16742_v44  ;;  %v4915_v45 = vsel %vm123_vm0, %v4913_v19, %v4914_v40  ;;  %v4917_v50 = vsel %vm123_vm0, %v4914_v40, %v4916_v18  ;;  %v4938_v10 = vrot.slane %v20346_v59, 2  ;;  %v4939_v53 = vrot.slane %v20347_v39, 2  ;;  %v20350_v49 = vld [vmem:[#allocation71_spill] sm:$0xff]  ;;  %v20355_v40 = vld [vmem:[#allocation110_spill] sm:$0xff] }
 0x3ae   :  { %20344 = vst [vmem:[#allocation60_spill] sm:$0xff] %v16746_v37  ;;  %v16758_v47 = vsel %vm1210_vm6, %v20348_v9, %v8654_v34  ;;  %v16762_v51 = vsel %vm1210_vm6, %v20350_v49, %v8653_v22  ;;  %v20352_v43 = vld [vmem:[#allocation139_spill] sm:$0xff]  ;;  %v16765_v37 = vpack.i.bf16 %v4917_v50, %v4915_v45  ;;  %v4941_v18 = vrot.slane %v20355_v40, 2  ;;  %v20356_v59 = vld [vmem:[#allocation82_spill] sm:$0xff]  ;;  %v20359_v22 = vld [vmem:[#allocation149_spill] sm:$0xff] }
 0x3af   :  { %9081 = vrot.lane.b32.xlu0 %v16733_v63, %s9779_s17  ;;  %20349 = vst [vmem:[#allocation62_spill] sm:$0xff] %v16758_v47  ;;  %20351 = vst [vmem:[#allocation28_spill] sm:$0xff] %v16762_v51  ;;  %v8664_v48 = vunpack.i.h.bf16 %v20352_v43  ;;  %v16767_v63 = vpop.permute.xlu1 %8796  ;;  %v4940_v19 = vsel %vm204_vm1, %v4938_v10, %v4939_v53  ;;  %v4923_v39 = vrot.slane %v20356_v59, 2  ;;  %v4924_v54 = vrot.slane %v20357_v13, 2  ;;  %v16773_v34 = vpop.permute.xlu0 %8811  ;;  %v20361_v45 = vld [vmem:[#allocation88_spill] sm:$0xff]  ;;  %v20363_v10 = vld [vmem:[#allocation133_spill] sm:$0xff] }
 0x3b0   :  { %20353 = vst [vmem:[#allocation126_spill] sm:$0xff] %v16765_v37  ;;  %20354 = vst [vmem:[#allocation151_spill] sm:$0xff] %v16767_v63  ;;  %v8663_v9 = vunpack.i.l.bf16 %v20352_v43  ;;  %v16778_v49 = vsel %vm1210_vm6, %v20359_v22, %v8648_v8  ;;  %v16782_v50 = vsel %vm1210_vm6, %v20361_v45, %v8649_v61  ;;  %9066 = vrot.lane.b32.xlu1 %v16765_v37, %s9778_s25  ;;  %v4926_v40 = vrot.slane %v20363_v10, 2  ;;  %v20364_v63 = vld [vmem:[#allocation98_spill] sm:$0xff]  ;;  %v20367_v22 = vld [vmem:[#allocation128_spill] sm:$0xff] }
 0x3b1   :  { %20358 = vst [vmem:[#allocation117_spill] sm:$0xff] %v16773_v34  ;;  %20360 = vst [vmem:[#allocation168_spill] sm:$0xff] %v16778_v49  ;;  %v8659_v47 = vunpack.i.h.bf16 %v20364_v63  ;;  %v8658_v51 = vunpack.i.l.bf16 %v20364_v63  ;;  %v4942_v34 = vsel %vm204_vm1, %v4939_v53, %v4941_v18  ;;  %v4925_v43 = vsel %vm204_vm1, %v4923_v39, %v4924_v54  ;;  %v20365_v32 = vld [vmem:[#allocation102_spill] sm:$0xff]  ;;  %v20371_v63 = vld [vmem:[#allocation65_spill] sm:$0xff] }
 0x3b2   :  { %20362 = vst [vmem:[#allocation77_spill] sm:$0xff] %v16782_v50  ;;  %v16793_v8 = vsel %vm1210_vm6, %v20365_v32, %v8664_v48  ;;  %v8674_v61 = vunpack.i.h.bf16 %v20367_v22  ;;  %v16796_v45 = vpack.i.bf16 %v4942_v34, %v4940_v19  ;;  %v4927_v37 = vsel %vm204_vm1, %v4924_v54, %v4926_v40  ;;  %v20372_v18 = vld [vmem:[#allocation143_spill] sm:$0xff]  ;;  %v20374_v48 = vld [vmem:[#allocation54_spill] sm:$0xff]  ;;  %v20376_v54 = vld [vmem:[#allocation96_spill] sm:$0xff] }
 0x3b3   :  { %20366 = vst [vmem:[#allocation165_spill] sm:$0xff] %v16793_v8  ;;  %v16799_v50 = vpop.permute.xlu1 %8806  ;;  %v8673_v10 = vunpack.i.l.bf16 %v20367_v22  ;;  %v16802_v49 = vpack.i.bf16 %v4927_v37, %v4925_v43  ;;  %v4948_v53 = vrot.slane %v20371_v63, 2  ;;  %v4949_v39 = vrot.slane %v20372_v18, 2  ;;  %v16806_v44 = vpop.permute.xlu0 %8821  ;;  %v20375_v19 = vld [vmem:[#allocation94_spill] sm:$0xff] }
 0x3b4   :  { %20368 = vst [vmem:[#allocation154_spill] sm:$0xff] %v16796_v45  ;;  %20369 = vst [vmem:[#allocation58_spill] sm:$0xff] %v16799_v50  ;;  %9091 = vrot.lane.b32.xlu0 %v16796_v45, %s9779_s17  ;;  %v4951_v32 = vrot.slane %v20374_v48, 2  ;;  %v4933_v34 = vrot.slane %v20375_v19, 2  ;;  %v4934_v40 = vrot.slane %v20376_v54, 2  ;;  %v20377_v50 = vld [vmem:[#allocation49_spill] sm:$0xff]  ;;  %v16820_v43 = vsel %vm1210_vm6, %v16461_v56, %v8658_v51 }
 0x3b5   :  { %20370 = vst [vmem:[#allocation119_spill] sm:$0xff] %v16802_v49  ;;  %20373 = vst [vmem:[#allocation85_spill] sm:$0xff] %v16806_v44  ;;  %v4936_v8 = vrot.slane %v20377_v50, 2  ;;  %v20378_v22 = vld [vmem:[#allocation118_spill] sm:$0xff]  ;;  %v16824_v18 = vsel %vm1210_vm6, %v16474_v12, %v8659_v47  ;;  %9076 = vrot.lane.b32.xlu1 %v16802_v49, %s9779_s17  ;;  %v4950_v48 = vsel %vm204_vm1, %v4948_v53, %v4949_v39  ;;  %v20381_v44 = vld [vmem:[#allocation115_spill] sm:$0xff] }
 0x3b6   :  { %v16816_v37 = vsel %vm1210_vm6, %v20378_v22, %v8663_v9  ;;  %20379 = vst [vmem:[#allocation48_spill] sm:$0xff] %v16820_v43  ;;  %20380 = vst [vmem:[#allocation125_spill] sm:$0xff] %v16824_v18  ;;  %v8683_v45 = vunpack.i.l.bf16 %v20381_v44  ;;  %v4952_v50 = vsel %vm204_vm1, %v4949_v39, %v4951_v32  ;;  %v4935_v9 = vsel %vm204_vm1, %v4933_v34, %v4934_v40 }
 0x3b7   :  { %v4937_v22 = vsel %vm204_vm1, %v4934_v40, %v4936_v8  ;;  %v16833_v63 = vpop.permute.xlu1 %8816  ;;  %v16837_v56 = vsel %vm1243_vm7, %v16503_v27, %v8673_v10  ;;  %v16841_v12 = vsel %vm1243_vm7, %v16499_v14, %v8674_v61  ;;  %v16843_v47 = vpack.i.bf16 %v4952_v50, %v4950_v48  ;;  %v16847_v53 = vpop.permute.xlu0 %8831  ;;  %v20386_v40 = vld [vmem:[#allocation111_spill] sm:$0xff]  ;;  %v20387_v14 = vld [vmem:[#allocation64_spill] sm:$0xff]  ;;  %v20388_v61 = vld [vmem:[#allocation146_spill] sm:$0xff] }
 0x3b8   :  { %20382 = vst [vmem:[#allocation36_spill] sm:$0xff] %v16833_v63  ;;  %v16845_v51 = vpack.i.bf16 %v4937_v22, %v4935_v9  ;;  %v8684_v39 = vunpack.i.h.bf16 %v20381_v44  ;;  %v4958_v34 = vrot.slane %v16418_v36, 2  ;;  %v4959_v18 = vrot.slane %v20386_v40, 2  ;;  %v20389_v48 = vld [vmem:[#allocation164_spill] sm:$0xff]  ;;  %v20391_v63 = vld [vmem:[#allocation153_spill] sm:$0xff] }
 0x3b9   :  { %20383 = vst [vmem:[#allocation113_spill] sm:$0xff] %v16843_v47  ;;  %9101 = vrot.lane.b32.xlu0 %v16843_v47, %s9779_s17  ;;  %v4961_v27 = vrot.slane %v20387_v14, 2  ;;  %v4943_v10 = vrot.slane %v20388_v61, 2  ;;  %v4944_v50 = vrot.slane %v20389_v48, 2  ;;  %v20390_v9 = vld [vmem:[#allocation112_spill] sm:$0xff]  ;;  %v16863_v22 = vsel %vm1243_vm7, %v16534_v16, %v8683_v45 }
 0x3ba   :  { %20384 = vst [vmem:[#allocation61_spill] sm:$0xff] %v16845_v51  ;;  %9086 = vrot.lane.b32.xlu1 %v16845_v51, %s9779_s17  ;;  %v4946_v44 = vrot.slane %v20390_v9, 2  ;;  %v8678_v43 = vunpack.i.l.bf16 %v20391_v63  ;;  %v4960_v47 = vsel %vm204_vm1, %v4958_v34, %v4959_v18  ;;  %v8679_v14 = vunpack.i.h.bf16 %v20391_v63  ;;  %v20393_v45 = vld [vmem:[#allocation76_spill] sm:$0xff] }
 0x3bb   :  { %v16868_v49 = vpop.permute.xlu1 %8826  ;;  %v4962_v51 = vsel %vm204_vm1, %v4959_v18, %v4961_v27  ;;  %v4945_v40 = vsel %vm204_vm1, %v4943_v10, %v4944_v50  ;;  %v16874_v36 = vpop.permute.xlu0 %8841  ;;  %v16878_v16 = vsel %vm1243_vm7, %v16519_v23, %v8684_v39  ;;  %v8694_v8 = vunpack.i.h.bf16 %v20393_v45 }
 0x3bc   :  { %20392 = vst [vmem:[#allocation121_spill] sm:$0xff] %v16868_v49  ;;  %v4947_v9 = vsel %vm204_vm1, %v4944_v50, %v4946_v44  ;;  %v16881_v32 = vpack.i.bf16 %v4962_v51, %v4960_v47  ;;  %v8693_v63 = vunpack.i.l.bf16 %v20393_v45  ;;  %v4968_v18 = vrot.slane %v16442_v17, 2 }
 0x3bd   :  { %v16883_v34 = vpack.i.bf16 %v4947_v9, %v4945_v40  ;;  %v4969_v27 = vrot.slane %v16427_v31, 2  ;;  %v4971_v10 = vrot.slane %v16444_v25, 2  ;;  %v16891_v50 = vsel %vm1243_vm7, %v16570_v46, %v8678_v43  ;;  %v20396_v46 = vld [vmem:[#allocation155_spill] sm:$0xff] }
 0x3be   :  { %20394 = vst [vmem:[#allocation90_spill] sm:$0xff] %v16881_v32  ;;  %9111 = vrot.lane.b32.xlu0 %v16881_v32, %s9779_s17  ;;  %v4953_v23 = vrot.slane %v16468_v5, 2  ;;  %v4954_v47 = vrot.slane %v16451_v15, 2  ;;  %v4956_v51 = vrot.slane %v16470_v26, 2  ;;  %v16904_v25 = vsel %vm1243_vm7, %v16581_v6, %v8679_v14 }
 0x3bf   :  { %20395 = vst [vmem:[#allocation130_spill] sm:$0xff] %v16883_v34  ;;  %9096 = vrot.lane.b32.xlu1 %v16883_v34, %s9779_s17  ;;  %v16900_v39 = vpop.permute.xlu1 %8836  ;;  %v8688_v43 = vunpack.i.l.bf16 %v20396_v46  ;;  %v4970_v40 = vsel %vm204_vm1, %v4968_v18, %v4969_v27  ;;  %v4972_v44 = vsel %vm204_vm1, %v4969_v27, %v4971_v10  ;;  %v16909_v9 = vpop.permute.xlu0 %8851  ;;  %v8689_v45 = vunpack.i.h.bf16 %v20396_v46  ;;  %v20398_v18 = vld [vmem:[#allocation46_spill] sm:$0xff] }
 0x3c0   :  { %v16912_v32 = vpack.i.bf16 %v4972_v44, %v4970_v40  ;;  %v4955_v26 = vsel %vm204_vm1, %v4953_v23, %v4954_v47  ;;  %v4957_v49 = vsel %vm204_vm1, %v4954_v47, %v4956_v51  ;;  %v16918_v6 = vsel %vm1243_vm7, %v16595_v21, %v8693_v63  ;;  %v20401_v51 = vld [vmem:[#allocation145_spill] sm:$0xff]  ;;  %v20402_v44 = vld [vmem:[#allocation8_spill] sm:$0xff] }
 0x3c1   :  { %v16922_v14 = vsel %vm1243_vm7, %v16591_v4, %v8694_v8  ;;  %v8703_v27 = vunpack.i.l.bf16 %v20398_v18  ;;  %v16925_v10 = vpack.i.bf16 %v4957_v49, %v4955_v26  ;;  %v8704_v46 = vunpack.i.h.bf16 %v20398_v18  ;;  %v20400_v49 = vld [vmem:[#allocation70_spill] sm:$0xff] }
 0x3c2   :  { %20397 = vst [vmem:[#allocation69_spill] sm:$0xff] %v16912_v32  ;;  %9121 = vrot.lane.b32.xlu0 %v16912_v32, %s9779_s17  ;;  %v4978_v23 = vrot.slane %v16526_v58, 2  ;;  %v4979_v47 = vrot.slane %v16528_v11, 2  ;;  %v4981_v21 = vrot.slane %v16530_v7, 2  ;;  %v16937_v4 = vsel %vm1243_vm7, %v16607_v57, %v8688_v43  ;;  %v20404_v7 = vld [vmem:[#allocation97_spill] sm:$0xff] }
 0x3c3   :  { %20399 = vst [vmem:[#allocation71_spill] sm:$0xff] %v16925_v10  ;;  %v16933_v63 = vpop.permute.xlu1 %8846  ;;  %9106 = vrot.lane.b32.xlu1 %v16925_v10, %s9779_s17  ;;  %v4963_v8 = vrot.slane %v20400_v49, 2  ;;  %v4964_v40 = vrot.slane %v20401_v51, 2  ;;  %v4966_v26 = vrot.slane %v20402_v44, 2  ;;  %v16944_v58 = vpop.permute.xlu0 %8861  ;;  %v16948_v11 = vsel %vm1243_vm7, %v16621_v2, %v8689_v45  ;;  %v20406_v45 = vld [vmem:[#allocation67_spill] sm:$0xff] }
 0x3c4   :  { %20403 = vst [vmem:[#allocation139_spill] sm:$0xff] %v16944_v58  ;;  %v8698_v18 = vunpack.i.l.bf16 %v20404_v7  ;;  %v4980_v57 = vsel %vm204_vm1, %v4978_v23, %v4979_v47  ;;  %v4982_v43 = vsel %vm204_vm1, %v4979_v47, %v4981_v21  ;;  %v16955_v32 = vsel %vm1243_vm7, %v16647_v33, %v8703_v27 }
 0x3c5   :  { %v16957_v10 = vpack.i.bf16 %v4982_v43, %v4980_v57  ;;  %v4965_v44 = vsel %vm204_vm1, %v4963_v8, %v4964_v40  ;;  %v4967_v34 = vsel %vm204_vm1, %v4964_v40, %v4966_v26  ;;  %v16963_v2 = vsel %vm1243_vm7, %v16628_v52, %v8704_v46  ;;  %v20410_v26 = vld [vmem:[#allocation84_spill] sm:$0xff] }
 0x3c6   :  { %v8714_v58 = vunpack.i.h.bf16 %v20406_v45  ;;  %v8699_v23 = vunpack.i.h.bf16 %v20404_v7  ;;  %v16967_v31 = vpack.i.bf16 %v4967_v34, %v4965_v44  ;;  %v8713_v33 = vunpack.i.l.bf16 %v20406_v45  ;;  %v20409_v34 = vld [vmem:[#allocation20_spill] sm:$0xff] }
 0x3c7   :  { %20405 = vst [vmem:[#allocation110_spill] sm:$0xff] %v16957_v10  ;;  %v16969_v47 = vpop.permute.xlu1 %8856  ;;  %9131 = vrot.lane.b32.xlu0 %v16957_v10, %s9779_s17  ;;  %v4988_v27 = vrot.slane %v16575_v38, 2  ;;  %v4989_v21 = vrot.slane %v16577_v42, 2  ;;  %v4991_v52 = vrot.slane %v16587_v20, 2  ;;  %v16977_v46 = vpop.permute.xlu0 %8871  ;;  %v16981_v8 = vsel %vm1243_vm7, %v16659_v60, %v8698_v18  ;;  %v20411_v38 = vld [vmem:[#allocation108_spill] sm:$0xff] }
 0x3c8   :  { %20407 = vst [vmem:[#allocation82_spill] sm:$0xff] %v16967_v31  ;;  %20408 = vst [vmem:[#allocation162_spill] sm:$0xff] %v16977_v46  ;;  %9116 = vrot.lane.b32.xlu1 %v16967_v31, %s9779_s17  ;;  %v4973_v40 = vrot.slane %v20409_v34, 2  ;;  %v4974_v7 = vrot.slane %v20410_v26, 2  ;;  %v4976_v57 = vrot.slane %v16617_v55, 2  ;;  %v8709_v43 = vunpack.i.h.bf16 %v20411_v38  ;;  %v20412_v45 = vld [vmem:[#allocation152_spill] sm:$0xff] }
 0x3c9   :  { %v8708_v42 = vunpack.i.l.bf16 %v20411_v38  ;;  %v4990_v20 = vsel %vm204_vm1, %v4988_v27, %v4989_v21  ;;  %v4992_v44 = vsel %vm204_vm1, %v4989_v21, %v4991_v52  ;;  %v8723_v60 = vunpack.i.l.bf16 %v20412_v45 }
 0x3ca   :  { %v16993_v18 = vpack.i.bf16 %v4992_v44, %v4990_v20  ;;  %v4975_v10 = vsel %vm204_vm1, %v4973_v40, %v4974_v7  ;;  %v4977_v31 = vsel %vm204_vm1, %v4974_v7, %v4976_v57  ;;  %v17001_v55 = vsel %vm1243_vm7, %v16680_v62, %v8713_v33  ;;  %v20415_v20 = vld [vmem:[#allocation160_spill] sm:$0xff]  ;;  %v20419_v44 = vld [vmem:[#allocation59_spill] sm:$0xff] }
 0x3cb   :  { %v16997_v46 = vpop.permute.xlu1 %8866  ;;  %v17005_v38 = vsel %vm1243_vm7, %v16663_v35, %v8699_v23  ;;  %v8724_v27 = vunpack.i.h.bf16 %v20412_v45  ;;  %v17008_v21 = vpack.i.bf16 %v4977_v31, %v4975_v10  ;;  %v17010_v52 = vpop.permute.xlu0 %8881  ;;  %v8718_v40 = vunpack.i.l.bf16 %v20415_v20 }
 0x3cc   :  { %20413 = vst [vmem:[#allocation149_spill] sm:$0xff] %v16993_v18  ;;  %9141 = vrot.lane.b32.xlu0 %v16993_v18, %s9779_s17  ;;  %v4983_v7 = vrot.slane %v16641_v28, 2  ;;  %v4984_v62 = vrot.slane %v16643_v1, 2  ;;  %v4986_v33 = vrot.slane %v16655_v24, 2  ;;  %v17020_v35 = vsel %vm1243_vm7, %v16676_v30, %v8714_v58  ;;  %v20416_v58 = vld [vmem:[#allocation131_spill] sm:$0xff] }
 0x3cd   :  { %20414 = vst [vmem:[#allocation88_spill] sm:$0xff] %v17008_v21  ;;  %v17024_v31 = vsel %vm1243_vm7, %v16688_v29, %v8708_v42  ;;  %v17028_v10 = vsel %vm1243_vm7, %v16713_v41, %v8709_v43  ;;  %v8719_v23 = vunpack.i.h.bf16 %v20415_v20  ;;  %9126 = vrot.lane.b32.xlu1 %v17008_v21, %s9779_s17  ;;  %v17035_v28 = vsel %vm1243_vm7, %v16724_v3, %v8723_v60  ;;  %v20421_v60 = vld [vmem:[#allocation140_spill] sm:$0xff] }
 0x3ce   :  { %v9150_v1 = vpack.i.bf16 %v20357_v13, %v20356_v59  ;;  %v4985_v24 = vsel %vm204_vm1, %v4983_v7, %v4984_v62  ;;  %v4987_v30 = vsel %vm204_vm1, %v4984_v62, %v4986_v33  ;;  %v17045_v41 = vsel %vm1243_vm7, %v16709_v0, %v8724_v27  ;;  %v20420_v59 = vld [vmem:[#allocation106_spill] sm:$0xff]  ;;  %v20423_v7 = vld [vmem:[#allocation60_spill] sm:$0xff]  ;;  %v20424_v33 = vld [vmem:[#allocation31_spill] sm:$0xff] }
 0x3cf   :  { %v17041_v29 = vpop.permute.xlu1 %8876  ;;  %v8734_v57 = vunpack.i.h.bf16 %v20416_v58  ;;  %v8733_v43 = vunpack.i.l.bf16 %v20416_v58  ;;  %v17049_v42 = vpack.i.bf16 %v4987_v30, %v4985_v24  ;;  %v17051_v3 = vpop.permute.xlu0 %8891  ;;  %v17055_v13 = vsel %vm1243_vm7, %v20419_v44, %v8718_v40  ;;  %v20422_v0 = vld [vmem:[#allocation166_spill] sm:$0xff]  ;;  %v20425_v30 = vld [vmem:[#allocation163_spill] sm:$0xff] }
 0x3d0   :  { %20418 = vst [vmem:[#allocation98_spill] sm:$0xff] %v17051_v3  ;;  %9151 = vrot.lane.b32.xlu0 %v9150_v1, %s9780_s24  ;;  %v4993_v45 = vrot.slane %v20420_v59, 2  ;;  %v4994_v20 = vrot.slane %v20421_v60, 2  ;;  %v4996_v27 = vrot.slane %v20422_v0, 2  ;;  %v17063_v62 = vsel %vm1243_vm7, %v20423_v7, %v8719_v23  ;;  %v20427_v60 = vld [vmem:[#allocation28_spill] sm:$0xff]  ;;  %v20428_v7 = vld [vmem:[#allocation75_spill] sm:$0xff] }
 0x3d1   :  { %20417 = vst [vmem:[#allocation133_spill] sm:$0xff] %v17049_v42  ;;  %v8743_v24 = vunpack.i.l.bf16 %v20424_v33  ;;  %v8729_v58 = vunpack.i.h.bf16 %v20425_v30  ;;  %v8728_v18 = vunpack.i.l.bf16 %v20425_v30  ;;  %9136 = vrot.lane.b32.xlu1 %v17049_v42, %s9779_s17  ;;  %v8744_v40 = vunpack.i.h.bf16 %v20424_v33  ;;  %v20431_v3 = vld [vmem:[#allocation62_spill] sm:$0xff] }
 0x3d2   :  { %v9160_v1 = vpack.i.bf16 %v20376_v54, %v20375_v19  ;;  %v4995_v44 = vsel %vm204_vm1, %v4993_v45, %v4994_v20  ;;  %v4997_v59 = vsel %vm204_vm1, %v4994_v20, %v4996_v27  ;;  %v17079_v0 = vsel %vm1243_vm7, %v20427_v60, %v8733_v43  ;;  %v20432_v54 = vld [vmem:[#allocation124_spill] sm:$0xff]  ;;  %v20436_v60 = vld [vmem:[#allocation77_spill] sm:$0xff] }
 0x3d3   :  { %v17075_v23 = vpop.permute.xlu1 %8886  ;;  %v8764_v30 = vunpack.i.h.bf16 %v20428_v7  ;;  %v8763_v21 = vunpack.i.l.bf16 %v20428_v7  ;;  %v17083_v42 = vpack.i.bf16 %v4997_v59, %v4995_v44  ;;  %v17085_v33 = vpop.permute.xlu0 %8901  ;;  %v17089_v19 = vsel %vm1243_vm7, %v20431_v3, %v8734_v57  ;;  %v20433_v20 = vld [vmem:[#allocation156_spill] sm:$0xff]  ;;  %v20437_v7 = vld [vmem:[#allocation165_spill] sm:$0xff] }
 0x3d4   :  { %20426 = vst [vmem:[#allocation102_spill] sm:$0xff] %v17075_v23  ;;  %20430 = vst [vmem:[#allocation143_spill] sm:$0xff] %v17085_v33  ;;  %v8773_v45 = vunpack.i.l.bf16 %v20432_v54  ;;  %v8759_v27 = vunpack.i.h.bf16 %v20433_v20  ;;  %v8758_v23 = vunpack.i.l.bf16 %v20433_v20  ;;  %9161 = vrot.lane.b32.xlu0 %v9160_v1, %s9780_s24  ;;  %v17097_v43 = vsel %vm1243_vm7, %v16816_v37, %v8743_v24  ;;  %v20435_v44 = vld [vmem:[#allocation168_spill] sm:$0xff]  ;;  %v20439_v20 = vld [vmem:[#allocation73_spill] sm:$0xff] }
 0x3d5   :  { %20429 = vst [vmem:[#allocation128_spill] sm:$0xff] %v17083_v42  ;;  %20434 = vst [vmem:[#allocation54_spill] sm:$0xff] %v17097_v43  ;;  %v17101_v59 = vsel %vm1243_vm7, %v20435_v44, %v8728_v18  ;;  %v17105_v57 = vsel %vm1243_vm7, %v20436_v60, %v8729_v58  ;;  %v8774_v3 = vunpack.i.h.bf16 %v20432_v54  ;;  %9146 = vrot.lane.b32.xlu1 %v17083_v42, %s9779_s17  ;;  %v8754_v37 = vunpack.i.h.bf16 %v20439_v20  ;;  %v20440_v24 = vld [vmem:[#allocation52_spill] sm:$0xff] }
 0x3d6   :  { %v17112_v1 = vsel %vm1243_vm7, %v20437_v7, %v8744_v40  ;;  %v9170_v18 = vpack.i.bf16 %v20389_v48, %v20388_v61  ;;  %v8753_v58 = vunpack.i.l.bf16 %v20439_v20  ;;  %v4643_v54 = vsel %vm1276_vm8, %v16863_v22, %v8763_v21  ;;  %v17125_v42 = vld [vmem:[#allocation2 + $0x1e8] sm:$0xff]  ;;  %v20442_v40 = vld [vmem:[#allocation83_spill] sm:$0xff] }
 0x3d7   :  { %20438 = vst [vmem:[#allocation94_spill] sm:$0xff] %v17112_v1  ;;  %v17118_v44 = vpop.permute.xlu1 %8896  ;;  %v4644_v60 = vsel %vm1276_vm8, %v16878_v16, %v8764_v30  ;;  %v9155_v7 = vpack.i.bf16 %v17125_v42, %v20442_v40  ;;  %v8912_v1 = vpop.permute.xlu0 %8911  ;;  %v17131_v43 = vsel %vm1276_vm8, %v16918_v6, %v8773_v45  ;;  %v4641_v61 = vsel %vm1276_vm8, %v16891_v50, %v8758_v23  ;;  %v20443_v21 = vld [vmem:[#allocation127_spill] sm:$0xff] }
 0x3d8   :  { %20441 = vst [vmem:[#allocation96_spill] sm:$0xff] %v17118_v44  ;;  %v4642_v48 = vsel %vm1276_vm8, %v16904_v25, %v8759_v27  ;;  %v8833_v22 = vunpack.i.l.bf16 %v16847_v53  ;;  %9171 = vrot.lane.b32.xlu0 %v9170_v18, %s9780_s24  ;;  %v17141_v16 = vsel %vm1276_vm8, %v16922_v14, %v8774_v3  ;;  %v8769_v30 = vunpack.i.h.bf16 %v20443_v21  ;;  %v20445_v18 = vld [vmem:[#allocation93_spill] sm:$0xff]  ;;  %v20446_v40 = vld [vmem:[#allocation87_spill] sm:$0xff] }
 0x3d9   :  { %v8834_v20 = vunpack.i.h.bf16 %v16847_v53  ;;  %9156 = vrot.lane.b32.xlu1 %v9155_v7, %s9780_s24  ;;  %v8913_v6 = vunpack.i.l.bf16 %v8912_v1  ;;  %v8844_v50 = vunpack.i.h.bf16 %v16874_v36  ;;  %v8843_v23 = vunpack.i.l.bf16 %v16874_v36 }
 0x3da   :  { %v9180_v25 = vpack.i.bf16 %v16451_v15, %v16468_v5  ;;  %v8914_v45 = vunpack.i.h.bf16 %v8912_v1  ;;  %v8768_v14 = vunpack.i.l.bf16 %v20443_v21  ;;  %v8839_v3 = vunpack.i.h.bf16 %v16900_v39  ;;  %v20447_v1 = vld [vmem:[#allocation158_spill] sm:$0xff] }
 0x3db   :  { %v17150_v27 = vpop.permute.xlu1 %8906  ;;  %v9165_v53 = vpack.i.bf16 %v20446_v40, %v20445_v18  ;;  %v8922_v44 = vpop.permute.xlu0 %8921  ;;  %v4639_v7 = vsel %vm1276_vm8, %v16837_v56, %v8753_v58  ;;  %v8838_v33 = vunpack.i.l.bf16 %v16900_v39  ;;  %v4640_v15 = vsel %vm1276_vm8, %v16841_v12, %v8754_v37 }
 0x3dc   :  { %20444 = vst [vmem:[#allocation49_spill] sm:$0xff] %v17150_v27  ;;  %9181 = vrot.lane.b32.xlu0 %v9180_v25, %s9780_s24  ;;  %v8923_v36 = vunpack.i.l.bf16 %v8922_v44  ;;  %v4671_v5 = vsel %vm1309_vm9, %v4639_v7, %v8833_v22  ;;  %v8784_v21 = vunpack.i.h.bf16 %v20447_v1  ;;  %v8924_v27 = vunpack.i.h.bf16 %v8922_v44  ;;  %v17172_v22 = vld [vmem:[#allocation2 + $0x248] sm:$0xff]  ;;  %v20448_v25 = vld [vmem:[#allocation65_spill] sm:$0xff] }
 0x3dd   :  { %9166 = vrot.lane.b32.xlu1 %v9165_v53, %s9780_s24  ;;  %v4672_v18 = vsel %vm1309_vm9, %v4640_v15, %v8834_v20  ;;  %v4703_v40 = vsel %vm1342_vm10, %v4671_v5, %v8913_v6  ;;  %v4675_v56 = vsel %vm1309_vm9, %v4643_v54, %v8843_v23  ;;  %v4676_v39 = vsel %vm1309_vm9, %v4644_v60, %v8844_v50 }
 0x3de   :  { %v9190_v58 = vpack.i.bf16 %v20401_v51, %v20400_v49  ;;  %v4704_v12 = vsel %vm1342_vm10, %v4672_v18, %v8914_v45  ;;  %v9175_v53 = vpack.i.bf16 %v17172_v22, %v20448_v25  ;;  %v4673_v6 = vsel %vm1309_vm9, %v4641_v61, %v8838_v33  ;;  %v9739_v51 = vld [vmem:[%s18751_s3 + $0x20] ss:$0 sps:$4 sm:$0xff]  }
 0x3df   :  { %v8917_v37 = vpop.permute.xlu1 %8916  ;;  %v6048_v44 = vpack.c.bf16 %v4704_v12, %v4703_v40  ;;  %v8932_v7 = vpop.permute.xlu0 %8931  ;;  %v4674_v54 = vsel %vm1309_vm9, %v4642_v48, %v8839_v3  ;;  %v4707_v49 = vsel %vm1342_vm10, %v4675_v56, %v8923_v36  ;;  %v6220_v60 = vsel %vm2892_vm4, %v9739_v51, 0  ;;  %v20449_v40 = vld [vmem:[#allocation63_spill] sm:$0xff] }
 0x3e0   :  { %v8919_v20 = vunpack.i.h.bf16 %v8917_v37  ;;  %v8918_v15 = vunpack.i.l.bf16 %v8917_v37  ;;  %9191 = vrot.lane.b32.xlu0 %v9190_v58, %s9780_s24  ;;  %v8783_v50 = vunpack.i.l.bf16 %v20447_v1  ;;  %v4708_v23 = vsel %vm1342_vm10, %v4676_v39, %v8924_v27  ;;  %6994 = vmatpush3.bf16.msra.mxu1 %v6220_v60  ;;  %v20450_v56 = vld [vmem:[#allocation111_spill] sm:$0xff]  ;;  %v20451_v37 = vld [vmem:[#allocation81_spill] sm:$0xff] }
 0x3e1   :  { %9176 = vrot.lane.b32.xlu1 %v9175_v53, %s9780_s24  ;;  %6995 = vmatprep.mubr.msk.bf16.mxu1 %vm2795_vm11, %v6048_v44  ;;  %v4645_v48 = vsel %vm1276_vm8, %v16937_v4, %v8768_v14  ;;  %v8853_v45 = vunpack.i.l.bf16 %v16909_v9  ;;  %v9200_v3 = vpack.i.bf16 %v20410_v26, %v20409_v34  ;;  %v4646_v27 = vsel %vm1276_vm8, %v16948_v11, %v8769_v30 }
 0x3e2   :  { %v4705_v33 = vsel %vm1342_vm10, %v4673_v6, %v8918_v15  ;;  %v4706_v61 = vsel %vm1342_vm10, %v4674_v54, %v8919_v20  ;;  %v8849_v1 = vunpack.i.h.bf16 %v16933_v63  ;;  %v8848_v18 = vunpack.i.l.bf16 %v16933_v63  ;;  %v20453_v6 = vld [vmem:[#allocation74_spill] sm:$0xff] }
 0x3e3   :  { %v8927_v36 = vpop.permute.xlu1 %8926  ;;  %v6049_v5 = vpack.c.bf16 %v4706_v61, %v4705_v33  ;;  %v9185_v39 = vpack.i.bf16 %v20450_v56, %v20449_v40  ;;  %v17201_v58 = vpop.permute.xlu0 %8941  ;;  %v8854_v4 = vunpack.i.h.bf16 %v16909_v9  ;;  %v6050_v14 = vpack.c.bf16 %v4708_v23, %v4707_v49  ;;  %v20454_v49 = vld [vmem:[#allocation68_spill] sm:$0xff]  ;;  %v20455_v23 = vld [vmem:[#allocation139_spill] sm:$0xff] }
 0x3e4   :  { %9201 = vrot.lane.b32.xlu0 %v9200_v3, %s9780_s24  ;;  %v8929_v34 = vunpack.i.h.bf16 %v8927_v36  ;;  %v8928_v26 = vunpack.i.l.bf16 %v8927_v36  ;;  %v4651_v12 = vsel %vm1276_vm8, %v16955_v32, %v8783_v50  ;;  %v4652_v11 = vsel %vm1276_vm8, %v16963_v2, %v8784_v21  ;;  %v20452_v21 = vld [vmem:[#allocation66_spill] sm:$0xff] }
 0x3e5   :  { %9186 = vrot.lane.b32.xlu1 %v9185_v39, %s9780_s24  ;;  %v8934_v63 = vunpack.i.h.bf16 %v8932_v7  ;;  %v8933_v30 = vunpack.i.l.bf16 %v8932_v7  ;;  %6996 = vmatmul.mubr.msk.bf16.vlgmr.msra.gmra.mrb[0].mxu1 %vm2795_vm11, %v6049_v5  ;;  %v8779_v25 = vunpack.i.h.bf16 %v20451_v37  ;;  %v8778_v9 = vunpack.i.l.bf16 %v20451_v37  ;;  %v20456_v5 = vld [vmem:[#allocation135_spill] sm:$0xff]  ;;  %v20457_v39 = vld [vmem:[#allocation78_spill] sm:$0xff] }
 0x3e6   :  { %v4679_v53 = vsel %vm1309_vm9, %v17131_v43, %v8853_v45  ;;  %6999 = vmatprep.mubr.msk.bf16.mxu1 %vm2795_vm11, %v6050_v14  ;;  %v4677_v32 = vsel %vm1309_vm9, %v4645_v48, %v8848_v18  ;;  %v4678_v2 = vsel %vm1309_vm9, %v4646_v27, %v8849_v1  ;;  %v9195_v20 = vpack.i.bf16 %v20452_v21, %v16442_v17  ;;  %v17257_v14 = vld [vmem:[#allocation2 + $0x200] sm:$0xff] }
 0x3e7   :  { %v8937_v44 = vpop.permute.xlu1 %8936  ;;  %v17220_v7 = vpop.permute.xlu0 %8951  ;;  %v4680_v15 = vsel %vm1309_vm9, %v17141_v16, %v8854_v4  ;;  %v4709_v43 = vsel %vm1342_vm10, %v4677_v32, %v8928_v26  ;;  %v4710_v54 = vsel %vm1342_vm10, %v4678_v2, %v8929_v34  ;;  %v8794_v51 = vunpack.i.h.bf16 %v20454_v49  ;;  %v20459_v2 = vld [vmem:[#allocation119_spill] sm:$0xff] }
 0x3e8   :  { %9211 = vrot.lane.b32.xlu0 %v20453_v6, %s9781_s26  ;;  %v8793_v60 = vunpack.i.l.bf16 %v20454_v49  ;;  %v4711_v17 = vsel %vm1342_vm10, %v4679_v53, %v8933_v30  ;;  %v4712_v50 = vsel %vm1342_vm10, %v4680_v15, %v8934_v63  ;;  %v8864_v33 = vunpack.i.h.bf16 %v20455_v23 }
 0x3e9   :  { %9196 = vrot.lane.b32.xlu1 %v9195_v20, %s9780_s24  ;;  %v8863_v16 = vunpack.i.l.bf16 %v20455_v23  ;;  %v8859_v48 = vunpack.i.h.bf16 %v16969_v47  ;;  %v8858_v45 = vunpack.i.l.bf16 %v16969_v47  ;;  %v6051_v36 = vpack.c.bf16 %v4710_v54, %v4709_v43  ;;  %v20460_v20 = vld [vmem:[#allocation162_spill] sm:$0xff]  ;;  %v20461_v23 = vld [vmem:[#allocation141_spill] sm:$0xff] }
 0x3ea   :  { %v8939_v27 = vunpack.i.h.bf16 %v8937_v44  ;;  %v8938_v1 = vunpack.i.l.bf16 %v8937_v44  ;;  %v6052_v18 = vpack.c.bf16 %v4712_v50, %v4711_v17  ;;  %v4649_v40 = vsel %vm1276_vm8, %v16981_v8, %v8778_v9  ;;  %v20458_v9 = vld [vmem:[#allocation45_spill] sm:$0xff] }
 0x3eb   :  { %v17235_v61 = vpop.permute.xlu1 %8946  ;;  %v17239_v3 = vpop.permute.xlu0 %8961  ;;  %v4650_v56 = vsel %vm1276_vm8, %v17005_v38, %v8779_v25  ;;  %v8944_v47 = vunpack.i.h.bf16 %v17201_v58  ;;  %v8943_v4 = vunpack.i.l.bf16 %v17201_v58  ;;  %v4655_v34 = vsel %vm1276_vm8, %v17001_v55, %v8793_v60  ;;  %v17259_v38 = vld [vmem:[#allocation2 + $0x1f8] sm:$0xff] }
 0x3ec   :  { %9221 = vrot.lane.b32.xlu0 %v20456_v5, %s9782_s27  ;;  %v4656_v26 = vsel %vm1276_vm8, %v17020_v35, %v8794_v51  ;;  %v4683_v8 = vsel %vm1309_vm9, %v4651_v12, %v8863_v16  ;;  %v9230_v63 = vpack.i.bf16 %v17257_v14, %v17259_v38  ;;  %v4681_v30 = vsel %vm1309_vm9, %v4649_v40, %v8858_v45  ;;  %v17286_v51 = vld [vmem:[#allocation2 + $0x1e0] sm:$0xff]  ;;  %v20462_v45 = vld [vmem:[#allocation57_spill] sm:$0xff] }
 0x3ed   :  { %9206 = vrot.lane.b32.xlu1 %v20457_v39, %s9781_s26  ;;  %7000 = vmatmul.mubr.msk.bf16.gmra.mrb[4].mxu1 %vm2795_vm11, %v6051_v36  ;;  %v4682_v55 = vsel %vm1309_vm9, %v4650_v56, %v8859_v48  ;;  %v4684_v35 = vsel %vm1309_vm9, %v4652_v11, %v8864_v33  ;;  %v4713_v12 = vsel %vm1342_vm10, %v4681_v30, %v8938_v1  ;;  %v8789_v53 = vunpack.i.h.bf16 %v20458_v9 }
 0x3ee   :  { %7003 = vmatprep.mubr.msk.bf16.mxu1 %vm2795_vm11, %v6052_v18  ;;  %v4714_v25 = vsel %vm1342_vm10, %v4682_v55, %v8939_v27  ;;  %v4715_v44 = vsel %vm1342_vm10, %v4683_v8, %v8943_v4  ;;  %v4716_v32 = vsel %vm1342_vm10, %v4684_v35, %v8944_v47  ;;  %v8788_v21 = vunpack.i.l.bf16 %v20458_v9 }
 0x3ef   :  { %v17264_v58 = vpop.permute.xlu1 %8956  ;;  %v17268_v37 = vpop.permute.xlu0 %8971  ;;  %v8874_v15 = vunpack.i.h.bf16 %v20460_v20  ;;  %v8873_v11 = vunpack.i.l.bf16 %v20460_v20  ;;  %v8869_v54 = vunpack.i.h.bf16 %v16997_v46  ;;  %v8868_v49 = vunpack.i.l.bf16 %v16997_v46 }
 0x3f0   :  { %9231 = vrot.lane.b32.xlu0 %v9230_v63, %s9783_s28  ;;  %v9225_v60 = vpack.i.bf16 %v17125_v42, %v17286_v51  ;;  %v6053_v50 = vpack.c.bf16 %v4714_v25, %v4713_v12  ;;  %v8949_v33 = vunpack.i.h.bf16 %v17235_v61  ;;  %v8948_v16 = vunpack.i.l.bf16 %v17235_v61  ;;  %v20464_v63 = vld [vmem:[#allocation151_spill] sm:$0xff] }
 0x3f1   :  { %9216 = vrot.lane.b32.xlu1 %v20459_v2, %s9782_s27  ;;  %v6054_v48 = vpack.c.bf16 %v4716_v32, %v4715_v44  ;;  %v8804_v36 = vunpack.i.h.bf16 %v20462_v45  ;;  %v8803_v46 = vunpack.i.l.bf16 %v20462_v45  ;;  %v8954_v27 = vunpack.i.h.bf16 %v17220_v7 }
 0x3f2   :  { %v8953_v1 = vunpack.i.l.bf16 %v17220_v7  ;;  %v4653_v18 = vsel %vm1276_vm8, %v17024_v31, %v8788_v21  ;;  %v4654_v40 = vsel %vm1276_vm8, %v17028_v10, %v8789_v53  ;;  %v4687_v7 = vsel %vm1309_vm9, %v4655_v34, %v8873_v11  ;;  %v20463_v10 = vld [vmem:[#allocation61_spill] sm:$0xff] }
 0x3f3   :  { %v17282_v43 = vpop.permute.xlu1 %8966  ;;  %v17290_v17 = vpop.permute.xlu0 %8981  ;;  %v4685_v56 = vsel %vm1309_vm9, %v4653_v18, %v8868_v49  ;;  %v4686_v39 = vsel %vm1309_vm9, %v4654_v40, %v8869_v54  ;;  %v4688_v4 = vsel %vm1309_vm9, %v4656_v26, %v8874_v15  ;;  %v8799_v30 = vunpack.i.h.bf16 %v20464_v63  ;;  %v20466_v54 = vld [vmem:[#allocation117_spill] sm:$0xff]  ;;  %v20469_v40 = vld [vmem:[#allocation98_spill] sm:$0xff] }
 0x3f4   :  { %9241 = vrot.lane.b32.xlu0 %v20461_v23, %s9784_s10  ;;  %v4717_v8 = vsel %vm1342_vm10, %v4685_v56, %v8948_v16  ;;  %v4718_v31 = vsel %vm1342_vm10, %v4686_v39, %v8949_v33  ;;  %v4719_v55 = vsel %vm1342_vm10, %v4687_v7, %v8953_v1  ;;  %v4720_v35 = vsel %vm1342_vm10, %v4688_v4, %v8954_v27  ;;  %v20468_v27 = vld [vmem:[#allocation58_spill] sm:$0xff]  ;;  %v17373_v39 = vld [vmem:[#allocation2 + $0x230] sm:$0xff]  ;;  %v17375_v7 = vld [vmem:[#allocation2 + $0x228] sm:$0xff] }
 0x3f5   :  { %9226 = vrot.lane.b32.xlu1 %v9225_v60, %s9783_s28  ;;  %7004 = vmatmul.mubr.msk.bf16.gmra.mrb[8].mxu1 %vm2795_vm11, %v6053_v50  ;;  %v8798_v34 = vunpack.i.l.bf16 %v20464_v63  ;;  %v8884_v26 = vunpack.i.h.bf16 %v17010_v52  ;;  %v8883_v12 = vunpack.i.l.bf16 %v17010_v52  ;;  %v8879_v9 = vunpack.i.h.bf16 %v17041_v29 }
 0x3f6   :  { %7007 = vmatprep.mubr.msk.bf16.mxu1 %vm2795_vm11, %v6054_v48  ;;  %v8878_v53 = vunpack.i.l.bf16 %v17041_v29  ;;  %v6055_v32 = vpack.c.bf16 %v4718_v31, %v4717_v8  ;;  %v8959_v2 = vunpack.i.h.bf16 %v17264_v58  ;;  %v8958_v21 = vunpack.i.l.bf16 %v17264_v58  ;;  %v20470_v31 = vld [vmem:[#allocation102_spill] sm:$0xff] }
 0x3f7   :  { %v17307_v61 = vpop.permute.xlu1 %8976  ;;  %v17311_v47 = vpop.permute.xlu0 %8991  ;;  %v6056_v20 = vpack.c.bf16 %v4720_v35, %v4719_v55  ;;  %v8738_v15 = vunpack.i.l.bf16 %v20440_v24  ;;  %v4659_v52 = vsel %vm1276_vm8, %v17035_v28, %v8803_v46  ;;  %v8964_v11 = vunpack.i.h.bf16 %v17239_v3 }
 0x3f8   :  { %9251 = vrot.lane.b32.xlu0 %v20463_v10, %s9785_s8  ;;  %v8963_v29 = vunpack.i.l.bf16 %v17239_v3  ;;  %v4660_v58 = vsel %vm1276_vm8, %v17045_v41, %v8804_v36  ;;  %v8814_v49 = vunpack.i.h.bf16 %v20466_v54  ;;  %v4657_v60 = vsel %vm1276_vm8, %v17055_v13, %v8798_v34 }
 0x3f9   :  { %9236 = vrot.lane.b32.xlu1 %v20453_v6, %s9784_s10  ;;  %v20465_v6 = vld [vmem:[#allocation132_spill] sm:$0xff]  ;;  %v4658_v28 = vsel %vm1276_vm8, %v17063_v62, %v8799_v30  ;;  %v4689_v3 = vsel %vm1309_vm9, %v4657_v60, %v8878_v53  ;;  %v4691_v41 = vsel %vm1309_vm9, %v4659_v52, %v8883_v12  ;;  %v4692_v16 = vsel %vm1309_vm9, %v4660_v58, %v8884_v26  ;;  %v20467_v62 = vld [vmem:[#allocation154_spill] sm:$0xff] }
 0x3fa   :  { %v4721_v48 = vsel %vm1342_vm10, %v4689_v3, %v8958_v21  ;;  %v8813_v45 = vunpack.i.l.bf16 %v20466_v54  ;;  %v4723_v36 = vsel %vm1342_vm10, %v4691_v41, %v8963_v29  ;;  %v4724_v46 = vsel %vm1342_vm10, %v4692_v16, %v8964_v11  ;;  %v17410_v29 = vld [vmem:[#allocation2 + $0x210] sm:$0xff]  ;;  %v20474_v16 = vld [vmem:[#allocation36_spill] sm:$0xff] }
 0x3fb   :  { %v17331_v44 = vpop.permute.xlu0 %9001  ;;  %v8809_v1 = vunpack.i.h.bf16 %v20468_v27  ;;  %v8808_v18 = vunpack.i.l.bf16 %v20468_v27  ;;  %v8894_v56 = vunpack.i.h.bf16 %v20469_v40  ;;  %v9280_v4 = vpack.i.bf16 %v17373_v39, %v17375_v7 }
 0x3fc   :  { %v17327_v25 = vpop.permute.xlu1 %8986  ;;  %9261 = vrot.lane.b32.xlu0 %v20465_v6, %s9781_s26  ;;  %v8889_v63 = vunpack.i.h.bf16 %v20470_v31  ;;  %v8888_v30 = vunpack.i.l.bf16 %v20470_v31  ;;  %v8893_v35 = vunpack.i.l.bf16 %v20469_v40  ;;  %v8969_v34 = vunpack.i.h.bf16 %v17282_v43 }
 0x3fd   :  { %9246 = vrot.lane.b32.xlu1 %v20456_v5, %s9785_s8  ;;  %7008 = vmatmul.mubr.msk.bf16.gmra.mrb[12].mxu1 %vm2795_vm11, %v6055_v32  ;;  %v4690_v5 = vsel %vm1309_vm9, %v4658_v28, %v8879_v9  ;;  %v8968_v26 = vunpack.i.l.bf16 %v17282_v43  ;;  %v6058_v12 = vpack.c.bf16 %v4724_v46, %v4723_v36  ;;  %v20471_v9 = vld [vmem:[#allocation48_spill] sm:$0xff]  ;;  %v4663_v32 = vsel %vm1276_vm8, %v17079_v0, %v8813_v45  ;;  %v20472_v0 = vld [vmem:[#allocation85_spill] sm:$0xff]  ;;  %v20473_v28 = vld [vmem:[#allocation50_spill] sm:$0xff] }
 0x3fe   :  { %7011 = vmatprep.mubr.msk.bf16.mxu1 %vm2795_vm11, %v6056_v20  ;;  %v4722_v13 = vsel %vm1342_vm10, %v4690_v5, %v8959_v2  ;;  %v4633_v53 = vsel %vm1243_vm7, %v20471_v9, %v8738_v15  ;;  %v8974_v2 = vunpack.i.h.bf16 %v17268_v37  ;;  %v8973_v21 = vunpack.i.l.bf16 %v17268_v37  ;;  %v20475_v45 = vld [vmem:[#allocation143_spill] sm:$0xff]  ;;  %v20476_v46 = vld [vmem:[#allocation96_spill] sm:$0xff] }
 0x3ff   :  { %v6057_v55 = vpack.c.bf16 %v4722_v13, %v4721_v48  ;;  %v4664_v43 = vsel %vm1276_vm8, %v17089_v19, %v8814_v49  ;;  %v4661_v20 = vsel %vm1276_vm8, %v17101_v59, %v8808_v18  ;;  %v4662_v15 = vsel %vm1276_vm8, %v17105_v57, %v8809_v1 }
 0x400   :  { %v17353_v50 = vpop.permute.xlu1 %8996  ;;  %9271 = vrot.lane.b32.xlu0 %v20467_v62, %s9782_s27  ;;  %v8824_v52 = vunpack.i.h.bf16 %v20472_v0  ;;  %v4693_v37 = vsel %vm1309_vm9, %v4661_v20, %v8888_v30  ;;  %v4694_v11 = vsel %vm1309_vm9, %v4662_v15, %v8889_v63  ;;  %v4695_v57 = vsel %vm1309_vm9, %v4663_v32, %v8893_v35  ;;  %v20477_v63 = vld [vmem:[#allocation130_spill] sm:$0xff]  ;;  %v20479_v35 = vld [vmem:[#allocation125_spill] sm:$0xff] }
 0x401   :  { %v17357_v33 = vpop.permute.xlu0 %9011  ;;  %9256 = vrot.lane.b32.xlu1 %v20461_v23, %s9781_s26  ;;  %v4696_v54 = vsel %vm1309_vm9, %v4664_v43, %v8894_v56  ;;  %v4725_v49 = vsel %vm1342_vm10, %v4693_v37, %v8968_v26  ;;  %v4726_v60 = vsel %vm1342_vm10, %v4694_v11, %v8969_v34  ;;  %v4727_v3 = vsel %vm1342_vm10, %v4695_v57, %v8973_v21  ;;  %v20481_v21 = vld [vmem:[#allocation94_spill] sm:$0xff]  ;;  %v20483_v11 = vld [vmem:[#allocation15_spill] sm:$0xff] }
 0x402   :  { %v4728_v5 = vsel %vm1342_vm10, %v4696_v54, %v8974_v2  ;;  %v8823_v41 = vunpack.i.l.bf16 %v20472_v0  ;;  %v8819_v48 = vunpack.i.h.bf16 %v20474_v16  ;;  %v8818_v13 = vunpack.i.l.bf16 %v20474_v16  ;;  %v20487_v16 = vld [vmem:[#allocation72_spill] sm:$0xff] }
 0x403   :  { %v8904_v36 = vunpack.i.h.bf16 %v20475_v45  ;;  %v8899_v27 = vunpack.i.h.bf16 %v20476_v46  ;;  %v8898_v1 = vunpack.i.l.bf16 %v20476_v46  ;;  %v6059_v40 = vpack.c.bf16 %v4726_v60, %v4725_v49  ;;  %v20484_v60 = vld [vmem:[#allocation109_spill] sm:$0xff] }
 0x404   :  { %v17379_v8 = vpop.permute.xlu1 %9006  ;;  %9281 = vrot.lane.b32.xlu0 %v9280_v4, %s9783_s28  ;;  %v8903_v56 = vunpack.i.l.bf16 %v20475_v45  ;;  %v8979_v4 = vunpack.i.h.bf16 %v17307_v61  ;;  %v8978_v31 = vunpack.i.l.bf16 %v17307_v61  ;;  %v6060_v30 = vpack.c.bf16 %v4728_v5, %v4727_v3  ;;  %v20480_v61 = vld [vmem:[#allocation54_spill] sm:$0xff]  ;;  %v20486_v5 = vld [vmem:[#allocation32_spill] sm:$0xff] }
 0x405   :  { %v17383_v23 = vpop.permute.xlu0 %9021  ;;  %9266 = vrot.lane.b32.xlu1 %v20463_v10, %s9782_s27  ;;  %7012 = vmatmul.mubr.msk.bf16.gmra.mrb[16].mxu1 %vm2795_vm11, %v6057_v55  ;;  %v17408_v10 = vld [vmem:[#allocation2 + $0x218] sm:$0xff]  ;;  %v20478_v55 = vunpack.i.h.bf16 %v20440_v24  ;;  %v8984_v26 = vunpack.i.h.bf16 %v17290_v17  ;;  %v4667_v32 = vsel %vm1276_vm8, %v20480_v61, %v8823_v41  ;;  %v4665_v2 = vsel %vm1276_vm8, %v4633_v53, %v8818_v13  ;;  %v20482_v53 = vld [vmem:[#allocation105_spill] sm:$0xff]  ;;  %v20489_v13 = vld [vmem:[#allocation136_spill] sm:$0xff] }
 0x406   :  { %7015 = vmatprep.mubr.msk.bf16.mxu1 %vm2795_vm11, %v6058_v12  ;;  %v9275_v19 = vpack.i.bf16 %v17408_v10, %v17410_v29  ;;  %v8983_v12 = vunpack.i.l.bf16 %v17290_v17  ;;  %v4668_v43 = vsel %vm1276_vm8, %v20481_v21, %v8824_v52  ;;  %v4697_v17 = vsel %vm1309_vm9, %v4665_v2, %v8898_v1  ;;  %v20491_v1 = vld [vmem:[#allocation49_spill] sm:$0xff] }
 0x407   :  { %v4634_v34 = vsel %vm1243_vm7, %v20479_v35, %v20478_v55  ;;  %v4699_v20 = vsel %vm1309_vm9, %v4667_v32, %v8903_v56  ;;  %v4700_v15 = vsel %vm1309_vm9, %v4668_v43, %v8904_v36  ;;  %v4729_v0 = vsel %vm1342_vm10, %v4697_v17, %v8978_v31  ;;  %v20490_v36 = vld [vmem:[#allocation121_spill] sm:$0xff] }
 0x408   :  { %v17416_v59 = vpop.permute.xlu1 %9016  ;;  %9291 = vrot.lane.b32.xlu0 %v20473_v28, %s9784_s10  ;;  %v4666_v24 = vsel %vm1276_vm8, %v4634_v34, %v8819_v48  ;;  %v8748_v57 = vunpack.i.l.bf16 %v20483_v11  ;;  %v4731_v52 = vsel %vm1342_vm10, %v4699_v20, %v8983_v12  ;;  %v4732_v54 = vsel %vm1342_vm10, %v4700_v15, %v8984_v26  ;;  %v20494_v34 = vld [vmem:[#allocation113_spill] sm:$0xff] }
 0x409   :  { %v17414_v58 = vpop.permute.xlu0 %9031  ;;  %9276 = vrot.lane.b32.xlu1 %v9275_v19, %s9783_s28  ;;  %v8749_v19 = vunpack.i.h.bf16 %v20483_v11  ;;  %v20485_v3 = vunpack.i.h.bf16 %v20484_v60  ;;  %v20488_v48 = vunpack.i.l.bf16 %v20487_v16  ;;  %v8829_v46 = vunpack.i.h.bf16 %v20490_v36  ;;  %v20501_v60 = vld [vmem:[#allocation142_spill] sm:$0xff] }
 0x40a   :  { %v20493_v31 = vunpack.i.h.bf16 %v20487_v16  ;;  %v8989_v55 = vunpack.i.h.bf16 %v17327_v25  ;;  %v8988_v35 = vunpack.i.l.bf16 %v17327_v25  ;;  %v6062_v26 = vpack.c.bf16 %v4732_v54, %v4731_v52  ;;  %v17504_v25 = vld [vmem:[#allocation2 + $0x258] sm:$0xff]  ;;  %v17552_v16 = vld [vmem:[#allocation2 + $0x288] sm:$0xff] }
 0x40b   :  { %v4574_v41 = vsel %vm1177_vm5, %v20486_v5, %v20485_v3  ;;  %v4605_v45 = vsel %vm1210_vm6, %v20489_v13, %v20488_v48  ;;  %20503 = vst [vmem:[#allocation112_spill] sm:$0xff] %v17552_v16 }
 0x40c   :  { %9301 = vrot.lane.b32.xlu0 %v20477_v63, %s9785_s8  ;;  %v4637_v12 = vsel %vm1243_vm7, %v4605_v45, %v8748_v57  ;;  %v20497_v57 = vld [vmem:[#allocation134_spill] sm:$0xff] }
 0x40d   :  { %v17433_v18 = vpop.permute.xlu0 %9041  ;;  %9286 = vrot.lane.b32.xlu1 %v20465_v6, %s9784_s10  ;;  %v17448_v9 = vpop.permute.xlu1 %9026  ;;  %7016 = vmatmul.mubr.msk.bf16.gmra.mrb[20].mxu1 %vm2795_vm11, %v6059_v40  ;;  %v4698_v6 = vsel %vm1309_vm9, %v4666_v24, %v8899_v27  ;;  %v8828_v27 = vunpack.i.l.bf16 %v20490_v36  ;;  %v8909_v40 = vunpack.i.h.bf16 %v20491_v1  ;;  %v17502_v24 = vld [vmem:[#allocation2 + $0x260] sm:$0xff]  ;;  %v17565_v36 = vld [vmem:[#allocation2 + $0x278] sm:$0xff] }
 0x40e   :  { %7019 = vmatprep.mubr.msk.bf16.mxu1 %vm2795_vm11, %v6060_v30  ;;  %v4730_v37 = vsel %vm1342_vm10, %v4698_v6, %v8979_v4  ;;  %v4606_v30 = vsel %vm1210_vm6, %v4574_v41, %v20493_v31  ;;  %v9330_v21 = vpack.i.bf16 %v17502_v24, %v17504_v25  ;;  %v20502_v41 = vld [vmem:[#allocation90_spill] sm:$0xff] }
 0x40f   :  { %v6061_v4 = vpack.c.bf16 %v4730_v37, %v4729_v0  ;;  %v4638_v61 = vsel %vm1243_vm7, %v4606_v30, %v8749_v19  ;;  %v4669_v32 = vsel %vm1276_vm8, %v4637_v12, %v8828_v27  ;;  %v17520_v0 = vld [vmem:[#allocation2 + $0x240] sm:$0xff] }
 0x410   :  { %9311 = vrot.lane.b32.xlu0 %v20482_v53, %s9781_s26  ;;  %v4670_v2 = vsel %vm1276_vm8, %v4638_v61, %v8829_v46  ;;  %v9325_v37 = vpack.i.bf16 %v17172_v22, %v17520_v0  ;;  %v17567_v46 = vld [vmem:[#allocation2 + $0x270] sm:$0xff]  ;;  %v17600_v61 = vld [vmem:[#allocation2 + $0x2b8] sm:$0xff] }
 0x411   :  { %9296 = vrot.lane.b32.xlu1 %v20467_v62, %s9785_s8  ;;  %v8908_v62 = vunpack.i.l.bf16 %v20491_v1  ;;  %v4702_v17 = vsel %vm1309_vm9, %v4670_v2, %v8909_v40  ;;  %v9375_v27 = vpack.i.bf16 %v17565_v36, %v17567_v46  ;;  %v20505_v1 = vld [vmem:[#allocation55_spill] sm:$0xff]  ;;  %20514 = vst [vmem:[#allocation8_spill] sm:$0xff] %v17600_v61 }
 0x412   :  { %v17472_v49 = vpop.permute.xlu0 %9051  ;;  %v4734_v20 = vsel %vm1342_vm10, %v4702_v17, %v8989_v55  ;;  %v20509_v55 = vld [vmem:[#allocation56_spill] sm:$0xff] }
 0x413   :  { %v17486_v56 = vpop.permute.xlu1 %9036  ;;  %v4701_v43 = vsel %vm1309_vm9, %v4669_v32, %v8908_v62  ;;  %v17602_v32 = vld [vmem:[#allocation2 + $0x2c0] sm:$0xff] }
 0x414   :  { %20492 = vst [vmem:[#allocation118_spill] sm:$0xff] %v17486_v56  ;;  %9321 = vrot.lane.b32.xlu0 %v20494_v34, %s9782_s27  ;;  %v4733_v6 = vsel %vm1342_vm10, %v4701_v43, %v8988_v35  ;;  %20515 = vst [vmem:[#allocation97_spill] sm:$0xff] %v17602_v32  ;;  %v9430_v2 = vpack.i.bf16 %v17602_v32, %v17600_v61  ;;  %v9762_v61 = vld [vmem:[#allocation2 + $0x1b8] sm:$0xff] }
 0x415   :  { %9306 = vrot.lane.b32.xlu1 %v20473_v28, %s9781_s26  ;;  %7020 = vmatmul.mubr.msk.bf16.gmra.mrb[24].mxu1 %vm2795_vm11, %v6061_v4  ;;  %v6063_v19 = vpack.c.bf16 %v4734_v20, %v4733_v6  ;;  %v20507_v4 = vld [vmem:[#allocation82_spill] sm:$0xff]  ;;  %v17615_v6 = vld [vmem:[#allocation2 + $0x2a8] sm:$0xff]  ;;  %v17617_v20 = vld [vmem:[#allocation2 + $0x2a0] sm:$0xff] }
 0x416   :  { %7023 = vmatprep.mubr.msk.bf16.mxu1 %vm2795_vm11, %v6062_v26  ;;  %v20512_v26 = vld [vmem:[#allocation69_spill] sm:$0xff]  ;;  %20518 = vst [vmem:[#allocation84_spill] sm:$0xff] %v17615_v6  ;;  %20519 = vst [vmem:[#allocation108_spill] sm:$0xff] %v17617_v20 }
 0x417   :  { %v17511_v28 = vpop.permute.xlu0 %9061 }
 0x418   :  { %20495 = vst [vmem:[#allocation115_spill] sm:$0xff] %v17511_v28  ;;  %9331 = vrot.lane.b32.xlu0 %v9330_v21, %s9783_s28 }
 0x419   :  { %9316 = vrot.lane.b32.xlu1 %v20477_v63, %s9782_s27  ;;  %v17518_v15 = vpop.permute.xlu1 %9046  ;;  %v20499_v63 = vld [vmem:[#allocation71_spill] sm:$0xff] }
 0x41a   :  { %20496 = vst [vmem:[#allocation64_spill] sm:$0xff] %v17518_v15 }
 0x41c   :  { %9341 = vrot.lane.b32.xlu0 %v20497_v57, %s9784_s10 }
 0x41d   :  { %v17524_v11 = vpop.permute.xlu0 %9071  ;;  %9326 = vrot.lane.b32.xlu1 %v9325_v37, %s9783_s28  ;;  %v17529_v52 = vpop.permute.xlu1 %9056  ;;  %7024 = vmatmul.mubr.msk.bf16.gmra.mrb[28].mxu1 %vm2795_vm11, %v6063_v19  ;;  %v9425_v37 = vpack.i.bf16 %v17615_v6, %v17617_v20  ;;  %v20520_v19 = vld [vmem:[#allocation159_spill] sm:$0xff] }
 0x41e   :  { %20498 = vst [vmem:[#allocation146_spill] sm:$0xff] %v17529_v52  ;;  %v8994_v52 = vunpack.i.h.bf16 %v17311_v47 }
 0x420   :  { %9351 = vrot.lane.b32.xlu0 %v20499_v63, %s9785_s8  ;;  %v5793_v32 = vsel %vm1111_vm2, %v9762_v61, %v8994_v52  ;;  %v20532_v52 = vld [vmem:[#allocation95_spill] sm:$0xff]  ;;  %v20533_v61 = vld [vmem:[#allocation133_spill] sm:$0xff] }
 0x421   :  { %v17534_v54 = vpop.permute.xlu0 %9081  ;;  %9336 = vrot.lane.b32.xlu1 %v20482_v53, %s9784_s10  ;;  %v17554_v53 = vld [vmem:[#allocation2 + $0x290] sm:$0xff] }
 0x422   :  { %v17538_v22 = vpop.permute.xlu1 %9066  ;;  %20504 = vst [vmem:[#allocation153_spill] sm:$0xff] %v17554_v53  ;;  %v9380_v48 = vpack.i.bf16 %v17554_v53, %v17552_v16  ;;  %v9765_v53 = vld [vmem:[#allocation2 + $0x1c8] sm:$0xff] }
 0x423   :  { %20500 = vst [vmem:[#allocation164_spill] sm:$0xff] %v17538_v22 }
 0x424   :  { %9361 = vrot.lane.b32.xlu0 %v20501_v60, %s9781_s26 }
 0x425   :  { %9346 = vrot.lane.b32.xlu1 %v20494_v34, %s9785_s8 }
 0x426   :  { %v17544_v3 = vpop.permute.xlu0 %9091 }
 0x427   :  { %v17546_v5 = vpop.permute.xlu1 %9076 }
 0x428   :  { %9371 = vrot.lane.b32.xlu0 %v20502_v41, %s9782_s27 }
 0x429   :  { %9356 = vrot.lane.b32.xlu1 %v20497_v57, %s9781_s26 }
 0x42b   :  { %v17558_v13 = vpop.permute.xlu0 %9101 }
 0x42c   :  { %v17560_v45 = vpop.permute.xlu1 %9086  ;;  %9381 = vrot.lane.b32.xlu0 %v9380_v48, %s9783_s28 }
 0x42d   :  { %9366 = vrot.lane.b32.xlu1 %v20499_v63, %s9782_s27 }
 0x430   :  { %9391 = vrot.lane.b32.xlu0 %v20505_v1, %s9784_s10  ;;  %v17573_v40 = vpop.permute.xlu0 %9111 }
 0x431   :  { %20506 = vst [vmem:[#allocation76_spill] sm:$0xff] %v17573_v40  ;;  %v17575_v62 = vpop.permute.xlu1 %9096  ;;  %9376 = vrot.lane.b32.xlu1 %v9375_v27, %s9783_s28 }
 0x434   :  { %9401 = vrot.lane.b32.xlu0 %v20507_v4, %s9785_s8  ;;  %v17580_v31 = vpop.permute.xlu0 %9121 }
 0x435   :  { %20508 = vst [vmem:[#allocation155_spill] sm:$0xff] %v17580_v31  ;;  %9386 = vrot.lane.b32.xlu1 %v20501_v60, %s9784_s10  ;;  %v17584_v30 = vpop.permute.xlu1 %9106  ;;  %v20522_v60 = vld [vmem:[#allocation88_spill] sm:$0xff]  ;;  %v17681_v31 = vld [vmem:[#allocation2 + $0x338] sm:$0xff] }
 0x438   :  { %9411 = vrot.lane.b32.xlu0 %v20509_v55, %s9781_s26 }
 0x439   :  { %9396 = vrot.lane.b32.xlu1 %v20502_v41, %s9785_s8  ;;  %v17590_v35 = vpop.permute.xlu0 %9131 }
 0x43a   :  { %20510 = vst [vmem:[#allocation46_spill] sm:$0xff] %v17590_v35  ;;  %v17592_v34 = vpop.permute.xlu1 %9116  ;;  %v9761_v35 = vld [vmem:[#allocation2 + $0x2f0] sm:$0xff] }
 0x43b   :  { %20511 = vst [vmem:[#allocation70_spill] sm:$0xff] %v17592_v34 }
 0x43c   :  { %9421 = vrot.lane.b32.xlu0 %v20512_v26, %s9782_s27 }
 0x43d   :  { %9406 = vrot.lane.b32.xlu1 %v20505_v1, %s9781_s26 }
 0x43e   :  { %v17598_v12 = vpop.permute.xlu0 %9141 }
 0x43f   :  { %20513 = vst [vmem:[#allocation145_spill] sm:$0xff] %v17598_v12  ;;  %v17606_v21 = vpop.permute.xlu1 %9126 }
 0x440   :  { %20516 = vst [vmem:[#allocation67_spill] sm:$0xff] %v17606_v21  ;;  %9431 = vrot.lane.b32.xlu0 %v9430_v2, %s9783_s28  ;;  %v17646_v2 = vld [vmem:[#allocation2 + $0x2d8] sm:$0xff]  ;;  %v8993_v21 = vunpack.i.l.bf16 %v17311_v47 }
 0x441   :  { %9416 = vrot.lane.b32.xlu1 %v20507_v4, %s9782_s27  ;;  %v17644_v4 = vld [vmem:[#allocation2 + $0x2d0] sm:$0xff]  ;;  %20525 = vst [vmem:[#allocation59_spill] sm:$0xff] %v17646_v2 }
 0x442   :  { %v17611_v43 = vpop.permute.xlu0 %9151  ;;  %20524 = vst [vmem:[#allocation131_spill] sm:$0xff] %v17644_v4 }
 0x443   :  { %v17613_v17 = vpop.permute.xlu1 %9136 }
 0x444   :  { %20517 = vst [vmem:[#allocation20_spill] sm:$0xff] %v17613_v17  ;;  %9441 = vrot.lane.b32.xlu0 %v20520_v19, %s9784_s10  ;;  %v9760_v17 = vld [vmem:[#allocation2 + $0x2e8] sm:$0xff] }
 0x445   :  { %9426 = vrot.lane.b32.xlu1 %v9425_v37, %s9783_s28 }
 0x446   :  { %v17624_v57 = vpop.permute.xlu0 %9161 }
 0x447   :  { %v17626_v63 = vpop.permute.xlu1 %9146 }
 0x448   :  { %20521 = vst [vmem:[#allocation152_spill] sm:$0xff] %v17626_v63  ;;  %9451 = vrot.lane.b32.xlu0 %v20522_v60, %s9785_s8 }
 0x449   :  { %9436 = vrot.lane.b32.xlu1 %v20509_v55, %s9784_s10  ;;  %v9455_v55 = vpack.i.bf16 %v17646_v2, %v17644_v4  ;;  %v9763_v4 = vld [vmem:[#allocation2 + $0x1b0] sm:$0xff] }
 0x44a   :  { %v17632_v41 = vpop.permute.xlu0 %9171 }
 0x44b   :  { %v17634_v48 = vpop.permute.xlu1 %9156 }
 0x44c   :  { %9461 = vrot.lane.b32.xlu0 %v20520_v19, %s9781_s26  ;;  %v9159_v6 = vunpack.i.h.bf16 %v17634_v48 }
 0x44d   :  { %9446 = vrot.lane.b32.xlu1 %v20512_v26, %s9785_s8  ;;  %v20527_v26 = vld [vmem:[#allocation120_spill] sm:$0xff] }
 0x44e   :  { %v17640_v27 = vpop.permute.xlu0 %9181 }
 0x44f   :  { %20523 = vst [vmem:[#allocation160_spill] sm:$0xff] %v17640_v27  ;;  %v17642_v1 = vpop.permute.xlu1 %9166 }
 0x450   :  { %9471 = vrot.lane.b32.xlu0 %v20522_v60, %s9782_s27  ;;  %v20530_v60 = vld [vmem:[#allocation110_spill] sm:$0xff] }
 0x451   :  { %9456 = vrot.lane.b32.xlu1 %v9455_v55, %s9780_s24 }
 0x452   :  { %v17653_v37 = vpop.permute.xlu0 %9191 }
 0x453   :  { %20526 = vst [vmem:[#allocation106_spill] sm:$0xff] %v17653_v37  ;;  %v17655_v19 = vpop.permute.xlu1 %9176  ;;  %v9003_v37 = vunpack.i.l.bf16 %v17331_v44 }
 0x454   :  { %9481 = vrot.lane.b32.xlu0 %v9455_v55, %s9783_s28  ;;  %v9485_v55 = vpack.i.bf16 %v9761_v35, %v9760_v17  ;;  %v8999_v35 = vunpack.i.h.bf16 %v17353_v50  ;;  %v8998_v17 = vunpack.i.l.bf16 %v17353_v50  ;;  %v5792_v50 = vsel %vm1111_vm2, %v9763_v4, %v8993_v21 }
 0x455   :  { %9466 = vrot.lane.b32.xlu1 %v20527_v26, %s9781_s26  ;;  %v17704_v47 = vsel %vm1111_vm2, %v17286_v51, %v9003_v37  ;;  %v9079_v51 = vunpack.i.h.bf16 %v17546_v5  ;;  %v9078_v37 = vunpack.i.l.bf16 %v17546_v5  ;;  %v9154_v21 = vunpack.i.h.bf16 %v17611_v43 }
 0x456   :  { %v17660_v63 = vpop.permute.xlu0 %9201 }
 0x457   :  { %20528 = vst [vmem:[#allocation140_spill] sm:$0xff] %v17660_v63  ;;  %v17662_v22 = vpop.permute.xlu1 %9186  ;;  %v17675_v63 = vld [vmem:[#allocation2 + $0x330] sm:$0xff] }
 0x458   :  { %20529 = vst [vmem:[#allocation166_spill] sm:$0xff] %v17662_v22  ;;  %9491 = vrot.lane.b32.xlu0 %v20527_v26, %s9784_s10  ;;  %v9004_v26 = vunpack.i.h.bf16 %v17331_v44  ;;  %v5794_v44 = vsel %vm1111_vm2, %v9765_v53, %v8998_v17  ;;  %v9766_v53 = vld [vmem:[#allocation2 + $0x300] sm:$0xff]  ;;  %v9767_v17 = vld [vmem:[#allocation2 + $0x308] sm:$0xff] }
 0x459   :  { %9476 = vrot.lane.b32.xlu1 %v20530_v60, %s9782_s27 }
 0x45a   :  { %v17668_v12 = vpop.permute.xlu0 %9211  ;;  %v17700_v2 = vsel %vm1111_vm2, %v17125_v42, %v9004_v26  ;;  %v9074_v42 = vunpack.i.h.bf16 %v17524_v11  ;;  %v9073_v26 = vunpack.i.l.bf16 %v17524_v11  ;;  %v9153_v11 = vunpack.i.l.bf16 %v17611_v43 }
 0x45b   :  { %v17670_v28 = vpop.permute.xlu1 %9196  ;;  %v9214_v40 = vunpack.i.h.bf16 %v17668_v12  ;;  %v9213_v5 = vunpack.i.l.bf16 %v17668_v12 }
 0x45c   :  { %20531 = vst [vmem:[#allocation60_spill] sm:$0xff] %v17670_v28  ;;  %9501 = vrot.lane.b32.xlu0 %v20530_v60, %s9785_s8  ;;  %v17683_v28 = vld [vmem:[#allocation2 + $0x340] sm:$0x3]  ;;  %v5825_v27 = vsel %vm1144_vm3, %v5793_v32, %v9074_v42 }
 0x45d   :  { %9486 = vrot.lane.b32.xlu1 %v9485_v55, %s9783_s28  ;;  %v5857_v32 = vsel %vm1177_vm5, %v5825_v27, %v9154_v21 }
 0x45e   :  { %v17687_v34 = vpop.permute.xlu0 %9221 }
 0x45f   :  { %v17689_v60 = vpop.permute.xlu1 %9206  ;;  %v9224_v56 = vunpack.i.h.bf16 %v17687_v34  ;;  %v9223_v12 = vunpack.i.l.bf16 %v17687_v34 }
 0x460   :  { %9511 = vrot.lane.b32.xlu0 %v9485_v55, %s9780_s24  ;;  %v9764_v55 = vld [vmem:[#allocation2 + $0x1d0] sm:$0xff]  ;;  %v9209_v42 = vunpack.i.h.bf16 %v17689_v60 }
 0x461   :  { %9496 = vrot.lane.b32.xlu1 %v20532_v52, %s9784_s10  ;;  %v5795_v16 = vsel %vm1111_vm2, %v9764_v55, %v8999_v35  ;;  %v9158_v35 = vunpack.i.l.bf16 %v17634_v48  ;;  %v9515_v55 = vpack.i.bf16 %v9767_v17, %v9766_v53  ;;  %v5824_v48 = vsel %vm1144_vm3, %v5792_v50, %v9073_v26 }
 0x462   :  { %v9232_v4 = vpop.permute.xlu0 %9231  ;;  %v5827_v53 = vsel %vm1144_vm3, %v5795_v16, %v9079_v51  ;;  %v5856_v50 = vsel %vm1177_vm5, %v5824_v48, %v9153_v11 }
 0x463   :  { %v9217_v20 = vpop.permute.xlu1 %9216  ;;  %v5859_v43 = vsel %vm1177_vm5, %v5827_v53, %v9159_v6  ;;  %v9208_v6 = vunpack.i.l.bf16 %v17689_v60  ;;  %v9234_v26 = vunpack.i.h.bf16 %v9232_v4  ;;  %v9233_v51 = vunpack.i.l.bf16 %v9232_v4  ;;  %v20534_v4 = vld [vmem:[#allocation100_spill] sm:$0xff] }
 0x464   :  { %9521 = vrot.lane.b32.xlu0 %v20532_v52, %s9781_s26  ;;  %v5826_v52 = vsel %vm1144_vm3, %v5794_v44, %v9078_v37  ;;  %v5891_v16 = vsel %vm1210_vm6, %v5859_v43, %v9214_v40  ;;  %v9219_v37 = vunpack.i.h.bf16 %v9217_v20 }
 0x465   :  { %9506 = vrot.lane.b32.xlu1 %v20533_v61, %s9785_s8  ;;  %v5858_v22 = vsel %vm1177_vm5, %v5826_v52, %v9158_v35  ;;  %v9218_v35 = vunpack.i.l.bf16 %v9217_v20  ;;  %v5889_v20 = vsel %vm1210_vm6, %v5857_v32, %v9209_v42 }
 0x466   :  { %v9242_v15 = vpop.permute.xlu0 %9241  ;;  %v5890_v44 = vsel %vm1210_vm6, %v5858_v22, %v9213_v5  ;;  %v5923_v22 = vsel %vm1243_vm7, %v5891_v16, %v9224_v56 }
 0x467   :  { %v9227_v17 = vpop.permute.xlu1 %9226  ;;  %v9243_v52 = vunpack.i.l.bf16 %v9242_v15  ;;  %v5922_v27 = vsel %vm1243_vm7, %v5890_v44, %v9223_v12  ;;  %v5955_v12 = vsel %vm1276_vm8, %v5923_v22, %v9234_v26 }
 0x468   :  { %9531 = vrot.lane.b32.xlu0 %v20533_v61, %s9782_s27  ;;  %v9244_v61 = vunpack.i.h.bf16 %v9242_v15  ;;  %v9229_v21 = vunpack.i.h.bf16 %v9227_v17  ;;  %v9228_v40 = vunpack.i.l.bf16 %v9227_v17  ;;  %v5888_v15 = vsel %vm1210_vm6, %v5856_v50, %v9208_v6 }
 0x469   :  { %9516 = vrot.lane.b32.xlu1 %v9515_v55, %s9780_s24  ;;  %v5954_v43 = vsel %vm1276_vm8, %v5922_v27, %v9233_v51  ;;  %v5920_v17 = vsel %vm1243_vm7, %v5888_v15, %v9218_v35  ;;  %v20535_v35 = vld [vmem:[#allocation149_spill] sm:$0xff]  ;;  %v20538_v15 = vrot.slane %v17683_v28, 1 }
 0x46a   :  { %v9252_v34 = vpop.permute.xlu0 %9251  ;;  %v5986_v44 = vsel %vm1309_vm9, %v5954_v43, %v9243_v52  ;;  %v5987_v16 = vsel %vm1309_vm9, %v5955_v12, %v9244_v61  ;;  %v9014_v61 = vunpack.i.h.bf16 %v17357_v33 }
 0x46b   :  { %v9237_v11 = vpop.permute.xlu1 %9236  ;;  %v9254_v5 = vunpack.i.h.bf16 %v9252_v34  ;;  %v9253_v48 = vunpack.i.l.bf16 %v9252_v34 }
 0x46c   :  { %9541 = vrot.lane.b32.xlu0 %v9515_v55, %s9783_s28  ;;  %v9239_v53 = vunpack.i.h.bf16 %v9237_v11  ;;  %v9238_v60 = vunpack.i.l.bf16 %v9237_v11  ;;  %v5921_v55 = vsel %vm1243_vm7, %v5889_v20, %v9219_v37  ;;  %v5952_v11 = vsel %vm1276_vm8, %v5920_v17, %v9228_v40 }
 0x46d   :  { %9526 = vrot.lane.b32.xlu1 %v20534_v4, %s9781_s26  ;;  %v5953_v32 = vsel %vm1276_vm8, %v5921_v55, %v9229_v21  ;;  %v6018_v6 = vsel %vm1342_vm10, %v5986_v44, %v9253_v48  ;;  %v6019_v26 = vsel %vm1342_vm10, %v5987_v16, %v9254_v5  ;;  %v9768_v48 = vld [vmem:[#allocation2 + $0x318] sm:$0xff]  ;;  %v9769_v5 = vld [vmem:[#allocation2 + $0x320] sm:$0xff]  ;;  %v20540_v17 = vunpack.i.h.bf16 %v17379_v8 }
 0x46e   :  { %v17753_v56 = vpop.permute.xlu0 %9261  ;;  %v5984_v51 = vsel %vm1309_vm9, %v5952_v11, %v9238_v60  ;;  %v5985_v37 = vsel %vm1309_vm9, %v5953_v32, %v9239_v53  ;;  %v20536_v60 = vrot.slane %v17681_v31, 1  ;;  %v20537_v53 = vrot.slane %v17675_v63, 1 }
 0x46f   :  { %v9247_v34 = vpop.permute.xlu1 %9246  ;;  %v5799_v55 = vsel %vm1111_vm2, %v17257_v14, %v20540_v17  ;;  %v20541_v44 = vunpack.i.l.bf16 %v17379_v8  ;;  %v5009_v11 = vrot.slane %v17683_v28, 2  ;;  %v9013_v32 = vunpack.i.l.bf16 %v17357_v33 }
 0x470   :  { %v9249_v50 = vunpack.i.h.bf16 %v9247_v34  ;;  %v9248_v42 = vunpack.i.l.bf16 %v9247_v34  ;;  %9551 = vrot.lane.b32.xlu0 %v20534_v4, %s9784_s10  ;;  %v9545_v4 = vpack.i.bf16 %v9769_v5, %v9768_v48  ;;  %v5003_v20 = vsel %vm123_vm0, %v20537_v53, %v20536_v60 }
 0x471   :  { %9536 = vrot.lane.b32.xlu1 %v20535_v35, %s9782_s27  ;;  %v20539_v43 = vmov %v20536_v60  ;;  %v5798_v16 = vsel %vm1111_vm2, %v17259_v38, %v20541_v44  ;;  %v6065_v34 = vpack.c.bf16 %v6019_v26, %v6018_v6  ;;  %v17805_v14 = vpack.i.bf16 %v17681_v31, %v17675_v63 }
 0x472   :  { %v6016_v52 = vsel %vm1342_vm10, %v5984_v51, %v9248_v42  ;;  %v6017_v27 = vsel %vm1342_vm10, %v5985_v37, %v9249_v50  ;;  %v17772_v22 = vpop.permute.xlu0 %9271  ;;  %v5005_v12 = vsel %vm123_vm0, %v20539_v43, %v20538_v15  ;;  %v20542_v8 = vrot.slane %v17681_v31, 2  ;;  %v20545_v15 = vld [vmem:[#allocation126_spill] sm:$0xff] }
 0x473   :  { %v6064_v21 = vpack.c.bf16 %v6017_v27, %v6016_v52  ;;  %v17774_v40 = vpop.permute.xlu1 %9256  ;;  %v17807_v38 = vpack.i.bf16 %v5005_v12, %v5003_v20  ;;  %v20543_v28 = vrot.slane %v17675_v63, 2  ;;  %v9084_v6 = vunpack.i.h.bf16 %v17534_v54  ;;  %v17820_v52 = vld [vmem:[#allocation2 + $0x348] sm:$0xff]  ;;  %v17822_v27 = vld [vmem:[#allocation2 + $0x350] sm:$0xff] }
 0x474   :  { %9561 = vrot.lane.b32.xlu0 %v20535_v35, %s9785_s8  ;;  %v9083_v26 = vunpack.i.l.bf16 %v17534_v54  ;;  %v9089_v51 = vunpack.i.h.bf16 %v17560_v45  ;;  %v9088_v37 = vunpack.i.l.bf16 %v17560_v45  ;;  %v9169_v63 = vunpack.i.h.bf16 %v17642_v1 }
 0x475   :  { %9546 = vrot.lane.b32.xlu1 %v9545_v4, %s9783_s28  ;;  %7027 = vmatprep.mubr.msk.bf16.mxu1 %vm2795_vm11, %v6064_v21  ;;  %v17814_v42 = vsel %vm204_vm1, %v20543_v28, %v20542_v8  ;;  %v17824_v21 = vld [vmem:[#allocation2 + $0x358] sm:$0x3]  ;;  %v9168_v48 = vunpack.i.l.bf16 %v17642_v1  ;;  %v20544_v5 = vmov %v20542_v8  ;;  %v9164_v45 = vunpack.i.h.bf16 %v17624_v57 }
 0x476   :  { %v17800_v50 = vpop.permute.xlu0 %9281  ;;  %7028 = vmatmul.mubr.msk.bf16.gmra.mrb[32].mxu1 %vm2795_vm11, %v6065_v34  ;;  %v17832_v54 = vsel %vm204_vm1, %v20544_v5, %v5009_v11  ;;  %v9163_v60 = vunpack.i.l.bf16 %v17624_v57  ;;  %v9264_v53 = vunpack.i.h.bf16 %v17753_v56  ;;  %v9263_v20 = vunpack.i.l.bf16 %v17753_v56 }
 0x477   :  { %v9267_v35 = vpop.permute.xlu1 %9266  ;;  %v5015_v1 = vrot.slane %v17822_v27, 1  ;;  %v5014_v31 = vrot.slane %v17820_v52, 1  ;;  %v5017_v12 = vrot.slane %v17824_v21, 1  ;;  %v5828_v17 = vsel %vm1144_vm3, %v17704_v47, %v9083_v26 }
 0x478   :  { %9571 = vrot.lane.b32.xlu0 %v9545_v4, %s9780_s24  ;;  %v5020_v4 = vrot.slane %v17822_v27, 2  ;;  %v5829_v57 = vsel %vm1144_vm3, %v17700_v2, %v9084_v6  ;;  %v5830_v56 = vsel %vm1144_vm3, %v5798_v16, %v9088_v37  ;;  %v5831_v44 = vsel %vm1144_vm3, %v5799_v55, %v9089_v51  ;;  %v20546_v6 = vld [vmem:[#allocation128_spill] sm:$0xff] }
 0x479   :  { %9556 = vrot.lane.b32.xlu1 %v20545_v15, %s9784_s10  ;;  %v5862_v11 = vsel %vm1177_vm5, %v5830_v56, %v9168_v48  ;;  %v5863_v8 = vsel %vm1177_vm5, %v5831_v44, %v9169_v63  ;;  %v9274_v28 = vunpack.i.h.bf16 %v17772_v22  ;;  %v9273_v5 = vunpack.i.l.bf16 %v17772_v22 }
 0x47a   :  { %v9292_v43 = vpop.permute.xlu0 %9291  ;;  %v5860_v47 = vsel %vm1177_vm5, %v5828_v17, %v9163_v60  ;;  %v5861_v2 = vsel %vm1177_vm5, %v5829_v57, %v9164_v45  ;;  %v5894_v16 = vsel %vm1210_vm6, %v5862_v11, %v9263_v20  ;;  %v5895_v55 = vsel %vm1210_vm6, %v5863_v8, %v9264_v53 }
 0x47b   :  { %v9277_v34 = vpop.permute.xlu1 %9276  ;;  %v9259_v26 = vunpack.i.h.bf16 %v17774_v40  ;;  %v9258_v51 = vunpack.i.l.bf16 %v17774_v40  ;;  %v9284_v22 = vunpack.i.h.bf16 %v17800_v50  ;;  %v9283_v37 = vunpack.i.l.bf16 %v17800_v50 }
 0x47c   :  { %9581 = vrot.lane.b32.xlu0 %v20545_v15, %s9781_s26  ;;  %v9269_v48 = vunpack.i.h.bf16 %v9267_v35  ;;  %v9268_v60 = vunpack.i.l.bf16 %v9267_v35  ;;  %v9294_v15 = vunpack.i.h.bf16 %v9292_v43  ;;  %v9293_v45 = vunpack.i.l.bf16 %v9292_v43 }
 0x47d   :  { %9566 = vrot.lane.b32.xlu1 %v20546_v6, %s9785_s8  ;;  %v5926_v20 = vsel %vm1243_vm7, %v5894_v16, %v9273_v5  ;;  %v5927_v53 = vsel %vm1243_vm7, %v5895_v55, %v9274_v28  ;;  %v9279_v57 = vunpack.i.h.bf16 %v9277_v34  ;;  %v9278_v56 = vunpack.i.l.bf16 %v9277_v34 }
 0x47e   :  { %v9302_v63 = vpop.permute.xlu0 %9301  ;;  %v5893_v50 = vsel %vm1210_vm6, %v5861_v2, %v9259_v26  ;;  %v5892_v35 = vsel %vm1210_vm6, %v5860_v47, %v9258_v51  ;;  %v5958_v43 = vsel %vm1276_vm8, %v5926_v20, %v9283_v37  ;;  %v5959_v28 = vsel %vm1276_vm8, %v5927_v53, %v9284_v22 }
 0x47f   :  { %v9287_v17 = vpop.permute.xlu1 %9286  ;;  %v9304_v40 = vunpack.i.h.bf16 %v9302_v63  ;;  %v9303_v44 = vunpack.i.l.bf16 %v9302_v63  ;;  %v5924_v34 = vsel %vm1243_vm7, %v5892_v35, %v9268_v60  ;;  %v5925_v16 = vsel %vm1243_vm7, %v5893_v50, %v9269_v48 }
 0x480   :  { %9591 = vrot.lane.b32.xlu0 %v20546_v6, %s9782_s27  ;;  %v9289_v11 = vunpack.i.h.bf16 %v9287_v17  ;;  %v9288_v8 = vunpack.i.l.bf16 %v9287_v17  ;;  %v5990_v55 = vsel %vm1309_vm9, %v5958_v43, %v9293_v45  ;;  %v5991_v6 = vsel %vm1309_vm9, %v5959_v28, %v9294_v15 }
 0x481   :  { %9576 = vrot.lane.b32.xlu1 %v17805_v14, %s9780_s24  ;;  %v5956_v17 = vsel %vm1276_vm8, %v5924_v34, %v9278_v56  ;;  %v5957_v2 = vsel %vm1276_vm8, %v5925_v16, %v9279_v57  ;;  %v6022_v51 = vsel %vm1342_vm10, %v5990_v55, %v9303_v44  ;;  %v6023_v22 = vsel %vm1342_vm10, %v5991_v6, %v9304_v40 }
 0x482   :  { %v17876_v5 = vpop.permute.xlu0 %9311  ;;  %v5988_v37 = vsel %vm1309_vm9, %v5956_v17, %v9288_v8  ;;  %v5989_v48 = vsel %vm1309_vm9, %v5957_v2, %v9289_v11  ;;  %v5019_v20 = vrot.slane %v17820_v52, 2  ;;  %v5801_v53 = vsel %vm1111_vm2, %v17408_v10, %v9014_v61 }
 0x483   :  { %v9297_v63 = vpop.permute.xlu1 %9296  ;;  %v9595_v40 = vpack.i.bf16 %v17832_v54, %v17814_v42  ;;  %v5800_v44 = vsel %vm1111_vm2, %v17410_v29, %v9013_v32  ;;  %v9024_v11 = vunpack.i.h.bf16 %v17383_v23  ;;  %v9023_v8 = vunpack.i.l.bf16 %v17383_v23 }
 0x484   :  { %v9299_v47 = vunpack.i.h.bf16 %v9297_v63  ;;  %v9298_v26 = vunpack.i.l.bf16 %v9297_v63  ;;  %9601 = vrot.lane.b32.xlu0 %v17805_v14, %s9783_s28  ;;  %v5022_v14 = vrot.slane %v17824_v21, 2  ;;  %v6067_v50 = vpack.c.bf16 %v6023_v22, %v6022_v51 }
 0x485   :  { %9586 = vrot.lane.b32.xlu1 %v17807_v38, %s9781_s26  ;;  %v9019_v10 = vunpack.i.h.bf16 %v17416_v59  ;;  %v9605_v33 = vpack.i.bf16 %v17822_v27, %v17820_v52  ;;  %v5016_v29 = vsel %vm123_vm0, %v5014_v31, %v5015_v1  ;;  %v5018_v61 = vsel %vm123_vm0, %v5015_v1, %v5017_v12 }
 0x486   :  { %v6020_v60 = vsel %vm1342_vm10, %v5988_v37, %v9298_v26  ;;  %v6021_v15 = vsel %vm1342_vm10, %v5989_v48, %v9299_v47  ;;  %v17894_v45 = vpop.permute.xlu0 %9321  ;;  %v9018_v32 = vunpack.i.l.bf16 %v17416_v59  ;;  %v5021_v42 = vsel %vm204_vm1, %v5019_v20, %v5020_v4 }
 0x487   :  { %v6066_v57 = vpack.c.bf16 %v6021_v15, %v6020_v60  ;;  %v17902_v56 = vpop.permute.xlu1 %9306  ;;  %v5023_v52 = vsel %vm204_vm1, %v5020_v4, %v5022_v14  ;;  %v9094_v54 = vunpack.i.h.bf16 %v17544_v3  ;;  %v9093_v21 = vunpack.i.l.bf16 %v17544_v3 }
 0x488   :  { %9611 = vrot.lane.b32.xlu0 %v17807_v38, %s9784_s10  ;;  %v9099_v31 = vunpack.i.h.bf16 %v17575_v62  ;;  %v9098_v1 = vunpack.i.l.bf16 %v17575_v62  ;;  %v9034_v12 = vunpack.i.h.bf16 %v17414_v58  ;;  %v9179_v35 = vunpack.i.h.bf16 %v17655_v19 }
 0x489   :  { %9596 = vrot.lane.b32.xlu1 %v9595_v40, %s9782_s27  ;;  %7031 = vmatprep.mubr.msk.bf16.mxu1 %vm2795_vm11, %v6066_v57  ;;  %v9178_v43 = vunpack.i.l.bf16 %v17655_v19  ;;  %v9615_v27 = vpack.i.bf16 %v5018_v61, %v5016_v29  ;;  %v9174_v4 = vunpack.i.h.bf16 %v17632_v41  ;;  %v9173_v28 = vunpack.i.l.bf16 %v17632_v41 }
 0x48a   :  { %v9332_v38 = vpop.permute.xlu0 %9331  ;;  %7032 = vmatmul.mubr.msk.bf16.gmra.mrb[36].mxu1 %vm2795_vm11, %v6067_v50  ;;  %v9314_v3 = vunpack.i.h.bf16 %v17876_v5  ;;  %v9313_v34 = vunpack.i.l.bf16 %v17876_v5  ;;  %v9033_v62 = vunpack.i.l.bf16 %v17414_v58  ;;  %v5803_v16 = vsel %vm1111_vm2, %v17373_v39, %v9019_v10 }
 0x48b   :  { %v9317_v59 = vpop.permute.xlu1 %9316  ;;  %v5802_v19 = vsel %vm1111_vm2, %v17375_v7, %v9018_v32  ;;  %v9625_v6 = vpack.i.bf16 %v5023_v52, %v5021_v42  ;;  %v5832_v63 = vsel %vm1144_vm3, %v5800_v44, %v9093_v21  ;;  %v5833_v41 = vsel %vm1144_vm3, %v5801_v53, %v9094_v54 }
 0x48c   :  { %9621 = vrot.lane.b32.xlu0 %v9595_v40, %s9785_s8  ;;  %v5834_v17 = vsel %vm1144_vm3, %v5802_v19, %v9098_v1  ;;  %v5835_v5 = vsel %vm1144_vm3, %v5803_v16, %v9099_v31  ;;  %v9324_v39 = vunpack.i.h.bf16 %v17894_v45  ;;  %v9323_v51 = vunpack.i.l.bf16 %v17894_v45 }
 0x48d   :  { %9606 = vrot.lane.b32.xlu1 %v9605_v33, %s9783_s28  ;;  %v5866_v47 = vsel %vm1177_vm5, %v5834_v17, %v9178_v43  ;;  %v5867_v26 = vsel %vm1177_vm5, %v5835_v5, %v9179_v35  ;;  %v5864_v7 = vsel %vm1177_vm5, %v5832_v63, %v9173_v28  ;;  %v5865_v22 = vsel %vm1177_vm5, %v5833_v41, %v9174_v4 }
 0x48e   :  { %v9342_v55 = vpop.permute.xlu0 %9341  ;;  %v5898_v37 = vsel %vm1210_vm6, %v5866_v47, %v9313_v34  ;;  %v5899_v48 = vsel %vm1210_vm6, %v5867_v26, %v9314_v3  ;;  %v9309_v60 = vunpack.i.h.bf16 %v17902_v56  ;;  %v9308_v15 = vunpack.i.l.bf16 %v17902_v56 }
 0x48f   :  { %v9327_v2 = vpop.permute.xlu1 %9326  ;;  %v9334_v20 = vunpack.i.h.bf16 %v9332_v38  ;;  %v9333_v14 = vunpack.i.l.bf16 %v9332_v38  ;;  %v9319_v57 = vunpack.i.h.bf16 %v9317_v59  ;;  %v9318_v40 = vunpack.i.l.bf16 %v9317_v59 }
 0x490   :  { %v9344_v45 = vunpack.i.h.bf16 %v9342_v55  ;;  %v9343_v44 = vunpack.i.l.bf16 %v9342_v55  ;;  %v5930_v10 = vsel %vm1243_vm7, %v5898_v37, %v9323_v51  ;;  %v5931_v33 = vsel %vm1243_vm7, %v5899_v48, %v9324_v39  ;;  %v9770_v51 = vld [vmem:[#allocation2 + $0x248] sm:$0xff] }
 0x491   :  { %9616 = vrot.lane.b32.xlu1 %v9615_v27, %s9784_s10  ;;  %v9329_v29 = vunpack.i.h.bf16 %v9327_v2  ;;  %v9328_v61 = vunpack.i.l.bf16 %v9327_v2  ;;  %v5897_v56 = vsel %vm1210_vm6, %v5865_v22, %v9309_v60  ;;  %v5896_v38 = vsel %vm1210_vm6, %v5864_v7, %v9308_v15 }
 0x492   :  { %v9352_v53 = vpop.permute.xlu0 %9351  ;;  %v5962_v21 = vsel %vm1276_vm8, %v5930_v10, %v9333_v14  ;;  %v5963_v31 = vsel %vm1276_vm8, %v5931_v33, %v9334_v20  ;;  %v5928_v59 = vsel %vm1243_vm7, %v5896_v38, %v9318_v40  ;;  %v5929_v35 = vsel %vm1243_vm7, %v5897_v56, %v9319_v57  ;;  %v20549_v40 = vld [vmem:[#allocation160_spill] sm:$0xff] }
 0x493   :  { %v9337_v50 = vpop.permute.xlu1 %9336  ;;  %v9354_v32 = vunpack.i.h.bf16 %v9352_v53  ;;  %v9353_v42 = vunpack.i.l.bf16 %v9352_v53  ;;  %v5994_v43 = vsel %vm1309_vm9, %v5962_v21, %v9343_v44  ;;  %v5995_v27 = vsel %vm1309_vm9, %v5963_v31, %v9344_v45  ;;  %v20548_v53 = vld [vmem:[#allocation166_spill] sm:$0xff]  ;;  %v20550_v33 = vld [vmem:[#allocation64_spill] sm:$0xff] }
 0x494   :  { %v9339_v52 = vunpack.i.h.bf16 %v9337_v50  ;;  %v9338_v54 = vunpack.i.l.bf16 %v9337_v50  ;;  %v5960_v28 = vsel %vm1276_vm8, %v5928_v59, %v9328_v61  ;;  %v5961_v3 = vsel %vm1276_vm8, %v5929_v35, %v9329_v29 }
 0x495   :  { %9626 = vrot.lane.b32.xlu1 %v9625_v6, %s9785_s8  ;;  %v6026_v19 = vsel %vm1342_vm10, %v5994_v43, %v9353_v42  ;;  %v6027_v55 = vsel %vm1342_vm10, %v5995_v27, %v9354_v32  ;;  %v9029_v41 = vunpack.i.h.bf16 %v17448_v9  ;;  %v9028_v17 = vunpack.i.l.bf16 %v17448_v9 }
 0x496   :  { %v17977_v1 = vpop.permute.xlu0 %9361  ;;  %v5992_v6 = vsel %vm1309_vm9, %v5960_v28, %v9338_v54  ;;  %v5993_v63 = vsel %vm1309_vm9, %v5961_v3, %v9339_v52  ;;  %v5805_v7 = vsel %vm1111_vm2, %v9770_v51, %v9024_v11  ;;  %v5804_v22 = vsel %vm1111_vm2, %v17520_v0, %v9023_v8  ;;  %v20551_v52 = vld [vmem:[#allocation76_spill] sm:$0xff] }
 0x497   :  { %v9347_v4 = vpop.permute.xlu1 %9346  ;;  %v6069_v37 = vpack.c.bf16 %v6027_v55, %v6026_v19  ;;  %v18006_v9 = vsel %vm1111_vm2, %v17565_v36, %v9034_v12  ;;  %v18012_v48 = vsel %vm1111_vm2, %v17567_v46, %v9033_v62  ;;  %v9044_v11 = vunpack.i.h.bf16 %v17433_v18 }
 0x498   :  { %v9349_v34 = vunpack.i.h.bf16 %v9347_v4  ;;  %v9348_v16 = vunpack.i.l.bf16 %v9347_v4  ;;  %v9043_v23 = vunpack.i.l.bf16 %v17433_v18  ;;  %v5807_v0 = vsel %vm1111_vm2, %v17502_v24, %v9029_v41  ;;  %v20547_v24 = vld [vmem:[#allocation118_spill] sm:$0xff] }
 0x499   :  { %v5806_v8 = vsel %vm1111_vm2, %v17504_v25, %v9028_v17  ;;  %v9104_v36 = vunpack.i.h.bf16 %v17558_v13  ;;  %v9103_v58 = vunpack.i.l.bf16 %v17558_v13  ;;  %v9054_v46 = vunpack.i.h.bf16 %v17472_v49 }
 0x49a   :  { %v6024_v5 = vsel %vm1342_vm10, %v5992_v6, %v9348_v16  ;;  %v6025_v2 = vsel %vm1342_vm10, %v5993_v63, %v9349_v34  ;;  %v9372_v47 = vpop.permute.xlu0 %9371  ;;  %v9053_v62 = vunpack.i.l.bf16 %v17472_v49  ;;  %v9109_v60 = vunpack.i.h.bf16 %v17584_v30 }
 0x49b   :  { %v6068_v26 = vpack.c.bf16 %v6025_v2, %v6024_v5  ;;  %v17993_v39 = vpop.permute.xlu1 %9356  ;;  %v9108_v15 = vunpack.i.l.bf16 %v17584_v30  ;;  %v9039_v14 = vunpack.i.h.bf16 %v20547_v24  ;;  %v9038_v25 = vunpack.i.l.bf16 %v20547_v24 }
 0x49c   :  { %v9189_v57 = vunpack.i.h.bf16 %v20548_v53  ;;  %v9188_v13 = vunpack.i.l.bf16 %v20548_v53  ;;  %v9184_v45 = vunpack.i.h.bf16 %v20549_v40  ;;  %v9183_v44 = vunpack.i.l.bf16 %v20549_v40 }
 0x49d   :  { %7035 = vmatprep.mubr.msk.bf16.mxu1 %vm2795_vm11, %v6068_v26  ;;  %v9364_v50 = vunpack.i.h.bf16 %v17977_v1  ;;  %v9363_v10 = vunpack.i.l.bf16 %v17977_v1  ;;  %v9049_v29 = vunpack.i.h.bf16 %v20550_v33  ;;  %v9048_v30 = vunpack.i.l.bf16 %v20550_v33  ;;  %v20561_v33 = vld [vmem:[#allocation155_spill] sm:$0xff] }
 0x49e   :  { %v9382_v12 = vpop.permute.xlu0 %9381  ;;  %7036 = vmatmul.mubr.msk.bf16.gmra.mrb[40].mxu1 %vm2795_vm11, %v6069_v37  ;;  %v5836_v61 = vsel %vm1144_vm3, %v5804_v22, %v9103_v58  ;;  %v5837_v32 = vsel %vm1144_vm3, %v5805_v7, %v9104_v36  ;;  %v9114_v54 = vunpack.i.h.bf16 %v20551_v52  ;;  %v9113_v56 = vunpack.i.l.bf16 %v20551_v52  ;;  %v20563_v52 = vld [vmem:[#allocation106_spill] sm:$0xff] }
 0x49f   :  { %v9367_v20 = vpop.permute.xlu1 %9366  ;;  %v5838_v38 = vsel %vm1144_vm3, %v5806_v8, %v9108_v15  ;;  %v5839_v21 = vsel %vm1144_vm3, %v5807_v0, %v9109_v60  ;;  %v9374_v35 = vunpack.i.h.bf16 %v9372_v47  ;;  %v9373_v43 = vunpack.i.l.bf16 %v9372_v47 }
 0x4a0   :  { %v5870_v1 = vsel %vm1177_vm5, %v5838_v38, %v9188_v13  ;;  %v5871_v59 = vsel %vm1177_vm5, %v5839_v21, %v9189_v57  ;;  %v5868_v27 = vsel %vm1177_vm5, %v5836_v61, %v9183_v44  ;;  %v5869_v4 = vsel %vm1177_vm5, %v5837_v32, %v9184_v45  ;;  %v20552_v38 = vld [vmem:[#allocation84_spill] sm:$0xff] }
 0x4a1   :  { %v5902_v28 = vsel %vm1210_vm6, %v5870_v1, %v9363_v10  ;;  %v5903_v3 = vsel %vm1210_vm6, %v5871_v59, %v9364_v50  ;;  %v9359_v34 = vunpack.i.h.bf16 %v17993_v39  ;;  %v9358_v16 = vunpack.i.l.bf16 %v17993_v39 }
 0x4a2   :  { %v9392_v42 = vpop.permute.xlu0 %9391  ;;  %v9384_v19 = vunpack.i.h.bf16 %v9382_v12  ;;  %v9383_v55 = vunpack.i.l.bf16 %v9382_v12  ;;  %v9369_v63 = vunpack.i.h.bf16 %v9367_v20  ;;  %v9368_v41 = vunpack.i.l.bf16 %v9367_v20 }
 0x4a3   :  { %v9377_v31 = vpop.permute.xlu1 %9376  ;;  %v9394_v17 = vunpack.i.h.bf16 %v9392_v42  ;;  %v9393_v5 = vunpack.i.l.bf16 %v9392_v42  ;;  %v5934_v47 = vsel %vm1243_vm7, %v5902_v28, %v9373_v43  ;;  %v5935_v26 = vsel %vm1243_vm7, %v5903_v3, %v9374_v35 }
 0x4a4   :  { %v9379_v51 = vunpack.i.h.bf16 %v9377_v31  ;;  %v9378_v7 = vunpack.i.l.bf16 %v9377_v31  ;;  %v5901_v39 = vsel %vm1210_vm6, %v5869_v4, %v9359_v34  ;;  %v5900_v36 = vsel %vm1210_vm6, %v5868_v27, %v9358_v16  ;;  %v20553_v31 = vld [vmem:[#allocation108_spill] sm:$0xff]  ;;  %v20554_v27 = vld [vmem:[#allocation59_spill] sm:$0xff] }
 0x4a5   :  { %v5966_v58 = vsel %vm1276_vm8, %v5934_v47, %v9383_v55  ;;  %v5967_v12 = vsel %vm1276_vm8, %v5935_v26, %v9384_v19  ;;  %v5932_v15 = vsel %vm1243_vm7, %v5900_v36, %v9368_v41  ;;  %v5933_v20 = vsel %vm1243_vm7, %v5901_v39, %v9369_v63  ;;  %v20557_v16 = vld [vmem:[#allocation112_spill] sm:$0xff] }
 0x4a6   :  { %v9402_v6 = vpop.permute.xlu0 %9401  ;;  %v5998_v53 = vsel %vm1309_vm9, %v5966_v58, %v9393_v5  ;;  %v5999_v57 = vsel %vm1309_vm9, %v5967_v12, %v9394_v17  ;;  %v5964_v40 = vsel %vm1276_vm8, %v5932_v15, %v9378_v7  ;;  %v5965_v45 = vsel %vm1276_vm8, %v5933_v20, %v9379_v51  ;;  %v20562_v17 = vld [vmem:[#allocation60_spill] sm:$0xff]  ;;  %v20564_v58 = vld [vmem:[#allocation67_spill] sm:$0xff] }
 0x4a7   :  { %v9387_v2 = vpop.permute.xlu1 %9386  ;;  %v9404_v22 = vunpack.i.h.bf16 %v9402_v6  ;;  %v9403_v37 = vunpack.i.l.bf16 %v9402_v6  ;;  %v18074_v21 = vsel %vm1111_vm2, %v20552_v38, %v9044_v11  ;;  %v18080_v1 = vsel %vm1111_vm2, %v20553_v31, %v9043_v23  ;;  %v20555_v11 = vld [vmem:[#allocation131_spill] sm:$0xff]  ;;  %v20556_v23 = vld [vmem:[#allocation153_spill] sm:$0xff]  ;;  %v20560_v6 = vld [vmem:[#allocation70_spill] sm:$0xff] }
 0x4a8   :  { %v9389_v0 = vunpack.i.h.bf16 %v9387_v2  ;;  %v9388_v8 = vunpack.i.l.bf16 %v9387_v2  ;;  %v18088_v4 = vsel %vm1111_vm2, %v20554_v27, %v9054_v46  ;;  %v18094_v18 = vsel %vm1111_vm2, %v20555_v11, %v9053_v62  ;;  %v20558_v46 = vld [vmem:[#allocation97_spill] sm:$0xff]  ;;  %v20559_v62 = vld [vmem:[#allocation8_spill] sm:$0xff] }
 0x4a9   :  { %v6030_v10 = vsel %vm1342_vm10, %v5998_v53, %v9403_v37  ;;  %v6031_v61 = vsel %vm1342_vm10, %v5999_v57, %v9404_v22  ;;  %v5811_v28 = vsel %vm1111_vm2, %v20556_v23, %v9039_v14  ;;  %v5810_v19 = vsel %vm1111_vm2, %v20557_v16, %v9038_v25 }
 0x4aa   :  { %v18058_v60 = vpop.permute.xlu0 %9411  ;;  %v5996_v32 = vsel %vm1309_vm9, %v5964_v40, %v9388_v8  ;;  %v5997_v42 = vsel %vm1309_vm9, %v5965_v45, %v9389_v0  ;;  %v18108_v49 = vsel %vm1111_vm2, %v20558_v46, %v9049_v29  ;;  %v18114_v55 = vsel %vm1111_vm2, %v20559_v62, %v9048_v30 }
 0x4ab   :  { %v9397_v13 = vpop.permute.xlu1 %9396  ;;  %v6071_v14 = vpack.c.bf16 %v6031_v61, %v6030_v10  ;;  %v5840_v24 = vsel %vm1144_vm3, %v18012_v48, %v9113_v56  ;;  %v5841_v25 = vsel %vm1144_vm3, %v18006_v9, %v9114_v54  ;;  %v9119_v29 = vunpack.i.h.bf16 %v20560_v6 }
 0x4ac   :  { %v9399_v44 = vunpack.i.h.bf16 %v9397_v13  ;;  %v9398_v50 = vunpack.i.l.bf16 %v9397_v13  ;;  %v9118_v63 = vunpack.i.l.bf16 %v20560_v6  ;;  %v9124_v30 = vunpack.i.h.bf16 %v20561_v33 }
 0x4ad   :  { %v9123_v41 = vunpack.i.l.bf16 %v20561_v33  ;;  %v9199_v5 = vunpack.i.h.bf16 %v20562_v17  ;;  %v9198_v2 = vunpack.i.l.bf16 %v20562_v17  ;;  %v9194_v56 = vunpack.i.h.bf16 %v20563_v52  ;;  %v20566_v17 = vld [vmem:[#allocation9_spill] sm:$0xff] }
 0x4ae   :  { %v6028_v59 = vsel %vm1342_vm10, %v5996_v32, %v9398_v50  ;;  %v6029_v35 = vsel %vm1342_vm10, %v5997_v42, %v9399_v44  ;;  %v9422_v43 = vpop.permute.xlu0 %9421  ;;  %v9193_v9 = vunpack.i.l.bf16 %v20563_v52  ;;  %v9414_v54 = vunpack.i.h.bf16 %v18058_v60 }
 0x4af   :  { %v6070_v3 = vpack.c.bf16 %v6029_v35, %v6028_v59  ;;  %v9407_v34 = vpop.permute.xlu1 %9406  ;;  %v9413_v47 = vunpack.i.l.bf16 %v18058_v60  ;;  %v9424_v51 = vunpack.i.h.bf16 %v9422_v43  ;;  %v9423_v7 = vunpack.i.l.bf16 %v9422_v43  ;;  %v18144_v60 = vld [vmem:[%s18752_s4] ss:$0 sm:$0xff] }
 0x4b0   :  { %v9409_v22 = vunpack.i.h.bf16 %v9407_v34  ;;  %v9408_v37 = vunpack.i.l.bf16 %v9407_v34  ;;  %v5842_v0 = vsel %vm1144_vm3, %v5810_v19, %v9118_v63  ;;  %v5843_v8 = vsel %vm1144_vm3, %v5811_v28, %v9119_v29 }
 0x4b1   :  { %7039 = vmatprep.mubr.msk.bf16.mxu1 %vm2795_vm11, %v6070_v3  ;;  %v9129_v12 = vunpack.i.h.bf16 %v20564_v58  ;;  %v5874_v15 = vsel %vm1177_vm5, %v5842_v0, %v9198_v2  ;;  %v5875_v20 = vsel %vm1177_vm5, %v5843_v8, %v9199_v5  ;;  %v5872_v13 = vsel %vm1177_vm5, %v5840_v24, %v9193_v9  ;;  %v20567_v9 = vld [vmem:[#allocation4_spill] sm:$0xff] }
 0x4b2   :  { %v9432_v48 = vpop.permute.xlu0 %9431  ;;  %7040 = vmatmul.mubr.msk.bf16.gmra.mrb[44].mxu1 %vm2795_vm11, %v6071_v14  ;;  %v5873_v40 = vsel %vm1177_vm5, %v5841_v25, %v9194_v56  ;;  %v5906_v45 = vsel %vm1210_vm6, %v5874_v15, %v9413_v47  ;;  %v5907_v44 = vsel %vm1210_vm6, %v5875_v20, %v9414_v54  ;;  %v5904_v42 = vsel %vm1210_vm6, %v5872_v13, %v9408_v37  ;;  %v20565_v14 = vld [vmem:[#allocation3_spill] sm:$0xff] }
 0x4b3   :  { %v9417_v26 = vpop.permute.xlu1 %9416  ;;  %v9434_v39 = vunpack.i.h.bf16 %v9432_v48  ;;  %v9433_v36 = vunpack.i.l.bf16 %v9432_v48  ;;  %v5938_v10 = vsel %vm1243_vm7, %v5906_v45, %v9423_v7  ;;  %v5939_v61 = vsel %vm1243_vm7, %v5907_v44, %v9424_v51 }
 0x4b4   :  { %v9418_v53 = vunpack.i.l.bf16 %v9417_v26  ;;  %v5905_v32 = vsel %vm1210_vm6, %v5873_v40, %v9409_v22  ;;  %v9419_v35 = vunpack.i.h.bf16 %v9417_v26  ;;  %v5847_v33 = vsel %vm1144_vm3, %v18108_v49, %v9129_v12 }
 0x4b5   :  { %v5970_v31 = vsel %vm1276_vm8, %v5938_v10, %v9433_v36  ;;  %v5971_v59 = vsel %vm1276_vm8, %v5939_v61, %v9434_v39  ;;  %v20568_v36 = vld [vmem:[#allocation10_spill] sm:$0xff] }
 0x4b6   :  { %v9442_v57 = vpop.permute.xlu0 %9441  ;;  %v5936_v11 = vsel %vm1243_vm7, %v5904_v42, %v9418_v53  ;;  %v5937_v47 = vsel %vm1243_vm7, %v5905_v32, %v9419_v35  ;;  %v9128_v32 = vunpack.i.l.bf16 %v20564_v58 }
 0x4b7   :  { %v9427_v50 = vpop.permute.xlu1 %9426  ;;  %v9444_v23 = vunpack.i.h.bf16 %v9442_v57  ;;  %v9443_v28 = vunpack.i.l.bf16 %v9442_v57 }
 0x4b8   :  { %v6997_v38 = vpop.f32.mrb[0].mxu1  ;;  %v9429_v19 = vunpack.i.h.bf16 %v9427_v50  ;;  %v9428_v46 = vunpack.i.l.bf16 %v9427_v50 }
 0x4b9   :  { %v6265_v43 = vadd.f32 %v6997_v38, %v18144_v60  ;;  %v6256_v27 = vpop.f32.mrb[1].mxu1  ;;  %v6002_v26 = vsel %vm1309_vm9, %v5970_v31, %v9443_v28  ;;  %v6003_v51 = vsel %vm1309_vm9, %v5971_v59, %v9444_v23 }
 0x4ba   :  { %v9452_v3 = vpop.permute.xlu0 %9451  ;;  %v6257_v34 = vadd.f32 %v18144_v60, %v6256_v27  ;;  %v6998_v16 = vpop.f32.mrb[2].mxu1  ;;  %v5968_v37 = vsel %vm1276_vm8, %v5936_v11, %v9428_v46  ;;  %v5969_v0 = vsel %vm1276_vm8, %v5937_v47, %v9429_v19  ;;  %v5846_v47 = vsel %vm1144_vm3, %v18114_v55, %v9128_v32  ;;  %v20576_v32 = vld [vmem:[#allocation12_spill] sm:$0xff] }
 0x4bb   :  { %v9437_v62 = vpop.permute.xlu1 %9436  ;;  %v6513_v24 = vadd.f32 %v6265_v43, %v20565_v14  ;;  %v6268_v25 = vadd.f32 %v6998_v16, %v18144_v60  ;;  %v6259_v6 = vpop.f32.mrb[3].mxu1  ;;  %v9454_v29 = vunpack.i.h.bf16 %v9452_v3  ;;  %v9453_v63 = vunpack.i.l.bf16 %v9452_v3  ;;  %v20569_v43 = vld [vmem:[#allocation140_spill] sm:$0xff]  ;;  %v20570_v3 = vld [vmem:[#allocation14_spill] sm:$0xff] }
 0x4bc   :  { %v6511_v5 = vadd.f32 %v6257_v34, %v20566_v17  ;;  %v6260_v2 = vadd.f32 %v18144_v60, %v6259_v6  ;;  %v9439_v48 = vunpack.i.h.bf16 %v9437_v62  ;;  %v9438_v52 = vunpack.i.l.bf16 %v9437_v62  ;;  %v20571_v62 = vld [vmem:[#allocation6_spill] sm:$0xff] }
 0x4bd   :  { %v6577_v56 = vmax.f32 %v6513_v24, 0.0  ;;  %v6514_v54 = vadd.f32 %v6268_v25, %v20567_v9  ;;  %v6034_v20 = vsel %vm1342_vm10, %v6002_v26, %v9453_v63  ;;  %v6035_v53 = vsel %vm1342_vm10, %v6003_v51, %v9454_v29  ;;  %v20572_v25 = vld [vmem:[#allocation146_spill] sm:$0xff] }
 0x4be   :  { %v18167_v7 = vpop.permute.xlu0 %9461  ;;  %v6575_v22 = vmax.f32 %v6511_v5, 0.0  ;;  %v6512_v15 = vadd.f32 %v6260_v2, %v20568_v36  ;;  %v6000_v45 = vsel %vm1309_vm9, %v5968_v37, %v9438_v52  ;;  %v6001_v44 = vsel %vm1309_vm9, %v5969_v0, %v9439_v48 }
 0x4bf   :  { %v9447_v8 = vpop.permute.xlu1 %9446  ;;  %6641 = vst.msk [vmem:[%s18753_s5 + $0x10] sm:$0xff] %vm1111_vm2, %v6577_v56  ;;  %v6578_v39 = vmax.f32 %v6514_v54, 0.0  ;;  %v9204_v27 = vunpack.i.h.bf16 %v20569_v43  ;;  %v9203_v11 = vunpack.i.l.bf16 %v20569_v43  ;;  %v6073_v19 = vpack.c.bf16 %v6035_v53, %v6034_v20  ;;  %v20573_v56 = vld [vmem:[#allocation16_spill] sm:$0xff]  ;;  %v20577_v43 = vld [vmem:[#allocation22_spill] sm:$0xff] }
 0x4c0   :  { %v9449_v57 = vunpack.i.h.bf16 %v9447_v8  ;;  %v9448_v13 = vunpack.i.l.bf16 %v9447_v8  ;;  %6639 = vst.msk [vmem:[%s18753_s5] sm:$0xff] %vm1111_vm2, %v6575_v22  ;;  %v7001_v40 = vpop.f32.mrb[4].mxu1  ;;  %v6576_v50 = vmax.f32 %v6512_v15, 0.0  ;;  %v9463_v46 = vunpack.i.l.bf16 %v18167_v7 }
 0x4c1   :  { %6642 = vst.msk [vmem:[%s18753_s5 + $0x18] sm:$0xff] %vm1111_vm2, %v6578_v39  ;;  %v6281_v10 = vadd.f32 %v7001_v40, %v18144_v60  ;;  %v6272_v61 = vpop.f32.mrb[5].mxu1  ;;  %v9059_v6 = vunpack.i.h.bf16 %v20572_v25  ;;  %v9058_v29 = vunpack.i.l.bf16 %v20572_v25  ;;  %v5844_v5 = vsel %vm1144_vm3, %v18080_v1, %v9123_v41  ;;  %v20574_v1 = vld [vmem:[#allocation7_spill] sm:$0xff]  ;;  %v20575_v40 = vld [vmem:[#allocation21_spill] sm:$0xff] }
 0x4c2   :  { %v6032_v42 = vsel %vm1342_vm10, %v6000_v45, %v9448_v13  ;;  %v6033_v38 = vsel %vm1342_vm10, %v6001_v44, %v9449_v57  ;;  %v18192_v31 = vpop.permute.xlu0 %9471  ;;  %v6273_v59 = vadd.f32 %v18144_v60, %v6272_v61  ;;  %v7002_v35 = vpop.f32.mrb[6].mxu1  ;;  %6640 = vst.msk [vmem:[%s18753_s5 + $0x8] sm:$0xff] %vm1111_vm2, %v6576_v50  ;;  %v9464_v2 = vunpack.i.h.bf16 %v18167_v7 }
 0x4c3   :  { %v6072_v23 = vpack.c.bf16 %v6033_v38, %v6032_v42  ;;  %v18197_v28 = vpop.permute.xlu1 %9456  ;;  %v6517_v34 = vadd.f32 %v6281_v10, %v20570_v3  ;;  %v6275_v16 = vpop.f32.mrb[7].mxu1  ;;  %v6284_v24 = vadd.f32 %v7002_v35, %v18144_v60  ;;  %v5845_v54 = vsel %vm1144_vm3, %v18074_v21, %v9124_v30 }
 0x4c4   :  { %v6515_v14 = vadd.f32 %v6273_v59, %v20571_v62  ;;  %v6276_v17 = vadd.f32 %v18144_v60, %v6275_v16  ;;  %v5876_v26 = vsel %vm1177_vm5, %v5844_v5, %v9203_v11  ;;  %v5877_v21 = vsel %vm1177_vm5, %v5845_v54, %v9204_v27 }
 0x4c5   :  { %7043 = vmatprep.mubr.msk.bf16.mxu1 %vm2795_vm11, %v6072_v23  ;;  %v6581_v63 = vmax.f32 %v6517_v34, 0.0  ;;  %v6518_v9 = vadd.f32 %v6284_v24, %v20573_v56  ;;  %v5908_v55 = vsel %vm1210_vm6, %v5876_v26, %v9463_v46  ;;  %v9474_v22 = vunpack.i.h.bf16 %v18192_v31  ;;  %v20578_v34 = vld [vmem:[#allocation13_spill] sm:$0xff] }
 0x4c6   :  { %v9482_v48 = vpop.permute.xlu0 %9481  ;;  %7044 = vmatmul.mubr.msk.bf16.gmra.mrb[48].mxu1 %vm2795_vm11, %v6073_v19  ;;  %v6579_v52 = vmax.f32 %v6515_v14, 0.0  ;;  %v6516_v41 = vadd.f32 %v6276_v17, %v20574_v1  ;;  %v9473_v37 = vunpack.i.l.bf16 %v18192_v31  ;;  %v5909_v49 = vsel %vm1210_vm6, %v5877_v21, %v9464_v2 }
 0x4c7   :  { %v18225_v51 = vpop.permute.xlu1 %9466  ;;  %6645 = vst.msk [vmem:[%s18753_s5 + $0x30] sm:$0xff] %vm1111_vm2, %v6581_v63  ;;  %v6582_v30 = vmax.f32 %v6518_v9, 0.0  ;;  %v9458_v12 = vunpack.i.l.bf16 %v18197_v28  ;;  %v9483_v39 = vunpack.i.l.bf16 %v9482_v48  ;;  %v9459_v53 = vunpack.i.h.bf16 %v18197_v28 }
 0x4c8   :  { %6643 = vst.msk [vmem:[%s18753_s5 + $0x20] sm:$0xff] %vm1111_vm2, %v6579_v52  ;;  %v7005_v7 = vpop.f32.mrb[8].mxu1  ;;  %v6580_v0 = vmax.f32 %v6516_v41, 0.0  ;;  %v9484_v57 = vunpack.i.h.bf16 %v9482_v48  ;;  %v5940_v31 = vsel %vm1243_vm7, %v5908_v55, %v9473_v37  ;;  %v5941_v59 = vsel %vm1243_vm7, %v5909_v49, %v9474_v22  ;;  %v20579_v37 = vld [vmem:[#allocation26_spill] sm:$0xff] }
 0x4c9   :  { %v6297_v58 = vadd.f32 %v7005_v7, %v18144_v60  ;;  %v6288_v8 = vpop.f32.mrb[9].mxu1  ;;  %6646 = vst.msk [vmem:[%s18753_s5 + $0x38] sm:$0xff] %vm1111_vm2, %v6582_v30  ;;  %v5878_v11 = vsel %vm1177_vm5, %v5846_v47, %v9458_v12  ;;  %v5972_v23 = vsel %vm1276_vm8, %v5940_v31, %v9483_v39  ;;  %v9468_v63 = vunpack.i.l.bf16 %v18225_v51  ;;  %v20580_v12 = vld [vmem:[#allocation17_spill] sm:$0xff] }
 0x4ca   :  { %v9492_v36 = vpop.permute.xlu0 %9491  ;;  %v6289_v15 = vadd.f32 %v18144_v60, %v6288_v8  ;;  %v7006_v20 = vpop.f32.mrb[10].mxu1  ;;  %6644 = vst.msk [vmem:[%s18753_s5 + $0x28] sm:$0xff] %vm1111_vm2, %v6580_v0  ;;  %v5973_v19 = vsel %vm1276_vm8, %v5941_v59, %v9484_v57  ;;  %v5879_v52 = vsel %vm1177_vm5, %v5847_v33, %v9459_v53  ;;  %v9469_v26 = vunpack.i.h.bf16 %v18225_v51  ;;  %v20581_v57 = vld [vmem:[#allocation27_spill] sm:$0xff] }
 0x4cb   :  { %v18253_v13 = vpop.permute.xlu1 %9476  ;;  %v6521_v45 = vadd.f32 %v6297_v58, %v20575_v40  ;;  %v6300_v44 = vadd.f32 %v7006_v20, %v18144_v60  ;;  %v6291_v50 = vpop.f32.mrb[11].mxu1  ;;  %v9494_v10 = vunpack.i.h.bf16 %v9492_v36  ;;  %v9493_v61 = vunpack.i.l.bf16 %v9492_v36 }
 0x4cc   :  { %v6519_v42 = vadd.f32 %v6289_v15, %v20576_v32  ;;  %v6292_v38 = vadd.f32 %v18144_v60, %v6291_v50  ;;  %v9478_v1 = vunpack.i.l.bf16 %v18253_v13  ;;  %v9479_v30 = vunpack.i.h.bf16 %v18253_v13  ;;  %v20583_v32 = vld [vmem:[#allocation46_spill] sm:$0xff] }
 0x4cd   :  { %v6585_v35 = vmax.f32 %v6521_v45, 0.0  ;;  %v6522_v27 = vadd.f32 %v6300_v44, %v20577_v43  ;;  %v6004_v17 = vsel %vm1309_vm9, %v5972_v23, %v9493_v61  ;;  %v6005_v5 = vsel %vm1309_vm9, %v5973_v19, %v9494_v10  ;;  %v20582_v10 = vld [vmem:[#allocation19_spill] sm:$0xff] }
 0x4ce   :  { %v9502_v28 = vpop.permute.xlu0 %9501  ;;  %v6583_v3 = vmax.f32 %v6519_v42, 0.0  ;;  %v6520_v16 = vadd.f32 %v6292_v38, %v20578_v34  ;;  %v5910_v8 = vsel %vm1210_vm6, %v5878_v11, %v9468_v63  ;;  %v5911_v40 = vsel %vm1210_vm6, %v5879_v52, %v9469_v26 }
 0x4cf   :  { %v9504_v46 = vunpack.i.h.bf16 %v9502_v28  ;;  %v9503_v62 = vunpack.i.l.bf16 %v9502_v28  ;;  %v9487_v14 = vpop.permute.xlu1 %9486  ;;  %6649 = vst.msk [vmem:[%s18753_s5 + $0x50] sm:$0xff] %vm1111_vm2, %v6585_v35  ;;  %v6586_v24 = vmax.f32 %v6522_v27, 0.0  ;;  %v5942_v45 = vsel %vm1243_vm7, %v5910_v8, %v9478_v1 }
 0x4d0   :  { %6647 = vst.msk [vmem:[%s18753_s5 + $0x40] sm:$0xff] %vm1111_vm2, %v6583_v3  ;;  %v6584_v2 = vmax.f32 %v6520_v16, 0.0  ;;  %v7009_v48 = vpop.f32.mrb[12].mxu1  ;;  %v9488_v7 = vunpack.i.l.bf16 %v9487_v14  ;;  %v9489_v49 = vunpack.i.h.bf16 %v9487_v14  ;;  %v9134_v42 = vunpack.i.h.bf16 %v20583_v32 }
 0x4d1   :  { %v6036_v56 = vsel %vm1342_vm10, %v6004_v17, %v9503_v62  ;;  %v6037_v9 = vsel %vm1342_vm10, %v6005_v5, %v9504_v46  ;;  %6650 = vst.msk [vmem:[%s18753_s5 + $0x58] sm:$0xff] %vm1111_vm2, %v6586_v24  ;;  %v6313_v54 = vadd.f32 %v7009_v48, %v18144_v60  ;;  %v6304_v47 = vpop.f32.mrb[13].mxu1  ;;  %v5943_v38 = vsel %vm1243_vm7, %v5911_v40, %v9479_v30  ;;  %v20584_v62 = vld [vmem:[#allocation20_spill] sm:$0xff] }
 0x4d2   :  { %v6074_v41 = vpack.c.bf16 %v6037_v9, %v6036_v56  ;;  %v18291_v21 = vpop.permute.xlu0 %9511  ;;  %6648 = vst.msk [vmem:[%s18753_s5 + $0x48] sm:$0xff] %vm1111_vm2, %v6584_v2  ;;  %v6305_v33 = vadd.f32 %v18144_v60, %v6304_v47  ;;  %v7010_v55 = vpop.f32.mrb[14].mxu1  ;;  %v5974_v31 = vsel %vm1276_vm8, %v5942_v45, %v9488_v7  ;;  %v5975_v43 = vsel %vm1276_vm8, %v5943_v38, %v9489_v49  ;;  %v9771_v7 = vld [vmem:[#allocation2 + $0x2f0] sm:$0xff] }
 0x4d3   :  { %v9497_v22 = vpop.permute.xlu1 %9496  ;;  %v6525_v0 = vadd.f32 %v6313_v54, %v20579_v37  ;;  %v6316_v51 = vadd.f32 %v7010_v55, %v18144_v60  ;;  %v6307_v58 = vpop.f32.mrb[15].mxu1  ;;  %v9133_v3 = vunpack.i.l.bf16 %v20583_v32  ;;  %v9139_v14 = vunpack.i.h.bf16 %v20584_v62  ;;  %v20585_v54 = vld [vmem:[#allocation34_spill] sm:$0xff]  ;;  %v9772_v37 = vld [vmem:[#allocation2 + $0x2e8] sm:$0xff] }
 0x4d4   :  { %7047 = vmatprep.mubr.msk.bf16.mxu1 %vm2795_vm11, %v6074_v41  ;;  %v6523_v39 = vadd.f32 %v6305_v33, %v20580_v12  ;;  %v6308_v36 = vadd.f32 %v18144_v60, %v6307_v58  ;;  %v9499_v15 = vunpack.i.h.bf16 %v9497_v22  ;;  %v9498_v20 = vunpack.i.l.bf16 %v9497_v22  ;;  %v20586_v33 = vld [vmem:[#allocation23_spill] sm:$0xff] }
 0x4d5   :  { %v6589_v53 = vmax.f32 %v6525_v0, 0.0  ;;  %v6526_v13 = vadd.f32 %v6316_v51, %v20581_v57  ;;  %v9138_v48 = vunpack.i.l.bf16 %v20584_v62  ;;  %v9513_v52 = vunpack.i.l.bf16 %v18291_v21 }
 0x4d6   :  { %v18308_v44 = vpop.permute.xlu0 %9521  ;;  %v6587_v50 = vmax.f32 %v6523_v39, 0.0  ;;  %v6524_v61 = vadd.f32 %v6308_v36, %v20582_v10  ;;  %v6006_v34 = vsel %vm1309_vm9, %v5974_v31, %v9498_v20  ;;  %v6007_v16 = vsel %vm1309_vm9, %v5975_v43, %v9499_v15  ;;  %v20587_v39 = vld [vmem:[#allocation35_spill] sm:$0xff] }
 0x4d7   :  { %v9507_v59 = vpop.permute.xlu1 %9506  ;;  %6653 = vst.msk [vmem:[%s18753_s5 + $0x70] sm:$0xff] %vm1111_vm2, %v6589_v53  ;;  %v6590_v35 = vmax.f32 %v6526_v13, 0.0  ;;  %v9514_v1 = vunpack.i.h.bf16 %v18291_v21  ;;  %v9523_v41 = vunpack.i.l.bf16 %v18308_v44  ;;  %v5819_v22 = vsel %vm1111_vm2, %v9771_v7, %v9059_v6 }
 0x4d8   :  { %v9509_v27 = vunpack.i.h.bf16 %v9507_v59  ;;  %v9508_v11 = vunpack.i.l.bf16 %v9507_v59  ;;  %6651 = vst.msk [vmem:[%s18753_s5 + $0x60] sm:$0xff] %vm1111_vm2, %v6587_v50  ;;  %v6588_v23 = vmax.f32 %v6524_v61, 0.0  ;;  %v7013_v28 = vpop.f32.mrb[16].mxu1  ;;  %v5818_v0 = vsel %vm1111_vm2, %v9772_v37, %v9058_v29 }
 0x4d9   :  { %6654 = vst.msk [vmem:[%s18753_s5 + $0x78] sm:$0xff] %vm1111_vm2, %v6590_v35  ;;  %v6329_v19 = vadd.f32 %v7013_v28, %v18144_v60  ;;  %v6320_v46 = vpop.f32.mrb[17].mxu1  ;;  %v5848_v58 = vsel %vm1144_vm3, %v18094_v18, %v9133_v3  ;;  %v9524_v8 = vunpack.i.h.bf16 %v18308_v44  ;;  %v5849_v6 = vsel %vm1144_vm3, %v18088_v4, %v9134_v42  ;;  %v20588_v18 = vld [vmem:[#allocation24_spill] sm:$0xff] }
 0x4da   :  { %v6038_v24 = vsel %vm1342_vm10, %v6006_v34, %v9508_v11  ;;  %v6039_v63 = vsel %vm1342_vm10, %v6007_v16, %v9509_v27  ;;  %v18334_v17 = vpop.permute.xlu0 %9531  ;;  %6652 = vst.msk [vmem:[%s18753_s5 + $0x68] sm:$0xff] %vm1111_vm2, %v6588_v23  ;;  %v6321_v5 = vadd.f32 %v18144_v60, %v6320_v46  ;;  %v7014_v2 = vpop.f32.mrb[18].mxu1  ;;  %v5850_v25 = vsel %vm1144_vm3, %v5818_v0, %v9138_v48  ;;  %v20589_v23 = vld [vmem:[#allocation39_spill] sm:$0xff]  ;;  %v20590_v46 = vld [vmem:[#allocation29_spill] sm:$0xff] }
 0x4db   :  { %v6075_v56 = vpack.c.bf16 %v6039_v63, %v6038_v24  ;;  %v18343_v9 = vpop.permute.xlu1 %9516  ;;  %v6529_v47 = vadd.f32 %v6329_v19, %v20585_v54  ;;  %v6323_v26 = vpop.f32.mrb[19].mxu1  ;;  %v6332_v30 = vadd.f32 %v7014_v2, %v18144_v60  ;;  %v5880_v29 = vsel %vm1177_vm5, %v5848_v58, %v9513_v52  ;;  %v20592_v54 = vld [vmem:[#allocation30_spill] sm:$0xff] }
 0x4dc   :  { %v6527_v55 = vadd.f32 %v6321_v5, %v20586_v33  ;;  %v6324_v21 = vadd.f32 %v18144_v60, %v6323_v26  ;;  %v5851_v53 = vsel %vm1144_vm3, %v5819_v22, %v9139_v14  ;;  %v5881_v57 = vsel %vm1177_vm5, %v5849_v6, %v9514_v1  ;;  %v20591_v5 = vld [vmem:[#allocation40_spill] sm:$0xff] }
 0x4dd   :  { %7048 = vmatmul.mubr.msk.bf16.gmra.mrb[52].mxu1 %vm2795_vm11, %v6075_v56  ;;  %v6593_v51 = vmax.f32 %v6529_v47, 0.0  ;;  %v6530_v36 = vadd.f32 %v6332_v30, %v20587_v39  ;;  %v5912_v13 = vsel %vm1210_vm6, %v5880_v29, %v9523_v41  ;;  %v9534_v45 = vunpack.i.h.bf16 %v18334_v17 }
 0x4de   :  { %v9542_v49 = vpop.permute.xlu0 %9541  ;;  %v6591_v12 = vmax.f32 %v6527_v55, 0.0  ;;  %v6528_v20 = vadd.f32 %v6324_v21, %v20588_v18  ;;  %v9533_v44 = vunpack.i.l.bf16 %v18334_v17  ;;  %v5913_v32 = vsel %vm1210_vm6, %v5881_v57, %v9524_v8  ;;  %v20593_v57 = vld [vmem:[#allocation43_spill] sm:$0xff] }
 0x4df   :  { %v18366_v15 = vpop.permute.xlu1 %9526  ;;  %6657 = vst.msk [vmem:[%s18753_s5 + $0x90] sm:$0xff] %vm1111_vm2, %v6593_v51  ;;  %v6594_v4 = vmax.f32 %v6530_v36, 0.0  ;;  %v9518_v42 = vunpack.i.l.bf16 %v18343_v9  ;;  %v9543_v38 = vunpack.i.l.bf16 %v9542_v49  ;;  %v9519_v43 = vunpack.i.h.bf16 %v18343_v9 }
 0x4e0   :  { %6655 = vst.msk [vmem:[%s18753_s5 + $0x80] sm:$0xff] %vm1111_vm2, %v6591_v12  ;;  %v7017_v40 = vpop.f32.mrb[20].mxu1  ;;  %v6592_v50 = vmax.f32 %v6528_v20, 0.0  ;;  %v9544_v27 = vunpack.i.h.bf16 %v9542_v49  ;;  %v5944_v24 = vsel %vm1243_vm7, %v5912_v13, %v9533_v44  ;;  %v5945_v63 = vsel %vm1243_vm7, %v5913_v32, %v9534_v45  ;;  %v20594_v44 = vld [vmem:[#allocation37_spill] sm:$0xff] }
 0x4e1   :  { %v6345_v10 = vadd.f32 %v7017_v40, %v18144_v60  ;;  %v6336_v61 = vpop.f32.mrb[21].mxu1  ;;  %6658 = vst.msk [vmem:[%s18753_s5 + $0x98] sm:$0xff] %vm1111_vm2, %v6594_v4  ;;  %v5882_v48 = vsel %vm1177_vm5, %v5850_v25, %v9518_v42  ;;  %v5976_v52 = vsel %vm1276_vm8, %v5944_v24, %v9543_v38  ;;  %v9528_v30 = vunpack.i.l.bf16 %v18366_v15  ;;  %v20595_v38 = vld [vmem:[#allocation44_spill] sm:$0xff] }
 0x4e2   :  { %v9552_v31 = vpop.permute.xlu0 %9551  ;;  %v6337_v59 = vadd.f32 %v18144_v60, %v6336_v61  ;;  %v7018_v35 = vpop.f32.mrb[22].mxu1  ;;  %6656 = vst.msk [vmem:[%s18753_s5 + $0x88] sm:$0xff] %vm1111_vm2, %v6592_v50  ;;  %v5977_v26 = vsel %vm1276_vm8, %v5945_v63, %v9544_v27  ;;  %v5883_v51 = vsel %vm1177_vm5, %v5851_v53, %v9519_v43  ;;  %v9529_v12 = vunpack.i.h.bf16 %v18366_v15 }
 0x4e3   :  { %v18391_v11 = vpop.permute.xlu1 %9536  ;;  %v6533_v28 = vadd.f32 %v6345_v10, %v20589_v23  ;;  %v6348_v3 = vadd.f32 %v7018_v35, %v18144_v60  ;;  %v6339_v34 = vpop.f32.mrb[23].mxu1  ;;  %v9554_v16 = vunpack.i.h.bf16 %v9552_v31  ;;  %v9553_v19 = vunpack.i.l.bf16 %v9552_v31 }
 0x4e4   :  { %v6531_v62 = vadd.f32 %v6337_v59, %v20590_v46  ;;  %v6340_v14 = vadd.f32 %v18144_v60, %v6339_v34  ;;  %v9538_v39 = vunpack.i.l.bf16 %v18391_v11  ;;  %v9539_v18 = vunpack.i.h.bf16 %v18391_v11  ;;  %v20596_v11 = vld [vmem:[#allocation38_spill] sm:$0xff] }
 0x4e5   :  { %v6597_v17 = vmax.f32 %v6533_v28, 0.0  ;;  %v6534_v2 = vadd.f32 %v6348_v3, %v20591_v5  ;;  %v6008_v7 = vsel %vm1309_vm9, %v5976_v52, %v9553_v19  ;;  %v6009_v22 = vsel %vm1309_vm9, %v5977_v26, %v9554_v16 }
 0x4e6   :  { %v9562_v56 = vpop.permute.xlu0 %9561  ;;  %v6595_v9 = vmax.f32 %v6531_v62, 0.0  ;;  %v6532_v47 = vadd.f32 %v6340_v14, %v20592_v54  ;;  %v5914_v40 = vsel %vm1210_vm6, %v5882_v48, %v9528_v30  ;;  %v5915_v59 = vsel %vm1210_vm6, %v5883_v51, %v9529_v12 }
 0x4e7   :  { %v9564_v1 = vunpack.i.h.bf16 %v9562_v56  ;;  %v9563_v41 = vunpack.i.l.bf16 %v9562_v56  ;;  %v9547_v33 = vpop.permute.xlu1 %9546  ;;  %6661 = vst.msk [vmem:[%s18753_s5 + $0xb0] sm:$0xff] %vm1111_vm2, %v6597_v17  ;;  %v6598_v55 = vmax.f32 %v6534_v2, 0.0  ;;  %v5946_v35 = vsel %vm1243_vm7, %v5914_v40, %v9538_v39  ;;  %v20601_v39 = vld [vmem:[#allocation145_spill] sm:$0xff] }
 0x4e8   :  { %6659 = vst.msk [vmem:[%s18753_s5 + $0xa0] sm:$0xff] %vm1111_vm2, %v6595_v9  ;;  %v6596_v37 = vmax.f32 %v6532_v47, 0.0  ;;  %v7021_v0 = vpop.f32.mrb[24].mxu1  ;;  %v9548_v20 = vunpack.i.l.bf16 %v9547_v33  ;;  %v9549_v45 = vunpack.i.h.bf16 %v9547_v33  ;;  %v5947_v28 = vsel %vm1243_vm7, %v5915_v59, %v9539_v18  ;;  %v20602_v18 = vld [vmem:[#allocation42_spill] sm:$0xff] }
 0x4e9   :  { %v6040_v21 = vsel %vm1342_vm10, %v6008_v7, %v9563_v41  ;;  %v6041_v58 = vsel %vm1342_vm10, %v6009_v22, %v9564_v1  ;;  %6662 = vst.msk [vmem:[%s18753_s5 + $0xb8] sm:$0xff] %vm1111_vm2, %v6598_v55  ;;  %v6361_v8 = vadd.f32 %v7021_v0, %v18144_v60  ;;  %v6352_v49 = vpop.f32.mrb[25].mxu1  ;;  %v20597_v1 = vld [vmem:[#allocation5_spill] sm:$0xff]  ;;  %v20599_v0 = vld [vmem:[#allocation115_spill] sm:$0xff] }
 0x4ea   :  { %v6076_v36 = vpack.c.bf16 %v6041_v58, %v6040_v21  ;;  %v18429_v6 = vpop.permute.xlu0 %9571  ;;  %6660 = vst.msk [vmem:[%s18753_s5 + $0xa8] sm:$0xff] %vm1111_vm2, %v6596_v37  ;;  %v6353_v25 = vadd.f32 %v18144_v60, %v6352_v49  ;;  %v7022_v29 = vpop.f32.mrb[26].mxu1  ;;  %v5978_v3 = vsel %vm1276_vm8, %v5946_v35, %v9548_v20  ;;  %v5979_v19 = vsel %vm1276_vm8, %v5947_v28, %v9549_v45  ;;  %v20598_v55 = vld [vmem:[#allocation41_spill] sm:$0xff]  ;;  %v20600_v49 = vld [vmem:[#allocation11_spill] sm:$0xff]  ;;  %v9773_v45 = vld [vmem:[#allocation2 + $0x308] sm:$0xff] }
 0x4eb   :  { %v9557_v53 = vpop.permute.xlu1 %9556  ;;  %v6537_v13 = vadd.f32 %v6361_v8, %v20593_v57  ;;  %v6364_v15 = vadd.f32 %v7022_v29, %v18144_v60  ;;  %v6355_v4 = vpop.f32.mrb[27].mxu1  ;;  %v9064_v51 = vunpack.i.h.bf16 %v20599_v0  ;;  %v9063_v21 = vunpack.i.l.bf16 %v20599_v0  ;;  %v9776_v0 = vld [vmem:[#allocation2 + $0x318] sm:$0xff] }
 0x4ec   :  { %7051 = vmatprep.mubr.msk.bf16.mxu1 %vm2795_vm11, %v6076_v36  ;;  %v6535_v50 = vadd.f32 %v6353_v25, %v20594_v44  ;;  %v6356_v10 = vadd.f32 %v18144_v60, %v6355_v4  ;;  %v9559_v61 = vunpack.i.h.bf16 %v9557_v53  ;;  %v9558_v32 = vunpack.i.l.bf16 %v9557_v53 }
 0x4ed   :  { %v6601_v42 = vmax.f32 %v6537_v13, 0.0  ;;  %v6538_v31 = vadd.f32 %v6364_v15, %v20595_v38  ;;  %v9144_v36 = vunpack.i.h.bf16 %v20601_v39  ;;  %v9143_v25 = vunpack.i.l.bf16 %v20601_v39 }
 0x4ee   :  { %v18446_v43 = vpop.permute.xlu0 %9581  ;;  %v6599_v27 = vmax.f32 %v6535_v50, 0.0  ;;  %v6536_v23 = vadd.f32 %v6356_v10, %v20596_v11  ;;  %v6010_v63 = vsel %vm1309_vm9, %v5978_v3, %v9558_v32  ;;  %v6011_v17 = vsel %vm1309_vm9, %v5979_v19, %v9559_v61  ;;  %v9774_v50 = vld [vmem:[#allocation2 + $0x300] sm:$0xff] }
 0x4ef   :  { %v9567_v34 = vpop.permute.xlu1 %9566  ;;  %6665 = vst.msk [vmem:[%s18753_s5 + $0xd0] sm:$0xff] %vm1111_vm2, %v6601_v42  ;;  %v6602_v16 = vmax.f32 %v6538_v31, 0.0  ;;  %v9574_v53 = vunpack.i.h.bf16 %v18429_v6  ;;  %v9573_v57 = vunpack.i.l.bf16 %v18429_v6  ;;  %v9584_v15 = vunpack.i.h.bf16 %v18446_v43 }
 0x4f0   :  { %v9569_v46 = vunpack.i.h.bf16 %v9567_v34  ;;  %v9568_v62 = vunpack.i.l.bf16 %v9567_v34  ;;  %6663 = vst.msk [vmem:[%s18753_s5 + $0xc0] sm:$0xff] %vm1111_vm2, %v6599_v27  ;;  %v6600_v14 = vmax.f32 %v6536_v23, 0.0  ;;  %v7025_v24 = vpop.f32.mrb[28].mxu1  ;;  %v9583_v4 = vunpack.i.l.bf16 %v18446_v43  ;;  %v20603_v34 = vld [vmem:[#allocation164_spill] sm:$0xff] }
 0x4f1   :  { %6666 = vst.msk [vmem:[%s18753_s5 + $0xd8] sm:$0xff] %vm1111_vm2, %v6602_v16  ;;  %v6377_v5 = vadd.f32 %v7025_v24, %v18144_v60  ;;  %v6368_v2 = vpop.f32.mrb[29].mxu1  ;;  %v5821_v44 = vsel %vm1111_vm2, %v9773_v45, %v9064_v51  ;;  %v5820_v10 = vsel %vm1111_vm2, %v9774_v50, %v9063_v21  ;;  %v9069_v16 = vunpack.i.h.bf16 %v20603_v34 }
 0x4f2   :  { %v6042_v48 = vsel %vm1342_vm10, %v6010_v63, %v9568_v62  ;;  %v6043_v52 = vsel %vm1342_vm10, %v6011_v17, %v9569_v46  ;;  %v9592_v56 = vpop.permute.xlu0 %9591  ;;  %6664 = vst.msk [vmem:[%s18753_s5 + $0xc8] sm:$0xff] %vm1111_vm2, %v6600_v14  ;;  %v6369_v9 = vadd.f32 %v18144_v60, %v6368_v2  ;;  %v7026_v54 = vpop.f32.mrb[30].mxu1  ;;  %v5852_v42 = vsel %vm1144_vm3, %v5820_v10, %v9143_v25 }
 0x4f3   :  { %v6077_v47 = vpack.c.bf16 %v6043_v52, %v6042_v48  ;;  %v18474_v26 = vpop.permute.xlu1 %9576  ;;  %v6541_v41 = vadd.f32 %v6377_v5, %v20597_v1  ;;  %v6371_v33 = vpop.f32.mrb[31].mxu1  ;;  %v6380_v7 = vadd.f32 %v7026_v54, %v18144_v60  ;;  %v9594_v61 = vunpack.i.h.bf16 %v9592_v56  ;;  %v20604_v48 = vld [vmem:[#allocation152_spill] sm:$0xff] }
 0x4f4   :  { %v6539_v30 = vadd.f32 %v6369_v9, %v20598_v55  ;;  %v6372_v37 = vadd.f32 %v18144_v60, %v6371_v33  ;;  %v9593_v32 = vunpack.i.l.bf16 %v9592_v56  ;;  %v5853_v38 = vsel %vm1144_vm3, %v5821_v44, %v9144_v36 }
 0x4f5   :  { %7052 = vmatmul.mubr.msk.bf16.gmra.mrb[56].mxu1 %vm2795_vm11, %v6077_v47  ;;  %v6605_v22 = vmax.f32 %v6541_v41, 0.0  ;;  %v6542_v12 = vadd.f32 %v6380_v7, %v20600_v49  ;;  %v5884_v43 = vsel %vm1177_vm5, %v5852_v42, %v9573_v57  ;;  %v5885_v27 = vsel %vm1177_vm5, %v5853_v38, %v9574_v53 }
 0x4f6   :  { %v9602_v58 = vpop.permute.xlu0 %9601  ;;  %v6603_v8 = vmax.f32 %v6539_v30, 0.0  ;;  %v6540_v20 = vadd.f32 %v6372_v37, %v20602_v18  ;;  %v5916_v28 = vsel %vm1210_vm6, %v5884_v43, %v9583_v4  ;;  %v5917_v3 = vsel %vm1210_vm6, %v5885_v27, %v9584_v15  ;;  %v20605_v43 = vld [vmem:[#allocation99_spill] sm:$0xff] }
 0x4f7   :  { %v18486_v29 = vpop.permute.xlu1 %9586  ;;  %6669 = vst.msk [vmem:[%s18753_s5 + $0xf0] sm:$0xff] %vm1111_vm2, %v6605_v22  ;;  %v6606_v13 = vmax.f32 %v6542_v12, 0.0  ;;  %v9604_v31 = vunpack.i.h.bf16 %v9602_v58  ;;  %v9603_v59 = vunpack.i.l.bf16 %v9602_v58  ;;  %v9068_v19 = vunpack.i.l.bf16 %v20603_v34  ;;  %v9775_v22 = vld [vmem:[#allocation2 + $0x320] sm:$0xff] }
 0x4f8   :  { %6667 = vst.msk [vmem:[%s18753_s5 + $0xe0] sm:$0xff] %vm1111_vm2, %v6603_v8  ;;  %v6604_v40 = vmax.f32 %v6540_v20, 0.0  ;;  %v5948_v46 = vsel %vm1243_vm7, %v5916_v28, %v9593_v32  ;;  %v5949_v62 = vsel %vm1243_vm7, %v5917_v3, %v9594_v61  ;;  %v9149_v52 = vunpack.i.h.bf16 %v20604_v48  ;;  %v20606_v28 = vld [vmem:[#allocation79_spill] sm:$0xff] }
 0x4f9   :  { %6670 = vst.msk [vmem:[%s18753_s5 + $0xf8] sm:$0xff] %vm1111_vm2, %v6606_v13  ;;  %v5980_v24 = vsel %vm1276_vm8, %v5948_v46, %v9603_v59  ;;  %v5981_v63 = vsel %vm1276_vm8, %v5949_v62, %v9604_v31  ;;  %v9148_v56 = vunpack.i.l.bf16 %v20604_v48  ;;  %v9579_v47 = vunpack.i.h.bf16 %v18474_v26 }
 0x4fa   :  { %v9612_v6 = vpop.permute.xlu0 %9611  ;;  %6668 = vst.msk [vmem:[%s18753_s5 + $0xe8] sm:$0xff] %vm1111_vm2, %v6604_v40  ;;  %v9578_v1 = vunpack.i.l.bf16 %v18474_v26  ;;  %v9589_v55 = vunpack.i.h.bf16 %v18486_v29  ;;  %v9588_v30 = vunpack.i.l.bf16 %v18486_v29  ;;  %v5823_v37 = vsel %vm1111_vm2, %v9775_v22, %v9069_v16 }
 0x4fb   :  { %v9597_v35 = vpop.permute.xlu1 %9596  ;;  %v9614_v11 = vunpack.i.h.bf16 %v9612_v6  ;;  %v9613_v23 = vunpack.i.l.bf16 %v9612_v6  ;;  %v5822_v51 = vsel %vm1111_vm2, %v9776_v0, %v9068_v19  ;;  %v5855_v49 = vsel %vm1144_vm3, %v5823_v37, %v9149_v52  ;;  %v20607_v19 = vld [vmem:[#allocation101_spill] sm:$0xff]  ;;  %v20612_v0 = vld [vmem:[#allocation92_spill] sm:$0xff] }
 0x4fc   :  { %v9599_v21 = vunpack.i.h.bf16 %v9597_v35  ;;  %v9598_v58 = vunpack.i.l.bf16 %v9597_v35  ;;  %v5854_v26 = vsel %vm1144_vm3, %v5822_v51, %v9148_v56  ;;  %v5887_v25 = vsel %vm1177_vm5, %v5855_v49, %v9579_v47 }
 0x4fd   :  { %v6012_v9 = vsel %vm1309_vm9, %v5980_v24, %v9613_v23  ;;  %v6013_v54 = vsel %vm1309_vm9, %v5981_v63, %v9614_v11  ;;  %v5886_v36 = vsel %vm1177_vm5, %v5854_v26, %v9578_v1  ;;  %v5919_v53 = vsel %vm1210_vm6, %v5887_v25, %v9589_v55 }
 0x4fe   :  { %v9622_v14 = vpop.permute.xlu0 %9621  ;;  %v5918_v20 = vsel %vm1210_vm6, %v5886_v36, %v9588_v30  ;;  %v5951_v13 = vsel %vm1243_vm7, %v5919_v53, %v9599_v21  ;;  %v20613_v36 = vld [vmem:[#allocation129_spill] sm:$0xff] }
 0x4ff   :  { %v9624_v17 = vunpack.i.h.bf16 %v9622_v14  ;;  %v9623_v5 = vunpack.i.l.bf16 %v9622_v14  ;;  %v9607_v2 = vpop.permute.xlu1 %9606  ;;  %v5950_v57 = vsel %vm1243_vm7, %v5918_v20, %v9598_v58  ;;  %v20608_v14 = vld [vmem:[#allocation80_spill] sm:$0xff]  ;;  %v20614_v20 = vld [vmem:[#allocation103_spill] sm:$0xff] }
 0x500   :  { %v9609_v12 = vunpack.i.h.bf16 %v9607_v2  ;;  %v9608_v39 = vunpack.i.l.bf16 %v9607_v2 }
 0x501   :  { %v6044_v41 = vsel %vm1342_vm10, %v6012_v9, %v9623_v5  ;;  %v6045_v33 = vsel %vm1342_vm10, %v6013_v54, %v9624_v17  ;;  %v20609_v9 = vld [vmem:[#allocation114_spill] sm:$0xff] }
 0x502   :  { %v6078_v7 = vpack.c.bf16 %v6045_v33, %v6044_v41  ;;  %v5982_v4 = vsel %vm1276_vm8, %v5950_v57, %v9608_v39  ;;  %v5983_v40 = vsel %vm1276_vm8, %v5951_v13, %v9609_v12  ;;  %v20610_v41 = vld [vmem:[#allocation91_spill] sm:$0xff] }
 0x503   :  { %v9617_v8 = vpop.permute.xlu1 %9616 }
 0x504   :  { %7055 = vmatprep.mubr.msk.bf16.mxu1 %vm2795_vm11, %v6078_v7  ;;  %v9619_v29 = vunpack.i.h.bf16 %v9617_v8  ;;  %v9618_v18 = vunpack.i.l.bf16 %v9617_v8  ;;  %v20611_v7 = vld [vmem:[#allocation116_spill] sm:$0xff] }
 0x506   :  { %v6014_v50 = vsel %vm1309_vm9, %v5982_v4, %v9618_v18  ;;  %v6015_v10 = vsel %vm1309_vm9, %v5983_v40, %v9619_v29 }
 0x507   :  { %v9627_v15 = vpop.permute.xlu1 %9626 }
 0x508   :  { %v9629_v45 = vunpack.i.h.bf16 %v9627_v15  ;;  %v9628_v44 = vunpack.i.l.bf16 %v9627_v15  ;;  %v20615_v15 = vld [vmem:[#allocation47_spill] sm:$0xff] }
 0x50a   :  { %v6046_v61 = vsel %vm1342_vm10, %v6014_v50, %v9628_v44  ;;  %v6047_v32 = vsel %vm1342_vm10, %v6015_v10, %v9629_v45  ;;  %v20616_v45 = vld [vmem:[#allocation107_spill] sm:$0xff] }
 0x50b   :  { %v6079_v6 = vpack.c.bf16 %v6047_v32, %v6046_v61 }
 0x50d   :  { %7056 = vmatmul.mubr.msk.bf16.gmra.mrb[60].mxu1 %vm2795_vm11, %v6079_v6 }
 0x549   :  { %v7029_v42 = vpop.f32.mrb[32].mxu1 }
 0x54a   :  { %v6393_v38 = vadd.f32 %v7029_v42, %v18144_v60  ;;  %v6384_v31 = vpop.f32.mrb[33].mxu1 }
 0x54b   :  { %v6385_v59 = vadd.f32 %v18144_v60, %v6384_v31  ;;  %v7030_v35 = vpop.f32.mrb[34].mxu1  ;;  %v20617_v31 = vld [vmem:[#allocation144_spill] sm:$0xff] }
 0x54c   :  { %v6545_v27 = vadd.f32 %v6393_v38, %v20605_v43  ;;  %v6396_v11 = vadd.f32 %v7030_v35, %v18144_v60  ;;  %v6387_v23 = vpop.f32.mrb[35].mxu1 }
 0x54d   :  { %v6543_v3 = vadd.f32 %v6385_v59, %v20606_v28  ;;  %v6388_v34 = vadd.f32 %v18144_v60, %v6387_v23 }
 0x54e   :  { %v6609_v16 = vmax.f32 %v6545_v27, 0.0  ;;  %v6546_v46 = vadd.f32 %v6396_v11, %v20607_v19  ;;  %v20618_v27 = vld [vmem:[#allocation122_spill] sm:$0xff]  ;;  %v20620_v19 = vld [vmem:[#allocation123_spill] sm:$0xff] }
 0x54f   :  { %v6607_v62 = vmax.f32 %v6543_v3, 0.0  ;;  %v6544_v24 = vadd.f32 %v6388_v34, %v20608_v14  ;;  %v20619_v3 = vld [vmem:[#allocation147_spill] sm:$0xff] }
 0x550   :  { %6673 = vst.msk [vmem:[%s18753_s5 + $0x110] sm:$0xff] %vm1111_vm2, %v6609_v16  ;;  %v6610_v63 = vmax.f32 %v6546_v46, 0.0 }
 0x551   :  { %6671 = vst.msk [vmem:[%s18753_s5 + $0x100] sm:$0xff] %vm1111_vm2, %v6607_v62  ;;  %v6608_v17 = vmax.f32 %v6544_v24, 0.0 }
 0x552   :  { %6674 = vst.msk [vmem:[%s18753_s5 + $0x118] sm:$0xff] %vm1111_vm2, %v6610_v63 }
 0x553   :  { %6672 = vst.msk [vmem:[%s18753_s5 + $0x108] sm:$0xff] %vm1111_vm2, %v6608_v17 }
 0x55d   :  { %v7033_v5 = vpop.f32.mrb[36].mxu1 }
 0x55e   :  { %v6409_v2 = vadd.f32 %v7033_v5, %v18144_v60  ;;  %v6400_v48 = vpop.f32.mrb[37].mxu1 }
 0x55f   :  { %v6401_v52 = vadd.f32 %v18144_v60, %v6400_v48  ;;  %v7034_v56 = vpop.f32.mrb[38].mxu1  ;;  %v20621_v48 = vld [vmem:[#allocation18_spill] sm:$0xff] }
 0x560   :  { %v6549_v54 = vadd.f32 %v6409_v2, %v20609_v9  ;;  %v6412_v47 = vadd.f32 %v7034_v56, %v18144_v60  ;;  %v6403_v1 = vpop.f32.mrb[39].mxu1  ;;  %v18653_v56 = vld [vmem:[%s18752_s4] ss:$0 sm:$0xff] }
 0x561   :  { %v6547_v33 = vadd.f32 %v6401_v52, %v20610_v41  ;;  %v6404_v55 = vadd.f32 %v18144_v60, %v6403_v1 }
 0x562   :  { %v6613_v30 = vmax.f32 %v6549_v54, 0.0  ;;  %v6550_v22 = vadd.f32 %v6412_v47, %v20611_v7  ;;  %v20622_v47 = vld [vmem:[#allocation137_spill] sm:$0xff] }
 0x563   :  { %v6611_v37 = vmax.f32 %v6547_v33, 0.0  ;;  %v6548_v51 = vadd.f32 %v6404_v55, %v20612_v0  ;;  %v20623_v55 = vld [vmem:[#allocation157_spill] sm:$0xff] }
 0x564   :  { %6677 = vst.msk [vmem:[%s18753_s5 + $0x130] sm:$0xff] %vm1111_vm2, %v6613_v30  ;;  %v6614_v21 = vmax.f32 %v6550_v22, 0.0 }
 0x565   :  { %6675 = vst.msk [vmem:[%s18753_s5 + $0x120] sm:$0xff] %vm1111_vm2, %v6611_v37  ;;  %v6612_v58 = vmax.f32 %v6548_v51, 0.0 }
 0x566   :  { %6678 = vst.msk [vmem:[%s18753_s5 + $0x138] sm:$0xff] %vm1111_vm2, %v6614_v21 }
 0x567   :  { %6676 = vst.msk [vmem:[%s18753_s5 + $0x128] sm:$0xff] %vm1111_vm2, %v6612_v58 }
 0x571   :  { %v7037_v8 = vpop.f32.mrb[40].mxu1 }
 0x572   :  { %v6425_v26 = vadd.f32 %v7037_v8, %v18144_v60  ;;  %v6416_v49 = vpop.f32.mrb[41].mxu1 }
 0x573   :  { %v6417_v12 = vadd.f32 %v18144_v60, %v6416_v49  ;;  %v7038_v39 = vpop.f32.mrb[42].mxu1  ;;  %v20625_v49 = vld [vmem:[#allocation25_spill] sm:$0xff] }
 0x574   :  { %v6553_v25 = vadd.f32 %v6425_v26, %v20613_v36  ;;  %v6428_v29 = vadd.f32 %v7038_v39, %v18144_v60  ;;  %v6419_v18 = vpop.f32.mrb[43].mxu1 }
 0x575   :  { %v6551_v53 = vadd.f32 %v6417_v12, %v20614_v20  ;;  %v6420_v57 = vadd.f32 %v18144_v60, %v6419_v18 }
 0x576   :  { %v6617_v13 = vmax.f32 %v6553_v25, 0.0  ;;  %v6554_v4 = vadd.f32 %v6428_v29, %v20615_v15  ;;  %v20626_v25 = vld [vmem:[#allocation148_spill] sm:$0xff]  ;;  %v20628_v15 = vld [vmem:[#allocation150_spill] sm:$0xff] }
 0x577   :  { %v6615_v40 = vmax.f32 %v6551_v53, 0.0  ;;  %v6552_v44 = vadd.f32 %v6420_v57, %v20616_v45  ;;  %v20627_v53 = vld [vmem:[#allocation167_spill] sm:$0xff] }
 0x578   :  { %6681 = vst.msk [vmem:[%s18753_s5 + $0x150] sm:$0xff] %vm1111_vm2, %v6617_v13  ;;  %v6618_v50 = vmax.f32 %v6554_v4, 0.0 }
 0x579   :  { %6679 = vst.msk [vmem:[%s18753_s5 + $0x140] sm:$0xff] %vm1111_vm2, %v6615_v40  ;;  %v6616_v10 = vmax.f32 %v6552_v44, 0.0 }
 0x57a   :  { %6682 = vst.msk [vmem:[%s18753_s5 + $0x158] sm:$0xff] %vm1111_vm2, %v6618_v50 }
 0x57b   :  { %6680 = vst.msk [vmem:[%s18753_s5 + $0x148] sm:$0xff] %vm1111_vm2, %v6616_v10 }
 0x585   :  { %v7041_v61 = vpop.f32.mrb[44].mxu1 }
 0x586   :  { %v6441_v32 = vadd.f32 %v7041_v61, %v18144_v60  ;;  %v6432_v6 = vpop.f32.mrb[45].mxu1 }
 0x587   :  { %v6433_v42 = vadd.f32 %v18144_v60, %v6432_v6  ;;  %v7042_v38 = vpop.f32.mrb[46].mxu1  ;;  %v20629_v6 = vld [vmem:[#allocation86_spill] sm:$0xff] }
 0x588   :  { %v6557_v59 = vadd.f32 %v6441_v32, %v20617_v31  ;;  %v6444_v35 = vadd.f32 %v7042_v38, %v18144_v60  ;;  %v6435_v43 = vpop.f32.mrb[47].mxu1 }
 0x589   :  { %v6555_v11 = vadd.f32 %v6433_v42, %v20618_v27  ;;  %v6436_v23 = vadd.f32 %v18144_v60, %v6435_v43 }
 0x58a   :  { %v6621_v28 = vmax.f32 %v6557_v59, 0.0  ;;  %v6558_v34 = vadd.f32 %v6444_v35, %v20619_v3  ;;  %v20630_v59 = vld [vmem:[#allocation51_spill] sm:$0xff]  ;;  %v20632_v3 = vld [vmem:[#allocation161_spill] sm:$0xff] }
 0x58b   :  { %v6619_v16 = vmax.f32 %v6555_v11, 0.0  ;;  %v6556_v46 = vadd.f32 %v6436_v23, %v20620_v19  ;;  %v20631_v11 = vld [vmem:[#allocation169_spill] sm:$0xff] }
 0x58c   :  { %6685 = vst.msk [vmem:[%s18753_s5 + $0x170] sm:$0xff] %vm1111_vm2, %v6621_v28  ;;  %v6622_v62 = vmax.f32 %v6558_v34, 0.0 }
 0x58d   :  { %6683 = vst.msk [vmem:[%s18753_s5 + $0x160] sm:$0xff] %vm1111_vm2, %v6619_v16  ;;  %v6620_v14 = vmax.f32 %v6556_v46, 0.0 }
 0x58e   :  { %6686 = vst.msk [vmem:[%s18753_s5 + $0x178] sm:$0xff] %vm1111_vm2, %v6622_v62 }
 0x58f   :  { %6684 = vst.msk [vmem:[%s18753_s5 + $0x168] sm:$0xff] %vm1111_vm2, %v6620_v14 }
 0x599   :  { %v7045_v24 = vpop.f32.mrb[48].mxu1 }
 0x59a   :  { %v6457_v63 = vadd.f32 %v7045_v24, %v18144_v60  ;;  %v6448_v17 = vpop.f32.mrb[49].mxu1 }
 0x59b   :  { %v6449_v5 = vadd.f32 %v18144_v60, %v6448_v17  ;;  %v7046_v2 = vpop.f32.mrb[50].mxu1  ;;  %v20624_v60 = vld [vmem:[#allocation138_spill] sm:$0xff]  ;;  %v20633_v17 = vld [vmem:[#allocation89_spill] sm:$0xff] }
 0x59c   :  { %v6561_v52 = vadd.f32 %v6457_v63, %v20621_v48  ;;  %v6460_v9 = vadd.f32 %v18653_v56, %v7046_v2  ;;  %v6451_v54 = vpop.f32.mrb[51].mxu1 }
 0x59d   :  { %v6559_v1 = vadd.f32 %v6449_v5, %v20622_v47  ;;  %v6452_v41 = vadd.f32 %v18653_v56, %v6451_v54 }
 0x59e   :  { %v6625_v33 = vmax.f32 %v6561_v52, 0.0  ;;  %v6562_v30 = vadd.f32 %v6460_v9, %v20623_v55  ;;  %v20634_v52 = vld [vmem:[#allocation33_spill] sm:$0xff] }
 0x59f   :  { %v6623_v7 = vmax.f32 %v6559_v1, 0.0  ;;  %v6560_v22 = vadd.f32 %v6452_v41, %v20624_v60  ;;  %v20635_v1 = vld [vmem:[#allocation104_spill] sm:$0xff]  ;;  %v20636_v55 = vld [vmem:[#allocation53_spill] sm:$0xff] }
 0x5a0   :  { %6689 = vst.msk [vmem:[%s18753_s5 + $0x190] sm:$0xff] %vm1111_vm2, %v6625_v33  ;;  %v6626_v37 = vmax.f32 %v6562_v30, 0.0 }
 0x5a1   :  { %6687 = vst.msk [vmem:[%s18753_s5 + $0x180] sm:$0xff] %vm1111_vm2, %v6623_v7  ;;  %v6624_v0 = vmax.f32 %v6560_v22, 0.0 }
 0x5a2   :  { %6690 = vst.msk [vmem:[%s18753_s5 + $0x198] sm:$0xff] %vm1111_vm2, %v6626_v37 }
 0x5a3   :  { %6688 = vst.msk [vmem:[%s18753_s5 + $0x188] sm:$0xff] %vm1111_vm2, %v6624_v0 }
 0x5b0   :  { %v7049_v51 = vpop.f32.mrb[52].mxu1 }
 0x5b1   :  { %v6473_v21 = vadd.f32 %v18653_v56, %v7049_v51  ;;  %v6464_v58 = vpop.f32.mrb[53].mxu1 }
 0x5b2   :  { %v6465_v8 = vadd.f32 %v18653_v56, %v6464_v58  ;;  %v7050_v26 = vpop.f32.mrb[54].mxu1 }
 0x5b3   :  { %v6565_v12 = vadd.f32 %v6473_v21, %v20625_v49  ;;  %v6476_v39 = vadd.f32 %v18653_v56, %v7050_v26  ;;  %v6467_v36 = vpop.f32.mrb[55].mxu1 }
 0x5b4   :  { %v6563_v29 = vadd.f32 %v6465_v8, %v20626_v25  ;;  %v6468_v18 = vadd.f32 %v18653_v56, %v6467_v36 }
 0x5b5   :  { %v6629_v20 = vmax.f32 %v6565_v12, 0.0  ;;  %v6566_v57 = vadd.f32 %v6476_v39, %v20627_v53 }
 0x5b6   :  { %v6627_v13 = vmax.f32 %v6563_v29, 0.0  ;;  %v6564_v4 = vadd.f32 %v6468_v18, %v20628_v15 }
 0x5b7   :  { %6693 = vst.msk [vmem:[%s18753_s5 + $0x1b0] sm:$0xff] %vm1111_vm2, %v6629_v20  ;;  %v6630_v40 = vmax.f32 %v6566_v57, 0.0 }
 0x5b8   :  { %6691 = vst.msk [vmem:[%s18753_s5 + $0x1a0] sm:$0xff] %vm1111_vm2, %v6627_v13  ;;  %v6628_v45 = vmax.f32 %v6564_v4, 0.0 }
 0x5b9   :  { %6694 = vst.msk [vmem:[%s18753_s5 + $0x1b8] sm:$0xff] %vm1111_vm2, %v6630_v40 }
 0x5ba   :  { %6692 = vst.msk [vmem:[%s18753_s5 + $0x1a8] sm:$0xff] %vm1111_vm2, %v6628_v45 }
 0x5c8   :  { %v7053_v44 = vpop.f32.mrb[56].mxu1 }
 0x5c9   :  { %v6489_v50 = vadd.f32 %v18653_v56, %v7053_v44  ;;  %v6480_v10 = vpop.f32.mrb[57].mxu1 }
 0x5ca   :  { %v6481_v61 = vadd.f32 %v18653_v56, %v6480_v10  ;;  %v7054_v32 = vpop.f32.mrb[58].mxu1 }
 0x5cb   :  { %v6569_v42 = vadd.f32 %v6489_v50, %v20629_v6  ;;  %v6492_v38 = vadd.f32 %v18653_v56, %v7054_v32  ;;  %v6483_v31 = vpop.f32.mrb[59].mxu1 }
 0x5cc   :  { %v6567_v35 = vadd.f32 %v6481_v61, %v20630_v59  ;;  %v6484_v43 = vadd.f32 %v18653_v56, %v6483_v31 }
 0x5cd   :  { %v6633_v27 = vmax.f32 %v6569_v42, 0.0  ;;  %v6570_v23 = vadd.f32 %v6492_v38, %v20631_v11 }
 0x5ce   :  { %v6631_v28 = vmax.f32 %v6567_v35, 0.0  ;;  %v6568_v34 = vadd.f32 %v6484_v43, %v20632_v3 }
 0x5cf   :  { %6697 = vst.msk [vmem:[%s18753_s5 + $0x1d0] sm:$0xff] %vm1111_vm2, %v6633_v27  ;;  %v6634_v16 = vmax.f32 %v6570_v23, 0.0 }
 0x5d0   :  { %6695 = vst.msk [vmem:[%s18753_s5 + $0x1c0] sm:$0xff] %vm1111_vm2, %v6631_v28  ;;  %v6632_v19 = vmax.f32 %v6568_v34, 0.0 }
 0x5d1   :  { %6698 = vst.msk [vmem:[%s18753_s5 + $0x1d8] sm:$0xff] %vm1111_vm2, %v6634_v16 }
 0x5d2   :  { %6696 = vst.msk [vmem:[%s18753_s5 + $0x1c8] sm:$0xff] %vm1111_vm2, %v6632_v19 }
 0x5e0   :  { %v7057_v46 = vpop.f32.mrb[60].mxu1 }
 0x5e1   :  { %v6505_v62 = vadd.f32 %v18653_v56, %v7057_v46  ;;  %v6496_v14 = vpop.f32.mrb[61].mxu1 }
 0x5e2   :  { %v6497_v24 = vadd.f32 %v18653_v56, %v6496_v14  ;;  %v7058_v63 = vpop.f32.mrb[62].mxu1 }
 0x5e3   :  { %v6573_v5 = vadd.f32 %v6505_v62, %v20633_v17  ;;  %v6508_v2 = vadd.f32 %v18653_v56, %v7058_v63  ;;  %v6499_v48 = vpop.f32.mrb[63].mxu1 }
 0x5e4   :  { %v6571_v9 = vadd.f32 %v6497_v24, %v20634_v52  ;;  %v6500_v54 = vadd.f32 %v18653_v56, %v6499_v48 }
 0x5e5   :  { %v6637_v47 = vmax.f32 %v6573_v5, 0.0  ;;  %v6574_v41 = vadd.f32 %v6508_v2, %v20635_v1 }
 0x5e6   :  { %v6635_v33 = vmax.f32 %v6571_v9, 0.0  ;;  %v6572_v30 = vadd.f32 %v6500_v54, %v20636_v55 }
 0x5e7   :  { %6701 = vst.msk [vmem:[%s18753_s5 + $0x1f0] sm:$0xff] %vm1111_vm2, %v6637_v47  ;;  %v6638_v7 = vmax.f32 %v6574_v41, 0.0 }
 0x5e8   :  { %6699 = vst.msk [vmem:[%s18753_s5 + $0x1e0] sm:$0xff] %vm1111_vm2, %v6635_v33  ;;  %v6636_v60 = vmax.f32 %v6572_v30, 0.0 }
 0x5e9   :  { %6702 = vst.msk [vmem:[%s18753_s5 + $0x1f8] sm:$0xff] %vm1111_vm2, %v6638_v7 }
 0x5ea   :  { %6700 = vst.msk [vmem:[%s18753_s5 + $0x1e8] sm:$0xff] %vm1111_vm2, %v6636_v60 }

</bundles_post_ra>
